<compile_context>
chip_gen: v7x
topology: tpu7x:2x2x1
jax: 0.10.0
libtpu: 0.0.40
codegen_flags: <defaults>
</compile_context>

<pallas_src>
import numpy as np
import jax
import jax.numpy as jnp
from jax.experimental import pallas as pl
from jax.experimental.pallas import tpu as pltpu


def _vmem_full(shape):
    n = len(shape)
    return pl.BlockSpec(tuple(shape), lambda i, _n=n: (0,) * _n)


_SMEM_SPEC = pl.BlockSpec(memory_space=pltpu.MemorySpace.SMEM)


# ---------------------------------------------------------------------------
# Fused forward wrapper + kernel
# ---------------------------------------------------------------------------
def cnn_model_2k_forward(x, p):
    x = x.astype(jnp.float32)
    B, cin, H, W = x.shape
    cmid = p["w_conv1"].shape[0]
    assert p["w_conv1"].shape == (cmid, cin, 2, 2)
    assert p["w_conv2"].shape == (cmid, cmid, 2, 2)

    pad = 2
    Hp, Wp = H + 2 * pad, W + 2 * pad            # padded input       (12, 24)
    H1, W1 = Hp - 1, Wp - 1                      # conv1 output       (11, 23)
    H1p, W1p = H1 // 2, W1 // 2                  # pool1 output       ( 5, 11)
    H2, W2 = H1p - 1, W1p - 1                    # conv2 output       ( 4, 10)
    H2p, W2p = H2 // 2, W2 // 2                  # pool2 output       ( 2,  5)
    feat = cmid * H2p * W2p                      # flattened features (80)
    assert feat == p["w_fc1"].shape[0], "flatten size must match fc1"
    n_h1, n_h2, n_out = p["w_fc1"].shape[1], p["w_fc2"].shape[1], p["w_fc3"].shape[1]

    RS1 = B * Hp          # per-channel row stride of the conv1 stack (24, 8-aligned)
    RS2 = B * H1p         # per-channel row stride of the pool1 stack (10)
    SC2 = 16              # per-channel row stride of the conv2 stack (8-aligned)
    SLAB = 8              # per-(channel,row) slab stride of the pool2 result
    assert B * H1p <= SC2 and B <= SLAB and SC2 % 8 == 0 and RS1 % 8 == 0
    n_c1s = cmid * RS1                                      # 192
    n_p1s = ((cmid - 1) * RS2 + 1 + SC2 + 7) // 8 * 8       # 88 (covers conv2 windows)
    assert n_p1s >= cmid * RS2
    n_c2s = cmid * SC2                                      # 128
    n_p2 = cmid * H2p * SLAB                                # 128

    # -------------------- wrapper-side layout plumbing (tiny) --------------------
    # conv1 padding=2 + batch stacking along rows (row = b*Hp + h).  One extra
    # zero row keeps the dy=1 conv windows in-bounds.
    xpad = jnp.pad(x, ((0, 0), (0, 0), (pad, pad), (pad, pad)))
    xs = jnp.transpose(xpad, (1, 0, 2, 3)).reshape(cin, B * Hp, Wp)
    xs = jnp.pad(xs, ((0, 0), (0, 1), (0, 0)))              # (cin, B*Hp + 1, Wp)

    # Precomputed 0/1 even-index selection matrices (host side).
    s1c = np.zeros((W1 - 1, W1p), np.float32)
    s1c[2 * np.arange(W1p), np.arange(W1p)] = 1.0
    s2c = np.zeros((W2 - 1, W2p), np.float32)
    s2c[2 * np.arange(W2p), np.arange(W2p)] = 1.0

    # pool1 row-select: picks even rows per (channel, batch) block and re-stacks
    # channels from stride RS1 to stride RS2; trailing rows stay zero.
    s1r = np.zeros((n_p1s, n_c1s - 1), np.float32)
    for co in range(cmid):
        for b in range(B):
            for pr in range(H1p):
                s1r[co * RS2 + b * H1p + pr, co * RS1 + b * Hp + 2 * pr] = 1.0

    # pool2 row-select: emits (channel, row) slabs of B rows at 8-aligned offsets,
    # ready to be copied into the (B, feat) fc-input tile.
    s2r = np.zeros((n_p2, n_c2s - 1), np.float32)
    for co in range(cmid):
        for y in range(H2p):
            for b in range(B):
                g = co * H2p + y
                s2r[g * SLAB + b, co * SC2 + b * H1p + 2 * y] = 1.0

    # ------------------------------ the kernel -----------------------------------
    def kernel(xs_ref, w1_ref, b1_ref, w2_ref, b2_ref,
               s1c_ref, s1r_ref, s2c_ref, s2r_ref,
               wf1_ref, bf1_ref, wf2_ref, bf2_ref, wf3_ref, bf3_ref,
               o_ref,
               c1s_ref, p1s_ref, c2s_ref, fcin_ref):
        f32 = jnp.float32

        # ---- conv1 (2x2, padding pre-applied) + ReLU: VPU FMAs over the batch ----
        win1 = []
        for ci in range(cin):
            for dy in range(2):
                for dx in range(2):
                    win1.append(xs_ref[ci, dy:dy + RS1, dx:dx + W1])     # (RS1, W1)
        for co in range(cmid):
            acc = None
            for ci in range(cin):
                for dy in range(2):
                    for dx in range(2):
                        w = w1_ref[((co * cin + ci) * 2 + dy) * 2 + dx]
                        t = w * win1[(ci * 2 + dy) * 2 + dx]
                        acc = t if acc is None else acc + t
            c1s_ref[co * RS1:(co + 1) * RS1, :] = jnp.maximum(acc + b1_ref[co], 0.0)

        # ---- pool1: pairwise max (VPU) + 2 consolidated selection matmuls (MXU) ----
        mw = jnp.maximum(c1s_ref[:, 0:W1 - 1], c1s_ref[:, 1:W1])          # (192, 22)
        p1c = jnp.dot(mw, s1c_ref[...], preferred_element_type=f32)       # (192, 11)
        mh = jnp.maximum(p1c[:-1, :], p1c[1:, :])                          # (191, 11)
        p1s_ref[...] = jnp.dot(s1r_ref[...], mh, preferred_element_type=f32)   # (88, 11)

        # ---- conv2 (2x2 valid) + ReLU: windows read from the pool1 scratch ----
        acc2 = [None] * cmid
        for ci in range(cmid):
            wins = []
            for dy in range(2):
                for dx in range(2):
                    wins.append(p1s_ref[ci * RS2 + dy:ci * RS2 + dy + SC2,
                                        dx:dx + W2])                       # (16, 10)
            for co in range(cmid):
                base = (co * cmid + ci) * 4
                for k in range(4):
                    t = w2_ref[base + k] * wins[k]
                    acc2[co] = t if acc2[co] is None else acc2[co] + t
        for co in range(cmid):
            c2s_ref[co * SC2:(co + 1) * SC2, :] = jnp.maximum(acc2[co] + b2_ref[co], 0.0)

        # ---- pool2: pairwise max + 2 consolidated selection matmuls ----
        mw2 = jnp.maximum(c2s_ref[:, 0:W2 - 1], c2s_ref[:, 1:W2])          # (128, 9)
        p2c = jnp.dot(mw2, s2c_ref[...], preferred_element_type=f32)       # (128, 5)
        mh2 = jnp.maximum(p2c[:-1, :], p2c[1:, :])                          # (127, 5)
        p2 = jnp.dot(s2r_ref[...], mh2, preferred_element_type=f32)        # (128, 5)

        # ---- flatten: 16 lane-offset stores build the (B, feat) fc input ----
        for g in range(cmid * H2p):
            fcin_ref[:, g * W2p:(g + 1) * W2p] = p2[g * SLAB:g * SLAB + B, :]

        # ---- fc1 / fc2 / fc3: one batched matmul each, single output store ----
        h = fcin_ref[...]
        h = jnp.maximum(jnp.dot(h, wf1_ref[...], preferred_element_type=f32)
                        + bf1_ref[...], 0.0)
        h = jnp.maximum(jnp.dot(h, wf2_ref[...], preferred_element_type=f32)
                        + bf2_ref[...], 0.0)
        o_ref[...] = (jnp.dot(h, wf3_ref[...], preferred_element_type=f32)
                      + bf3_ref[...]).astype(o_ref.dtype)

    # ------------------------------ pallas_call ----------------------------------
    args = (
        xs,
        jnp.asarray(p["w_conv1"], jnp.float32).reshape(-1),
        jnp.asarray(p["b_conv1"], jnp.float32),
        jnp.asarray(p["w_conv2"], jnp.float32).reshape(-1),
        jnp.asarray(p["b_conv2"], jnp.float32),
        jnp.asarray(s1c), jnp.asarray(s1r), jnp.asarray(s2c), jnp.asarray(s2r),
        jnp.asarray(p["w_fc1"], jnp.float32),
        jnp.asarray(p["b_fc1"], jnp.float32).reshape(1, -1),
        jnp.asarray(p["w_fc2"], jnp.float32),
        jnp.asarray(p["b_fc2"], jnp.float32).reshape(1, -1),
        jnp.asarray(p["w_fc3"], jnp.float32),
        jnp.asarray(p["b_fc3"], jnp.float32).reshape(1, -1),
    )
    in_specs = [
        _vmem_full(xs.shape),
        _SMEM_SPEC, _SMEM_SPEC, _SMEM_SPEC, _SMEM_SPEC,       # conv weights/biases
        _vmem_full(s1c.shape), _vmem_full(s1r.shape),
        _vmem_full(s2c.shape), _vmem_full(s2r.shape),
        _vmem_full((feat, n_h1)), _vmem_full((1, n_h1)),
        _vmem_full((n_h1, n_h2)), _vmem_full((1, n_h2)),
        _vmem_full((n_h2, n_out)), _vmem_full((1, n_out)),
    ]
    return pl.pallas_call(
        kernel,
        out_shape=jax.ShapeDtypeStruct((B, n_out), jnp.float32),
        grid=(1,),
        in_specs=in_specs,
        out_specs=_vmem_full((B, n_out)),
        scratch_shapes=[
            pltpu.VMEM((n_c1s, W1), jnp.float32),    # conv1 stacked output
            pltpu.VMEM((n_p1s, W1p), jnp.float32),   # pool1 stacked output
            pltpu.VMEM((n_c2s, W2), jnp.float32),    # conv2 stacked output
            pltpu.VMEM((B, feat), jnp.float32),      # flattened fc input
        ],
        compiler_params=pltpu.CompilerParams(dimension_semantics=("arbitrary",)),
    )(*args)


# ---------------------------------------------------------------------------
# Deterministic parameter init (PyTorch-style uniform fan-in bounds)
# ---------------------------------------------------------------------------
def init_params(key):
    ks = jax.random.split(key, 10)

    def u(k, shape, fan_in):
        bound = 1.0 / jnp.sqrt(jnp.float32(fan_in))
        return jax.random.uniform(k, shape, jnp.float32, -bound, bound)

    p = {}
    p["w_conv1"] = u(ks[0], (8, 2, 2, 2), 2 * 2 * 2)
    p["b_conv1"] = u(ks[1], (8,), 2 * 2 * 2)
    p["w_conv2"] = u(ks[2], (8, 8, 2, 2), 8 * 2 * 2)
    p["b_conv2"] = u(ks[3], (8,), 8 * 2 * 2)
    # FC weights stored as (in, out) for direct matmul
    p["w_fc1"] = u(ks[4], (80, 64), 80)
    p["b_fc1"] = u(ks[5], (64,), 80)
    p["w_fc2"] = u(ks[6], (64, 16), 64)
    p["b_fc2"] = u(ks[7], (16,), 64)
    p["w_fc3"] = u(ks[8], (16, 4), 16)
    p["b_fc3"] = u(ks[9], (4,), 16)
    return p


# ---------------------------------------------------------------------------
# Pure-JAX reference of the PyTorch forward (for validation)
# ---------------------------------------------------------------------------
def _pool_ref(t):
    n, c, h, w = t.shape
    ho, wo = h // 2, w // 2
    t = t[:, :, : 2 * ho, : 2 * wo].reshape(n, c, ho, 2, wo, 2)
    return t.max(axis=(3, 5))


def reference_forward(x, p):
    dn = ("NCHW", "OIHW", "NCHW")
    out = jax.lax.conv_general_dilated(x, p["w_conv1"], (1, 1),
                                       [(2, 2), (2, 2)], dimension_numbers=dn)
    out = jnp.maximum(out + p["b_conv1"][None, :, None, None], 0.0)
    out = _pool_ref(out)
    out = jax.lax.conv_general_dilated(out, p["w_conv2"], (1, 1), "VALID",
                                       dimension_numbers=dn)
    out = jnp.maximum(out + p["b_conv2"][None, :, None, None], 0.0)
    out = _pool_ref(out)
    out = out.reshape(out.shape[0], -1)
    out = jnp.maximum(out @ p["w_fc1"] + p["b_fc1"], 0.0)
    out = jnp.maximum(out @ p["w_fc2"] + p["b_fc2"], 0.0)
    return out @ p["w_fc3"] + p["b_fc3"]


if __name__ == "__main__":
    key = jax.random.PRNGKey(0)
    k_x, k_p = jax.random.split(key)

    # input: (batch=2, in_channels=2, H=8, W=20) -> flatten size 80 matches fc1
    x = jax.random.normal(k_x, (2, 2, 8, 20), dtype=jnp.float32)
    params = init_params(k_p)

    out = jax.block_until_ready(cnn_model_2k_forward(x, params))
    ref = jax.block_until_ready(reference_forward(x, params))

    assert out.shape == (2, 4), out.shape
    assert jnp.allclose(out, ref, atol=1e-4, rtol=1e-4), (
        "mismatch vs reference: max abs err = "
        f"{float(jnp.max(jnp.abs(out - ref)))}")
    print("KERNEL_OK")
</pallas_src>

<mosaic_0001>
module attributes {stable_mosaic.version = 11 : i64} {
  func.func @kernel(%arg0: i32, %arg1: memref<2x25x24xf32, #tpu.memory_space<vmem>>, %arg2: memref<64xf32, #tpu.memory_space<smem>>, %arg3: memref<8xf32, #tpu.memory_space<smem>>, %arg4: memref<256xf32, #tpu.memory_space<smem>>, %arg5: memref<8xf32, #tpu.memory_space<smem>>, %arg6: memref<22x11xf32, #tpu.memory_space<vmem>>, %arg7: memref<88x191xf32, #tpu.memory_space<vmem>>, %arg8: memref<9x5xf32, #tpu.memory_space<vmem>>, %arg9: memref<128x127xf32, #tpu.memory_space<vmem>>, %arg10: memref<80x64xf32, #tpu.memory_space<vmem>>, %arg11: memref<1x64xf32, #tpu.memory_space<vmem>>, %arg12: memref<64x16xf32, #tpu.memory_space<vmem>>, %arg13: memref<1x16xf32, #tpu.memory_space<vmem>>, %arg14: memref<16x4xf32, #tpu.memory_space<vmem>>, %arg15: memref<1x4xf32, #tpu.memory_space<vmem>>, %arg16: memref<2x4xf32, #tpu.memory_space<vmem>>, %arg17: memref<192x23xf32, #tpu.memory_space<vmem>>, %arg18: memref<88x11xf32, #tpu.memory_space<vmem>>, %arg19: memref<128x10xf32, #tpu.memory_space<vmem>>, %arg20: memref<2x80xf32, #tpu.memory_space<vmem>>) attributes {dimension_semantics = [#tpu.dimension_semantics<arbitrary>], iteration_bounds = array<i64: 1>, scalar_prefetch = 0 : i64, scratch_operands = 4 : i64, tpu.core_type = #tpu.core_type<tc>, window_params = [{pipeline_mode = #tpu.pipeline_mode<synchronous>, transform_indices = @transform_0, window_bounds = array<i64: 2, 25, 24>}, {transform_indices = @transform_1, window_bounds = array<i64: 64>}, {transform_indices = @transform_2, window_bounds = array<i64: 8>}, {transform_indices = @transform_3, window_bounds = array<i64: 256>}, {transform_indices = @transform_4, window_bounds = array<i64: 8>}, {pipeline_mode = #tpu.pipeline_mode<synchronous>, transform_indices = @transform_5, window_bounds = array<i64: 22, 11>}, {pipeline_mode = #tpu.pipeline_mode<synchronous>, transform_indices = @transform_6, window_bounds = array<i64: 88, 191>}, {pipeline_mode = #tpu.pipeline_mode<synchronous>, transform_indices = @transform_7, window_bounds = array<i64: 9, 5>}, {pipeline_mode = #tpu.pipeline_mode<synchronous>, transform_indices = @transform_8, window_bounds = array<i64: 128, 127>}, {pipeline_mode = #tpu.pipeline_mode<synchronous>, transform_indices = @transform_9, window_bounds = array<i64: 80, 64>}, {pipeline_mode = #tpu.pipeline_mode<synchronous>, transform_indices = @transform_10, window_bounds = array<i64: 1, 64>}, {pipeline_mode = #tpu.pipeline_mode<synchronous>, transform_indices = @transform_11, window_bounds = array<i64: 64, 16>}, {pipeline_mode = #tpu.pipeline_mode<synchronous>, transform_indices = @transform_12, window_bounds = array<i64: 1, 16>}, {pipeline_mode = #tpu.pipeline_mode<synchronous>, transform_indices = @transform_13, window_bounds = array<i64: 16, 4>}, {pipeline_mode = #tpu.pipeline_mode<synchronous>, transform_indices = @transform_14, window_bounds = array<i64: 1, 4>}, {pipeline_mode = #tpu.pipeline_mode<synchronous>, transform_indices = @transform_15, window_bounds = array<i64: 2, 4>}]} {
    %c0 = arith.constant 0 : index
    %c0_0 = arith.constant 0 : index
    %c0_1 = arith.constant 0 : index
    %0 = vector.load %arg1[%c0, %c0_0, %c0_1] : memref<2x25x24xf32, #tpu.memory_space<vmem>>, vector<1x24x23xf32>
    %1 = vector.shape_cast %0 : vector<1x24x23xf32> to vector<24x23xf32>
    %c0_2 = arith.constant 0 : index
    %c0_3 = arith.constant 0 : index
    %c1 = arith.constant 1 : index
    %2 = vector.load %arg1[%c0_2, %c0_3, %c1] : memref<2x25x24xf32, #tpu.memory_space<vmem>>, vector<1x24x23xf32>
    %3 = vector.shape_cast %2 : vector<1x24x23xf32> to vector<24x23xf32>
    %c0_4 = arith.constant 0 : index
    %c1_5 = arith.constant 1 : index
    %c0_6 = arith.constant 0 : index
    %4 = vector.load %arg1[%c0_4, %c1_5, %c0_6] : memref<2x25x24xf32, #tpu.memory_space<vmem>>, vector<1x24x23xf32>
    %5 = vector.shape_cast %4 : vector<1x24x23xf32> to vector<24x23xf32>
    %c0_7 = arith.constant 0 : index
    %c1_8 = arith.constant 1 : index
    %c1_9 = arith.constant 1 : index
    %6 = vector.load %arg1[%c0_7, %c1_8, %c1_9] : memref<2x25x24xf32, #tpu.memory_space<vmem>>, vector<1x24x23xf32>
    %7 = vector.shape_cast %6 : vector<1x24x23xf32> to vector<24x23xf32>
    %c1_10 = arith.constant 1 : index
    %c0_11 = arith.constant 0 : index
    %c0_12 = arith.constant 0 : index
    %8 = vector.load %arg1[%c1_10, %c0_11, %c0_12] : memref<2x25x24xf32, #tpu.memory_space<vmem>>, vector<1x24x23xf32>
    %9 = vector.shape_cast %8 : vector<1x24x23xf32> to vector<24x23xf32>
    %c1_13 = arith.constant 1 : index
    %c0_14 = arith.constant 0 : index
    %c1_15 = arith.constant 1 : index
    %10 = vector.load %arg1[%c1_13, %c0_14, %c1_15] : memref<2x25x24xf32, #tpu.memory_space<vmem>>, vector<1x24x23xf32>
    %11 = vector.shape_cast %10 : vector<1x24x23xf32> to vector<24x23xf32>
    %c1_16 = arith.constant 1 : index
    %c1_17 = arith.constant 1 : index
    %c0_18 = arith.constant 0 : index
    %12 = vector.load %arg1[%c1_16, %c1_17, %c0_18] : memref<2x25x24xf32, #tpu.memory_space<vmem>>, vector<1x24x23xf32>
    %13 = vector.shape_cast %12 : vector<1x24x23xf32> to vector<24x23xf32>
    %c1_19 = arith.constant 1 : index
    %c1_20 = arith.constant 1 : index
    %c1_21 = arith.constant 1 : index
    %14 = vector.load %arg1[%c1_19, %c1_20, %c1_21] : memref<2x25x24xf32, #tpu.memory_space<vmem>>, vector<1x24x23xf32>
    %15 = vector.shape_cast %14 : vector<1x24x23xf32> to vector<24x23xf32>
    %c0_22 = arith.constant 0 : index
    %16 = memref.load %arg2[%c0_22] : memref<64xf32, #tpu.memory_space<smem>>
    %17 = vector.broadcast %16 : f32 to vector<24x23xf32>
    %18 = arith.mulf %17, %1 : vector<24x23xf32>
    %c1_23 = arith.constant 1 : index
    %19 = memref.load %arg2[%c1_23] : memref<64xf32, #tpu.memory_space<smem>>
    %20 = vector.broadcast %19 : f32 to vector<24x23xf32>
    %21 = arith.mulf %20, %3 : vector<24x23xf32>
    %22 = arith.addf %18, %21 : vector<24x23xf32>
    %c2 = arith.constant 2 : index
    %23 = memref.load %arg2[%c2] : memref<64xf32, #tpu.memory_space<smem>>
    %24 = vector.broadcast %23 : f32 to vector<24x23xf32>
    %25 = arith.mulf %24, %5 : vector<24x23xf32>
    %26 = arith.addf %22, %25 : vector<24x23xf32>
    %c3 = arith.constant 3 : index
    %27 = memref.load %arg2[%c3] : memref<64xf32, #tpu.memory_space<smem>>
    %28 = vector.broadcast %27 : f32 to vector<24x23xf32>
    %29 = arith.mulf %28, %7 : vector<24x23xf32>
    %30 = arith.addf %26, %29 : vector<24x23xf32>
    %c4 = arith.constant 4 : index
    %31 = memref.load %arg2[%c4] : memref<64xf32, #tpu.memory_space<smem>>
    %32 = vector.broadcast %31 : f32 to vector<24x23xf32>
    %33 = arith.mulf %32, %9 : vector<24x23xf32>
    %34 = arith.addf %30, %33 : vector<24x23xf32>
    %c5 = arith.constant 5 : index
    %35 = memref.load %arg2[%c5] : memref<64xf32, #tpu.memory_space<smem>>
    %36 = vector.broadcast %35 : f32 to vector<24x23xf32>
    %37 = arith.mulf %36, %11 : vector<24x23xf32>
    %38 = arith.addf %34, %37 : vector<24x23xf32>
    %c6 = arith.constant 6 : index
    %39 = memref.load %arg2[%c6] : memref<64xf32, #tpu.memory_space<smem>>
    %40 = vector.broadcast %39 : f32 to vector<24x23xf32>
    %41 = arith.mulf %40, %13 : vector<24x23xf32>
    %42 = arith.addf %38, %41 : vector<24x23xf32>
    %c7 = arith.constant 7 : index
    %43 = memref.load %arg2[%c7] : memref<64xf32, #tpu.memory_space<smem>>
    %44 = vector.broadcast %43 : f32 to vector<24x23xf32>
    %45 = arith.mulf %44, %15 : vector<24x23xf32>
    %46 = arith.addf %42, %45 : vector<24x23xf32>
    %c0_24 = arith.constant 0 : index
    %47 = memref.load %arg3[%c0_24] : memref<8xf32, #tpu.memory_space<smem>>
    %48 = vector.broadcast %47 : f32 to vector<24x23xf32>
    %49 = arith.addf %46, %48 : vector<24x23xf32>
    %cst = arith.constant 0.000000e+00 : f32
    %50 = vector.broadcast %cst : f32 to vector<24x23xf32>
    %51 = arith.maximumf %49, %50 : vector<24x23xf32>
    %c0_25 = arith.constant 0 : index
    %c0_26 = arith.constant 0 : index
    %52 = vector.load %arg17[%c0_25, %c0_26] : memref<192x23xf32, #tpu.memory_space<vmem>>, vector<24x23xf32>
    tpu.vector_store %arg17[%c0_25, %c0_26], %51 {strides = array<i32>} : memref<192x23xf32, #tpu.memory_space<vmem>>, vector<24x23xf32>,
    %c8 = arith.constant 8 : index
    %53 = memref.load %arg2[%c8] : memref<64xf32, #tpu.memory_space<smem>>
    %54 = vector.broadcast %53 : f32 to vector<24x23xf32>
    %55 = arith.mulf %54, %1 : vector<24x23xf32>
    %c9 = arith.constant 9 : index
    %56 = memref.load %arg2[%c9] : memref<64xf32, #tpu.memory_space<smem>>
    %57 = vector.broadcast %56 : f32 to vector<24x23xf32>
    %58 = arith.mulf %57, %3 : vector<24x23xf32>
    %59 = arith.addf %55, %58 : vector<24x23xf32>
    %c10 = arith.constant 10 : index
    %60 = memref.load %arg2[%c10] : memref<64xf32, #tpu.memory_space<smem>>
    %61 = vector.broadcast %60 : f32 to vector<24x23xf32>
    %62 = arith.mulf %61, %5 : vector<24x23xf32>
    %63 = arith.addf %59, %62 : vector<24x23xf32>
    %c11 = arith.constant 11 : index
    %64 = memref.load %arg2[%c11] : memref<64xf32, #tpu.memory_space<smem>>
    %65 = vector.broadcast %64 : f32 to vector<24x23xf32>
    %66 = arith.mulf %65, %7 : vector<24x23xf32>
    %67 = arith.addf %63, %66 : vector<24x23xf32>
    %c12 = arith.constant 12 : index
    %68 = memref.load %arg2[%c12] : memref<64xf32, #tpu.memory_space<smem>>
    %69 = vector.broadcast %68 : f32 to vector<24x23xf32>
    %70 = arith.mulf %69, %9 : vector<24x23xf32>
    %71 = arith.addf %67, %70 : vector<24x23xf32>
    %c13 = arith.constant 13 : index
    %72 = memref.load %arg2[%c13] : memref<64xf32, #tpu.memory_space<smem>>
    %73 = vector.broadcast %72 : f32 to vector<24x23xf32>
    %74 = arith.mulf %73, %11 : vector<24x23xf32>
    %75 = arith.addf %71, %74 : vector<24x23xf32>
    %c14 = arith.constant 14 : index
    %76 = memref.load %arg2[%c14] : memref<64xf32, #tpu.memory_space<smem>>
    %77 = vector.broadcast %76 : f32 to vector<24x23xf32>
    %78 = arith.mulf %77, %13 : vector<24x23xf32>
    %79 = arith.addf %75, %78 : vector<24x23xf32>
    %c15 = arith.constant 15 : index
    %80 = memref.load %arg2[%c15] : memref<64xf32, #tpu.memory_space<smem>>
    %81 = vector.broadcast %80 : f32 to vector<24x23xf32>
    %82 = arith.mulf %81, %15 : vector<24x23xf32>
    %83 = arith.addf %79, %82 : vector<24x23xf32>
    %c1_27 = arith.constant 1 : index
    %84 = memref.load %arg3[%c1_27] : memref<8xf32, #tpu.memory_space<smem>>
    %85 = vector.broadcast %84 : f32 to vector<24x23xf32>
    %86 = arith.addf %83, %85 : vector<24x23xf32>
    %cst_28 = arith.constant 0.000000e+00 : f32
    %87 = vector.broadcast %cst_28 : f32 to vector<24x23xf32>
    %88 = arith.maximumf %86, %87 : vector<24x23xf32>
    %c24 = arith.constant 24 : index
    %c0_29 = arith.constant 0 : index
    %89 = vector.load %arg17[%c24, %c0_29] : memref<192x23xf32, #tpu.memory_space<vmem>>, vector<24x23xf32>
    tpu.vector_store %arg17[%c24, %c0_29], %88 {strides = array<i32>} : memref<192x23xf32, #tpu.memory_space<vmem>>, vector<24x23xf32>,
    %c16 = arith.constant 16 : index
    %90 = memref.load %arg2[%c16] : memref<64xf32, #tpu.memory_space<smem>>
    %91 = vector.broadcast %90 : f32 to vector<24x23xf32>
    %92 = arith.mulf %91, %1 : vector<24x23xf32>
    %c17 = arith.constant 17 : index
    %93 = memref.load %arg2[%c17] : memref<64xf32, #tpu.memory_space<smem>>
    %94 = vector.broadcast %93 : f32 to vector<24x23xf32>
    %95 = arith.mulf %94, %3 : vector<24x23xf32>
    %96 = arith.addf %92, %95 : vector<24x23xf32>
    %c18 = arith.constant 18 : index
    %97 = memref.load %arg2[%c18] : memref<64xf32, #tpu.memory_space<smem>>
    %98 = vector.broadcast %97 : f32 to vector<24x23xf32>
    %99 = arith.mulf %98, %5 : vector<24x23xf32>
    %100 = arith.addf %96, %99 : vector<24x23xf32>
    %c19 = arith.constant 19 : index
    %101 = memref.load %arg2[%c19] : memref<64xf32, #tpu.memory_space<smem>>
    %102 = vector.broadcast %101 : f32 to vector<24x23xf32>
    %103 = arith.mulf %102, %7 : vector<24x23xf32>
    %104 = arith.addf %100, %103 : vector<24x23xf32>
    %c20 = arith.constant 20 : index
    %105 = memref.load %arg2[%c20] : memref<64xf32, #tpu.memory_space<smem>>
    %106 = vector.broadcast %105 : f32 to vector<24x23xf32>
    %107 = arith.mulf %106, %9 : vector<24x23xf32>
    %108 = arith.addf %104, %107 : vector<24x23xf32>
    %c21 = arith.constant 21 : index
    %109 = memref.load %arg2[%c21] : memref<64xf32, #tpu.memory_space<smem>>
    %110 = vector.broadcast %109 : f32 to vector<24x23xf32>
    %111 = arith.mulf %110, %11 : vector<24x23xf32>
    %112 = arith.addf %108, %111 : vector<24x23xf32>
    %c22 = arith.constant 22 : index
    %113 = memref.load %arg2[%c22] : memref<64xf32, #tpu.memory_space<smem>>
    %114 = vector.broadcast %113 : f32 to vector<24x23xf32>
    %115 = arith.mulf %114, %13 : vector<24x23xf32>
    %116 = arith.addf %112, %115 : vector<24x23xf32>
    %c23 = arith.constant 23 : index
    %117 = memref.load %arg2[%c23] : memref<64xf32, #tpu.memory_space<smem>>
    %118 = vector.broadcast %117 : f32 to vector<24x23xf32>
    %119 = arith.mulf %118, %15 : vector<24x23xf32>
    %120 = arith.addf %116, %119 : vector<24x23xf32>
    %c2_30 = arith.constant 2 : index
    %121 = memref.load %arg3[%c2_30] : memref<8xf32, #tpu.memory_space<smem>>
    %122 = vector.broadcast %121 : f32 to vector<24x23xf32>
    %123 = arith.addf %120, %122 : vector<24x23xf32>
    %cst_31 = arith.constant 0.000000e+00 : f32
    %124 = vector.broadcast %cst_31 : f32 to vector<24x23xf32>
    %125 = arith.maximumf %123, %124 : vector<24x23xf32>
    %c48 = arith.constant 48 : index
    %c0_32 = arith.constant 0 : index
    %126 = vector.load %arg17[%c48, %c0_32] : memref<192x23xf32, #tpu.memory_space<vmem>>, vector<24x23xf32>
    tpu.vector_store %arg17[%c48, %c0_32], %125 {strides = array<i32>} : memref<192x23xf32, #tpu.memory_space<vmem>>, vector<24x23xf32>,
    %c24_33 = arith.constant 24 : index
    %127 = memref.load %arg2[%c24_33] : memref<64xf32, #tpu.memory_space<smem>>
    %128 = vector.broadcast %127 : f32 to vector<24x23xf32>
    %129 = arith.mulf %128, %1 : vector<24x23xf32>
    %c25 = arith.constant 25 : index
    %130 = memref.load %arg2[%c25] : memref<64xf32, #tpu.memory_space<smem>>
    %131 = vector.broadcast %130 : f32 to vector<24x23xf32>
    %132 = arith.mulf %131, %3 : vector<24x23xf32>
    %133 = arith.addf %129, %132 : vector<24x23xf32>
    %c26 = arith.constant 26 : index
    %134 = memref.load %arg2[%c26] : memref<64xf32, #tpu.memory_space<smem>>
    %135 = vector.broadcast %134 : f32 to vector<24x23xf32>
    %136 = arith.mulf %135, %5 : vector<24x23xf32>
    %137 = arith.addf %133, %136 : vector<24x23xf32>
    %c27 = arith.constant 27 : index
    %138 = memref.load %arg2[%c27] : memref<64xf32, #tpu.memory_space<smem>>
    %139 = vector.broadcast %138 : f32 to vector<24x23xf32>
    %140 = arith.mulf %139, %7 : vector<24x23xf32>
    %141 = arith.addf %137, %140 : vector<24x23xf32>
    %c28 = arith.constant 28 : index
    %142 = memref.load %arg2[%c28] : memref<64xf32, #tpu.memory_space<smem>>
    %143 = vector.broadcast %142 : f32 to vector<24x23xf32>
    %144 = arith.mulf %143, %9 : vector<24x23xf32>
    %145 = arith.addf %141, %144 : vector<24x23xf32>
    %c29 = arith.constant 29 : index
    %146 = memref.load %arg2[%c29] : memref<64xf32, #tpu.memory_space<smem>>
    %147 = vector.broadcast %146 : f32 to vector<24x23xf32>
    %148 = arith.mulf %147, %11 : vector<24x23xf32>
    %149 = arith.addf %145, %148 : vector<24x23xf32>
    %c30 = arith.constant 30 : index
    %150 = memref.load %arg2[%c30] : memref<64xf32, #tpu.memory_space<smem>>
    %151 = vector.broadcast %150 : f32 to vector<24x23xf32>
    %152 = arith.mulf %151, %13 : vector<24x23xf32>
    %153 = arith.addf %149, %152 : vector<24x23xf32>
    %c31 = arith.constant 31 : index
    %154 = memref.load %arg2[%c31] : memref<64xf32, #tpu.memory_space<smem>>
    %155 = vector.broadcast %154 : f32 to vector<24x23xf32>
    %156 = arith.mulf %155, %15 : vector<24x23xf32>
    %157 = arith.addf %153, %156 : vector<24x23xf32>
    %c3_34 = arith.constant 3 : index
    %158 = memref.load %arg3[%c3_34] : memref<8xf32, #tpu.memory_space<smem>>
    %159 = vector.broadcast %158 : f32 to vector<24x23xf32>
    %160 = arith.addf %157, %159 : vector<24x23xf32>
    %cst_35 = arith.constant 0.000000e+00 : f32
    %161 = vector.broadcast %cst_35 : f32 to vector<24x23xf32>
    %162 = arith.maximumf %160, %161 : vector<24x23xf32>
    %c72 = arith.constant 72 : index
    %c0_36 = arith.constant 0 : index
    %163 = vector.load %arg17[%c72, %c0_36] : memref<192x23xf32, #tpu.memory_space<vmem>>, vector<24x23xf32>
    tpu.vector_store %arg17[%c72, %c0_36], %162 {strides = array<i32>} : memref<192x23xf32, #tpu.memory_space<vmem>>, vector<24x23xf32>,
    %c32 = arith.constant 32 : index
    %164 = memref.load %arg2[%c32] : memref<64xf32, #tpu.memory_space<smem>>
    %165 = vector.broadcast %164 : f32 to vector<24x23xf32>
    %166 = arith.mulf %165, %1 : vector<24x23xf32>
    %c33 = arith.constant 33 : index
    %167 = memref.load %arg2[%c33] : memref<64xf32, #tpu.memory_space<smem>>
    %168 = vector.broadcast %167 : f32 to vector<24x23xf32>
    %169 = arith.mulf %168, %3 : vector<24x23xf32>
    %170 = arith.addf %166, %169 : vector<24x23xf32>
    %c34 = arith.constant 34 : index
    %171 = memref.load %arg2[%c34] : memref<64xf32, #tpu.memory_space<smem>>
    %172 = vector.broadcast %171 : f32 to vector<24x23xf32>
    %173 = arith.mulf %172, %5 : vector<24x23xf32>
    %174 = arith.addf %170, %173 : vector<24x23xf32>
    %c35 = arith.constant 35 : index
    %175 = memref.load %arg2[%c35] : memref<64xf32, #tpu.memory_space<smem>>
    %176 = vector.broadcast %175 : f32 to vector<24x23xf32>
    %177 = arith.mulf %176, %7 : vector<24x23xf32>
    %178 = arith.addf %174, %177 : vector<24x23xf32>
    %c36 = arith.constant 36 : index
    %179 = memref.load %arg2[%c36] : memref<64xf32, #tpu.memory_space<smem>>
    %180 = vector.broadcast %179 : f32 to vector<24x23xf32>
    %181 = arith.mulf %180, %9 : vector<24x23xf32>
    %182 = arith.addf %178, %181 : vector<24x23xf32>
    %c37 = arith.constant 37 : index
    %183 = memref.load %arg2[%c37] : memref<64xf32, #tpu.memory_space<smem>>
    %184 = vector.broadcast %183 : f32 to vector<24x23xf32>
    %185 = arith.mulf %184, %11 : vector<24x23xf32>
    %186 = arith.addf %182, %185 : vector<24x23xf32>
    %c38 = arith.constant 38 : index
    %187 = memref.load %arg2[%c38] : memref<64xf32, #tpu.memory_space<smem>>
    %188 = vector.broadcast %187 : f32 to vector<24x23xf32>
    %189 = arith.mulf %188, %13 : vector<24x23xf32>
    %190 = arith.addf %186, %189 : vector<24x23xf32>
    %c39 = arith.constant 39 : index
    %191 = memref.load %arg2[%c39] : memref<64xf32, #tpu.memory_space<smem>>
    %192 = vector.broadcast %191 : f32 to vector<24x23xf32>
    %193 = arith.mulf %192, %15 : vector<24x23xf32>
    %194 = arith.addf %190, %193 : vector<24x23xf32>
    %c4_37 = arith.constant 4 : index
    %195 = memref.load %arg3[%c4_37] : memref<8xf32, #tpu.memory_space<smem>>
    %196 = vector.broadcast %195 : f32 to vector<24x23xf32>
    %197 = arith.addf %194, %196 : vector<24x23xf32>
    %cst_38 = arith.constant 0.000000e+00 : f32
    %198 = vector.broadcast %cst_38 : f32 to vector<24x23xf32>
    %199 = arith.maximumf %197, %198 : vector<24x23xf32>
    %c96 = arith.constant 96 : index
    %c0_39 = arith.constant 0 : index
    %200 = vector.load %arg17[%c96, %c0_39] : memref<192x23xf32, #tpu.memory_space<vmem>>, vector<24x23xf32>
    tpu.vector_store %arg17[%c96, %c0_39], %199 {strides = array<i32>} : memref<192x23xf32, #tpu.memory_space<vmem>>, vector<24x23xf32>,
    %c40 = arith.constant 40 : index
    %201 = memref.load %arg2[%c40] : memref<64xf32, #tpu.memory_space<smem>>
    %202 = vector.broadcast %201 : f32 to vector<24x23xf32>
    %203 = arith.mulf %202, %1 : vector<24x23xf32>
    %c41 = arith.constant 41 : index
    %204 = memref.load %arg2[%c41] : memref<64xf32, #tpu.memory_space<smem>>
    %205 = vector.broadcast %204 : f32 to vector<24x23xf32>
    %206 = arith.mulf %205, %3 : vector<24x23xf32>
    %207 = arith.addf %203, %206 : vector<24x23xf32>
    %c42 = arith.constant 42 : index
    %208 = memref.load %arg2[%c42] : memref<64xf32, #tpu.memory_space<smem>>
    %209 = vector.broadcast %208 : f32 to vector<24x23xf32>
    %210 = arith.mulf %209, %5 : vector<24x23xf32>
    %211 = arith.addf %207, %210 : vector<24x23xf32>
    %c43 = arith.constant 43 : index
    %212 = memref.load %arg2[%c43] : memref<64xf32, #tpu.memory_space<smem>>
    %213 = vector.broadcast %212 : f32 to vector<24x23xf32>
    %214 = arith.mulf %213, %7 : vector<24x23xf32>
    %215 = arith.addf %211, %214 : vector<24x23xf32>
    %c44 = arith.constant 44 : index
    %216 = memref.load %arg2[%c44] : memref<64xf32, #tpu.memory_space<smem>>
    %217 = vector.broadcast %216 : f32 to vector<24x23xf32>
    %218 = arith.mulf %217, %9 : vector<24x23xf32>
    %219 = arith.addf %215, %218 : vector<24x23xf32>
    %c45 = arith.constant 45 : index
    %220 = memref.load %arg2[%c45] : memref<64xf32, #tpu.memory_space<smem>>
    %221 = vector.broadcast %220 : f32 to vector<24x23xf32>
    %222 = arith.mulf %221, %11 : vector<24x23xf32>
    %223 = arith.addf %219, %222 : vector<24x23xf32>
    %c46 = arith.constant 46 : index
    %224 = memref.load %arg2[%c46] : memref<64xf32, #tpu.memory_space<smem>>
    %225 = vector.broadcast %224 : f32 to vector<24x23xf32>
    %226 = arith.mulf %225, %13 : vector<24x23xf32>
    %227 = arith.addf %223, %226 : vector<24x23xf32>
    %c47 = arith.constant 47 : index
    %228 = memref.load %arg2[%c47] : memref<64xf32, #tpu.memory_space<smem>>
    %229 = vector.broadcast %228 : f32 to vector<24x23xf32>
    %230 = arith.mulf %229, %15 : vector<24x23xf32>
    %231 = arith.addf %227, %230 : vector<24x23xf32>
    %c5_40 = arith.constant 5 : index
    %232 = memref.load %arg3[%c5_40] : memref<8xf32, #tpu.memory_space<smem>>
    %233 = vector.broadcast %232 : f32 to vector<24x23xf32>
    %234 = arith.addf %231, %233 : vector<24x23xf32>
    %cst_41 = arith.constant 0.000000e+00 : f32
    %235 = vector.broadcast %cst_41 : f32 to vector<24x23xf32>
    %236 = arith.maximumf %234, %235 : vector<24x23xf32>
    %c120 = arith.constant 120 : index
    %c0_42 = arith.constant 0 : index
    %237 = vector.load %arg17[%c120, %c0_42] : memref<192x23xf32, #tpu.memory_space<vmem>>, vector<24x23xf32>
    tpu.vector_store %arg17[%c120, %c0_42], %236 {strides = array<i32>} : memref<192x23xf32, #tpu.memory_space<vmem>>, vector<24x23xf32>,
    %c48_43 = arith.constant 48 : index
    %238 = memref.load %arg2[%c48_43] : memref<64xf32, #tpu.memory_space<smem>>
    %239 = vector.broadcast %238 : f32 to vector<24x23xf32>
    %240 = arith.mulf %239, %1 : vector<24x23xf32>
    %c49 = arith.constant 49 : index
    %241 = memref.load %arg2[%c49] : memref<64xf32, #tpu.memory_space<smem>>
    %242 = vector.broadcast %241 : f32 to vector<24x23xf32>
    %243 = arith.mulf %242, %3 : vector<24x23xf32>
    %244 = arith.addf %240, %243 : vector<24x23xf32>
    %c50 = arith.constant 50 : index
    %245 = memref.load %arg2[%c50] : memref<64xf32, #tpu.memory_space<smem>>
    %246 = vector.broadcast %245 : f32 to vector<24x23xf32>
    %247 = arith.mulf %246, %5 : vector<24x23xf32>
    %248 = arith.addf %244, %247 : vector<24x23xf32>
    %c51 = arith.constant 51 : index
    %249 = memref.load %arg2[%c51] : memref<64xf32, #tpu.memory_space<smem>>
    %250 = vector.broadcast %249 : f32 to vector<24x23xf32>
    %251 = arith.mulf %250, %7 : vector<24x23xf32>
    %252 = arith.addf %248, %251 : vector<24x23xf32>
    %c52 = arith.constant 52 : index
    %253 = memref.load %arg2[%c52] : memref<64xf32, #tpu.memory_space<smem>>
    %254 = vector.broadcast %253 : f32 to vector<24x23xf32>
    %255 = arith.mulf %254, %9 : vector<24x23xf32>
    %256 = arith.addf %252, %255 : vector<24x23xf32>
    %c53 = arith.constant 53 : index
    %257 = memref.load %arg2[%c53] : memref<64xf32, #tpu.memory_space<smem>>
    %258 = vector.broadcast %257 : f32 to vector<24x23xf32>
    %259 = arith.mulf %258, %11 : vector<24x23xf32>
    %260 = arith.addf %256, %259 : vector<24x23xf32>
    %c54 = arith.constant 54 : index
    %261 = memref.load %arg2[%c54] : memref<64xf32, #tpu.memory_space<smem>>
    %262 = vector.broadcast %261 : f32 to vector<24x23xf32>
    %263 = arith.mulf %262, %13 : vector<24x23xf32>
    %264 = arith.addf %260, %263 : vector<24x23xf32>
    %c55 = arith.constant 55 : index
    %265 = memref.load %arg2[%c55] : memref<64xf32, #tpu.memory_space<smem>>
    %266 = vector.broadcast %265 : f32 to vector<24x23xf32>
    %267 = arith.mulf %266, %15 : vector<24x23xf32>
    %268 = arith.addf %264, %267 : vector<24x23xf32>
    %c6_44 = arith.constant 6 : index
    %269 = memref.load %arg3[%c6_44] : memref<8xf32, #tpu.memory_space<smem>>
    %270 = vector.broadcast %269 : f32 to vector<24x23xf32>
    %271 = arith.addf %268, %270 : vector<24x23xf32>
    %cst_45 = arith.constant 0.000000e+00 : f32
    %272 = vector.broadcast %cst_45 : f32 to vector<24x23xf32>
    %273 = arith.maximumf %271, %272 : vector<24x23xf32>
    %c144 = arith.constant 144 : index
    %c0_46 = arith.constant 0 : index
    %274 = vector.load %arg17[%c144, %c0_46] : memref<192x23xf32, #tpu.memory_space<vmem>>, vector<24x23xf32>
    tpu.vector_store %arg17[%c144, %c0_46], %273 {strides = array<i32>} : memref<192x23xf32, #tpu.memory_space<vmem>>, vector<24x23xf32>,
    %c56 = arith.constant 56 : index
    %275 = memref.load %arg2[%c56] : memref<64xf32, #tpu.memory_space<smem>>
    %276 = vector.broadcast %275 : f32 to vector<24x23xf32>
    %277 = arith.mulf %276, %1 : vector<24x23xf32>
    %c57 = arith.constant 57 : index
    %278 = memref.load %arg2[%c57] : memref<64xf32, #tpu.memory_space<smem>>
    %279 = vector.broadcast %278 : f32 to vector<24x23xf32>
    %280 = arith.mulf %279, %3 : vector<24x23xf32>
    %281 = arith.addf %277, %280 : vector<24x23xf32>
    %c58 = arith.constant 58 : index
    %282 = memref.load %arg2[%c58] : memref<64xf32, #tpu.memory_space<smem>>
    %283 = vector.broadcast %282 : f32 to vector<24x23xf32>
    %284 = arith.mulf %283, %5 : vector<24x23xf32>
    %285 = arith.addf %281, %284 : vector<24x23xf32>
    %c59 = arith.constant 59 : index
    %286 = memref.load %arg2[%c59] : memref<64xf32, #tpu.memory_space<smem>>
    %287 = vector.broadcast %286 : f32 to vector<24x23xf32>
    %288 = arith.mulf %287, %7 : vector<24x23xf32>
    %289 = arith.addf %285, %288 : vector<24x23xf32>
    %c60 = arith.constant 60 : index
    %290 = memref.load %arg2[%c60] : memref<64xf32, #tpu.memory_space<smem>>
    %291 = vector.broadcast %290 : f32 to vector<24x23xf32>
    %292 = arith.mulf %291, %9 : vector<24x23xf32>
    %293 = arith.addf %289, %292 : vector<24x23xf32>
    %c61 = arith.constant 61 : index
    %294 = memref.load %arg2[%c61] : memref<64xf32, #tpu.memory_space<smem>>
    %295 = vector.broadcast %294 : f32 to vector<24x23xf32>
    %296 = arith.mulf %295, %11 : vector<24x23xf32>
    %297 = arith.addf %293, %296 : vector<24x23xf32>
    %c62 = arith.constant 62 : index
    %298 = memref.load %arg2[%c62] : memref<64xf32, #tpu.memory_space<smem>>
    %299 = vector.broadcast %298 : f32 to vector<24x23xf32>
    %300 = arith.mulf %299, %13 : vector<24x23xf32>
    %301 = arith.addf %297, %300 : vector<24x23xf32>
    %c63 = arith.constant 63 : index
    %302 = memref.load %arg2[%c63] : memref<64xf32, #tpu.memory_space<smem>>
    %303 = vector.broadcast %302 : f32 to vector<24x23xf32>
    %304 = arith.mulf %303, %15 : vector<24x23xf32>
    %305 = arith.addf %301, %304 : vector<24x23xf32>
    %c7_47 = arith.constant 7 : index
    %306 = memref.load %arg3[%c7_47] : memref<8xf32, #tpu.memory_space<smem>>
    %307 = vector.broadcast %306 : f32 to vector<24x23xf32>
    %308 = arith.addf %305, %307 : vector<24x23xf32>
    %cst_48 = arith.constant 0.000000e+00 : f32
    %309 = vector.broadcast %cst_48 : f32 to vector<24x23xf32>
    %310 = arith.maximumf %308, %309 : vector<24x23xf32>
    %c168 = arith.constant 168 : index
    %c0_49 = arith.constant 0 : index
    %311 = vector.load %arg17[%c168, %c0_49] : memref<192x23xf32, #tpu.memory_space<vmem>>, vector<24x23xf32>
    tpu.vector_store %arg17[%c168, %c0_49], %310 {strides = array<i32>} : memref<192x23xf32, #tpu.memory_space<vmem>>, vector<24x23xf32>,
    %c0_50 = arith.constant 0 : index
    %c0_51 = arith.constant 0 : index
    %312 = vector.load %arg17[%c0_50, %c0_51] : memref<192x23xf32, #tpu.memory_space<vmem>>, vector<192x22xf32>
    %c0_52 = arith.constant 0 : index
    %c1_53 = arith.constant 1 : index
    %313 = vector.load %arg17[%c0_52, %c1_53] : memref<192x23xf32, #tpu.memory_space<vmem>>, vector<192x22xf32>
    %314 = arith.maximumf %312, %313 : vector<192x22xf32>
    %c0_54 = arith.constant 0 : index
    %c0_55 = arith.constant 0 : index
    %315 = vector.load %arg6[%c0_54, %c0_55] : memref<22x11xf32, #tpu.memory_space<vmem>>, vector<22x11xf32>
    %cst_56 = arith.constant dense<0.000000e+00> : vector<192x11xf32>
    %316 = tpu.matmul %314, %315, %cst_56 {dimension_numbers = #tpu.dot_dimension_numbers<[1], [0], [0], [1], [0, 0, 1, 1], [], []>} : vector<192x22xf32>, vector<22x11xf32>, vector<192x11xf32> -> vector<192x11xf32>
    %317 = vector.extract_strided_slice %316 {offsets = [0, 0], sizes = [191, 11], strides = [1, 1]} : vector<192x11xf32> to vector<191x11xf32>
    %318 = vector.extract_strided_slice %316 {offsets = [1, 0], sizes = [191, 11], strides = [1, 1]} : vector<192x11xf32> to vector<191x11xf32>
    %319 = arith.maximumf %317, %318 : vector<191x11xf32>
    %c0_57 = arith.constant 0 : index
    %c0_58 = arith.constant 0 : index
    %320 = vector.load %arg7[%c0_57, %c0_58] : memref<88x191xf32, #tpu.memory_space<vmem>>, vector<88x191xf32>
    %cst_59 = arith.constant dense<0.000000e+00> : vector<88x11xf32>
    %321 = tpu.matmul %320, %319, %cst_59 {dimension_numbers = #tpu.dot_dimension_numbers<[1], [0], [0], [1], [0, 0, 1, 1], [], []>} : vector<88x191xf32>, vector<191x11xf32>, vector<88x11xf32> -> vector<88x11xf32>
    %c0_60 = arith.constant 0 : index
    %c0_61 = arith.constant 0 : index
    %322 = vector.load %arg18[%c0_60, %c0_61] : memref<88x11xf32, #tpu.memory_space<vmem>>, vector<88x11xf32>
    tpu.vector_store %arg18[%c0_60, %c0_61], %321 {strides = array<i32>} : memref<88x11xf32, #tpu.memory_space<vmem>>, vector<88x11xf32>,
    %c0_62 = arith.constant 0 : index
    %c0_63 = arith.constant 0 : index
    %323 = vector.load %arg18[%c0_62, %c0_63] : memref<88x11xf32, #tpu.memory_space<vmem>>, vector<16x10xf32>
    %c0_64 = arith.constant 0 : index
    %c1_65 = arith.constant 1 : index
    %324 = vector.load %arg18[%c0_64, %c1_65] : memref<88x11xf32, #tpu.memory_space<vmem>>, vector<16x10xf32>
    %c1_66 = arith.constant 1 : index
    %c0_67 = arith.constant 0 : index
    %325 = vector.load %arg18[%c1_66, %c0_67] : memref<88x11xf32, #tpu.memory_space<vmem>>, vector<16x10xf32>
    %c1_68 = arith.constant 1 : index
    %c1_69 = arith.constant 1 : index
    %326 = vector.load %arg18[%c1_68, %c1_69] : memref<88x11xf32, #tpu.memory_space<vmem>>, vector<16x10xf32>
    %c0_70 = arith.constant 0 : index
    %327 = memref.load %arg4[%c0_70] : memref<256xf32, #tpu.memory_space<smem>>
    %328 = vector.broadcast %327 : f32 to vector<16x10xf32>
    %329 = arith.mulf %328, %323 : vector<16x10xf32>
    %c1_71 = arith.constant 1 : index
    %330 = memref.load %arg4[%c1_71] : memref<256xf32, #tpu.memory_space<smem>>
    %331 = vector.broadcast %330 : f32 to vector<16x10xf32>
    %332 = arith.mulf %331, %324 : vector<16x10xf32>
    %333 = arith.addf %329, %332 : vector<16x10xf32>
    %c2_72 = arith.constant 2 : index
    %334 = memref.load %arg4[%c2_72] : memref<256xf32, #tpu.memory_space<smem>>
    %335 = vector.broadcast %334 : f32 to vector<16x10xf32>
    %336 = arith.mulf %335, %325 : vector<16x10xf32>
    %337 = arith.addf %333, %336 : vector<16x10xf32>
    %c3_73 = arith.constant 3 : index
    %338 = memref.load %arg4[%c3_73] : memref<256xf32, #tpu.memory_space<smem>>
    %339 = vector.broadcast %338 : f32 to vector<16x10xf32>
    %340 = arith.mulf %339, %326 : vector<16x10xf32>
    %341 = arith.addf %337, %340 : vector<16x10xf32>
    %c32_74 = arith.constant 32 : index
    %342 = memref.load %arg4[%c32_74] : memref<256xf32, #tpu.memory_space<smem>>
    %343 = vector.broadcast %342 : f32 to vector<16x10xf32>
    %344 = arith.mulf %343, %323 : vector<16x10xf32>
    %c33_75 = arith.constant 33 : index
    %345 = memref.load %arg4[%c33_75] : memref<256xf32, #tpu.memory_space<smem>>
    %346 = vector.broadcast %345 : f32 to vector<16x10xf32>
    %347 = arith.mulf %346, %324 : vector<16x10xf32>
    %348 = arith.addf %344, %347 : vector<16x10xf32>
    %c34_76 = arith.constant 34 : index
    %349 = memref.load %arg4[%c34_76] : memref<256xf32, #tpu.memory_space<smem>>
    %350 = vector.broadcast %349 : f32 to vector<16x10xf32>
    %351 = arith.mulf %350, %325 : vector<16x10xf32>
    %352 = arith.addf %348, %351 : vector<16x10xf32>
    %c35_77 = arith.constant 35 : index
    %353 = memref.load %arg4[%c35_77] : memref<256xf32, #tpu.memory_space<smem>>
    %354 = vector.broadcast %353 : f32 to vector<16x10xf32>
    %355 = arith.mulf %354, %326 : vector<16x10xf32>
    %356 = arith.addf %352, %355 : vector<16x10xf32>
    %c64 = arith.constant 64 : index
    %357 = memref.load %arg4[%c64] : memref<256xf32, #tpu.memory_space<smem>>
    %358 = vector.broadcast %357 : f32 to vector<16x10xf32>
    %359 = arith.mulf %358, %323 : vector<16x10xf32>
    %c65 = arith.constant 65 : index
    %360 = memref.load %arg4[%c65] : memref<256xf32, #tpu.memory_space<smem>>
    %361 = vector.broadcast %360 : f32 to vector<16x10xf32>
    %362 = arith.mulf %361, %324 : vector<16x10xf32>
    %363 = arith.addf %359, %362 : vector<16x10xf32>
    %c66 = arith.constant 66 : index
    %364 = memref.load %arg4[%c66] : memref<256xf32, #tpu.memory_space<smem>>
    %365 = vector.broadcast %364 : f32 to vector<16x10xf32>
    %366 = arith.mulf %365, %325 : vector<16x10xf32>
    %367 = arith.addf %363, %366 : vector<16x10xf32>
    %c67 = arith.constant 67 : index
    %368 = memref.load %arg4[%c67] : memref<256xf32, #tpu.memory_space<smem>>
    %369 = vector.broadcast %368 : f32 to vector<16x10xf32>
    %370 = arith.mulf %369, %326 : vector<16x10xf32>
    %371 = arith.addf %367, %370 : vector<16x10xf32>
    %c96_78 = arith.constant 96 : index
    %372 = memref.load %arg4[%c96_78] : memref<256xf32, #tpu.memory_space<smem>>
    %373 = vector.broadcast %372 : f32 to vector<16x10xf32>
    %374 = arith.mulf %373, %323 : vector<16x10xf32>
    %c97 = arith.constant 97 : index
    %375 = memref.load %arg4[%c97] : memref<256xf32, #tpu.memory_space<smem>>
    %376 = vector.broadcast %375 : f32 to vector<16x10xf32>
    %377 = arith.mulf %376, %324 : vector<16x10xf32>
    %378 = arith.addf %374, %377 : vector<16x10xf32>
    %c98 = arith.constant 98 : index
    %379 = memref.load %arg4[%c98] : memref<256xf32, #tpu.memory_space<smem>>
    %380 = vector.broadcast %379 : f32 to vector<16x10xf32>
    %381 = arith.mulf %380, %325 : vector<16x10xf32>
    %382 = arith.addf %378, %381 : vector<16x10xf32>
    %c99 = arith.constant 99 : index
    %383 = memref.load %arg4[%c99] : memref<256xf32, #tpu.memory_space<smem>>
    %384 = vector.broadcast %383 : f32 to vector<16x10xf32>
    %385 = arith.mulf %384, %326 : vector<16x10xf32>
    %386 = arith.addf %382, %385 : vector<16x10xf32>
    %c128 = arith.constant 128 : index
    %387 = memref.load %arg4[%c128] : memref<256xf32, #tpu.memory_space<smem>>
    %388 = vector.broadcast %387 : f32 to vector<16x10xf32>
    %389 = arith.mulf %388, %323 : vector<16x10xf32>
    %c129 = arith.constant 129 : index
    %390 = memref.load %arg4[%c129] : memref<256xf32, #tpu.memory_space<smem>>
    %391 = vector.broadcast %390 : f32 to vector<16x10xf32>
    %392 = arith.mulf %391, %324 : vector<16x10xf32>
    %393 = arith.addf %389, %392 : vector<16x10xf32>
    %c130 = arith.constant 130 : index
    %394 = memref.load %arg4[%c130] : memref<256xf32, #tpu.memory_space<smem>>
    %395 = vector.broadcast %394 : f32 to vector<16x10xf32>
    %396 = arith.mulf %395, %325 : vector<16x10xf32>
    %397 = arith.addf %393, %396 : vector<16x10xf32>
    %c131 = arith.constant 131 : index
    %398 = memref.load %arg4[%c131] : memref<256xf32, #tpu.memory_space<smem>>
    %399 = vector.broadcast %398 : f32 to vector<16x10xf32>
    %400 = arith.mulf %399, %326 : vector<16x10xf32>
    %401 = arith.addf %397, %400 : vector<16x10xf32>
    %c160 = arith.constant 160 : index
    %402 = memref.load %arg4[%c160] : memref<256xf32, #tpu.memory_space<smem>>
    %403 = vector.broadcast %402 : f32 to vector<16x10xf32>
    %404 = arith.mulf %403, %323 : vector<16x10xf32>
    %c161 = arith.constant 161 : index
    %405 = memref.load %arg4[%c161] : memref<256xf32, #tpu.memory_space<smem>>
    %406 = vector.broadcast %405 : f32 to vector<16x10xf32>
    %407 = arith.mulf %406, %324 : vector<16x10xf32>
    %408 = arith.addf %404, %407 : vector<16x10xf32>
    %c162 = arith.constant 162 : index
    %409 = memref.load %arg4[%c162] : memref<256xf32, #tpu.memory_space<smem>>
    %410 = vector.broadcast %409 : f32 to vector<16x10xf32>
    %411 = arith.mulf %410, %325 : vector<16x10xf32>
    %412 = arith.addf %408, %411 : vector<16x10xf32>
    %c163 = arith.constant 163 : index
    %413 = memref.load %arg4[%c163] : memref<256xf32, #tpu.memory_space<smem>>
    %414 = vector.broadcast %413 : f32 to vector<16x10xf32>
    %415 = arith.mulf %414, %326 : vector<16x10xf32>
    %416 = arith.addf %412, %415 : vector<16x10xf32>
    %c192 = arith.constant 192 : index
    %417 = memref.load %arg4[%c192] : memref<256xf32, #tpu.memory_space<smem>>
    %418 = vector.broadcast %417 : f32 to vector<16x10xf32>
    %419 = arith.mulf %418, %323 : vector<16x10xf32>
    %c193 = arith.constant 193 : index
    %420 = memref.load %arg4[%c193] : memref<256xf32, #tpu.memory_space<smem>>
    %421 = vector.broadcast %420 : f32 to vector<16x10xf32>
    %422 = arith.mulf %421, %324 : vector<16x10xf32>
    %423 = arith.addf %419, %422 : vector<16x10xf32>
    %c194 = arith.constant 194 : index
    %424 = memref.load %arg4[%c194] : memref<256xf32, #tpu.memory_space<smem>>
    %425 = vector.broadcast %424 : f32 to vector<16x10xf32>
    %426 = arith.mulf %425, %325 : vector<16x10xf32>
    %427 = arith.addf %423, %426 : vector<16x10xf32>
    %c195 = arith.constant 195 : index
    %428 = memref.load %arg4[%c195] : memref<256xf32, #tpu.memory_space<smem>>
    %429 = vector.broadcast %428 : f32 to vector<16x10xf32>
    %430 = arith.mulf %429, %326 : vector<16x10xf32>
    %431 = arith.addf %427, %430 : vector<16x10xf32>
    %c224 = arith.constant 224 : index
    %432 = memref.load %arg4[%c224] : memref<256xf32, #tpu.memory_space<smem>>
    %433 = vector.broadcast %432 : f32 to vector<16x10xf32>
    %434 = arith.mulf %433, %323 : vector<16x10xf32>
    %c225 = arith.constant 225 : index
    %435 = memref.load %arg4[%c225] : memref<256xf32, #tpu.memory_space<smem>>
    %436 = vector.broadcast %435 : f32 to vector<16x10xf32>
    %437 = arith.mulf %436, %324 : vector<16x10xf32>
    %438 = arith.addf %434, %437 : vector<16x10xf32>
    %c226 = arith.constant 226 : index
    %439 = memref.load %arg4[%c226] : memref<256xf32, #tpu.memory_space<smem>>
    %440 = vector.broadcast %439 : f32 to vector<16x10xf32>
    %441 = arith.mulf %440, %325 : vector<16x10xf32>
    %442 = arith.addf %438, %441 : vector<16x10xf32>
    %c227 = arith.constant 227 : index
    %443 = memref.load %arg4[%c227] : memref<256xf32, #tpu.memory_space<smem>>
    %444 = vector.broadcast %443 : f32 to vector<16x10xf32>
    %445 = arith.mulf %444, %326 : vector<16x10xf32>
    %446 = arith.addf %442, %445 : vector<16x10xf32>
    %c10_79 = arith.constant 10 : index
    %c0_80 = arith.constant 0 : index
    %447 = vector.load %arg18[%c10_79, %c0_80] : memref<88x11xf32, #tpu.memory_space<vmem>>, vector<16x10xf32>
    %c10_81 = arith.constant 10 : index
    %c1_82 = arith.constant 1 : index
    %448 = vector.load %arg18[%c10_81, %c1_82] : memref<88x11xf32, #tpu.memory_space<vmem>>, vector<16x10xf32>
    %c11_83 = arith.constant 11 : index
    %c0_84 = arith.constant 0 : index
    %449 = vector.load %arg18[%c11_83, %c0_84] : memref<88x11xf32, #tpu.memory_space<vmem>>, vector<16x10xf32>
    %c11_85 = arith.constant 11 : index
    %c1_86 = arith.constant 1 : index
    %450 = vector.load %arg18[%c11_85, %c1_86] : memref<88x11xf32, #tpu.memory_space<vmem>>, vector<16x10xf32>
    %c4_87 = arith.constant 4 : index
    %451 = memref.load %arg4[%c4_87] : memref<256xf32, #tpu.memory_space<smem>>
    %452 = vector.broadcast %451 : f32 to vector<16x10xf32>
    %453 = arith.mulf %452, %447 : vector<16x10xf32>
    %454 = arith.addf %341, %453 : vector<16x10xf32>
    %c5_88 = arith.constant 5 : index
    %455 = memref.load %arg4[%c5_88] : memref<256xf32, #tpu.memory_space<smem>>
    %456 = vector.broadcast %455 : f32 to vector<16x10xf32>
    %457 = arith.mulf %456, %448 : vector<16x10xf32>
    %458 = arith.addf %454, %457 : vector<16x10xf32>
    %c6_89 = arith.constant 6 : index
    %459 = memref.load %arg4[%c6_89] : memref<256xf32, #tpu.memory_space<smem>>
    %460 = vector.broadcast %459 : f32 to vector<16x10xf32>
    %461 = arith.mulf %460, %449 : vector<16x10xf32>
    %462 = arith.addf %458, %461 : vector<16x10xf32>
    %c7_90 = arith.constant 7 : index
    %463 = memref.load %arg4[%c7_90] : memref<256xf32, #tpu.memory_space<smem>>
    %464 = vector.broadcast %463 : f32 to vector<16x10xf32>
    %465 = arith.mulf %464, %450 : vector<16x10xf32>
    %466 = arith.addf %462, %465 : vector<16x10xf32>
    %c36_91 = arith.constant 36 : index
    %467 = memref.load %arg4[%c36_91] : memref<256xf32, #tpu.memory_space<smem>>
    %468 = vector.broadcast %467 : f32 to vector<16x10xf32>
    %469 = arith.mulf %468, %447 : vector<16x10xf32>
    %470 = arith.addf %356, %469 : vector<16x10xf32>
    %c37_92 = arith.constant 37 : index
    %471 = memref.load %arg4[%c37_92] : memref<256xf32, #tpu.memory_space<smem>>
    %472 = vector.broadcast %471 : f32 to vector<16x10xf32>
    %473 = arith.mulf %472, %448 : vector<16x10xf32>
    %474 = arith.addf %470, %473 : vector<16x10xf32>
    %c38_93 = arith.constant 38 : index
    %475 = memref.load %arg4[%c38_93] : memref<256xf32, #tpu.memory_space<smem>>
    %476 = vector.broadcast %475 : f32 to vector<16x10xf32>
    %477 = arith.mulf %476, %449 : vector<16x10xf32>
    %478 = arith.addf %474, %477 : vector<16x10xf32>
    %c39_94 = arith.constant 39 : index
    %479 = memref.load %arg4[%c39_94] : memref<256xf32, #tpu.memory_space<smem>>
    %480 = vector.broadcast %479 : f32 to vector<16x10xf32>
    %481 = arith.mulf %480, %450 : vector<16x10xf32>
    %482 = arith.addf %478, %481 : vector<16x10xf32>
    %c68 = arith.constant 68 : index
    %483 = memref.load %arg4[%c68] : memref<256xf32, #tpu.memory_space<smem>>
    %484 = vector.broadcast %483 : f32 to vector<16x10xf32>
    %485 = arith.mulf %484, %447 : vector<16x10xf32>
    %486 = arith.addf %371, %485 : vector<16x10xf32>
    %c69 = arith.constant 69 : index
    %487 = memref.load %arg4[%c69] : memref<256xf32, #tpu.memory_space<smem>>
    %488 = vector.broadcast %487 : f32 to vector<16x10xf32>
    %489 = arith.mulf %488, %448 : vector<16x10xf32>
    %490 = arith.addf %486, %489 : vector<16x10xf32>
    %c70 = arith.constant 70 : index
    %491 = memref.load %arg4[%c70] : memref<256xf32, #tpu.memory_space<smem>>
    %492 = vector.broadcast %491 : f32 to vector<16x10xf32>
    %493 = arith.mulf %492, %449 : vector<16x10xf32>
    %494 = arith.addf %490, %493 : vector<16x10xf32>
    %c71 = arith.constant 71 : index
    %495 = memref.load %arg4[%c71] : memref<256xf32, #tpu.memory_space<smem>>
    %496 = vector.broadcast %495 : f32 to vector<16x10xf32>
    %497 = arith.mulf %496, %450 : vector<16x10xf32>
    %498 = arith.addf %494, %497 : vector<16x10xf32>
    %c100 = arith.constant 100 : index
    %499 = memref.load %arg4[%c100] : memref<256xf32, #tpu.memory_space<smem>>
    %500 = vector.broadcast %499 : f32 to vector<16x10xf32>
    %501 = arith.mulf %500, %447 : vector<16x10xf32>
    %502 = arith.addf %386, %501 : vector<16x10xf32>
    %c101 = arith.constant 101 : index
    %503 = memref.load %arg4[%c101] : memref<256xf32, #tpu.memory_space<smem>>
    %504 = vector.broadcast %503 : f32 to vector<16x10xf32>
    %505 = arith.mulf %504, %448 : vector<16x10xf32>
    %506 = arith.addf %502, %505 : vector<16x10xf32>
    %c102 = arith.constant 102 : index
    %507 = memref.load %arg4[%c102] : memref<256xf32, #tpu.memory_space<smem>>
    %508 = vector.broadcast %507 : f32 to vector<16x10xf32>
    %509 = arith.mulf %508, %449 : vector<16x10xf32>
    %510 = arith.addf %506, %509 : vector<16x10xf32>
    %c103 = arith.constant 103 : index
    %511 = memref.load %arg4[%c103] : memref<256xf32, #tpu.memory_space<smem>>
    %512 = vector.broadcast %511 : f32 to vector<16x10xf32>
    %513 = arith.mulf %512, %450 : vector<16x10xf32>
    %514 = arith.addf %510, %513 : vector<16x10xf32>
    %c132 = arith.constant 132 : index
    %515 = memref.load %arg4[%c132] : memref<256xf32, #tpu.memory_space<smem>>
    %516 = vector.broadcast %515 : f32 to vector<16x10xf32>
    %517 = arith.mulf %516, %447 : vector<16x10xf32>
    %518 = arith.addf %401, %517 : vector<16x10xf32>
    %c133 = arith.constant 133 : index
    %519 = memref.load %arg4[%c133] : memref<256xf32, #tpu.memory_space<smem>>
    %520 = vector.broadcast %519 : f32 to vector<16x10xf32>
    %521 = arith.mulf %520, %448 : vector<16x10xf32>
    %522 = arith.addf %518, %521 : vector<16x10xf32>
    %c134 = arith.constant 134 : index
    %523 = memref.load %arg4[%c134] : memref<256xf32, #tpu.memory_space<smem>>
    %524 = vector.broadcast %523 : f32 to vector<16x10xf32>
    %525 = arith.mulf %524, %449 : vector<16x10xf32>
    %526 = arith.addf %522, %525 : vector<16x10xf32>
    %c135 = arith.constant 135 : index
    %527 = memref.load %arg4[%c135] : memref<256xf32, #tpu.memory_space<smem>>
    %528 = vector.broadcast %527 : f32 to vector<16x10xf32>
    %529 = arith.mulf %528, %450 : vector<16x10xf32>
    %530 = arith.addf %526, %529 : vector<16x10xf32>
    %c164 = arith.constant 164 : index
    %531 = memref.load %arg4[%c164] : memref<256xf32, #tpu.memory_space<smem>>
    %532 = vector.broadcast %531 : f32 to vector<16x10xf32>
    %533 = arith.mulf %532, %447 : vector<16x10xf32>
    %534 = arith.addf %416, %533 : vector<16x10xf32>
    %c165 = arith.constant 165 : index
    %535 = memref.load %arg4[%c165] : memref<256xf32, #tpu.memory_space<smem>>
    %536 = vector.broadcast %535 : f32 to vector<16x10xf32>
    %537 = arith.mulf %536, %448 : vector<16x10xf32>
    %538 = arith.addf %534, %537 : vector<16x10xf32>
    %c166 = arith.constant 166 : index
    %539 = memref.load %arg4[%c166] : memref<256xf32, #tpu.memory_space<smem>>
    %540 = vector.broadcast %539 : f32 to vector<16x10xf32>
    %541 = arith.mulf %540, %449 : vector<16x10xf32>
    %542 = arith.addf %538, %541 : vector<16x10xf32>
    %c167 = arith.constant 167 : index
    %543 = memref.load %arg4[%c167] : memref<256xf32, #tpu.memory_space<smem>>
    %544 = vector.broadcast %543 : f32 to vector<16x10xf32>
    %545 = arith.mulf %544, %450 : vector<16x10xf32>
    %546 = arith.addf %542, %545 : vector<16x10xf32>
    %c196 = arith.constant 196 : index
    %547 = memref.load %arg4[%c196] : memref<256xf32, #tpu.memory_space<smem>>
    %548 = vector.broadcast %547 : f32 to vector<16x10xf32>
    %549 = arith.mulf %548, %447 : vector<16x10xf32>
    %550 = arith.addf %431, %549 : vector<16x10xf32>
    %c197 = arith.constant 197 : index
    %551 = memref.load %arg4[%c197] : memref<256xf32, #tpu.memory_space<smem>>
    %552 = vector.broadcast %551 : f32 to vector<16x10xf32>
    %553 = arith.mulf %552, %448 : vector<16x10xf32>
    %554 = arith.addf %550, %553 : vector<16x10xf32>
    %c198 = arith.constant 198 : index
    %555 = memref.load %arg4[%c198] : memref<256xf32, #tpu.memory_space<smem>>
    %556 = vector.broadcast %555 : f32 to vector<16x10xf32>
    %557 = arith.mulf %556, %449 : vector<16x10xf32>
    %558 = arith.addf %554, %557 : vector<16x10xf32>
    %c199 = arith.constant 199 : index
    %559 = memref.load %arg4[%c199] : memref<256xf32, #tpu.memory_space<smem>>
    %560 = vector.broadcast %559 : f32 to vector<16x10xf32>
    %561 = arith.mulf %560, %450 : vector<16x10xf32>
    %562 = arith.addf %558, %561 : vector<16x10xf32>
    %c228 = arith.constant 228 : index
    %563 = memref.load %arg4[%c228] : memref<256xf32, #tpu.memory_space<smem>>
    %564 = vector.broadcast %563 : f32 to vector<16x10xf32>
    %565 = arith.mulf %564, %447 : vector<16x10xf32>
    %566 = arith.addf %446, %565 : vector<16x10xf32>
    %c229 = arith.constant 229 : index
    %567 = memref.load %arg4[%c229] : memref<256xf32, #tpu.memory_space<smem>>
    %568 = vector.broadcast %567 : f32 to vector<16x10xf32>
    %569 = arith.mulf %568, %448 : vector<16x10xf32>
    %570 = arith.addf %566, %569 : vector<16x10xf32>
    %c230 = arith.constant 230 : index
    %571 = memref.load %arg4[%c230] : memref<256xf32, #tpu.memory_space<smem>>
    %572 = vector.broadcast %571 : f32 to vector<16x10xf32>
    %573 = arith.mulf %572, %449 : vector<16x10xf32>
    %574 = arith.addf %570, %573 : vector<16x10xf32>
    %c231 = arith.constant 231 : index
    %575 = memref.load %arg4[%c231] : memref<256xf32, #tpu.memory_space<smem>>
    %576 = vector.broadcast %575 : f32 to vector<16x10xf32>
    %577 = arith.mulf %576, %450 : vector<16x10xf32>
    %578 = arith.addf %574, %577 : vector<16x10xf32>
    %c20_95 = arith.constant 20 : index
    %c0_96 = arith.constant 0 : index
    %579 = vector.load %arg18[%c20_95, %c0_96] : memref<88x11xf32, #tpu.memory_space<vmem>>, vector<16x10xf32>
    %c20_97 = arith.constant 20 : index
    %c1_98 = arith.constant 1 : index
    %580 = vector.load %arg18[%c20_97, %c1_98] : memref<88x11xf32, #tpu.memory_space<vmem>>, vector<16x10xf32>
    %c21_99 = arith.constant 21 : index
    %c0_100 = arith.constant 0 : index
    %581 = vector.load %arg18[%c21_99, %c0_100] : memref<88x11xf32, #tpu.memory_space<vmem>>, vector<16x10xf32>
    %c21_101 = arith.constant 21 : index
    %c1_102 = arith.constant 1 : index
    %582 = vector.load %arg18[%c21_101, %c1_102] : memref<88x11xf32, #tpu.memory_space<vmem>>, vector<16x10xf32>
    %c8_103 = arith.constant 8 : index
    %583 = memref.load %arg4[%c8_103] : memref<256xf32, #tpu.memory_space<smem>>
    %584 = vector.broadcast %583 : f32 to vector<16x10xf32>
    %585 = arith.mulf %584, %579 : vector<16x10xf32>
    %586 = arith.addf %466, %585 : vector<16x10xf32>
    %c9_104 = arith.constant 9 : index
    %587 = memref.load %arg4[%c9_104] : memref<256xf32, #tpu.memory_space<smem>>
    %588 = vector.broadcast %587 : f32 to vector<16x10xf32>
    %589 = arith.mulf %588, %580 : vector<16x10xf32>
    %590 = arith.addf %586, %589 : vector<16x10xf32>
    %c10_105 = arith.constant 10 : index
    %591 = memref.load %arg4[%c10_105] : memref<256xf32, #tpu.memory_space<smem>>
    %592 = vector.broadcast %591 : f32 to vector<16x10xf32>
    %593 = arith.mulf %592, %581 : vector<16x10xf32>
    %594 = arith.addf %590, %593 : vector<16x10xf32>
    %c11_106 = arith.constant 11 : index
    %595 = memref.load %arg4[%c11_106] : memref<256xf32, #tpu.memory_space<smem>>
    %596 = vector.broadcast %595 : f32 to vector<16x10xf32>
    %597 = arith.mulf %596, %582 : vector<16x10xf32>
    %598 = arith.addf %594, %597 : vector<16x10xf32>
    %c40_107 = arith.constant 40 : index
    %599 = memref.load %arg4[%c40_107] : memref<256xf32, #tpu.memory_space<smem>>
    %600 = vector.broadcast %599 : f32 to vector<16x10xf32>
    %601 = arith.mulf %600, %579 : vector<16x10xf32>
    %602 = arith.addf %482, %601 : vector<16x10xf32>
    %c41_108 = arith.constant 41 : index
    %603 = memref.load %arg4[%c41_108] : memref<256xf32, #tpu.memory_space<smem>>
    %604 = vector.broadcast %603 : f32 to vector<16x10xf32>
    %605 = arith.mulf %604, %580 : vector<16x10xf32>
    %606 = arith.addf %602, %605 : vector<16x10xf32>
    %c42_109 = arith.constant 42 : index
    %607 = memref.load %arg4[%c42_109] : memref<256xf32, #tpu.memory_space<smem>>
    %608 = vector.broadcast %607 : f32 to vector<16x10xf32>
    %609 = arith.mulf %608, %581 : vector<16x10xf32>
    %610 = arith.addf %606, %609 : vector<16x10xf32>
    %c43_110 = arith.constant 43 : index
    %611 = memref.load %arg4[%c43_110] : memref<256xf32, #tpu.memory_space<smem>>
    %612 = vector.broadcast %611 : f32 to vector<16x10xf32>
    %613 = arith.mulf %612, %582 : vector<16x10xf32>
    %614 = arith.addf %610, %613 : vector<16x10xf32>
    %c72_111 = arith.constant 72 : index
    %615 = memref.load %arg4[%c72_111] : memref<256xf32, #tpu.memory_space<smem>>
    %616 = vector.broadcast %615 : f32 to vector<16x10xf32>
    %617 = arith.mulf %616, %579 : vector<16x10xf32>
    %618 = arith.addf %498, %617 : vector<16x10xf32>
    %c73 = arith.constant 73 : index
    %619 = memref.load %arg4[%c73] : memref<256xf32, #tpu.memory_space<smem>>
    %620 = vector.broadcast %619 : f32 to vector<16x10xf32>
    %621 = arith.mulf %620, %580 : vector<16x10xf32>
    %622 = arith.addf %618, %621 : vector<16x10xf32>
    %c74 = arith.constant 74 : index
    %623 = memref.load %arg4[%c74] : memref<256xf32, #tpu.memory_space<smem>>
    %624 = vector.broadcast %623 : f32 to vector<16x10xf32>
    %625 = arith.mulf %624, %581 : vector<16x10xf32>
    %626 = arith.addf %622, %625 : vector<16x10xf32>
    %c75 = arith.constant 75 : index
    %627 = memref.load %arg4[%c75] : memref<256xf32, #tpu.memory_space<smem>>
    %628 = vector.broadcast %627 : f32 to vector<16x10xf32>
    %629 = arith.mulf %628, %582 : vector<16x10xf32>
    %630 = arith.addf %626, %629 : vector<16x10xf32>
    %c104 = arith.constant 104 : index
    %631 = memref.load %arg4[%c104] : memref<256xf32, #tpu.memory_space<smem>>
    %632 = vector.broadcast %631 : f32 to vector<16x10xf32>
    %633 = arith.mulf %632, %579 : vector<16x10xf32>
    %634 = arith.addf %514, %633 : vector<16x10xf32>
    %c105 = arith.constant 105 : index
    %635 = memref.load %arg4[%c105] : memref<256xf32, #tpu.memory_space<smem>>
    %636 = vector.broadcast %635 : f32 to vector<16x10xf32>
    %637 = arith.mulf %636, %580 : vector<16x10xf32>
    %638 = arith.addf %634, %637 : vector<16x10xf32>
    %c106 = arith.constant 106 : index
    %639 = memref.load %arg4[%c106] : memref<256xf32, #tpu.memory_space<smem>>
    %640 = vector.broadcast %639 : f32 to vector<16x10xf32>
    %641 = arith.mulf %640, %581 : vector<16x10xf32>
    %642 = arith.addf %638, %641 : vector<16x10xf32>
    %c107 = arith.constant 107 : index
    %643 = memref.load %arg4[%c107] : memref<256xf32, #tpu.memory_space<smem>>
    %644 = vector.broadcast %643 : f32 to vector<16x10xf32>
    %645 = arith.mulf %644, %582 : vector<16x10xf32>
    %646 = arith.addf %642, %645 : vector<16x10xf32>
    %c136 = arith.constant 136 : index
    %647 = memref.load %arg4[%c136] : memref<256xf32, #tpu.memory_space<smem>>
    %648 = vector.broadcast %647 : f32 to vector<16x10xf32>
    %649 = arith.mulf %648, %579 : vector<16x10xf32>
    %650 = arith.addf %530, %649 : vector<16x10xf32>
    %c137 = arith.constant 137 : index
    %651 = memref.load %arg4[%c137] : memref<256xf32, #tpu.memory_space<smem>>
    %652 = vector.broadcast %651 : f32 to vector<16x10xf32>
    %653 = arith.mulf %652, %580 : vector<16x10xf32>
    %654 = arith.addf %650, %653 : vector<16x10xf32>
    %c138 = arith.constant 138 : index
    %655 = memref.load %arg4[%c138] : memref<256xf32, #tpu.memory_space<smem>>
    %656 = vector.broadcast %655 : f32 to vector<16x10xf32>
    %657 = arith.mulf %656, %581 : vector<16x10xf32>
    %658 = arith.addf %654, %657 : vector<16x10xf32>
    %c139 = arith.constant 139 : index
    %659 = memref.load %arg4[%c139] : memref<256xf32, #tpu.memory_space<smem>>
    %660 = vector.broadcast %659 : f32 to vector<16x10xf32>
    %661 = arith.mulf %660, %582 : vector<16x10xf32>
    %662 = arith.addf %658, %661 : vector<16x10xf32>
    %c168_112 = arith.constant 168 : index
    %663 = memref.load %arg4[%c168_112] : memref<256xf32, #tpu.memory_space<smem>>
    %664 = vector.broadcast %663 : f32 to vector<16x10xf32>
    %665 = arith.mulf %664, %579 : vector<16x10xf32>
    %666 = arith.addf %546, %665 : vector<16x10xf32>
    %c169 = arith.constant 169 : index
    %667 = memref.load %arg4[%c169] : memref<256xf32, #tpu.memory_space<smem>>
    %668 = vector.broadcast %667 : f32 to vector<16x10xf32>
    %669 = arith.mulf %668, %580 : vector<16x10xf32>
    %670 = arith.addf %666, %669 : vector<16x10xf32>
    %c170 = arith.constant 170 : index
    %671 = memref.load %arg4[%c170] : memref<256xf32, #tpu.memory_space<smem>>
    %672 = vector.broadcast %671 : f32 to vector<16x10xf32>
    %673 = arith.mulf %672, %581 : vector<16x10xf32>
    %674 = arith.addf %670, %673 : vector<16x10xf32>
    %c171 = arith.constant 171 : index
    %675 = memref.load %arg4[%c171] : memref<256xf32, #tpu.memory_space<smem>>
    %676 = vector.broadcast %675 : f32 to vector<16x10xf32>
    %677 = arith.mulf %676, %582 : vector<16x10xf32>
    %678 = arith.addf %674, %677 : vector<16x10xf32>
    %c200 = arith.constant 200 : index
    %679 = memref.load %arg4[%c200] : memref<256xf32, #tpu.memory_space<smem>>
    %680 = vector.broadcast %679 : f32 to vector<16x10xf32>
    %681 = arith.mulf %680, %579 : vector<16x10xf32>
    %682 = arith.addf %562, %681 : vector<16x10xf32>
    %c201 = arith.constant 201 : index
    %683 = memref.load %arg4[%c201] : memref<256xf32, #tpu.memory_space<smem>>
    %684 = vector.broadcast %683 : f32 to vector<16x10xf32>
    %685 = arith.mulf %684, %580 : vector<16x10xf32>
    %686 = arith.addf %682, %685 : vector<16x10xf32>
    %c202 = arith.constant 202 : index
    %687 = memref.load %arg4[%c202] : memref<256xf32, #tpu.memory_space<smem>>
    %688 = vector.broadcast %687 : f32 to vector<16x10xf32>
    %689 = arith.mulf %688, %581 : vector<16x10xf32>
    %690 = arith.addf %686, %689 : vector<16x10xf32>
    %c203 = arith.constant 203 : index
    %691 = memref.load %arg4[%c203] : memref<256xf32, #tpu.memory_space<smem>>
    %692 = vector.broadcast %691 : f32 to vector<16x10xf32>
    %693 = arith.mulf %692, %582 : vector<16x10xf32>
    %694 = arith.addf %690, %693 : vector<16x10xf32>
    %c232 = arith.constant 232 : index
    %695 = memref.load %arg4[%c232] : memref<256xf32, #tpu.memory_space<smem>>
    %696 = vector.broadcast %695 : f32 to vector<16x10xf32>
    %697 = arith.mulf %696, %579 : vector<16x10xf32>
    %698 = arith.addf %578, %697 : vector<16x10xf32>
    %c233 = arith.constant 233 : index
    %699 = memref.load %arg4[%c233] : memref<256xf32, #tpu.memory_space<smem>>
    %700 = vector.broadcast %699 : f32 to vector<16x10xf32>
    %701 = arith.mulf %700, %580 : vector<16x10xf32>
    %702 = arith.addf %698, %701 : vector<16x10xf32>
    %c234 = arith.constant 234 : index
    %703 = memref.load %arg4[%c234] : memref<256xf32, #tpu.memory_space<smem>>
    %704 = vector.broadcast %703 : f32 to vector<16x10xf32>
    %705 = arith.mulf %704, %581 : vector<16x10xf32>
    %706 = arith.addf %702, %705 : vector<16x10xf32>
    %c235 = arith.constant 235 : index
    %707 = memref.load %arg4[%c235] : memref<256xf32, #tpu.memory_space<smem>>
    %708 = vector.broadcast %707 : f32 to vector<16x10xf32>
    %709 = arith.mulf %708, %582 : vector<16x10xf32>
    %710 = arith.addf %706, %709 : vector<16x10xf32>
    %c30_113 = arith.constant 30 : index
    %c0_114 = arith.constant 0 : index
    %711 = vector.load %arg18[%c30_113, %c0_114] : memref<88x11xf32, #tpu.memory_space<vmem>>, vector<16x10xf32>
    %c30_115 = arith.constant 30 : index
    %c1_116 = arith.constant 1 : index
    %712 = vector.load %arg18[%c30_115, %c1_116] : memref<88x11xf32, #tpu.memory_space<vmem>>, vector<16x10xf32>
    %c31_117 = arith.constant 31 : index
    %c0_118 = arith.constant 0 : index
    %713 = vector.load %arg18[%c31_117, %c0_118] : memref<88x11xf32, #tpu.memory_space<vmem>>, vector<16x10xf32>
    %c31_119 = arith.constant 31 : index
    %c1_120 = arith.constant 1 : index
    %714 = vector.load %arg18[%c31_119, %c1_120] : memref<88x11xf32, #tpu.memory_space<vmem>>, vector<16x10xf32>
    %c12_121 = arith.constant 12 : index
    %715 = memref.load %arg4[%c12_121] : memref<256xf32, #tpu.memory_space<smem>>
    %716 = vector.broadcast %715 : f32 to vector<16x10xf32>
    %717 = arith.mulf %716, %711 : vector<16x10xf32>
    %718 = arith.addf %598, %717 : vector<16x10xf32>
    %c13_122 = arith.constant 13 : index
    %719 = memref.load %arg4[%c13_122] : memref<256xf32, #tpu.memory_space<smem>>
    %720 = vector.broadcast %719 : f32 to vector<16x10xf32>
    %721 = arith.mulf %720, %712 : vector<16x10xf32>
    %722 = arith.addf %718, %721 : vector<16x10xf32>
    %c14_123 = arith.constant 14 : index
    %723 = memref.load %arg4[%c14_123] : memref<256xf32, #tpu.memory_space<smem>>
    %724 = vector.broadcast %723 : f32 to vector<16x10xf32>
    %725 = arith.mulf %724, %713 : vector<16x10xf32>
    %726 = arith.addf %722, %725 : vector<16x10xf32>
    %c15_124 = arith.constant 15 : index
    %727 = memref.load %arg4[%c15_124] : memref<256xf32, #tpu.memory_space<smem>>
    %728 = vector.broadcast %727 : f32 to vector<16x10xf32>
    %729 = arith.mulf %728, %714 : vector<16x10xf32>
    %730 = arith.addf %726, %729 : vector<16x10xf32>
    %c44_125 = arith.constant 44 : index
    %731 = memref.load %arg4[%c44_125] : memref<256xf32, #tpu.memory_space<smem>>
    %732 = vector.broadcast %731 : f32 to vector<16x10xf32>
    %733 = arith.mulf %732, %711 : vector<16x10xf32>
    %734 = arith.addf %614, %733 : vector<16x10xf32>
    %c45_126 = arith.constant 45 : index
    %735 = memref.load %arg4[%c45_126] : memref<256xf32, #tpu.memory_space<smem>>
    %736 = vector.broadcast %735 : f32 to vector<16x10xf32>
    %737 = arith.mulf %736, %712 : vector<16x10xf32>
    %738 = arith.addf %734, %737 : vector<16x10xf32>
    %c46_127 = arith.constant 46 : index
    %739 = memref.load %arg4[%c46_127] : memref<256xf32, #tpu.memory_space<smem>>
    %740 = vector.broadcast %739 : f32 to vector<16x10xf32>
    %741 = arith.mulf %740, %713 : vector<16x10xf32>
    %742 = arith.addf %738, %741 : vector<16x10xf32>
    %c47_128 = arith.constant 47 : index
    %743 = memref.load %arg4[%c47_128] : memref<256xf32, #tpu.memory_space<smem>>
    %744 = vector.broadcast %743 : f32 to vector<16x10xf32>
    %745 = arith.mulf %744, %714 : vector<16x10xf32>
    %746 = arith.addf %742, %745 : vector<16x10xf32>
    %c76 = arith.constant 76 : index
    %747 = memref.load %arg4[%c76] : memref<256xf32, #tpu.memory_space<smem>>
    %748 = vector.broadcast %747 : f32 to vector<16x10xf32>
    %749 = arith.mulf %748, %711 : vector<16x10xf32>
    %750 = arith.addf %630, %749 : vector<16x10xf32>
    %c77 = arith.constant 77 : index
    %751 = memref.load %arg4[%c77] : memref<256xf32, #tpu.memory_space<smem>>
    %752 = vector.broadcast %751 : f32 to vector<16x10xf32>
    %753 = arith.mulf %752, %712 : vector<16x10xf32>
    %754 = arith.addf %750, %753 : vector<16x10xf32>
    %c78 = arith.constant 78 : index
    %755 = memref.load %arg4[%c78] : memref<256xf32, #tpu.memory_space<smem>>
    %756 = vector.broadcast %755 : f32 to vector<16x10xf32>
    %757 = arith.mulf %756, %713 : vector<16x10xf32>
    %758 = arith.addf %754, %757 : vector<16x10xf32>
    %c79 = arith.constant 79 : index
    %759 = memref.load %arg4[%c79] : memref<256xf32, #tpu.memory_space<smem>>
    %760 = vector.broadcast %759 : f32 to vector<16x10xf32>
    %761 = arith.mulf %760, %714 : vector<16x10xf32>
    %762 = arith.addf %758, %761 : vector<16x10xf32>
    %c108 = arith.constant 108 : index
    %763 = memref.load %arg4[%c108] : memref<256xf32, #tpu.memory_space<smem>>
    %764 = vector.broadcast %763 : f32 to vector<16x10xf32>
    %765 = arith.mulf %764, %711 : vector<16x10xf32>
    %766 = arith.addf %646, %765 : vector<16x10xf32>
    %c109 = arith.constant 109 : index
    %767 = memref.load %arg4[%c109] : memref<256xf32, #tpu.memory_space<smem>>
    %768 = vector.broadcast %767 : f32 to vector<16x10xf32>
    %769 = arith.mulf %768, %712 : vector<16x10xf32>
    %770 = arith.addf %766, %769 : vector<16x10xf32>
    %c110 = arith.constant 110 : index
    %771 = memref.load %arg4[%c110] : memref<256xf32, #tpu.memory_space<smem>>
    %772 = vector.broadcast %771 : f32 to vector<16x10xf32>
    %773 = arith.mulf %772, %713 : vector<16x10xf32>
    %774 = arith.addf %770, %773 : vector<16x10xf32>
    %c111 = arith.constant 111 : index
    %775 = memref.load %arg4[%c111] : memref<256xf32, #tpu.memory_space<smem>>
    %776 = vector.broadcast %775 : f32 to vector<16x10xf32>
    %777 = arith.mulf %776, %714 : vector<16x10xf32>
    %778 = arith.addf %774, %777 : vector<16x10xf32>
    %c140 = arith.constant 140 : index
    %779 = memref.load %arg4[%c140] : memref<256xf32, #tpu.memory_space<smem>>
    %780 = vector.broadcast %779 : f32 to vector<16x10xf32>
    %781 = arith.mulf %780, %711 : vector<16x10xf32>
    %782 = arith.addf %662, %781 : vector<16x10xf32>
    %c141 = arith.constant 141 : index
    %783 = memref.load %arg4[%c141] : memref<256xf32, #tpu.memory_space<smem>>
    %784 = vector.broadcast %783 : f32 to vector<16x10xf32>
    %785 = arith.mulf %784, %712 : vector<16x10xf32>
    %786 = arith.addf %782, %785 : vector<16x10xf32>
    %c142 = arith.constant 142 : index
    %787 = memref.load %arg4[%c142] : memref<256xf32, #tpu.memory_space<smem>>
    %788 = vector.broadcast %787 : f32 to vector<16x10xf32>
    %789 = arith.mulf %788, %713 : vector<16x10xf32>
    %790 = arith.addf %786, %789 : vector<16x10xf32>
    %c143 = arith.constant 143 : index
    %791 = memref.load %arg4[%c143] : memref<256xf32, #tpu.memory_space<smem>>
    %792 = vector.broadcast %791 : f32 to vector<16x10xf32>
    %793 = arith.mulf %792, %714 : vector<16x10xf32>
    %794 = arith.addf %790, %793 : vector<16x10xf32>
    %c172 = arith.constant 172 : index
    %795 = memref.load %arg4[%c172] : memref<256xf32, #tpu.memory_space<smem>>
    %796 = vector.broadcast %795 : f32 to vector<16x10xf32>
    %797 = arith.mulf %796, %711 : vector<16x10xf32>
    %798 = arith.addf %678, %797 : vector<16x10xf32>
    %c173 = arith.constant 173 : index
    %799 = memref.load %arg4[%c173] : memref<256xf32, #tpu.memory_space<smem>>
    %800 = vector.broadcast %799 : f32 to vector<16x10xf32>
    %801 = arith.mulf %800, %712 : vector<16x10xf32>
    %802 = arith.addf %798, %801 : vector<16x10xf32>
    %c174 = arith.constant 174 : index
    %803 = memref.load %arg4[%c174] : memref<256xf32, #tpu.memory_space<smem>>
    %804 = vector.broadcast %803 : f32 to vector<16x10xf32>
    %805 = arith.mulf %804, %713 : vector<16x10xf32>
    %806 = arith.addf %802, %805 : vector<16x10xf32>
    %c175 = arith.constant 175 : index
    %807 = memref.load %arg4[%c175] : memref<256xf32, #tpu.memory_space<smem>>
    %808 = vector.broadcast %807 : f32 to vector<16x10xf32>
    %809 = arith.mulf %808, %714 : vector<16x10xf32>
    %810 = arith.addf %806, %809 : vector<16x10xf32>
    %c204 = arith.constant 204 : index
    %811 = memref.load %arg4[%c204] : memref<256xf32, #tpu.memory_space<smem>>
    %812 = vector.broadcast %811 : f32 to vector<16x10xf32>
    %813 = arith.mulf %812, %711 : vector<16x10xf32>
    %814 = arith.addf %694, %813 : vector<16x10xf32>
    %c205 = arith.constant 205 : index
    %815 = memref.load %arg4[%c205] : memref<256xf32, #tpu.memory_space<smem>>
    %816 = vector.broadcast %815 : f32 to vector<16x10xf32>
    %817 = arith.mulf %816, %712 : vector<16x10xf32>
    %818 = arith.addf %814, %817 : vector<16x10xf32>
    %c206 = arith.constant 206 : index
    %819 = memref.load %arg4[%c206] : memref<256xf32, #tpu.memory_space<smem>>
    %820 = vector.broadcast %819 : f32 to vector<16x10xf32>
    %821 = arith.mulf %820, %713 : vector<16x10xf32>
    %822 = arith.addf %818, %821 : vector<16x10xf32>
    %c207 = arith.constant 207 : index
    %823 = memref.load %arg4[%c207] : memref<256xf32, #tpu.memory_space<smem>>
    %824 = vector.broadcast %823 : f32 to vector<16x10xf32>
    %825 = arith.mulf %824, %714 : vector<16x10xf32>
    %826 = arith.addf %822, %825 : vector<16x10xf32>
    %c236 = arith.constant 236 : index
    %827 = memref.load %arg4[%c236] : memref<256xf32, #tpu.memory_space<smem>>
    %828 = vector.broadcast %827 : f32 to vector<16x10xf32>
    %829 = arith.mulf %828, %711 : vector<16x10xf32>
    %830 = arith.addf %710, %829 : vector<16x10xf32>
    %c237 = arith.constant 237 : index
    %831 = memref.load %arg4[%c237] : memref<256xf32, #tpu.memory_space<smem>>
    %832 = vector.broadcast %831 : f32 to vector<16x10xf32>
    %833 = arith.mulf %832, %712 : vector<16x10xf32>
    %834 = arith.addf %830, %833 : vector<16x10xf32>
    %c238 = arith.constant 238 : index
    %835 = memref.load %arg4[%c238] : memref<256xf32, #tpu.memory_space<smem>>
    %836 = vector.broadcast %835 : f32 to vector<16x10xf32>
    %837 = arith.mulf %836, %713 : vector<16x10xf32>
    %838 = arith.addf %834, %837 : vector<16x10xf32>
    %c239 = arith.constant 239 : index
    %839 = memref.load %arg4[%c239] : memref<256xf32, #tpu.memory_space<smem>>
    %840 = vector.broadcast %839 : f32 to vector<16x10xf32>
    %841 = arith.mulf %840, %714 : vector<16x10xf32>
    %842 = arith.addf %838, %841 : vector<16x10xf32>
    %c40_129 = arith.constant 40 : index
    %c0_130 = arith.constant 0 : index
    %843 = vector.load %arg18[%c40_129, %c0_130] : memref<88x11xf32, #tpu.memory_space<vmem>>, vector<16x10xf32>
    %c40_131 = arith.constant 40 : index
    %c1_132 = arith.constant 1 : index
    %844 = vector.load %arg18[%c40_131, %c1_132] : memref<88x11xf32, #tpu.memory_space<vmem>>, vector<16x10xf32>
    %c41_133 = arith.constant 41 : index
    %c0_134 = arith.constant 0 : index
    %845 = vector.load %arg18[%c41_133, %c0_134] : memref<88x11xf32, #tpu.memory_space<vmem>>, vector<16x10xf32>
    %c41_135 = arith.constant 41 : index
    %c1_136 = arith.constant 1 : index
    %846 = vector.load %arg18[%c41_135, %c1_136] : memref<88x11xf32, #tpu.memory_space<vmem>>, vector<16x10xf32>
    %c16_137 = arith.constant 16 : index
    %847 = memref.load %arg4[%c16_137] : memref<256xf32, #tpu.memory_space<smem>>
    %848 = vector.broadcast %847 : f32 to vector<16x10xf32>
    %849 = arith.mulf %848, %843 : vector<16x10xf32>
    %850 = arith.addf %730, %849 : vector<16x10xf32>
    %c17_138 = arith.constant 17 : index
    %851 = memref.load %arg4[%c17_138] : memref<256xf32, #tpu.memory_space<smem>>
    %852 = vector.broadcast %851 : f32 to vector<16x10xf32>
    %853 = arith.mulf %852, %844 : vector<16x10xf32>
    %854 = arith.addf %850, %853 : vector<16x10xf32>
    %c18_139 = arith.constant 18 : index
    %855 = memref.load %arg4[%c18_139] : memref<256xf32, #tpu.memory_space<smem>>
    %856 = vector.broadcast %855 : f32 to vector<16x10xf32>
    %857 = arith.mulf %856, %845 : vector<16x10xf32>
    %858 = arith.addf %854, %857 : vector<16x10xf32>
    %c19_140 = arith.constant 19 : index
    %859 = memref.load %arg4[%c19_140] : memref<256xf32, #tpu.memory_space<smem>>
    %860 = vector.broadcast %859 : f32 to vector<16x10xf32>
    %861 = arith.mulf %860, %846 : vector<16x10xf32>
    %862 = arith.addf %858, %861 : vector<16x10xf32>
    %c48_141 = arith.constant 48 : index
    %863 = memref.load %arg4[%c48_141] : memref<256xf32, #tpu.memory_space<smem>>
    %864 = vector.broadcast %863 : f32 to vector<16x10xf32>
    %865 = arith.mulf %864, %843 : vector<16x10xf32>
    %866 = arith.addf %746, %865 : vector<16x10xf32>
    %c49_142 = arith.constant 49 : index
    %867 = memref.load %arg4[%c49_142] : memref<256xf32, #tpu.memory_space<smem>>
    %868 = vector.broadcast %867 : f32 to vector<16x10xf32>
    %869 = arith.mulf %868, %844 : vector<16x10xf32>
    %870 = arith.addf %866, %869 : vector<16x10xf32>
    %c50_143 = arith.constant 50 : index
    %871 = memref.load %arg4[%c50_143] : memref<256xf32, #tpu.memory_space<smem>>
    %872 = vector.broadcast %871 : f32 to vector<16x10xf32>
    %873 = arith.mulf %872, %845 : vector<16x10xf32>
    %874 = arith.addf %870, %873 : vector<16x10xf32>
    %c51_144 = arith.constant 51 : index
    %875 = memref.load %arg4[%c51_144] : memref<256xf32, #tpu.memory_space<smem>>
    %876 = vector.broadcast %875 : f32 to vector<16x10xf32>
    %877 = arith.mulf %876, %846 : vector<16x10xf32>
    %878 = arith.addf %874, %877 : vector<16x10xf32>
    %c80 = arith.constant 80 : index
    %879 = memref.load %arg4[%c80] : memref<256xf32, #tpu.memory_space<smem>>
    %880 = vector.broadcast %879 : f32 to vector<16x10xf32>
    %881 = arith.mulf %880, %843 : vector<16x10xf32>
    %882 = arith.addf %762, %881 : vector<16x10xf32>
    %c81 = arith.constant 81 : index
    %883 = memref.load %arg4[%c81] : memref<256xf32, #tpu.memory_space<smem>>
    %884 = vector.broadcast %883 : f32 to vector<16x10xf32>
    %885 = arith.mulf %884, %844 : vector<16x10xf32>
    %886 = arith.addf %882, %885 : vector<16x10xf32>
    %c82 = arith.constant 82 : index
    %887 = memref.load %arg4[%c82] : memref<256xf32, #tpu.memory_space<smem>>
    %888 = vector.broadcast %887 : f32 to vector<16x10xf32>
    %889 = arith.mulf %888, %845 : vector<16x10xf32>
    %890 = arith.addf %886, %889 : vector<16x10xf32>
    %c83 = arith.constant 83 : index
    %891 = memref.load %arg4[%c83] : memref<256xf32, #tpu.memory_space<smem>>
    %892 = vector.broadcast %891 : f32 to vector<16x10xf32>
    %893 = arith.mulf %892, %846 : vector<16x10xf32>
    %894 = arith.addf %890, %893 : vector<16x10xf32>
    %c112 = arith.constant 112 : index
    %895 = memref.load %arg4[%c112] : memref<256xf32, #tpu.memory_space<smem>>
    %896 = vector.broadcast %895 : f32 to vector<16x10xf32>
    %897 = arith.mulf %896, %843 : vector<16x10xf32>
    %898 = arith.addf %778, %897 : vector<16x10xf32>
    %c113 = arith.constant 113 : index
    %899 = memref.load %arg4[%c113] : memref<256xf32, #tpu.memory_space<smem>>
    %900 = vector.broadcast %899 : f32 to vector<16x10xf32>
    %901 = arith.mulf %900, %844 : vector<16x10xf32>
    %902 = arith.addf %898, %901 : vector<16x10xf32>
    %c114 = arith.constant 114 : index
    %903 = memref.load %arg4[%c114] : memref<256xf32, #tpu.memory_space<smem>>
    %904 = vector.broadcast %903 : f32 to vector<16x10xf32>
    %905 = arith.mulf %904, %845 : vector<16x10xf32>
    %906 = arith.addf %902, %905 : vector<16x10xf32>
    %c115 = arith.constant 115 : index
    %907 = memref.load %arg4[%c115] : memref<256xf32, #tpu.memory_space<smem>>
    %908 = vector.broadcast %907 : f32 to vector<16x10xf32>
    %909 = arith.mulf %908, %846 : vector<16x10xf32>
    %910 = arith.addf %906, %909 : vector<16x10xf32>
    %c144_145 = arith.constant 144 : index
    %911 = memref.load %arg4[%c144_145] : memref<256xf32, #tpu.memory_space<smem>>
    %912 = vector.broadcast %911 : f32 to vector<16x10xf32>
    %913 = arith.mulf %912, %843 : vector<16x10xf32>
    %914 = arith.addf %794, %913 : vector<16x10xf32>
    %c145 = arith.constant 145 : index
    %915 = memref.load %arg4[%c145] : memref<256xf32, #tpu.memory_space<smem>>
    %916 = vector.broadcast %915 : f32 to vector<16x10xf32>
    %917 = arith.mulf %916, %844 : vector<16x10xf32>
    %918 = arith.addf %914, %917 : vector<16x10xf32>
    %c146 = arith.constant 146 : index
    %919 = memref.load %arg4[%c146] : memref<256xf32, #tpu.memory_space<smem>>
    %920 = vector.broadcast %919 : f32 to vector<16x10xf32>
    %921 = arith.mulf %920, %845 : vector<16x10xf32>
    %922 = arith.addf %918, %921 : vector<16x10xf32>
    %c147 = arith.constant 147 : index
    %923 = memref.load %arg4[%c147] : memref<256xf32, #tpu.memory_space<smem>>
    %924 = vector.broadcast %923 : f32 to vector<16x10xf32>
    %925 = arith.mulf %924, %846 : vector<16x10xf32>
    %926 = arith.addf %922, %925 : vector<16x10xf32>
    %c176 = arith.constant 176 : index
    %927 = memref.load %arg4[%c176] : memref<256xf32, #tpu.memory_space<smem>>
    %928 = vector.broadcast %927 : f32 to vector<16x10xf32>
    %929 = arith.mulf %928, %843 : vector<16x10xf32>
    %930 = arith.addf %810, %929 : vector<16x10xf32>
    %c177 = arith.constant 177 : index
    %931 = memref.load %arg4[%c177] : memref<256xf32, #tpu.memory_space<smem>>
    %932 = vector.broadcast %931 : f32 to vector<16x10xf32>
    %933 = arith.mulf %932, %844 : vector<16x10xf32>
    %934 = arith.addf %930, %933 : vector<16x10xf32>
    %c178 = arith.constant 178 : index
    %935 = memref.load %arg4[%c178] : memref<256xf32, #tpu.memory_space<smem>>
    %936 = vector.broadcast %935 : f32 to vector<16x10xf32>
    %937 = arith.mulf %936, %845 : vector<16x10xf32>
    %938 = arith.addf %934, %937 : vector<16x10xf32>
    %c179 = arith.constant 179 : index
    %939 = memref.load %arg4[%c179] : memref<256xf32, #tpu.memory_space<smem>>
    %940 = vector.broadcast %939 : f32 to vector<16x10xf32>
    %941 = arith.mulf %940, %846 : vector<16x10xf32>
    %942 = arith.addf %938, %941 : vector<16x10xf32>
    %c208 = arith.constant 208 : index
    %943 = memref.load %arg4[%c208] : memref<256xf32, #tpu.memory_space<smem>>
    %944 = vector.broadcast %943 : f32 to vector<16x10xf32>
    %945 = arith.mulf %944, %843 : vector<16x10xf32>
    %946 = arith.addf %826, %945 : vector<16x10xf32>
    %c209 = arith.constant 209 : index
    %947 = memref.load %arg4[%c209] : memref<256xf32, #tpu.memory_space<smem>>
    %948 = vector.broadcast %947 : f32 to vector<16x10xf32>
    %949 = arith.mulf %948, %844 : vector<16x10xf32>
    %950 = arith.addf %946, %949 : vector<16x10xf32>
    %c210 = arith.constant 210 : index
    %951 = memref.load %arg4[%c210] : memref<256xf32, #tpu.memory_space<smem>>
    %952 = vector.broadcast %951 : f32 to vector<16x10xf32>
    %953 = arith.mulf %952, %845 : vector<16x10xf32>
    %954 = arith.addf %950, %953 : vector<16x10xf32>
    %c211 = arith.constant 211 : index
    %955 = memref.load %arg4[%c211] : memref<256xf32, #tpu.memory_space<smem>>
    %956 = vector.broadcast %955 : f32 to vector<16x10xf32>
    %957 = arith.mulf %956, %846 : vector<16x10xf32>
    %958 = arith.addf %954, %957 : vector<16x10xf32>
    %c240 = arith.constant 240 : index
    %959 = memref.load %arg4[%c240] : memref<256xf32, #tpu.memory_space<smem>>
    %960 = vector.broadcast %959 : f32 to vector<16x10xf32>
    %961 = arith.mulf %960, %843 : vector<16x10xf32>
    %962 = arith.addf %842, %961 : vector<16x10xf32>
    %c241 = arith.constant 241 : index
    %963 = memref.load %arg4[%c241] : memref<256xf32, #tpu.memory_space<smem>>
    %964 = vector.broadcast %963 : f32 to vector<16x10xf32>
    %965 = arith.mulf %964, %844 : vector<16x10xf32>
    %966 = arith.addf %962, %965 : vector<16x10xf32>
    %c242 = arith.constant 242 : index
    %967 = memref.load %arg4[%c242] : memref<256xf32, #tpu.memory_space<smem>>
    %968 = vector.broadcast %967 : f32 to vector<16x10xf32>
    %969 = arith.mulf %968, %845 : vector<16x10xf32>
    %970 = arith.addf %966, %969 : vector<16x10xf32>
    %c243 = arith.constant 243 : index
    %971 = memref.load %arg4[%c243] : memref<256xf32, #tpu.memory_space<smem>>
    %972 = vector.broadcast %971 : f32 to vector<16x10xf32>
    %973 = arith.mulf %972, %846 : vector<16x10xf32>
    %974 = arith.addf %970, %973 : vector<16x10xf32>
    %c50_146 = arith.constant 50 : index
    %c0_147 = arith.constant 0 : index
    %975 = vector.load %arg18[%c50_146, %c0_147] : memref<88x11xf32, #tpu.memory_space<vmem>>, vector<16x10xf32>
    %c50_148 = arith.constant 50 : index
    %c1_149 = arith.constant 1 : index
    %976 = vector.load %arg18[%c50_148, %c1_149] : memref<88x11xf32, #tpu.memory_space<vmem>>, vector<16x10xf32>
    %c51_150 = arith.constant 51 : index
    %c0_151 = arith.constant 0 : index
    %977 = vector.load %arg18[%c51_150, %c0_151] : memref<88x11xf32, #tpu.memory_space<vmem>>, vector<16x10xf32>
    %c51_152 = arith.constant 51 : index
    %c1_153 = arith.constant 1 : index
    %978 = vector.load %arg18[%c51_152, %c1_153] : memref<88x11xf32, #tpu.memory_space<vmem>>, vector<16x10xf32>
    %c20_154 = arith.constant 20 : index
    %979 = memref.load %arg4[%c20_154] : memref<256xf32, #tpu.memory_space<smem>>
    %980 = vector.broadcast %979 : f32 to vector<16x10xf32>
    %981 = arith.mulf %980, %975 : vector<16x10xf32>
    %982 = arith.addf %862, %981 : vector<16x10xf32>
    %c21_155 = arith.constant 21 : index
    %983 = memref.load %arg4[%c21_155] : memref<256xf32, #tpu.memory_space<smem>>
    %984 = vector.broadcast %983 : f32 to vector<16x10xf32>
    %985 = arith.mulf %984, %976 : vector<16x10xf32>
    %986 = arith.addf %982, %985 : vector<16x10xf32>
    %c22_156 = arith.constant 22 : index
    %987 = memref.load %arg4[%c22_156] : memref<256xf32, #tpu.memory_space<smem>>
    %988 = vector.broadcast %987 : f32 to vector<16x10xf32>
    %989 = arith.mulf %988, %977 : vector<16x10xf32>
    %990 = arith.addf %986, %989 : vector<16x10xf32>
    %c23_157 = arith.constant 23 : index
    %991 = memref.load %arg4[%c23_157] : memref<256xf32, #tpu.memory_space<smem>>
    %992 = vector.broadcast %991 : f32 to vector<16x10xf32>
    %993 = arith.mulf %992, %978 : vector<16x10xf32>
    %994 = arith.addf %990, %993 : vector<16x10xf32>
    %c52_158 = arith.constant 52 : index
    %995 = memref.load %arg4[%c52_158] : memref<256xf32, #tpu.memory_space<smem>>
    %996 = vector.broadcast %995 : f32 to vector<16x10xf32>
    %997 = arith.mulf %996, %975 : vector<16x10xf32>
    %998 = arith.addf %878, %997 : vector<16x10xf32>
    %c53_159 = arith.constant 53 : index
    %999 = memref.load %arg4[%c53_159] : memref<256xf32, #tpu.memory_space<smem>>
    %1000 = vector.broadcast %999 : f32 to vector<16x10xf32>
    %1001 = arith.mulf %1000, %976 : vector<16x10xf32>
    %1002 = arith.addf %998, %1001 : vector<16x10xf32>
    %c54_160 = arith.constant 54 : index
    %1003 = memref.load %arg4[%c54_160] : memref<256xf32, #tpu.memory_space<smem>>
    %1004 = vector.broadcast %1003 : f32 to vector<16x10xf32>
    %1005 = arith.mulf %1004, %977 : vector<16x10xf32>
    %1006 = arith.addf %1002, %1005 : vector<16x10xf32>
    %c55_161 = arith.constant 55 : index
    %1007 = memref.load %arg4[%c55_161] : memref<256xf32, #tpu.memory_space<smem>>
    %1008 = vector.broadcast %1007 : f32 to vector<16x10xf32>
    %1009 = arith.mulf %1008, %978 : vector<16x10xf32>
    %1010 = arith.addf %1006, %1009 : vector<16x10xf32>
    %c84 = arith.constant 84 : index
    %1011 = memref.load %arg4[%c84] : memref<256xf32, #tpu.memory_space<smem>>
    %1012 = vector.broadcast %1011 : f32 to vector<16x10xf32>
    %1013 = arith.mulf %1012, %975 : vector<16x10xf32>
    %1014 = arith.addf %894, %1013 : vector<16x10xf32>
    %c85 = arith.constant 85 : index
    %1015 = memref.load %arg4[%c85] : memref<256xf32, #tpu.memory_space<smem>>
    %1016 = vector.broadcast %1015 : f32 to vector<16x10xf32>
    %1017 = arith.mulf %1016, %976 : vector<16x10xf32>
    %1018 = arith.addf %1014, %1017 : vector<16x10xf32>
    %c86 = arith.constant 86 : index
    %1019 = memref.load %arg4[%c86] : memref<256xf32, #tpu.memory_space<smem>>
    %1020 = vector.broadcast %1019 : f32 to vector<16x10xf32>
    %1021 = arith.mulf %1020, %977 : vector<16x10xf32>
    %1022 = arith.addf %1018, %1021 : vector<16x10xf32>
    %c87 = arith.constant 87 : index
    %1023 = memref.load %arg4[%c87] : memref<256xf32, #tpu.memory_space<smem>>
    %1024 = vector.broadcast %1023 : f32 to vector<16x10xf32>
    %1025 = arith.mulf %1024, %978 : vector<16x10xf32>
    %1026 = arith.addf %1022, %1025 : vector<16x10xf32>
    %c116 = arith.constant 116 : index
    %1027 = memref.load %arg4[%c116] : memref<256xf32, #tpu.memory_space<smem>>
    %1028 = vector.broadcast %1027 : f32 to vector<16x10xf32>
    %1029 = arith.mulf %1028, %975 : vector<16x10xf32>
    %1030 = arith.addf %910, %1029 : vector<16x10xf32>
    %c117 = arith.constant 117 : index
    %1031 = memref.load %arg4[%c117] : memref<256xf32, #tpu.memory_space<smem>>
    %1032 = vector.broadcast %1031 : f32 to vector<16x10xf32>
    %1033 = arith.mulf %1032, %976 : vector<16x10xf32>
    %1034 = arith.addf %1030, %1033 : vector<16x10xf32>
    %c118 = arith.constant 118 : index
    %1035 = memref.load %arg4[%c118] : memref<256xf32, #tpu.memory_space<smem>>
    %1036 = vector.broadcast %1035 : f32 to vector<16x10xf32>
    %1037 = arith.mulf %1036, %977 : vector<16x10xf32>
    %1038 = arith.addf %1034, %1037 : vector<16x10xf32>
    %c119 = arith.constant 119 : index
    %1039 = memref.load %arg4[%c119] : memref<256xf32, #tpu.memory_space<smem>>
    %1040 = vector.broadcast %1039 : f32 to vector<16x10xf32>
    %1041 = arith.mulf %1040, %978 : vector<16x10xf32>
    %1042 = arith.addf %1038, %1041 : vector<16x10xf32>
    %c148 = arith.constant 148 : index
    %1043 = memref.load %arg4[%c148] : memref<256xf32, #tpu.memory_space<smem>>
    %1044 = vector.broadcast %1043 : f32 to vector<16x10xf32>
    %1045 = arith.mulf %1044, %975 : vector<16x10xf32>
    %1046 = arith.addf %926, %1045 : vector<16x10xf32>
    %c149 = arith.constant 149 : index
    %1047 = memref.load %arg4[%c149] : memref<256xf32, #tpu.memory_space<smem>>
    %1048 = vector.broadcast %1047 : f32 to vector<16x10xf32>
    %1049 = arith.mulf %1048, %976 : vector<16x10xf32>
    %1050 = arith.addf %1046, %1049 : vector<16x10xf32>
    %c150 = arith.constant 150 : index
    %1051 = memref.load %arg4[%c150] : memref<256xf32, #tpu.memory_space<smem>>
    %1052 = vector.broadcast %1051 : f32 to vector<16x10xf32>
    %1053 = arith.mulf %1052, %977 : vector<16x10xf32>
    %1054 = arith.addf %1050, %1053 : vector<16x10xf32>
    %c151 = arith.constant 151 : index
    %1055 = memref.load %arg4[%c151] : memref<256xf32, #tpu.memory_space<smem>>
    %1056 = vector.broadcast %1055 : f32 to vector<16x10xf32>
    %1057 = arith.mulf %1056, %978 : vector<16x10xf32>
    %1058 = arith.addf %1054, %1057 : vector<16x10xf32>
    %c180 = arith.constant 180 : index
    %1059 = memref.load %arg4[%c180] : memref<256xf32, #tpu.memory_space<smem>>
    %1060 = vector.broadcast %1059 : f32 to vector<16x10xf32>
    %1061 = arith.mulf %1060, %975 : vector<16x10xf32>
    %1062 = arith.addf %942, %1061 : vector<16x10xf32>
    %c181 = arith.constant 181 : index
    %1063 = memref.load %arg4[%c181] : memref<256xf32, #tpu.memory_space<smem>>
    %1064 = vector.broadcast %1063 : f32 to vector<16x10xf32>
    %1065 = arith.mulf %1064, %976 : vector<16x10xf32>
    %1066 = arith.addf %1062, %1065 : vector<16x10xf32>
    %c182 = arith.constant 182 : index
    %1067 = memref.load %arg4[%c182] : memref<256xf32, #tpu.memory_space<smem>>
    %1068 = vector.broadcast %1067 : f32 to vector<16x10xf32>
    %1069 = arith.mulf %1068, %977 : vector<16x10xf32>
    %1070 = arith.addf %1066, %1069 : vector<16x10xf32>
    %c183 = arith.constant 183 : index
    %1071 = memref.load %arg4[%c183] : memref<256xf32, #tpu.memory_space<smem>>
    %1072 = vector.broadcast %1071 : f32 to vector<16x10xf32>
    %1073 = arith.mulf %1072, %978 : vector<16x10xf32>
    %1074 = arith.addf %1070, %1073 : vector<16x10xf32>
    %c212 = arith.constant 212 : index
    %1075 = memref.load %arg4[%c212] : memref<256xf32, #tpu.memory_space<smem>>
    %1076 = vector.broadcast %1075 : f32 to vector<16x10xf32>
    %1077 = arith.mulf %1076, %975 : vector<16x10xf32>
    %1078 = arith.addf %958, %1077 : vector<16x10xf32>
    %c213 = arith.constant 213 : index
    %1079 = memref.load %arg4[%c213] : memref<256xf32, #tpu.memory_space<smem>>
    %1080 = vector.broadcast %1079 : f32 to vector<16x10xf32>
    %1081 = arith.mulf %1080, %976 : vector<16x10xf32>
    %1082 = arith.addf %1078, %1081 : vector<16x10xf32>
    %c214 = arith.constant 214 : index
    %1083 = memref.load %arg4[%c214] : memref<256xf32, #tpu.memory_space<smem>>
    %1084 = vector.broadcast %1083 : f32 to vector<16x10xf32>
    %1085 = arith.mulf %1084, %977 : vector<16x10xf32>
    %1086 = arith.addf %1082, %1085 : vector<16x10xf32>
    %c215 = arith.constant 215 : index
    %1087 = memref.load %arg4[%c215] : memref<256xf32, #tpu.memory_space<smem>>
    %1088 = vector.broadcast %1087 : f32 to vector<16x10xf32>
    %1089 = arith.mulf %1088, %978 : vector<16x10xf32>
    %1090 = arith.addf %1086, %1089 : vector<16x10xf32>
    %c244 = arith.constant 244 : index
    %1091 = memref.load %arg4[%c244] : memref<256xf32, #tpu.memory_space<smem>>
    %1092 = vector.broadcast %1091 : f32 to vector<16x10xf32>
    %1093 = arith.mulf %1092, %975 : vector<16x10xf32>
    %1094 = arith.addf %974, %1093 : vector<16x10xf32>
    %c245 = arith.constant 245 : index
    %1095 = memref.load %arg4[%c245] : memref<256xf32, #tpu.memory_space<smem>>
    %1096 = vector.broadcast %1095 : f32 to vector<16x10xf32>
    %1097 = arith.mulf %1096, %976 : vector<16x10xf32>
    %1098 = arith.addf %1094, %1097 : vector<16x10xf32>
    %c246 = arith.constant 246 : index
    %1099 = memref.load %arg4[%c246] : memref<256xf32, #tpu.memory_space<smem>>
    %1100 = vector.broadcast %1099 : f32 to vector<16x10xf32>
    %1101 = arith.mulf %1100, %977 : vector<16x10xf32>
    %1102 = arith.addf %1098, %1101 : vector<16x10xf32>
    %c247 = arith.constant 247 : index
    %1103 = memref.load %arg4[%c247] : memref<256xf32, #tpu.memory_space<smem>>
    %1104 = vector.broadcast %1103 : f32 to vector<16x10xf32>
    %1105 = arith.mulf %1104, %978 : vector<16x10xf32>
    %1106 = arith.addf %1102, %1105 : vector<16x10xf32>
    %c60_162 = arith.constant 60 : index
    %c0_163 = arith.constant 0 : index
    %1107 = vector.load %arg18[%c60_162, %c0_163] : memref<88x11xf32, #tpu.memory_space<vmem>>, vector<16x10xf32>
    %c60_164 = arith.constant 60 : index
    %c1_165 = arith.constant 1 : index
    %1108 = vector.load %arg18[%c60_164, %c1_165] : memref<88x11xf32, #tpu.memory_space<vmem>>, vector<16x10xf32>
    %c61_166 = arith.constant 61 : index
    %c0_167 = arith.constant 0 : index
    %1109 = vector.load %arg18[%c61_166, %c0_167] : memref<88x11xf32, #tpu.memory_space<vmem>>, vector<16x10xf32>
    %c61_168 = arith.constant 61 : index
    %c1_169 = arith.constant 1 : index
    %1110 = vector.load %arg18[%c61_168, %c1_169] : memref<88x11xf32, #tpu.memory_space<vmem>>, vector<16x10xf32>
    %c24_170 = arith.constant 24 : index
    %1111 = memref.load %arg4[%c24_170] : memref<256xf32, #tpu.memory_space<smem>>
    %1112 = vector.broadcast %1111 : f32 to vector<16x10xf32>
    %1113 = arith.mulf %1112, %1107 : vector<16x10xf32>
    %1114 = arith.addf %994, %1113 : vector<16x10xf32>
    %c25_171 = arith.constant 25 : index
    %1115 = memref.load %arg4[%c25_171] : memref<256xf32, #tpu.memory_space<smem>>
    %1116 = vector.broadcast %1115 : f32 to vector<16x10xf32>
    %1117 = arith.mulf %1116, %1108 : vector<16x10xf32>
    %1118 = arith.addf %1114, %1117 : vector<16x10xf32>
    %c26_172 = arith.constant 26 : index
    %1119 = memref.load %arg4[%c26_172] : memref<256xf32, #tpu.memory_space<smem>>
    %1120 = vector.broadcast %1119 : f32 to vector<16x10xf32>
    %1121 = arith.mulf %1120, %1109 : vector<16x10xf32>
    %1122 = arith.addf %1118, %1121 : vector<16x10xf32>
    %c27_173 = arith.constant 27 : index
    %1123 = memref.load %arg4[%c27_173] : memref<256xf32, #tpu.memory_space<smem>>
    %1124 = vector.broadcast %1123 : f32 to vector<16x10xf32>
    %1125 = arith.mulf %1124, %1110 : vector<16x10xf32>
    %1126 = arith.addf %1122, %1125 : vector<16x10xf32>
    %c56_174 = arith.constant 56 : index
    %1127 = memref.load %arg4[%c56_174] : memref<256xf32, #tpu.memory_space<smem>>
    %1128 = vector.broadcast %1127 : f32 to vector<16x10xf32>
    %1129 = arith.mulf %1128, %1107 : vector<16x10xf32>
    %1130 = arith.addf %1010, %1129 : vector<16x10xf32>
    %c57_175 = arith.constant 57 : index
    %1131 = memref.load %arg4[%c57_175] : memref<256xf32, #tpu.memory_space<smem>>
    %1132 = vector.broadcast %1131 : f32 to vector<16x10xf32>
    %1133 = arith.mulf %1132, %1108 : vector<16x10xf32>
    %1134 = arith.addf %1130, %1133 : vector<16x10xf32>
    %c58_176 = arith.constant 58 : index
    %1135 = memref.load %arg4[%c58_176] : memref<256xf32, #tpu.memory_space<smem>>
    %1136 = vector.broadcast %1135 : f32 to vector<16x10xf32>
    %1137 = arith.mulf %1136, %1109 : vector<16x10xf32>
    %1138 = arith.addf %1134, %1137 : vector<16x10xf32>
    %c59_177 = arith.constant 59 : index
    %1139 = memref.load %arg4[%c59_177] : memref<256xf32, #tpu.memory_space<smem>>
    %1140 = vector.broadcast %1139 : f32 to vector<16x10xf32>
    %1141 = arith.mulf %1140, %1110 : vector<16x10xf32>
    %1142 = arith.addf %1138, %1141 : vector<16x10xf32>
    %c88 = arith.constant 88 : index
    %1143 = memref.load %arg4[%c88] : memref<256xf32, #tpu.memory_space<smem>>
    %1144 = vector.broadcast %1143 : f32 to vector<16x10xf32>
    %1145 = arith.mulf %1144, %1107 : vector<16x10xf32>
    %1146 = arith.addf %1026, %1145 : vector<16x10xf32>
    %c89 = arith.constant 89 : index
    %1147 = memref.load %arg4[%c89] : memref<256xf32, #tpu.memory_space<smem>>
    %1148 = vector.broadcast %1147 : f32 to vector<16x10xf32>
    %1149 = arith.mulf %1148, %1108 : vector<16x10xf32>
    %1150 = arith.addf %1146, %1149 : vector<16x10xf32>
    %c90 = arith.constant 90 : index
    %1151 = memref.load %arg4[%c90] : memref<256xf32, #tpu.memory_space<smem>>
    %1152 = vector.broadcast %1151 : f32 to vector<16x10xf32>
    %1153 = arith.mulf %1152, %1109 : vector<16x10xf32>
    %1154 = arith.addf %1150, %1153 : vector<16x10xf32>
    %c91 = arith.constant 91 : index
    %1155 = memref.load %arg4[%c91] : memref<256xf32, #tpu.memory_space<smem>>
    %1156 = vector.broadcast %1155 : f32 to vector<16x10xf32>
    %1157 = arith.mulf %1156, %1110 : vector<16x10xf32>
    %1158 = arith.addf %1154, %1157 : vector<16x10xf32>
    %c120_178 = arith.constant 120 : index
    %1159 = memref.load %arg4[%c120_178] : memref<256xf32, #tpu.memory_space<smem>>
    %1160 = vector.broadcast %1159 : f32 to vector<16x10xf32>
    %1161 = arith.mulf %1160, %1107 : vector<16x10xf32>
    %1162 = arith.addf %1042, %1161 : vector<16x10xf32>
    %c121 = arith.constant 121 : index
    %1163 = memref.load %arg4[%c121] : memref<256xf32, #tpu.memory_space<smem>>
    %1164 = vector.broadcast %1163 : f32 to vector<16x10xf32>
    %1165 = arith.mulf %1164, %1108 : vector<16x10xf32>
    %1166 = arith.addf %1162, %1165 : vector<16x10xf32>
    %c122 = arith.constant 122 : index
    %1167 = memref.load %arg4[%c122] : memref<256xf32, #tpu.memory_space<smem>>
    %1168 = vector.broadcast %1167 : f32 to vector<16x10xf32>
    %1169 = arith.mulf %1168, %1109 : vector<16x10xf32>
    %1170 = arith.addf %1166, %1169 : vector<16x10xf32>
    %c123 = arith.constant 123 : index
    %1171 = memref.load %arg4[%c123] : memref<256xf32, #tpu.memory_space<smem>>
    %1172 = vector.broadcast %1171 : f32 to vector<16x10xf32>
    %1173 = arith.mulf %1172, %1110 : vector<16x10xf32>
    %1174 = arith.addf %1170, %1173 : vector<16x10xf32>
    %c152 = arith.constant 152 : index
    %1175 = memref.load %arg4[%c152] : memref<256xf32, #tpu.memory_space<smem>>
    %1176 = vector.broadcast %1175 : f32 to vector<16x10xf32>
    %1177 = arith.mulf %1176, %1107 : vector<16x10xf32>
    %1178 = arith.addf %1058, %1177 : vector<16x10xf32>
    %c153 = arith.constant 153 : index
    %1179 = memref.load %arg4[%c153] : memref<256xf32, #tpu.memory_space<smem>>
    %1180 = vector.broadcast %1179 : f32 to vector<16x10xf32>
    %1181 = arith.mulf %1180, %1108 : vector<16x10xf32>
    %1182 = arith.addf %1178, %1181 : vector<16x10xf32>
    %c154 = arith.constant 154 : index
    %1183 = memref.load %arg4[%c154] : memref<256xf32, #tpu.memory_space<smem>>
    %1184 = vector.broadcast %1183 : f32 to vector<16x10xf32>
    %1185 = arith.mulf %1184, %1109 : vector<16x10xf32>
    %1186 = arith.addf %1182, %1185 : vector<16x10xf32>
    %c155 = arith.constant 155 : index
    %1187 = memref.load %arg4[%c155] : memref<256xf32, #tpu.memory_space<smem>>
    %1188 = vector.broadcast %1187 : f32 to vector<16x10xf32>
    %1189 = arith.mulf %1188, %1110 : vector<16x10xf32>
    %1190 = arith.addf %1186, %1189 : vector<16x10xf32>
    %c184 = arith.constant 184 : index
    %1191 = memref.load %arg4[%c184] : memref<256xf32, #tpu.memory_space<smem>>
    %1192 = vector.broadcast %1191 : f32 to vector<16x10xf32>
    %1193 = arith.mulf %1192, %1107 : vector<16x10xf32>
    %1194 = arith.addf %1074, %1193 : vector<16x10xf32>
    %c185 = arith.constant 185 : index
    %1195 = memref.load %arg4[%c185] : memref<256xf32, #tpu.memory_space<smem>>
    %1196 = vector.broadcast %1195 : f32 to vector<16x10xf32>
    %1197 = arith.mulf %1196, %1108 : vector<16x10xf32>
    %1198 = arith.addf %1194, %1197 : vector<16x10xf32>
    %c186 = arith.constant 186 : index
    %1199 = memref.load %arg4[%c186] : memref<256xf32, #tpu.memory_space<smem>>
    %1200 = vector.broadcast %1199 : f32 to vector<16x10xf32>
    %1201 = arith.mulf %1200, %1109 : vector<16x10xf32>
    %1202 = arith.addf %1198, %1201 : vector<16x10xf32>
    %c187 = arith.constant 187 : index
    %1203 = memref.load %arg4[%c187] : memref<256xf32, #tpu.memory_space<smem>>
    %1204 = vector.broadcast %1203 : f32 to vector<16x10xf32>
    %1205 = arith.mulf %1204, %1110 : vector<16x10xf32>
    %1206 = arith.addf %1202, %1205 : vector<16x10xf32>
    %c216 = arith.constant 216 : index
    %1207 = memref.load %arg4[%c216] : memref<256xf32, #tpu.memory_space<smem>>
    %1208 = vector.broadcast %1207 : f32 to vector<16x10xf32>
    %1209 = arith.mulf %1208, %1107 : vector<16x10xf32>
    %1210 = arith.addf %1090, %1209 : vector<16x10xf32>
    %c217 = arith.constant 217 : index
    %1211 = memref.load %arg4[%c217] : memref<256xf32, #tpu.memory_space<smem>>
    %1212 = vector.broadcast %1211 : f32 to vector<16x10xf32>
    %1213 = arith.mulf %1212, %1108 : vector<16x10xf32>
    %1214 = arith.addf %1210, %1213 : vector<16x10xf32>
    %c218 = arith.constant 218 : index
    %1215 = memref.load %arg4[%c218] : memref<256xf32, #tpu.memory_space<smem>>
    %1216 = vector.broadcast %1215 : f32 to vector<16x10xf32>
    %1217 = arith.mulf %1216, %1109 : vector<16x10xf32>
    %1218 = arith.addf %1214, %1217 : vector<16x10xf32>
    %c219 = arith.constant 219 : index
    %1219 = memref.load %arg4[%c219] : memref<256xf32, #tpu.memory_space<smem>>
    %1220 = vector.broadcast %1219 : f32 to vector<16x10xf32>
    %1221 = arith.mulf %1220, %1110 : vector<16x10xf32>
    %1222 = arith.addf %1218, %1221 : vector<16x10xf32>
    %c248 = arith.constant 248 : index
    %1223 = memref.load %arg4[%c248] : memref<256xf32, #tpu.memory_space<smem>>
    %1224 = vector.broadcast %1223 : f32 to vector<16x10xf32>
    %1225 = arith.mulf %1224, %1107 : vector<16x10xf32>
    %1226 = arith.addf %1106, %1225 : vector<16x10xf32>
    %c249 = arith.constant 249 : index
    %1227 = memref.load %arg4[%c249] : memref<256xf32, #tpu.memory_space<smem>>
    %1228 = vector.broadcast %1227 : f32 to vector<16x10xf32>
    %1229 = arith.mulf %1228, %1108 : vector<16x10xf32>
    %1230 = arith.addf %1226, %1229 : vector<16x10xf32>
    %c250 = arith.constant 250 : index
    %1231 = memref.load %arg4[%c250] : memref<256xf32, #tpu.memory_space<smem>>
    %1232 = vector.broadcast %1231 : f32 to vector<16x10xf32>
    %1233 = arith.mulf %1232, %1109 : vector<16x10xf32>
    %1234 = arith.addf %1230, %1233 : vector<16x10xf32>
    %c251 = arith.constant 251 : index
    %1235 = memref.load %arg4[%c251] : memref<256xf32, #tpu.memory_space<smem>>
    %1236 = vector.broadcast %1235 : f32 to vector<16x10xf32>
    %1237 = arith.mulf %1236, %1110 : vector<16x10xf32>
    %1238 = arith.addf %1234, %1237 : vector<16x10xf32>
    %c70_179 = arith.constant 70 : index
    %c0_180 = arith.constant 0 : index
    %1239 = vector.load %arg18[%c70_179, %c0_180] : memref<88x11xf32, #tpu.memory_space<vmem>>, vector<16x10xf32>
    %c70_181 = arith.constant 70 : index
    %c1_182 = arith.constant 1 : index
    %1240 = vector.load %arg18[%c70_181, %c1_182] : memref<88x11xf32, #tpu.memory_space<vmem>>, vector<16x10xf32>
    %c71_183 = arith.constant 71 : index
    %c0_184 = arith.constant 0 : index
    %1241 = vector.load %arg18[%c71_183, %c0_184] : memref<88x11xf32, #tpu.memory_space<vmem>>, vector<16x10xf32>
    %c71_185 = arith.constant 71 : index
    %c1_186 = arith.constant 1 : index
    %1242 = vector.load %arg18[%c71_185, %c1_186] : memref<88x11xf32, #tpu.memory_space<vmem>>, vector<16x10xf32>
    %c28_187 = arith.constant 28 : index
    %1243 = memref.load %arg4[%c28_187] : memref<256xf32, #tpu.memory_space<smem>>
    %1244 = vector.broadcast %1243 : f32 to vector<16x10xf32>
    %1245 = arith.mulf %1244, %1239 : vector<16x10xf32>
    %1246 = arith.addf %1126, %1245 : vector<16x10xf32>
    %c29_188 = arith.constant 29 : index
    %1247 = memref.load %arg4[%c29_188] : memref<256xf32, #tpu.memory_space<smem>>
    %1248 = vector.broadcast %1247 : f32 to vector<16x10xf32>
    %1249 = arith.mulf %1248, %1240 : vector<16x10xf32>
    %1250 = arith.addf %1246, %1249 : vector<16x10xf32>
    %c30_189 = arith.constant 30 : index
    %1251 = memref.load %arg4[%c30_189] : memref<256xf32, #tpu.memory_space<smem>>
    %1252 = vector.broadcast %1251 : f32 to vector<16x10xf32>
    %1253 = arith.mulf %1252, %1241 : vector<16x10xf32>
    %1254 = arith.addf %1250, %1253 : vector<16x10xf32>
    %c31_190 = arith.constant 31 : index
    %1255 = memref.load %arg4[%c31_190] : memref<256xf32, #tpu.memory_space<smem>>
    %1256 = vector.broadcast %1255 : f32 to vector<16x10xf32>
    %1257 = arith.mulf %1256, %1242 : vector<16x10xf32>
    %1258 = arith.addf %1254, %1257 : vector<16x10xf32>
    %c60_191 = arith.constant 60 : index
    %1259 = memref.load %arg4[%c60_191] : memref<256xf32, #tpu.memory_space<smem>>
    %1260 = vector.broadcast %1259 : f32 to vector<16x10xf32>
    %1261 = arith.mulf %1260, %1239 : vector<16x10xf32>
    %1262 = arith.addf %1142, %1261 : vector<16x10xf32>
    %c61_192 = arith.constant 61 : index
    %1263 = memref.load %arg4[%c61_192] : memref<256xf32, #tpu.memory_space<smem>>
    %1264 = vector.broadcast %1263 : f32 to vector<16x10xf32>
    %1265 = arith.mulf %1264, %1240 : vector<16x10xf32>
    %1266 = arith.addf %1262, %1265 : vector<16x10xf32>
    %c62_193 = arith.constant 62 : index
    %1267 = memref.load %arg4[%c62_193] : memref<256xf32, #tpu.memory_space<smem>>
    %1268 = vector.broadcast %1267 : f32 to vector<16x10xf32>
    %1269 = arith.mulf %1268, %1241 : vector<16x10xf32>
    %1270 = arith.addf %1266, %1269 : vector<16x10xf32>
    %c63_194 = arith.constant 63 : index
    %1271 = memref.load %arg4[%c63_194] : memref<256xf32, #tpu.memory_space<smem>>
    %1272 = vector.broadcast %1271 : f32 to vector<16x10xf32>
    %1273 = arith.mulf %1272, %1242 : vector<16x10xf32>
    %1274 = arith.addf %1270, %1273 : vector<16x10xf32>
    %c92 = arith.constant 92 : index
    %1275 = memref.load %arg4[%c92] : memref<256xf32, #tpu.memory_space<smem>>
    %1276 = vector.broadcast %1275 : f32 to vector<16x10xf32>
    %1277 = arith.mulf %1276, %1239 : vector<16x10xf32>
    %1278 = arith.addf %1158, %1277 : vector<16x10xf32>
    %c93 = arith.constant 93 : index
    %1279 = memref.load %arg4[%c93] : memref<256xf32, #tpu.memory_space<smem>>
    %1280 = vector.broadcast %1279 : f32 to vector<16x10xf32>
    %1281 = arith.mulf %1280, %1240 : vector<16x10xf32>
    %1282 = arith.addf %1278, %1281 : vector<16x10xf32>
    %c94 = arith.constant 94 : index
    %1283 = memref.load %arg4[%c94] : memref<256xf32, #tpu.memory_space<smem>>
    %1284 = vector.broadcast %1283 : f32 to vector<16x10xf32>
    %1285 = arith.mulf %1284, %1241 : vector<16x10xf32>
    %1286 = arith.addf %1282, %1285 : vector<16x10xf32>
    %c95 = arith.constant 95 : index
    %1287 = memref.load %arg4[%c95] : memref<256xf32, #tpu.memory_space<smem>>
    %1288 = vector.broadcast %1287 : f32 to vector<16x10xf32>
    %1289 = arith.mulf %1288, %1242 : vector<16x10xf32>
    %1290 = arith.addf %1286, %1289 : vector<16x10xf32>
    %c124 = arith.constant 124 : index
    %1291 = memref.load %arg4[%c124] : memref<256xf32, #tpu.memory_space<smem>>
    %1292 = vector.broadcast %1291 : f32 to vector<16x10xf32>
    %1293 = arith.mulf %1292, %1239 : vector<16x10xf32>
    %1294 = arith.addf %1174, %1293 : vector<16x10xf32>
    %c125 = arith.constant 125 : index
    %1295 = memref.load %arg4[%c125] : memref<256xf32, #tpu.memory_space<smem>>
    %1296 = vector.broadcast %1295 : f32 to vector<16x10xf32>
    %1297 = arith.mulf %1296, %1240 : vector<16x10xf32>
    %1298 = arith.addf %1294, %1297 : vector<16x10xf32>
    %c126 = arith.constant 126 : index
    %1299 = memref.load %arg4[%c126] : memref<256xf32, #tpu.memory_space<smem>>
    %1300 = vector.broadcast %1299 : f32 to vector<16x10xf32>
    %1301 = arith.mulf %1300, %1241 : vector<16x10xf32>
    %1302 = arith.addf %1298, %1301 : vector<16x10xf32>
    %c127 = arith.constant 127 : index
    %1303 = memref.load %arg4[%c127] : memref<256xf32, #tpu.memory_space<smem>>
    %1304 = vector.broadcast %1303 : f32 to vector<16x10xf32>
    %1305 = arith.mulf %1304, %1242 : vector<16x10xf32>
    %1306 = arith.addf %1302, %1305 : vector<16x10xf32>
    %c156 = arith.constant 156 : index
    %1307 = memref.load %arg4[%c156] : memref<256xf32, #tpu.memory_space<smem>>
    %1308 = vector.broadcast %1307 : f32 to vector<16x10xf32>
    %1309 = arith.mulf %1308, %1239 : vector<16x10xf32>
    %1310 = arith.addf %1190, %1309 : vector<16x10xf32>
    %c157 = arith.constant 157 : index
    %1311 = memref.load %arg4[%c157] : memref<256xf32, #tpu.memory_space<smem>>
    %1312 = vector.broadcast %1311 : f32 to vector<16x10xf32>
    %1313 = arith.mulf %1312, %1240 : vector<16x10xf32>
    %1314 = arith.addf %1310, %1313 : vector<16x10xf32>
    %c158 = arith.constant 158 : index
    %1315 = memref.load %arg4[%c158] : memref<256xf32, #tpu.memory_space<smem>>
    %1316 = vector.broadcast %1315 : f32 to vector<16x10xf32>
    %1317 = arith.mulf %1316, %1241 : vector<16x10xf32>
    %1318 = arith.addf %1314, %1317 : vector<16x10xf32>
    %c159 = arith.constant 159 : index
    %1319 = memref.load %arg4[%c159] : memref<256xf32, #tpu.memory_space<smem>>
    %1320 = vector.broadcast %1319 : f32 to vector<16x10xf32>
    %1321 = arith.mulf %1320, %1242 : vector<16x10xf32>
    %1322 = arith.addf %1318, %1321 : vector<16x10xf32>
    %c188 = arith.constant 188 : index
    %1323 = memref.load %arg4[%c188] : memref<256xf32, #tpu.memory_space<smem>>
    %1324 = vector.broadcast %1323 : f32 to vector<16x10xf32>
    %1325 = arith.mulf %1324, %1239 : vector<16x10xf32>
    %1326 = arith.addf %1206, %1325 : vector<16x10xf32>
    %c189 = arith.constant 189 : index
    %1327 = memref.load %arg4[%c189] : memref<256xf32, #tpu.memory_space<smem>>
    %1328 = vector.broadcast %1327 : f32 to vector<16x10xf32>
    %1329 = arith.mulf %1328, %1240 : vector<16x10xf32>
    %1330 = arith.addf %1326, %1329 : vector<16x10xf32>
    %c190 = arith.constant 190 : index
    %1331 = memref.load %arg4[%c190] : memref<256xf32, #tpu.memory_space<smem>>
    %1332 = vector.broadcast %1331 : f32 to vector<16x10xf32>
    %1333 = arith.mulf %1332, %1241 : vector<16x10xf32>
    %1334 = arith.addf %1330, %1333 : vector<16x10xf32>
    %c191 = arith.constant 191 : index
    %1335 = memref.load %arg4[%c191] : memref<256xf32, #tpu.memory_space<smem>>
    %1336 = vector.broadcast %1335 : f32 to vector<16x10xf32>
    %1337 = arith.mulf %1336, %1242 : vector<16x10xf32>
    %1338 = arith.addf %1334, %1337 : vector<16x10xf32>
    %c220 = arith.constant 220 : index
    %1339 = memref.load %arg4[%c220] : memref<256xf32, #tpu.memory_space<smem>>
    %1340 = vector.broadcast %1339 : f32 to vector<16x10xf32>
    %1341 = arith.mulf %1340, %1239 : vector<16x10xf32>
    %1342 = arith.addf %1222, %1341 : vector<16x10xf32>
    %c221 = arith.constant 221 : index
    %1343 = memref.load %arg4[%c221] : memref<256xf32, #tpu.memory_space<smem>>
    %1344 = vector.broadcast %1343 : f32 to vector<16x10xf32>
    %1345 = arith.mulf %1344, %1240 : vector<16x10xf32>
    %1346 = arith.addf %1342, %1345 : vector<16x10xf32>
    %c222 = arith.constant 222 : index
    %1347 = memref.load %arg4[%c222] : memref<256xf32, #tpu.memory_space<smem>>
    %1348 = vector.broadcast %1347 : f32 to vector<16x10xf32>
    %1349 = arith.mulf %1348, %1241 : vector<16x10xf32>
    %1350 = arith.addf %1346, %1349 : vector<16x10xf32>
    %c223 = arith.constant 223 : index
    %1351 = memref.load %arg4[%c223] : memref<256xf32, #tpu.memory_space<smem>>
    %1352 = vector.broadcast %1351 : f32 to vector<16x10xf32>
    %1353 = arith.mulf %1352, %1242 : vector<16x10xf32>
    %1354 = arith.addf %1350, %1353 : vector<16x10xf32>
    %c252 = arith.constant 252 : index
    %1355 = memref.load %arg4[%c252] : memref<256xf32, #tpu.memory_space<smem>>
    %1356 = vector.broadcast %1355 : f32 to vector<16x10xf32>
    %1357 = arith.mulf %1356, %1239 : vector<16x10xf32>
    %1358 = arith.addf %1238, %1357 : vector<16x10xf32>
    %c253 = arith.constant 253 : index
    %1359 = memref.load %arg4[%c253] : memref<256xf32, #tpu.memory_space<smem>>
    %1360 = vector.broadcast %1359 : f32 to vector<16x10xf32>
    %1361 = arith.mulf %1360, %1240 : vector<16x10xf32>
    %1362 = arith.addf %1358, %1361 : vector<16x10xf32>
    %c254 = arith.constant 254 : index
    %1363 = memref.load %arg4[%c254] : memref<256xf32, #tpu.memory_space<smem>>
    %1364 = vector.broadcast %1363 : f32 to vector<16x10xf32>
    %1365 = arith.mulf %1364, %1241 : vector<16x10xf32>
    %1366 = arith.addf %1362, %1365 : vector<16x10xf32>
    %c255 = arith.constant 255 : index
    %1367 = memref.load %arg4[%c255] : memref<256xf32, #tpu.memory_space<smem>>
    %1368 = vector.broadcast %1367 : f32 to vector<16x10xf32>
    %1369 = arith.mulf %1368, %1242 : vector<16x10xf32>
    %1370 = arith.addf %1366, %1369 : vector<16x10xf32>
    %c0_195 = arith.constant 0 : index
    %1371 = memref.load %arg5[%c0_195] : memref<8xf32, #tpu.memory_space<smem>>
    %1372 = vector.broadcast %1371 : f32 to vector<16x10xf32>
    %1373 = arith.addf %1258, %1372 : vector<16x10xf32>
    %cst_196 = arith.constant 0.000000e+00 : f32
    %1374 = vector.broadcast %cst_196 : f32 to vector<16x10xf32>
    %1375 = arith.maximumf %1373, %1374 : vector<16x10xf32>
    %c0_197 = arith.constant 0 : index
    %c0_198 = arith.constant 0 : index
    %1376 = vector.load %arg19[%c0_197, %c0_198] : memref<128x10xf32, #tpu.memory_space<vmem>>, vector<16x10xf32>
    tpu.vector_store %arg19[%c0_197, %c0_198], %1375 {strides = array<i32>} : memref<128x10xf32, #tpu.memory_space<vmem>>, vector<16x10xf32>,
    %c1_199 = arith.constant 1 : index
    %1377 = memref.load %arg5[%c1_199] : memref<8xf32, #tpu.memory_space<smem>>
    %1378 = vector.broadcast %1377 : f32 to vector<16x10xf32>
    %1379 = arith.addf %1274, %1378 : vector<16x10xf32>
    %cst_200 = arith.constant 0.000000e+00 : f32
    %1380 = vector.broadcast %cst_200 : f32 to vector<16x10xf32>
    %1381 = arith.maximumf %1379, %1380 : vector<16x10xf32>
    %c16_201 = arith.constant 16 : index
    %c0_202 = arith.constant 0 : index
    %1382 = vector.load %arg19[%c16_201, %c0_202] : memref<128x10xf32, #tpu.memory_space<vmem>>, vector<16x10xf32>
    tpu.vector_store %arg19[%c16_201, %c0_202], %1381 {strides = array<i32>} : memref<128x10xf32, #tpu.memory_space<vmem>>, vector<16x10xf32>,
    %c2_203 = arith.constant 2 : index
    %1383 = memref.load %arg5[%c2_203] : memref<8xf32, #tpu.memory_space<smem>>
    %1384 = vector.broadcast %1383 : f32 to vector<16x10xf32>
    %1385 = arith.addf %1290, %1384 : vector<16x10xf32>
    %cst_204 = arith.constant 0.000000e+00 : f32
    %1386 = vector.broadcast %cst_204 : f32 to vector<16x10xf32>
    %1387 = arith.maximumf %1385, %1386 : vector<16x10xf32>
    %c32_205 = arith.constant 32 : index
    %c0_206 = arith.constant 0 : index
    %1388 = vector.load %arg19[%c32_205, %c0_206] : memref<128x10xf32, #tpu.memory_space<vmem>>, vector<16x10xf32>
    tpu.vector_store %arg19[%c32_205, %c0_206], %1387 {strides = array<i32>} : memref<128x10xf32, #tpu.memory_space<vmem>>, vector<16x10xf32>,
    %c3_207 = arith.constant 3 : index
    %1389 = memref.load %arg5[%c3_207] : memref<8xf32, #tpu.memory_space<smem>>
    %1390 = vector.broadcast %1389 : f32 to vector<16x10xf32>
    %1391 = arith.addf %1306, %1390 : vector<16x10xf32>
    %cst_208 = arith.constant 0.000000e+00 : f32
    %1392 = vector.broadcast %cst_208 : f32 to vector<16x10xf32>
    %1393 = arith.maximumf %1391, %1392 : vector<16x10xf32>
    %c48_209 = arith.constant 48 : index
    %c0_210 = arith.constant 0 : index
    %1394 = vector.load %arg19[%c48_209, %c0_210] : memref<128x10xf32, #tpu.memory_space<vmem>>, vector<16x10xf32>
    tpu.vector_store %arg19[%c48_209, %c0_210], %1393 {strides = array<i32>} : memref<128x10xf32, #tpu.memory_space<vmem>>, vector<16x10xf32>,
    %c4_211 = arith.constant 4 : index
    %1395 = memref.load %arg5[%c4_211] : memref<8xf32, #tpu.memory_space<smem>>
    %1396 = vector.broadcast %1395 : f32 to vector<16x10xf32>
    %1397 = arith.addf %1322, %1396 : vector<16x10xf32>
    %cst_212 = arith.constant 0.000000e+00 : f32
    %1398 = vector.broadcast %cst_212 : f32 to vector<16x10xf32>
    %1399 = arith.maximumf %1397, %1398 : vector<16x10xf32>
    %c64_213 = arith.constant 64 : index
    %c0_214 = arith.constant 0 : index
    %1400 = vector.load %arg19[%c64_213, %c0_214] : memref<128x10xf32, #tpu.memory_space<vmem>>, vector<16x10xf32>
    tpu.vector_store %arg19[%c64_213, %c0_214], %1399 {strides = array<i32>} : memref<128x10xf32, #tpu.memory_space<vmem>>, vector<16x10xf32>,
    %c5_215 = arith.constant 5 : index
    %1401 = memref.load %arg5[%c5_215] : memref<8xf32, #tpu.memory_space<smem>>
    %1402 = vector.broadcast %1401 : f32 to vector<16x10xf32>
    %1403 = arith.addf %1338, %1402 : vector<16x10xf32>
    %cst_216 = arith.constant 0.000000e+00 : f32
    %1404 = vector.broadcast %cst_216 : f32 to vector<16x10xf32>
    %1405 = arith.maximumf %1403, %1404 : vector<16x10xf32>
    %c80_217 = arith.constant 80 : index
    %c0_218 = arith.constant 0 : index
    %1406 = vector.load %arg19[%c80_217, %c0_218] : memref<128x10xf32, #tpu.memory_space<vmem>>, vector<16x10xf32>
    tpu.vector_store %arg19[%c80_217, %c0_218], %1405 {strides = array<i32>} : memref<128x10xf32, #tpu.memory_space<vmem>>, vector<16x10xf32>,
    %c6_219 = arith.constant 6 : index
    %1407 = memref.load %arg5[%c6_219] : memref<8xf32, #tpu.memory_space<smem>>
    %1408 = vector.broadcast %1407 : f32 to vector<16x10xf32>
    %1409 = arith.addf %1354, %1408 : vector<16x10xf32>
    %cst_220 = arith.constant 0.000000e+00 : f32
    %1410 = vector.broadcast %cst_220 : f32 to vector<16x10xf32>
    %1411 = arith.maximumf %1409, %1410 : vector<16x10xf32>
    %c96_221 = arith.constant 96 : index
    %c0_222 = arith.constant 0 : index
    %1412 = vector.load %arg19[%c96_221, %c0_222] : memref<128x10xf32, #tpu.memory_space<vmem>>, vector<16x10xf32>
    tpu.vector_store %arg19[%c96_221, %c0_222], %1411 {strides = array<i32>} : memref<128x10xf32, #tpu.memory_space<vmem>>, vector<16x10xf32>,
    %c7_223 = arith.constant 7 : index
    %1413 = memref.load %arg5[%c7_223] : memref<8xf32, #tpu.memory_space<smem>>
    %1414 = vector.broadcast %1413 : f32 to vector<16x10xf32>
    %1415 = arith.addf %1370, %1414 : vector<16x10xf32>
    %cst_224 = arith.constant 0.000000e+00 : f32
    %1416 = vector.broadcast %cst_224 : f32 to vector<16x10xf32>
    %1417 = arith.maximumf %1415, %1416 : vector<16x10xf32>
    %c112_225 = arith.constant 112 : index
    %c0_226 = arith.constant 0 : index
    %1418 = vector.load %arg19[%c112_225, %c0_226] : memref<128x10xf32, #tpu.memory_space<vmem>>, vector<16x10xf32>
    tpu.vector_store %arg19[%c112_225, %c0_226], %1417 {strides = array<i32>} : memref<128x10xf32, #tpu.memory_space<vmem>>, vector<16x10xf32>,
    %c0_227 = arith.constant 0 : index
    %c0_228 = arith.constant 0 : index
    %1419 = vector.load %arg19[%c0_227, %c0_228] : memref<128x10xf32, #tpu.memory_space<vmem>>, vector<128x9xf32>
    %c0_229 = arith.constant 0 : index
    %c1_230 = arith.constant 1 : index
    %1420 = vector.load %arg19[%c0_229, %c1_230] : memref<128x10xf32, #tpu.memory_space<vmem>>, vector<128x9xf32>
    %1421 = arith.maximumf %1419, %1420 : vector<128x9xf32>
    %c0_231 = arith.constant 0 : index
    %c0_232 = arith.constant 0 : index
    %1422 = vector.load %arg8[%c0_231, %c0_232] : memref<9x5xf32, #tpu.memory_space<vmem>>, vector<9x5xf32>
    %cst_233 = arith.constant dense<0.000000e+00> : vector<128x5xf32>
    %1423 = tpu.matmul %1421, %1422, %cst_233 {dimension_numbers = #tpu.dot_dimension_numbers<[1], [0], [0], [1], [0, 0, 1, 1], [], []>} : vector<128x9xf32>, vector<9x5xf32>, vector<128x5xf32> -> vector<128x5xf32>
    %1424 = vector.extract_strided_slice %1423 {offsets = [0, 0], sizes = [127, 5], strides = [1, 1]} : vector<128x5xf32> to vector<127x5xf32>
    %1425 = vector.extract_strided_slice %1423 {offsets = [1, 0], sizes = [127, 5], strides = [1, 1]} : vector<128x5xf32> to vector<127x5xf32>
    %1426 = arith.maximumf %1424, %1425 : vector<127x5xf32>
    %c0_234 = arith.constant 0 : index
    %c0_235 = arith.constant 0 : index
    %1427 = vector.load %arg9[%c0_234, %c0_235] : memref<128x127xf32, #tpu.memory_space<vmem>>, vector<128x127xf32>
    %cst_236 = arith.constant dense<0.000000e+00> : vector<128x5xf32>
    %1428 = tpu.matmul %1427, %1426, %cst_236 {dimension_numbers = #tpu.dot_dimension_numbers<[1], [0], [0], [1], [0, 0, 1, 1], [], []>} : vector<128x127xf32>, vector<127x5xf32>, vector<128x5xf32> -> vector<128x5xf32>
    %1429 = vector.extract_strided_slice %1428 {offsets = [0, 0], sizes = [2, 5], strides = [1, 1]} : vector<128x5xf32> to vector<2x5xf32>
    %c0_237 = arith.constant 0 : index
    %c0_238 = arith.constant 0 : index
    %1430 = vector.load %arg20[%c0_237, %c0_238] : memref<2x80xf32, #tpu.memory_space<vmem>>, vector<2x5xf32>
    tpu.vector_store %arg20[%c0_237, %c0_238], %1429 {strides = array<i32>} : memref<2x80xf32, #tpu.memory_space<vmem>>, vector<2x5xf32>,
    %1431 = vector.extract_strided_slice %1428 {offsets = [8, 0], sizes = [2, 5], strides = [1, 1]} : vector<128x5xf32> to vector<2x5xf32>
    %c0_239 = arith.constant 0 : index
    %c5_240 = arith.constant 5 : index
    %1432 = vector.load %arg20[%c0_239, %c5_240] : memref<2x80xf32, #tpu.memory_space<vmem>>, vector<2x5xf32>
    tpu.vector_store %arg20[%c0_239, %c5_240], %1431 {strides = array<i32>} : memref<2x80xf32, #tpu.memory_space<vmem>>, vector<2x5xf32>,
    %1433 = vector.extract_strided_slice %1428 {offsets = [16, 0], sizes = [2, 5], strides = [1, 1]} : vector<128x5xf32> to vector<2x5xf32>
    %c0_241 = arith.constant 0 : index
    %c10_242 = arith.constant 10 : index
    %1434 = vector.load %arg20[%c0_241, %c10_242] : memref<2x80xf32, #tpu.memory_space<vmem>>, vector<2x5xf32>
    tpu.vector_store %arg20[%c0_241, %c10_242], %1433 {strides = array<i32>} : memref<2x80xf32, #tpu.memory_space<vmem>>, vector<2x5xf32>,
    %1435 = vector.extract_strided_slice %1428 {offsets = [24, 0], sizes = [2, 5], strides = [1, 1]} : vector<128x5xf32> to vector<2x5xf32>
    %c0_243 = arith.constant 0 : index
    %c15_244 = arith.constant 15 : index
    %1436 = vector.load %arg20[%c0_243, %c15_244] : memref<2x80xf32, #tpu.memory_space<vmem>>, vector<2x5xf32>
    tpu.vector_store %arg20[%c0_243, %c15_244], %1435 {strides = array<i32>} : memref<2x80xf32, #tpu.memory_space<vmem>>, vector<2x5xf32>,
    %1437 = vector.extract_strided_slice %1428 {offsets = [32, 0], sizes = [2, 5], strides = [1, 1]} : vector<128x5xf32> to vector<2x5xf32>
    %c0_245 = arith.constant 0 : index
    %c20_246 = arith.constant 20 : index
    %1438 = vector.load %arg20[%c0_245, %c20_246] : memref<2x80xf32, #tpu.memory_space<vmem>>, vector<2x5xf32>
    tpu.vector_store %arg20[%c0_245, %c20_246], %1437 {strides = array<i32>} : memref<2x80xf32, #tpu.memory_space<vmem>>, vector<2x5xf32>,
    %1439 = vector.extract_strided_slice %1428 {offsets = [40, 0], sizes = [2, 5], strides = [1, 1]} : vector<128x5xf32> to vector<2x5xf32>
    %c0_247 = arith.constant 0 : index
    %c25_248 = arith.constant 25 : index
    %1440 = vector.load %arg20[%c0_247, %c25_248] : memref<2x80xf32, #tpu.memory_space<vmem>>, vector<2x5xf32>
    tpu.vector_store %arg20[%c0_247, %c25_248], %1439 {strides = array<i32>} : memref<2x80xf32, #tpu.memory_space<vmem>>, vector<2x5xf32>,
    %1441 = vector.extract_strided_slice %1428 {offsets = [48, 0], sizes = [2, 5], strides = [1, 1]} : vector<128x5xf32> to vector<2x5xf32>
    %c0_249 = arith.constant 0 : index
    %c30_250 = arith.constant 30 : index
    %1442 = vector.load %arg20[%c0_249, %c30_250] : memref<2x80xf32, #tpu.memory_space<vmem>>, vector<2x5xf32>
    tpu.vector_store %arg20[%c0_249, %c30_250], %1441 {strides = array<i32>} : memref<2x80xf32, #tpu.memory_space<vmem>>, vector<2x5xf32>,
    %1443 = vector.extract_strided_slice %1428 {offsets = [56, 0], sizes = [2, 5], strides = [1, 1]} : vector<128x5xf32> to vector<2x5xf32>
    %c0_251 = arith.constant 0 : index
    %c35_252 = arith.constant 35 : index
    %1444 = vector.load %arg20[%c0_251, %c35_252] : memref<2x80xf32, #tpu.memory_space<vmem>>, vector<2x5xf32>
    tpu.vector_store %arg20[%c0_251, %c35_252], %1443 {strides = array<i32>} : memref<2x80xf32, #tpu.memory_space<vmem>>, vector<2x5xf32>,
    %1445 = vector.extract_strided_slice %1428 {offsets = [64, 0], sizes = [2, 5], strides = [1, 1]} : vector<128x5xf32> to vector<2x5xf32>
    %c0_253 = arith.constant 0 : index
    %c40_254 = arith.constant 40 : index
    %1446 = vector.load %arg20[%c0_253, %c40_254] : memref<2x80xf32, #tpu.memory_space<vmem>>, vector<2x5xf32>
    tpu.vector_store %arg20[%c0_253, %c40_254], %1445 {strides = array<i32>} : memref<2x80xf32, #tpu.memory_space<vmem>>, vector<2x5xf32>,
    %1447 = vector.extract_strided_slice %1428 {offsets = [72, 0], sizes = [2, 5], strides = [1, 1]} : vector<128x5xf32> to vector<2x5xf32>
    %c0_255 = arith.constant 0 : index
    %c45_256 = arith.constant 45 : index
    %1448 = vector.load %arg20[%c0_255, %c45_256] : memref<2x80xf32, #tpu.memory_space<vmem>>, vector<2x5xf32>
    tpu.vector_store %arg20[%c0_255, %c45_256], %1447 {strides = array<i32>} : memref<2x80xf32, #tpu.memory_space<vmem>>, vector<2x5xf32>,
    %1449 = vector.extract_strided_slice %1428 {offsets = [80, 0], sizes = [2, 5], strides = [1, 1]} : vector<128x5xf32> to vector<2x5xf32>
    %c0_257 = arith.constant 0 : index
    %c50_258 = arith.constant 50 : index
    %1450 = vector.load %arg20[%c0_257, %c50_258] : memref<2x80xf32, #tpu.memory_space<vmem>>, vector<2x5xf32>
    tpu.vector_store %arg20[%c0_257, %c50_258], %1449 {strides = array<i32>} : memref<2x80xf32, #tpu.memory_space<vmem>>, vector<2x5xf32>,
    %1451 = vector.extract_strided_slice %1428 {offsets = [88, 0], sizes = [2, 5], strides = [1, 1]} : vector<128x5xf32> to vector<2x5xf32>
    %c0_259 = arith.constant 0 : index
    %c55_260 = arith.constant 55 : index
    %1452 = vector.load %arg20[%c0_259, %c55_260] : memref<2x80xf32, #tpu.memory_space<vmem>>, vector<2x5xf32>
    tpu.vector_store %arg20[%c0_259, %c55_260], %1451 {strides = array<i32>} : memref<2x80xf32, #tpu.memory_space<vmem>>, vector<2x5xf32>,
    %1453 = vector.extract_strided_slice %1428 {offsets = [96, 0], sizes = [2, 5], strides = [1, 1]} : vector<128x5xf32> to vector<2x5xf32>
    %c0_261 = arith.constant 0 : index
    %c60_262 = arith.constant 60 : index
    %1454 = vector.load %arg20[%c0_261, %c60_262] : memref<2x80xf32, #tpu.memory_space<vmem>>, vector<2x5xf32>
    tpu.vector_store %arg20[%c0_261, %c60_262], %1453 {strides = array<i32>} : memref<2x80xf32, #tpu.memory_space<vmem>>, vector<2x5xf32>,
    %1455 = vector.extract_strided_slice %1428 {offsets = [104, 0], sizes = [2, 5], strides = [1, 1]} : vector<128x5xf32> to vector<2x5xf32>
    %c0_263 = arith.constant 0 : index
    %c65_264 = arith.constant 65 : index
    %1456 = vector.load %arg20[%c0_263, %c65_264] : memref<2x80xf32, #tpu.memory_space<vmem>>, vector<2x5xf32>
    tpu.vector_store %arg20[%c0_263, %c65_264], %1455 {strides = array<i32>} : memref<2x80xf32, #tpu.memory_space<vmem>>, vector<2x5xf32>,
    %1457 = vector.extract_strided_slice %1428 {offsets = [112, 0], sizes = [2, 5], strides = [1, 1]} : vector<128x5xf32> to vector<2x5xf32>
    %c0_265 = arith.constant 0 : index
    %c70_266 = arith.constant 70 : index
    %1458 = vector.load %arg20[%c0_265, %c70_266] : memref<2x80xf32, #tpu.memory_space<vmem>>, vector<2x5xf32>
    tpu.vector_store %arg20[%c0_265, %c70_266], %1457 {strides = array<i32>} : memref<2x80xf32, #tpu.memory_space<vmem>>, vector<2x5xf32>,
    %1459 = vector.extract_strided_slice %1428 {offsets = [120, 0], sizes = [2, 5], strides = [1, 1]} : vector<128x5xf32> to vector<2x5xf32>
    %c0_267 = arith.constant 0 : index
    %c75_268 = arith.constant 75 : index
    %1460 = vector.load %arg20[%c0_267, %c75_268] : memref<2x80xf32, #tpu.memory_space<vmem>>, vector<2x5xf32>
    tpu.vector_store %arg20[%c0_267, %c75_268], %1459 {strides = array<i32>} : memref<2x80xf32, #tpu.memory_space<vmem>>, vector<2x5xf32>,
    %c0_269 = arith.constant 0 : index
    %c0_270 = arith.constant 0 : index
    %1461 = vector.load %arg20[%c0_269, %c0_270] : memref<2x80xf32, #tpu.memory_space<vmem>>, vector<2x80xf32>
    %c0_271 = arith.constant 0 : index
    %c0_272 = arith.constant 0 : index
    %1462 = vector.load %arg10[%c0_271, %c0_272] : memref<80x64xf32, #tpu.memory_space<vmem>>, vector<80x64xf32>
    %cst_273 = arith.constant dense<0.000000e+00> : vector<2x64xf32>
    %1463 = tpu.matmul %1461, %1462, %cst_273 {dimension_numbers = #tpu.dot_dimension_numbers<[1], [0], [0], [1], [0, 0, 1, 1], [], []>} : vector<2x80xf32>, vector<80x64xf32>, vector<2x64xf32> -> vector<2x64xf32>
    %c0_274 = arith.constant 0 : index
    %c0_275 = arith.constant 0 : index
    %1464 = vector.load %arg11[%c0_274, %c0_275] : memref<1x64xf32, #tpu.memory_space<vmem>>, vector<1x64xf32>
    %1465 = vector.broadcast %1464 : vector<1x64xf32> to vector<2x64xf32>
    %1466 = arith.addf %1463, %1465 : vector<2x64xf32>
    %cst_276 = arith.constant 0.000000e+00 : f32
    %1467 = vector.broadcast %cst_276 : f32 to vector<2x64xf32>
    %1468 = arith.maximumf %1466, %1467 : vector<2x64xf32>
    %c0_277 = arith.constant 0 : index
    %c0_278 = arith.constant 0 : index
    %1469 = vector.load %arg12[%c0_277, %c0_278] : memref<64x16xf32, #tpu.memory_space<vmem>>, vector<64x16xf32>
    %cst_279 = arith.constant dense<0.000000e+00> : vector<2x16xf32>
    %1470 = tpu.matmul %1468, %1469, %cst_279 {dimension_numbers = #tpu.dot_dimension_numbers<[1], [0], [0], [1], [0, 0, 1, 1], [], []>} : vector<2x64xf32>, vector<64x16xf32>, vector<2x16xf32> -> vector<2x16xf32>
    %c0_280 = arith.constant 0 : index
    %c0_281 = arith.constant 0 : index
    %1471 = vector.load %arg13[%c0_280, %c0_281] : memref<1x16xf32, #tpu.memory_space<vmem>>, vector<1x16xf32>
    %1472 = vector.broadcast %1471 : vector<1x16xf32> to vector<2x16xf32>
    %1473 = arith.addf %1470, %1472 : vector<2x16xf32>
    %cst_282 = arith.constant 0.000000e+00 : f32
    %1474 = vector.broadcast %cst_282 : f32 to vector<2x16xf32>
    %1475 = arith.maximumf %1473, %1474 : vector<2x16xf32>
    %c0_283 = arith.constant 0 : index
    %c0_284 = arith.constant 0 : index
    %1476 = vector.load %arg14[%c0_283, %c0_284] : memref<16x4xf32, #tpu.memory_space<vmem>>, vector<16x4xf32>
    %cst_285 = arith.constant dense<0.000000e+00> : vector<2x4xf32>
    %1477 = tpu.matmul %1475, %1476, %cst_285 {dimension_numbers = #tpu.dot_dimension_numbers<[1], [0], [0], [1], [0, 0, 1, 1], [], []>} : vector<2x16xf32>, vector<16x4xf32>, vector<2x4xf32> -> vector<2x4xf32>
    %c0_286 = arith.constant 0 : index
    %c0_287 = arith.constant 0 : index
    %1478 = vector.load %arg15[%c0_286, %c0_287] : memref<1x4xf32, #tpu.memory_space<vmem>>, vector<1x4xf32>
    %1479 = vector.broadcast %1478 : vector<1x4xf32> to vector<2x4xf32>
    %1480 = arith.addf %1477, %1479 : vector<2x4xf32>
    %c0_288 = arith.constant 0 : index
    %c0_289 = arith.constant 0 : index
    %1481 = vector.load %arg16[%c0_288, %c0_289] : memref<2x4xf32, #tpu.memory_space<vmem>>, vector<2x4xf32>
    tpu.vector_store %arg16[%c0_288, %c0_289], %1480 {strides = array<i32>} : memref<2x4xf32, #tpu.memory_space<vmem>>, vector<2x4xf32>,
    return
  }
  func.func @transform_0(%arg0: i32) -> (i32, i32, i32) {
    %c0_i32 = arith.constant 0 : i32
    %c0_i32_0 = arith.constant 0 : i32
    %c0_i32_1 = arith.constant 0 : i32
    %c0_i32_2 = arith.constant 0 : i32
    return %c0_i32, %c0_i32_0, %c0_i32_1 : i32, i32, i32
  }
  func.func @transform_1(%arg0: i32) -> i32 {
    %c0_i32 = arith.constant 0 : i32
    %c0_i32_0 = arith.constant 0 : i32
    return %c0_i32 : i32
  }
  func.func @transform_2(%arg0: i32) -> i32 {
    %c0_i32 = arith.constant 0 : i32
    %c0_i32_0 = arith.constant 0 : i32
    return %c0_i32 : i32
  }
  func.func @transform_3(%arg0: i32) -> i32 {
    %c0_i32 = arith.constant 0 : i32
    %c0_i32_0 = arith.constant 0 : i32
    return %c0_i32 : i32
  }
  func.func @transform_4(%arg0: i32) -> i32 {
    %c0_i32 = arith.constant 0 : i32
    %c0_i32_0 = arith.constant 0 : i32
    return %c0_i32 : i32
  }
  func.func @transform_5(%arg0: i32) -> (i32, i32) {
    %c0_i32 = arith.constant 0 : i32
    %c0_i32_0 = arith.constant 0 : i32
    %c0_i32_1 = arith.constant 0 : i32
    return %c0_i32, %c0_i32_0 : i32, i32
  }
  func.func @transform_6(%arg0: i32) -> (i32, i32) {
    %c0_i32 = arith.constant 0 : i32
    %c0_i32_0 = arith.constant 0 : i32
    %c0_i32_1 = arith.constant 0 : i32
    return %c0_i32, %c0_i32_0 : i32, i32
  }
  func.func @transform_7(%arg0: i32) -> (i32, i32) {
    %c0_i32 = arith.constant 0 : i32
    %c0_i32_0 = arith.constant 0 : i32
    %c0_i32_1 = arith.constant 0 : i32
    return %c0_i32, %c0_i32_0 : i32, i32
  }
  func.func @transform_8(%arg0: i32) -> (i32, i32) {
    %c0_i32 = arith.constant 0 : i32
    %c0_i32_0 = arith.constant 0 : i32
    %c0_i32_1 = arith.constant 0 : i32
    return %c0_i32, %c0_i32_0 : i32, i32
  }
  func.func @transform_9(%arg0: i32) -> (i32, i32) {
    %c0_i32 = arith.constant 0 : i32
    %c0_i32_0 = arith.constant 0 : i32
    %c0_i32_1 = arith.constant 0 : i32
    return %c0_i32, %c0_i32_0 : i32, i32
  }
  func.func @transform_10(%arg0: i32) -> (i32, i32) {
    %c0_i32 = arith.constant 0 : i32
    %c0_i32_0 = arith.constant 0 : i32
    %c0_i32_1 = arith.constant 0 : i32
    return %c0_i32, %c0_i32_0 : i32, i32
  }
  func.func @transform_11(%arg0: i32) -> (i32, i32) {
    %c0_i32 = arith.constant 0 : i32
    %c0_i32_0 = arith.constant 0 : i32
    %c0_i32_1 = arith.constant 0 : i32
    return %c0_i32, %c0_i32_0 : i32, i32
  }
  func.func @transform_12(%arg0: i32) -> (i32, i32) {
    %c0_i32 = arith.constant 0 : i32
    %c0_i32_0 = arith.constant 0 : i32
    %c0_i32_1 = arith.constant 0 : i32
    return %c0_i32, %c0_i32_0 : i32, i32
  }
  func.func @transform_13(%arg0: i32) -> (i32, i32) {
    %c0_i32 = arith.constant 0 : i32
    %c0_i32_0 = arith.constant 0 : i32
    %c0_i32_1 = arith.constant 0 : i32
    return %c0_i32, %c0_i32_0 : i32, i32
  }
  func.func @transform_14(%arg0: i32) -> (i32, i32) {
    %c0_i32 = arith.constant 0 : i32
    %c0_i32_0 = arith.constant 0 : i32
    %c0_i32_1 = arith.constant 0 : i32
    return %c0_i32, %c0_i32_0 : i32, i32
  }
  func.func @transform_15(%arg0: i32) -> (i32, i32) {
    %c0_i32 = arith.constant 0 : i32
    %c0_i32_0 = arith.constant 0 : i32
    %c0_i32_1 = arith.constant 0 : i32
    return %c0_i32, %c0_i32_0 : i32, i32
  }
}

</mosaic_0001>

<bundles_post_ra>
// kernel: tpu_custom_call.1
= control target key start
LH: loop header
LB: loop body
LE: loop exit
PB: predicated region body
PF: predicated region fallthrough
CT: control target
= control target key end

     0   :  { %s10772_s0 = inlined_call_operand.vmem [shape: f32[2,25,24], index: 0, kind: input, shape index: {}]   ;;  %s10773_s1 = inlined_call_operand.hbm [shape: f32[64], index: 1, kind: input, shape index: {}]   ;;  %s10774_s2 = inlined_call_operand.hbm [shape: f32[8], index: 2, kind: input, shape index: {}]   ;;  %s10775_s3 = inlined_call_operand.vmem [shape: f32[256], index: 3, kind: input, shape index: {}]   ;;  %s10776_s4 = inlined_call_operand.hbm [shape: f32[8], index: 4, kind: input, shape index: {}]   ;;  %s10777_s5 = inlined_call_operand.vmem [shape: f32[22,11], index: 5, kind: input, shape index: {}]   ;;  %s10778_s6 = inlined_call_operand.vmem [shape: f32[88,191], index: 6, kind: input, shape index: {}]   ;;  %s10779_s7 = inlined_call_operand.vmem [shape: f32[9,5], index: 7, kind: input, shape index: {}]   ;;  %s10780_s8 = inlined_call_operand.vmem [shape: f32[128,127], index: 8, kind: input, shape index: {}]   ;;  %s10781_s9 = inlined_call_operand.vmem [shape: f32[80,64], index: 9, kind: input, shape index: {}]   ;;  %s10782_s10 = inlined_call_operand.vmem [shape: f32[1,64], index: 10, kind: input, shape index: {}]   ;;  %s10783_s11 = inlined_call_operand.vmem [shape: f32[64,16], index: 11, kind: input, shape index: {}]   ;;  %s10784_s12 = inlined_call_operand.vmem [shape: f32[1,16], index: 12, kind: input, shape index: {}]   ;;  %s10785_s13 = inlined_call_operand.vmem [shape: f32[16,4], index: 13, kind: input, shape index: {}]   ;;  %s10786_s14 = inlined_call_operand.vmem [shape: f32[1,4], index: 14, kind: input, shape index: {}]   ;;  %s10787_s15 = inlined_call_operand.hbm [shape: f32[2,4], index: 15, kind: output, shape index: {}]  }
   0x1   :  { %10825 = sst [smem:[#allocation27_spill]] %s10779_s7 }
   0x2   :  { %10826 = sst [smem:[#allocation28_spill]] %s10780_s8 }
   0x3   :  { %10827 = sst [smem:[#allocation29_spill]] %s10781_s9 }
   0x4   :  { %10828 = sst [smem:[#allocation30_spill]] %s10782_s10 }
   0x5   :  { %10829 = sst [smem:[#allocation31_spill]] %s10783_s11 }
   0x6   :  { %10830 = sst [smem:[#allocation32_spill]] %s10784_s12 }
   0x7   :  { %10831 = sst [smem:[#allocation33_spill]] %s10785_s13 }
   0x8   :  { %10832 = sst [smem:[#allocation34_spill]] %s10786_s14 }
   0x9   :  { %10833 = sst [smem:[#allocation35_spill]] %s10787_s15 }
   0xa   :  { %20 = vsyncpa [#allocation8], 0 }
   0xb   :  { %21 = vsyncpa [#allocation11], 0 }
   0xc   :  { %22 = vsyncpa [#allocation9], 0 }
   0xd   :  { %23 = vsyncpa [#allocation7], 0  ;;  %s6252_s20 = scalar_lea.hbm %s10774_s2, 16 }
   0xe   :  { %p6253_p0 = scmp.ne.s32.totalorder %s10774_s2, %s6252_s20  ;;  %p6256_p1 = scmp.lt.u32.totalorder %s6252_s20, %s10774_s2 }
  0x10   :  { %p6258_p2 = pnand %p6256_p1, %p6253_p0 }
  0x12   :  { %6261 = shalt.err (!%p6258_p2)
}
  0x13   :  { %s6326_s25 = smov [#allocation10]   ;;  %s6262_s30 = scalar_lea.hbm %s10773_s1, 16 }
  0x14   :  { %41 = dma.hbm_to_smem %s10774_s2, 16, %s6326_s25, [#allocation11]  }
  0x15   :  { %p6263_p3 = scmp.ne.s32.totalorder %s10773_s1, %s6262_s30  ;;  %p6266_p4 = scmp.lt.u32.totalorder %s6262_s30, %s10773_s1 }
  0x17   :  { %p6268_p5 = pnand %p6266_p4, %p6263_p3 }
  0x19   :  { %6271 = shalt.err (!%p6268_p5)
}
  0x1a   :  { %s6327_s20 = smov [#allocation6]   ;;  %s48_s24 = sshll.u32 %s10775_s3, 4  ;;  %s49_s24 = int_to_ptr.vmem [resolvable:$true] %s48_s24 }
  0x1b   :  { %33 = dma.hbm_to_smem %s10773_s1, 16, %s6327_s20, [#allocation8]  }
  0x1c   :  { %s6272_s25 = scalar_lea.vmem %s49_s24, 32  ;;  %p6277_p7 = scmp.lt.s32.totalorder %s49_s24, %s49_s24 }
  0x1d   :  { %p6273_p6 = scmp.ne.s32.totalorder %s49_s24, %s6272_s25  ;;  %p6278_p8 = scmp.lt.s32.totalorder %s6272_s25, %s6272_s25 }
  0x1f   :  { %p6279_p9 = por %p6278_p8, %p6277_p7 }
  0x21   :  { %p6280_p10 = pnand %p6279_p9, %p6273_p6 }
  0x23   :  { %6283 = shalt.err (!%p6280_p10)
}
  0x24   :  { %s6328_s26 = smov [#allocation12]   ;;  %s6284_s29 = scalar_lea.hbm %s10776_s4, 16 }
  0x25   :  { %51 = dma.vmem_to_smem %s49_s24, 32, %s6328_s26, [#allocation9]  }
  0x26   :  { %p6285_p11 = scmp.ne.s32.totalorder %s10776_s4, %s6284_s29  ;;  %p6288_p12 = scmp.lt.u32.totalorder %s6284_s29, %s10776_s4 }
  0x28   :  { %p6290_p13 = pnand %p6288_p12, %p6285_p11 }
  0x2a   :  { %6293 = shalt.err (!%p6290_p13)
}
  0x2b   :  { %s6329_s17 = smov [#allocation13]  }
  0x2c   :  { %59 = dma.hbm_to_smem %s10776_s4, 16, %s6329_s17, [#allocation11]  }
  0x2d   :  { %6316 = dma.done.wait [#allocation8], 16  }
  0x2e   :  { %6317 = vsyncadd [#allocation8], 4294967280 }
  0x2f   :  { %6318 = dma.done.wait [#allocation11], 16  }
  0x30   :  { %6319 = vsyncadd [#allocation11], 4294967280 }
  0x31   :  { %6320 = dma.done.wait [#allocation9], 32  }
  0x32   :  { %6321 = vsyncadd [#allocation9], 4294967264 }
  0x33   :  { %6322 = dma.done.wait [#allocation11], 16  }
  0x34   :  { %6323 = vsyncadd [#allocation11], 4294967280 }
  0x35   :  { %92 = sfence }
  0x36   :  { %s5399_s20 = sld [smem:[#allocation6 + $0x1]]  ;;  %s5401_s21 = sld [smem:[#allocation6 + $0x3]]  ;;  %v6473_v0 = vld [vmem:[%s10772_s0 + $0x10] sm:$0xff]  ;;  %v6478_v1 = vld [vmem:[%s10772_s0] sm:$0xff]  ;;  %v6488_v4 = vld [vmem:[%s10772_s0 + $0x8] sm:$0xff]  ;;  %vm223_vm0 = vcmask 187392  }
  0x37   :  { %s5407_s22 = sld [smem:[#allocation6 + $0x9]]  ;;  %v6483_v3 = vld [vmem:[%s10772_s0 + $0x1] sm:$0xff]  ;;  %s5403_s29 = sld [smem:[#allocation6 + $0x5]]  ;;  %v6499_v11 = vld [vmem:[%s10772_s0 + $0x9] sm:$0xff]  ;;  %v6513_v16 = vld [vmem:[%s10772_s0 + $0x11] sm:$0xff]  ;;  %vm1287_vm1 = vcmask 1045504  }
  0x38   :  { %s10790_s30 = smov 127   ;;  %v6508_v14 = vld [vmem:[%s10772_s0 + $0x20] sm:$0xff]  ;;  %v6522_v19 = vld [vmem:[%s10772_s0 + $0x28] sm:$0xff]  ;;  %s5405_s2 = sld [smem:[#allocation6 + $0x7]]  ;;  %v6540_v27 = vld [vmem:[%s10772_s0 + $0x30] sm:$0xff]  ;;  %vm1214_vm2 = vcmask 179200  }
  0x39   :  { %s5416_s23 = sld [smem:[#allocation6 + $0x11]]  ;;  %v6535_v25 = vld [vmem:[%s10772_s0 + $0x21] sm:$0xff]  ;;  %s5411_s27 = sld [smem:[#allocation6 + $0xd]]  ;;  %v6553_v33 = vld [vmem:[%s10772_s0 + $0x29] sm:$0xff]  ;;  %v6566_v39 = vld [vmem:[%s10772_s0 + $0x31] sm:$0xff]  ;;  %vm1500_vm3 = vcmask 1046528  }
  0x3a   :  { %s5418_s1 = sld [smem:[#allocation6 + $0x13]]  ;;  %s5413_s17 = sld [smem:[#allocation6 + $0xf]]  ;;  %vm1618_vm4 = vcmask 515072   ;;  %vm6332_vm5 = vmmov 1   ;;  %vm1775_vm7 = vcmask 89088   ;;  %vm4369_vm8 = vcmask 80896  }
  0x3b   :  { %s5425_s18 = sld [smem:[#allocation6 + $0x19]]  ;;  %s5420_s19 = sld [smem:[#allocation6 + $0x15]]  ;;  %vm7320_vm6 = vmpackc.low %vm1500_vm3, %vm6332_vm5  ;;  %vm4575_vm9 = vcmask 1040384   ;;  %vm4526_vm11 = vcmask 72704   ;;  %vm4819_vm12 = vcmask 1039360   ;;  %vm5016_vm13 = vcmask 33792  }
  0x3c   :  { %v112_v2 = vstv %s5399_s20  ;;  %v140_v7 = vstv %s5401_s21  ;;  %s5409_s20 = sld [smem:[#allocation6 + $0xb]]  ;;  %s5422_s21 = sld [smem:[#allocation6 + $0x17]]  ;;  %vm10354_vm10 = vmpackc.low %vm4575_vm9, %vm6332_vm5  ;;  %vm6342_vm14 = vmmov 0   ;;  %vm5022_vm15 = vcmask 74792  }
  0x3d   :  { %v115_v5 = vmul.f32 %v112_v2, %v6473_v0  ;;  %v113_v6 = vmul.f32 %v112_v2, %v6478_v1  ;;  %v141_v8 = vmul.f32 %v140_v7, %v6483_v3  ;;  %v114_v9 = vmul.f32 %v112_v2, %v6488_v4  ;;  %s5431_s24 = sld [smem:[#allocation6 + $0x1f]]  ;;  %s5443_s25 = sld [smem:[#allocation6 + $0x29]] }
  0x3e   :  { %v233_v10 = vstv %s5407_s22  ;;  %v142_v13 = vmul.f32 %v140_v7, %v6499_v11  ;;  %v168_v15 = vstv %s5403_s29  ;;  %v143_v18 = vmul.f32 %v140_v7, %v6513_v16  ;;  %s5434_s22 = sld [smem:[#allocation6 + $0x21]]  ;;  %s5438_s4 = sld [smem:[#allocation6 + $0x25]] }
  0x3f   :  { %123 = vrot.lane.b32.xlu1 %v115_v5, %s10790_s30  ;;  %119 = vrot.lane.b32.xlu0 %v113_v6, %s10790_s30  ;;  %v234_v12 = vmul.f32 %v233_v10, %v6478_v1  ;;  %v169_v17 = vmul.f32 %v6508_v14, %v168_v15  ;;  %v170_v20 = vmul.f32 %v6522_v19, %v168_v15  ;;  %v196_v26 = vstv %s5405_s2  ;;  %s5429_s2 = sld [smem:[#allocation6 + $0x1d]]  ;;  %s5445_s26 = sld [smem:[#allocation6 + $0x2b]] }
  0x40   :  { %v235_v21 = vmul.f32 %v233_v10, %v6488_v4  ;;  %v236_v24 = vmul.f32 %v233_v10, %v6473_v0  ;;  %v197_v28 = vmul.f32 %v6535_v25, %v196_v26  ;;  %v171_v29 = vmul.f32 %v6540_v27, %v168_v15  ;;  %s5440_s28 = sld [smem:[#allocation6 + $0x27]]  ;;  %s5400_s29 = sld [smem:[#allocation6 + $0x2]] }
  0x41   :  { %v353_v30 = vstv %s5416_s23  ;;  %v198_v35 = vmul.f32 %v6553_v33, %v196_v26  ;;  %v289_v36 = vstv %s5411_s27  ;;  %v199_v41 = vmul.f32 %v6566_v39, %v196_v26  ;;  %s5436_s23 = sld [smem:[#allocation6 + $0x23]]  ;;  %s106_s27 = sld [smem:[#allocation6]] }
  0x42   :  { %v261_v22 = vstv %s5409_s20  ;;  %v354_v31 = vmul.f32 %v353_v30, %v6478_v1  ;;  %v355_v37 = vmul.f32 %v353_v30, %v6488_v4  ;;  %v290_v38 = vmul.f32 %v6508_v14, %v289_v36  ;;  %s5427_s20 = sld [smem:[#allocation6 + $0x1b]]  ;;  %s5402_s16 = sld [smem:[#allocation6 + $0x4]] }
  0x43   :  { %147 = vrot.lane.b32.xlu1 %v141_v8, %s10790_s30  ;;  %121 = vrot.lane.b32.xlu0 %v114_v9, %s10790_s30  ;;  %v262_v23 = vmul.f32 %v261_v22, %v6483_v3  ;;  %v263_v32 = vmul.f32 %v261_v22, %v6499_v11  ;;  %v264_v34 = vmul.f32 %v261_v22, %v6513_v16  ;;  %v381_v42 = vstv %s5418_s1  ;;  %s5452_s1 = sld [smem:[#allocation6 + $0x31]]  ;;  %s5447_s3 = sld [smem:[#allocation6 + $0x2d]] }
  0x44   :  { %v291_v40 = vmul.f32 %v6522_v19, %v289_v36  ;;  %v382_v43 = vmul.f32 %v381_v42, %v6483_v3  ;;  %v356_v44 = vmul.f32 %v353_v30, %v6473_v0  ;;  %v317_v45 = vstv %s5413_s17  ;;  %s5404_s17 = sld [smem:[#allocation6 + $0x6]]  ;;  %s7740_s15 = sld [smem:[#allocation12 + $0x42]] }
  0x45   :  { %v318_v46 = vmul.f32 %v6535_v25, %v317_v45  ;;  %v292_v47 = vmul.f32 %v6540_v27, %v289_v36  ;;  %v473_v48 = vstv %s5425_s18  ;;  %v383_v50 = vmul.f32 %v381_v42, %v6499_v11  ;;  %s5454_s18 = sld [smem:[#allocation6 + $0x33]]  ;;  %s7742_s14 = sld [smem:[#allocation12 + $0x4]] }
  0x46   :  { %v474_v49 = vmul.f32 %v473_v48, %v6478_v1  ;;  %v384_v51 = vmul.f32 %v381_v42, %v6513_v16  ;;  %v319_v52 = vmul.f32 %v6553_v33, %v317_v45  ;;  %v409_v53 = vstv %s5420_s19  ;;  %s5406_s19 = sld [smem:[#allocation6 + $0x8]]  ;;  %s7754_s13 = sld [smem:[#allocation12 + $0x2b]] }
  0x47   :  { %240 = vrot.lane.b32.xlu1 %v234_v12, %s10790_s30  ;;  %149 = vrot.lane.b32.xlu0 %v142_v13, %s10790_s30  ;;  %v475_v54 = vmul.f32 %v473_v48, %v6488_v4  ;;  %v410_v55 = vmul.f32 %v6508_v14, %v409_v53  ;;  %v411_v56 = vmul.f32 %v6522_v19, %v409_v53  ;;  %v437_v61 = vstv %s5422_s21  ;;  %s215_s21 = sld [smem:[#allocation10]]  ;;  %s7768_s10 = sld [smem:[#allocation12 + $0x24]] }
  0x48   :  { %v320_v57 = vmul.f32 %v6566_v39, %v317_v45  ;;  %v501_v58 = vstv %s5427_s20  ;;  %v476_v60 = vmul.f32 %v473_v48, %v6473_v0  ;;  %v438_v62 = vmul.f32 %v6535_v25, %v437_v61  ;;  %s5449_s20 = sld [smem:[#allocation6 + $0x2f]]  ;;  %s7744_s12 = sld [smem:[#allocation12 + $0x60]] }
  0x49   :  { %v502_v59 = vmul.f32 %v501_v58, %v6483_v3  ;;  %v412_v63 = vmul.f32 %v6540_v27, %v409_v53  ;;  %v593_v2 = vstv %s5434_s22  ;;  %v503_v6 = vmul.f32 %v501_v58, %v6499_v11  ;;  %s5461_s22 = sld [smem:[#allocation6 + $0x39]]  ;;  %s7783_s11 = sld [smem:[#allocation12 + $0x80]] }
  0x4a   :  { %v594_v5 = vmul.f32 %v593_v2, %v6478_v1  ;;  %v504_v7 = vmul.f32 %v501_v58, %v6513_v16  ;;  %v439_v8 = vmul.f32 %v6553_v33, %v437_v61  ;;  %v529_v9 = vstv %s5429_s2  ;;  %s6691_s2 = sld [smem:[#allocation6 + $0xa]]  ;;  %s7793_s9 = sld [smem:[#allocation12 + $0xa0]] }
  0x4b   :  { %175 = vrot.lane.b32.xlu1 %v169_v17, %s10790_s30  ;;  %151 = vrot.lane.b32.xlu0 %v143_v18, %s10790_s30  ;;  %v595_v10 = vmul.f32 %v593_v2, %v6488_v4  ;;  %v530_v12 = vmul.f32 %v6508_v14, %v529_v9  ;;  %v531_v13 = vmul.f32 %v6522_v19, %v529_v9  ;;  %v621_v17 = vstv %s5436_s23  ;;  %s5410_s23 = sld [smem:[#allocation6 + $0xc]]  ;;  %10839 = sst [smem:[#allocation23_spill]] %s7742_s14 }
  0x4c   :  { %v440_v15 = vmul.f32 %v6566_v39, %v437_v61  ;;  %v622_v18 = vmul.f32 %v621_v17, %v6483_v3  ;;  %v677_v42 = vstv %s5440_s28  ;;  %s5414_s28 = sld [smem:[#allocation10 + $0x1]]  ;;  %s7809_s8 = sld [smem:[#allocation12 + $0x4b]]  ;;  %vm5058_vm5 = vcmask 320792  }
  0x4d   :  { %10842 = sst [smem:[#allocation25_spill]] %s7768_s10  ;;  %s7811_s7 = sld [smem:[#allocation12 + $0xa9]]  ;;  %vm5082_vm9 = vcmask 484792  }
  0x4f   :  { %177 = vrot.lane.b32.xlu1 %v170_v20, %s10790_s30  ;;  %242 = vrot.lane.b32.xlu0 %v235_v21, %s10790_s30  ;;  %v596_v20 = vmul.f32 %v593_v2, %v6473_v0  ;;  %v557_v21 = vstv %s5431_s24  ;;  %s6724_s24 = sld [smem:[#allocation6 + $0x35]] }
  0x50   :  { %v558_v22 = vmul.f32 %v6535_v25, %v557_v21  ;;  %v559_v30 = vmul.f32 %v6553_v33, %v557_v21  ;;  %v560_v36 = vmul.f32 %v6566_v39, %v557_v21 }
  0x52   :  { %10843 = sst [smem:[#allocation26_spill]] %s7809_s8 }
  0x53   :  { %268 = vrot.lane.b32.xlu1 %v262_v23, %s10790_s30  ;;  %244 = vrot.lane.b32.xlu0 %v236_v24, %s10790_s30  ;;  %v532_v23 = vmul.f32 %v6540_v27, %v529_v9  ;;  %v713_v24 = vstv %s5443_s25  ;;  %s6746_s25 = sld [smem:[#allocation6 + $0xe]] }
  0x54   :  { %v714_v26 = vmul.f32 %v713_v24, %v6478_v1 }
  0x57   :  { %203 = vrot.lane.b32.xlu1 %v197_v28, %s10790_s30  ;;  %179 = vrot.lane.b32.xlu0 %v171_v29, %s10790_s30  ;;  %v623_v28 = vmul.f32 %v621_v17, %v6499_v11  ;;  %v624_v29 = vmul.f32 %v621_v17, %v6513_v16  ;;  %v6682_v17 = vstv %s5404_s17  ;;  %s6854_s17 = sld [smem:[#allocation6 + $0x16]] }
  0x5b   :  { %360 = vrot.lane.b32.xlu1 %v354_v31, %s10790_s30  ;;  %270 = vrot.lane.b32.xlu0 %v263_v32, %s10790_s30  ;;  %v649_v31 = vstv %s5438_s4  ;;  %v715_v32 = vmul.f32 %v713_v24, %v6488_v4  ;;  %s6759_s4 = sld [smem:[#allocation6 + $0x3b]] }
  0x5c   :  { %v652_v48 = vmul.f32 %v6540_v27, %v649_v31 }
  0x5f   :  { %272 = vrot.lane.b32.xlu1 %v264_v34, %s10790_s30  ;;  %205 = vrot.lane.b32.xlu0 %v198_v35, %s10790_s30  ;;  %v650_v34 = vmul.f32 %v6508_v14, %v649_v31  ;;  %v651_v35 = vmul.f32 %v6522_v19, %v649_v31 }
  0x63   :  { %362 = vrot.lane.b32.xlu1 %v355_v37, %s10790_s30  ;;  %296 = vrot.lane.b32.xlu0 %v290_v38, %s10790_s30  ;;  %v741_v37 = vstv %s5445_s26  ;;  %v107_v38 = vstv %s106_s27  ;;  %s6768_s26 = sld [smem:[#allocation6 + $0x10]]  ;;  %s6779_s27 = sld [smem:[#allocation6 + $0x37]] }
  0x64   :  { %v108_v45 = vmul.f32 %v107_v38, %v6478_v1  ;;  %v744_v61 = vmul.f32 %v741_v37, %v6513_v16 }
  0x67   :  { %298 = vrot.lane.b32.xlu1 %v291_v40, %s10790_s30  ;;  %207 = vrot.lane.b32.xlu0 %v199_v41, %s10790_s30  ;;  %v742_v40 = vmul.f32 %v741_v37, %v6483_v3  ;;  %v716_v41 = vmul.f32 %v713_v24, %v6473_v0 }
  0x6b   :  { %388 = vrot.lane.b32.xlu1 %v382_v43, %s10790_s30  ;;  %364 = vrot.lane.b32.xlu0 %v356_v44, %s10790_s30 }
  0x6f   :  { %324 = vrot.lane.b32.xlu1 %v318_v46, %s10790_s30  ;;  %300 = vrot.lane.b32.xlu0 %v292_v47, %s10790_s30  ;;  %v6653_v46 = vstv %s5400_s29  ;;  %v678_v47 = vmul.f32 %v6535_v25, %v677_v42  ;;  %s6797_s29 = sld [smem:[#allocation6 + $0x12]] }
  0x70   :  { %v133_v53 = vmul.f32 %v6653_v46, %v6483_v3 }
  0x73   :  { %480 = vrot.lane.b32.xlu1 %v474_v49, %s10790_s30  ;;  %390 = vrot.lane.b32.xlu0 %v383_v50, %s10790_s30  ;;  %v833_v49 = vstv %s5452_s1  ;;  %s5465_s1 = sld [smem:[#allocation6 + $0x3d]] }
  0x77   :  { %392 = vrot.lane.b32.xlu1 %v384_v51, %s10790_s30  ;;  %326 = vrot.lane.b32.xlu0 %v319_v52, %s10790_s30 }
  0x7b   :  { %482 = vrot.lane.b32.xlu1 %v475_v54, %s10790_s30  ;;  %416 = vrot.lane.b32.xlu0 %v410_v55, %s10790_s30  ;;  %v834_v54 = vmul.f32 %v833_v49, %v6478_v1  ;;  %v743_v55 = vmul.f32 %v741_v37, %v6499_v11 }
  0x7f   :  { %418 = vrot.lane.b32.xlu1 %v411_v56, %s10790_s30  ;;  %328 = vrot.lane.b32.xlu0 %v320_v57, %s10790_s30 }
  0x83   :  { %508 = vrot.lane.b32.xlu1 %v502_v59, %s10790_s30  ;;  %484 = vrot.lane.b32.xlu0 %v476_v60, %s10790_s30  ;;  %v109_v59 = vmul.f32 %v107_v38, %v6488_v4  ;;  %v6668_v60 = vstv %s5402_s16  ;;  %s5419_s16 = sld [smem:[#allocation6 + $0x14]] }
  0x84   :  { %v161_v9 = vmul.f32 %v6508_v14, %v6668_v60 }
  0x87   :  { %444 = vrot.lane.b32.xlu1 %v438_v62, %s10790_s30  ;;  %420 = vrot.lane.b32.xlu0 %v412_v63, %s10790_s30  ;;  %v679_v62 = vmul.f32 %v6553_v33, %v677_v42  ;;  %v769_v63 = vstv %s5447_s3  ;;  %s6850_s3 = sld [smem:[#allocation6 + $0x3f]] }
  0x88   :  { %v771_v21 = vmul.f32 %v6522_v19, %v769_v63 }
  0x8b   :  { %600 = vrot.lane.b32.xlu1 %v594_v5, %s10790_s30  ;;  %510 = vrot.lane.b32.xlu0 %v503_v6, %s10790_s30 }
  0x8f   :  { %512 = vrot.lane.b32.xlu1 %v504_v7, %s10790_s30  ;;  %446 = vrot.lane.b32.xlu0 %v439_v8, %s10790_s30  ;;  %v134_v8 = vmul.f32 %v6653_v46, %v6499_v11 }
  0x93   :  { %602 = vrot.lane.b32.xlu1 %v595_v10, %s10790_s30  ;;  %536 = vrot.lane.b32.xlu0 %v530_v12, %s10790_s30  ;;  %v835_v10 = vmul.f32 %v833_v49, %v6488_v4  ;;  %v770_v12 = vmul.f32 %v6508_v14, %v769_v63 }
  0x97   :  { %538 = vrot.lane.b32.xlu1 %v531_v13, %s10790_s30  ;;  %448 = vrot.lane.b32.xlu0 %v440_v15, %s10790_s30 }
  0x9b   :  { %628 = vrot.lane.b32.xlu1 %v622_v18, %s10790_s30  ;;  %604 = vrot.lane.b32.xlu0 %v596_v20, %s10790_s30 }
  0x9f   :  { %564 = vrot.lane.b32.xlu1 %v558_v22, %s10790_s30  ;;  %540 = vrot.lane.b32.xlu0 %v532_v23, %s10790_s30  ;;  %v680_v22 = vmul.f32 %v6566_v39, %v677_v42  ;;  %v110_v23 = vmul.f32 %v107_v38, %v6473_v0  ;;  %v135_v38 = vmul.f32 %v6653_v46, %v6513_v16  ;;  %v6710_v42 = vstv %s215_s21  ;;  %s7407_s21 = sld [smem:[#allocation12 + $0x23]] }
  0xa0   :  { %v772_v46 = vmul.f32 %v6540_v27, %v769_v63 }
  0xa3   :  { %720 = vrot.lane.b32.xlu1 %v714_v26, %s10790_s30  ;;  %630 = vrot.lane.b32.xlu0 %v623_v28, %s10790_s30  ;;  %v189_v26 = vmul.f32 %v6535_v25, %v6682_v17  ;;  %v861_v28 = vstv %s5454_s18  ;;  %s5439_s18 = sld [smem:[#allocation6 + $0x26]] }
  0xa7   :  { %632 = vrot.lane.b32.xlu1 %v624_v29, %s10790_s30  ;;  %566 = vrot.lane.b32.xlu0 %v559_v30, %s10790_s30 }
  0xab   :  { %722 = vrot.lane.b32.xlu1 %v715_v32, %s10790_s30  ;;  %656 = vrot.lane.b32.xlu0 %v650_v34, %s10790_s30  ;;  %v162_v32 = vmul.f32 %v6522_v19, %v6668_v60  ;;  %v6699_v34 = vstv %s5406_s19  ;;  %s7571_s19 = sld [smem:[#allocation12 + $0x47]] }
  0xaf   :  { %658 = vrot.lane.b32.xlu1 %v651_v35, %s10790_s30  ;;  %568 = vrot.lane.b32.xlu0 %v560_v36, %s10790_s30  ;;  %v862_v35 = vmul.f32 %v861_v28, %v6483_v3  ;;  %v836_v36 = vmul.f32 %v833_v49, %v6473_v0  ;;  %v190_v49 = vmul.f32 %v6553_v33, %v6682_v17 }
  0xb1   :  { %v6648_v43 = vpop.permute.xlu1 %123  ;;  %v120_v44 = vpop.permute.xlu0 %119 }
  0xb2   :  { %v128_v52 = vadd.f32 %v120_v44, %v108_v45  ;;  %v130_v37 = vadd.f32 %v6648_v43, %v110_v23 }
  0xb3   :  { %748 = vrot.lane.b32.xlu1 %v742_v40, %s10790_s30  ;;  %724 = vrot.lane.b32.xlu0 %v716_v41, %s10790_s30  ;;  %v6708_v41 = vstv %s5449_s20  ;;  %s7405_s20 = sld [smem:[#allocation12 + $0x61]] }
  0xb4   :  { %v136_v58 = vadd.f32 %v133_v53, %v128_v52  ;;  %v798_v43 = vmul.f32 %v6535_v25, %v6708_v41 }
  0xb5   :  { %v148_v50 = vpop.permute.xlu1 %147  ;;  %v122_v51 = vpop.permute.xlu0 %121 }
  0xb6   :  { %v156_v6 = vadd.f32 %v148_v50, %v136_v58  ;;  %v129_v7 = vadd.f32 %v122_v51, %v109_v59  ;;  %v138_v51 = vadd.f32 %v135_v38, %v130_v37 }
  0xb7   :  { %684 = vrot.lane.b32.xlu1 %v678_v47, %s10790_s30  ;;  %660 = vrot.lane.b32.xlu0 %v652_v48, %s10790_s30  ;;  %v229_v47 = vmul.f32 %v6699_v34, %v6478_v1 }
  0xb8   :  { %v137_v18 = vadd.f32 %v134_v8, %v129_v7  ;;  %v164_v20 = vadd.f32 %v161_v9, %v156_v6  ;;  %v230_v9 = vmul.f32 %v6699_v34, %v6488_v4 }
  0xb9   :  { %v6663_v56 = vpop.permute.xlu1 %240  ;;  %v150_v57 = vpop.permute.xlu0 %149 }
  0xba   :  { %v157_v31 = vadd.f32 %v150_v57, %v137_v18  ;;  %v249_v6 = vadd.f32 %v6663_v56, %v229_v47  ;;  %v6752_v56 = vstv %s5410_s23  ;;  %v799_v18 = vmul.f32 %v6553_v33, %v6708_v41  ;;  %s7435_s23 = sld [smem:[#allocation12 + $0x43]] }
  0xbb   :  { %840 = vrot.lane.b32.xlu1 %v834_v54, %s10790_s30  ;;  %750 = vrot.lane.b32.xlu0 %v743_v55, %s10790_s30  ;;  %v6722_v54 = vstv %s5461_s22  ;;  %v6727_v55 = vstv %s6691_s2  ;;  %s6884_s22 = sld [smem:[#allocation6 + $0x18]]  ;;  %s6893_s2 = sld [smem:[#allocation10 + $0x2]] }
  0xbc   :  { %v165_v48 = vadd.f32 %v162_v32, %v157_v31  ;;  %v954_v63 = vmul.f32 %v6722_v54, %v6478_v1  ;;  %v254_v7 = vmul.f32 %v6727_v55, %v6483_v3 }
  0xbd   :  { %v176_v2 = vpop.permute.xlu1 %175  ;;  %v152_v5 = vpop.permute.xlu0 %151 }
  0xbe   :  { %v184_v24 = vadd.f32 %v176_v2, %v164_v20  ;;  %v158_v59 = vadd.f32 %v152_v5, %v138_v51  ;;  %v863_v2 = vmul.f32 %v861_v28, %v6499_v11  ;;  %v191_v20 = vmul.f32 %v6566_v39, %v6682_v17 }
  0xbf   :  { %752 = vrot.lane.b32.xlu1 %v744_v61, %s10790_s30  ;;  %686 = vrot.lane.b32.xlu0 %v679_v62, %s10790_s30  ;;  %v163_v62 = vmul.f32 %v6540_v27, %v6668_v60  ;;  %v955_v17 = vmul.f32 %v6722_v54, %v6488_v4 }
  0xc0   :  { %v192_v40 = vadd.f32 %v189_v26, %v184_v24  ;;  %v889_v24 = vstv %s6724_s24  ;;  %s5451_s24 = sld [smem:[#allocation6 + $0x30]] }
  0xc1   :  { %v178_v13 = vpop.permute.xlu1 %177  ;;  %v6680_v15 = vpop.permute.xlu0 %242 }
  0xc2   :  { %v185_v52 = vadd.f32 %v178_v13, %v165_v48  ;;  %v864_v13 = vmul.f32 %v861_v28, %v6513_v16  ;;  %v250_v37 = vadd.f32 %v6680_v15, %v230_v9  ;;  %v891_v15 = vmul.f32 %v6522_v19, %v889_v24 }
  0xc3   :  { %842 = vrot.lane.b32.xlu1 %v835_v10, %s10790_s30  ;;  %776 = vrot.lane.b32.xlu0 %v770_v12, %s10790_s30  ;;  %v166_v10 = vadd.f32 %v163_v62, %v158_v59 }
  0xc4   :  { %v193_v5 = vadd.f32 %v190_v49, %v185_v52 }
  0xc5   :  { %v6693_v29 = vpop.permute.xlu1 %268  ;;  %v6695_v30 = vpop.permute.xlu0 %244 }
  0xc7   :  { %778 = vrot.lane.b32.xlu1 %v771_v21, %s10790_s30  ;;  %688 = vrot.lane.b32.xlu0 %v680_v22, %s10790_s30  ;;  %v257_v21 = vadd.f32 %v254_v7, %v249_v6 }
  0xc9   :  { %v204_v44 = vpop.permute.xlu1 %203  ;;  %v180_v45 = vpop.permute.xlu0 %179  ;;  %v277_v32 = vadd.f32 %v6693_v29, %v257_v21  ;;  %v255_v29 = vmul.f32 %v6727_v55, %v6499_v11 }
  0xca   :  { %v212_v50 = vadd.f32 %v204_v44, %v192_v40  ;;  %v186_v22 = vadd.f32 %v180_v45, %v166_v10  ;;  %v6782_v45 = vstv %s6746_s25  ;;  %s5428_s25 = sld [smem:[#allocation6 + $0x1c]] }
  0xcb   :  { %868 = vrot.lane.b32.xlu1 %v862_v35, %s10790_s30  ;;  %844 = vrot.lane.b32.xlu0 %v836_v36, %s10790_s30  ;;  %v282_v35 = vmul.f32 %v6508_v14, %v6752_v56  ;;  %v890_v36 = vmul.f32 %v6508_v14, %v889_v24  ;;  %v258_v49 = vadd.f32 %v255_v29, %v250_v37 }
  0xcc   :  { %v217_v53 = vadd.f32 %v6710_v42, %v212_v50  ;;  %v194_v38 = vadd.f32 %v191_v20, %v186_v22  ;;  %v231_v50 = vmul.f32 %v6699_v34, %v6473_v0  ;;  %v311_v22 = vmul.f32 %v6553_v33, %v6782_v45 }
  0xcd   :  { %v6729_v57 = vpop.permute.xlu1 %360  ;;  %v6731_v58 = vpop.permute.xlu0 %270  ;;  %v285_v47 = vadd.f32 %v282_v35, %v277_v32 }
  0xce   :  { %v220_v61 = vmax.f32 %v217_v53, 0.0  ;;  %v310_v53 = vmul.f32 %v6535_v25, %v6782_v45  ;;  %v251_v6 = vadd.f32 %v6695_v30, %v231_v50 }
  0xcf   :  { %804 = vrot.lane.b32.xlu1 %v798_v43, %s10790_s30  ;;  %780 = vrot.lane.b32.xlu0 %v772_v46, %s10790_s30  ;;  %v800_v43 = vmul.f32 %v6566_v39, %v6708_v41  ;;  %v6792_v46 = vstv %s6759_s4  ;;  %v283_v41 = vmul.f32 %v6522_v19, %v6752_v56  ;;  %s5430_s4 = sld [smem:[#allocation6 + $0x1e]] }
  0xd0   :  { %224 = vst.msk [vmem:[#allocation2] sm:$0xff] %vm223_vm0, %v220_v61  ;;  %v278_v61 = vadd.f32 %v6731_v58, %v258_v49  ;;  %v256_v58 = vmul.f32 %v6727_v55, %v6513_v16  ;;  %v892_v55 = vmul.f32 %v6540_v27, %v889_v24  ;;  %v284_v24 = vmul.f32 %v6540_v27, %v6752_v56 }
  0xd1   :  { %v6744_v8 = vpop.permute.xlu1 %272  ;;  %v206_v60 = vpop.permute.xlu0 %205 }
  0xd2   :  { %v213_v12 = vadd.f32 %v206_v60, %v193_v5  ;;  %v917_v5 = vstv %s6779_s27  ;;  %v6820_v60 = vstv %s5414_s28  ;;  %s5432_s27 = sld [smem:[#allocation10 + $0x3]]  ;;  %s5435_s28 = sld [smem:[#allocation6 + $0x22]] }
  0xd3   :  { %960 = vrot.lane.b32.xlu1 %v954_v63, %s10790_s30  ;;  %870 = vrot.lane.b32.xlu0 %v863_v2, %s10790_s30  ;;  %v6807_v63 = vstv %s6768_s26  ;;  %v956_v2 = vmul.f32 %v6722_v54, %v6473_v0  ;;  %v918_v30 = vmul.f32 %v6535_v25, %v917_v5  ;;  %s5433_s26 = sld [smem:[#allocation6 + $0x20]] }
  0xd4   :  { %v218_v23 = vadd.f32 %v6710_v42, %v213_v12  ;;  %v286_v12 = vadd.f32 %v283_v41, %v278_v61  ;;  %v349_v54 = vmul.f32 %v6807_v63, %v6478_v1  ;;  %v1212_v61 = vld [vmem:[%s10777_s5 + $0x8] sm:$0xff] }
  0xd5   :  { %v6763_v26 = vpop.permute.xlu1 %362  ;;  %v297_v31 = vpop.permute.xlu0 %296 }
  0xd6   :  { %v221_v28 = vmax.f32 %v218_v23, 0.0  ;;  %v305_v51 = vadd.f32 %v297_v31, %v285_v47  ;;  %v6832_v23 = vstv %s6797_s29  ;;  %v369_v37 = vadd.f32 %v6729_v57, %v349_v54  ;;  %s5464_s29 = sld [smem:[#allocation6 + $0x3c]] }
  0xd7   :  { %872 = vrot.lane.b32.xlu1 %v864_v13, %s10790_s30  ;;  %806 = vrot.lane.b32.xlu0 %v799_v18, %s10790_s30  ;;  %v259_v18 = vadd.f32 %v256_v58, %v251_v6  ;;  %v374_v29 = vmul.f32 %v6832_v23, %v6483_v3  ;;  %v6860_v57 = vstv %s5419_s16  ;;  %v920_v58 = vmul.f32 %v6566_v39, %v917_v5  ;;  %s5437_s16 = sld [smem:[#allocation6 + $0x24]] }
  0xd8   :  { %225 = vst.msk [vmem:[#allocation2 + $0x8] sm:$0xff] %vm223_vm0, %v221_v28  ;;  %v313_v7 = vadd.f32 %v310_v53, %v305_v51  ;;  %v1211_v53 = vld [vmem:[%s10777_s5] sm:$0xff]  ;;  %v6891_v54 = vstv %s6854_s17  ;;  %s5446_s17 = sld [smem:[#allocation6 + $0x2c]] }
  0xd9   :  { %v299_v40 = vpop.permute.xlu1 %298  ;;  %v208_v44 = vpop.permute.xlu0 %207  ;;  %v279_v28 = vadd.f32 %v6744_v8, %v259_v18 }
  0xda   :  { %v214_v48 = vadd.f32 %v208_v44, %v194_v38  ;;  %v306_v20 = vadd.f32 %v299_v40, %v286_v12  ;;  %v1009_v38 = vstv %s5465_s1  ;;  %s7191_s1 = sld [smem:[#allocation6 + $0x3e]] }
  0xdb   :  { %962 = vrot.lane.b32.xlu1 %v955_v17, %s10790_s30  ;;  %896 = vrot.lane.b32.xlu0 %v890_v36, %s10790_s30  ;;  %v919_v17 = vmul.f32 %v6553_v33, %v917_v5  ;;  %v983_v36 = vmul.f32 %v6792_v46, %v6499_v11  ;;  %v287_v44 = vadd.f32 %v284_v24, %v279_v28 }
  0xdc   :  { %v219_v52 = vadd.f32 %v6710_v42, %v214_v48  ;;  %v982_v42 = vmul.f32 %v6792_v46, %v6483_v3  ;;  %v314_v8 = vadd.f32 %v311_v22, %v306_v20  ;;  %v350_v48 = vmul.f32 %v6807_v63, %v6488_v4 }
  0xdd   :  { %v6799_v34 = vpop.permute.xlu1 %388  ;;  %v6801_v59 = vpop.permute.xlu0 %364  ;;  %v1010_v50 = vmul.f32 %v6508_v14, %v1009_v38  ;;  %v1011_v6 = vmul.f32 %v6522_v19, %v1009_v38  ;;  %v1012_v20 = vmul.f32 %v6540_v27, %v1009_v38  ;;  %v6918_v38 = vstv %s6884_s22  ;;  %s5448_s22 = sld [smem:[#allocation6 + $0x2e]] }
  0xde   :  { %v222_v62 = vmax.f32 %v219_v52, 0.0  ;;  %v312_v52 = vmul.f32 %v6566_v39, %v6782_v45  ;;  %v402_v45 = vmul.f32 %v6508_v14, %v6860_v57 }
  0xdf   :  { %898 = vrot.lane.b32.xlu1 %v891_v15, %s10790_s30  ;;  %808 = vrot.lane.b32.xlu0 %v800_v43, %s10790_s30  ;;  %v984_v15 = vmul.f32 %v6792_v46, %v6513_v16  ;;  %v377_v43 = vadd.f32 %v374_v29, %v369_v37  ;;  %v6083_v46 = vpack.c.bf16 %v1212_v61, %v1211_v53 }
  0xe0   :  { %226 = vst.msk [vmem:[#allocation2 + $0x10] sm:$0xff] %vm223_vm0, %v222_v62 }
  0xe1   :  { %v325_v9 = vpop.permute.xlu1 %324  ;;  %v301_v10 = vpop.permute.xlu0 %300  ;;  %6084 = vmatprep.subr.bf16.mxu0 %v6083_v46 }
  0xe2   :  { %v333_v13 = vadd.f32 %v325_v9, %v313_v7  ;;  %v307_v49 = vadd.f32 %v301_v10, %v287_v44  ;;  %v370_v7 = vadd.f32 %v6763_v26, %v350_v48  ;;  %v1037_v10 = vstv %s6850_s3  ;;  %6086 = vmatpush3.bf16.msra.mxu0 %v6083_v46  ;;  %v1213_v26 = vld [vmem:[%s10777_s5 + $0x10] sm:$0x3f]  ;;  %s5426_s5 = sld [smem:[#allocation6 + $0x1a]]  ;;  %s7395_s3 = sld [smem:[#allocation12 + $0x41]] }
  0xe3   :  { %988 = vrot.lane.b32.xlu1 %v982_v42, %s10790_s30  ;;  %964 = vrot.lane.b32.xlu0 %v956_v2, %s10790_s30  ;;  %v397_v42 = vadd.f32 %v6799_v34, %v377_v43  ;;  %v375_v34 = vmul.f32 %v6832_v23, %v6499_v11  ;;  %v1038_v18 = vmul.f32 %v6535_v25, %v1037_v10  ;;  %v6924_v44 = vstv %s6893_s2  ;;  %s5442_s2 = sld [smem:[#allocation6 + $0x28]] }
  0xe4   :  { %v338_v21 = vadd.f32 %v6820_v60, %v333_v13  ;;  %v315_v9 = vadd.f32 %v312_v52, %v307_v49  ;;  %5912 = vmatprep.subr.msk.mxu0 %vm1287_vm1, %v1213_v26  ;;  %v1039_v29 = vmul.f32 %v6553_v33, %v1037_v10  ;;  %v469_v43 = vmul.f32 %v6918_v38, %v6478_v1 }
  0xe5   :  { %v6834_v31 = vpop.permute.xlu1 %480  ;;  %v6836_v32 = vpop.permute.xlu0 %390  ;;  %v405_v5 = vadd.f32 %v402_v45, %v397_v42  ;;  %v404_v46 = vmul.f32 %v6540_v27, %v6860_v57  ;;  %v6940_v42 = vld [vmem:[#allocation2 + $0x8] sm:$0xff] }
  0xe6   :  { %v341_v35 = vmax.f32 %v338_v21, 0.0  ;;  %v378_v21 = vadd.f32 %v375_v34, %v370_v7  ;;  %5913 = vmatpush3.msk.msra.mxu0 %vm1287_vm1, %v1213_v26  ;;  %v489_v45 = vadd.f32 %v6834_v31, %v469_v43  ;;  %vm5034_vm1 = vcmask 156792  }
  0xe7   :  { %924 = vrot.lane.b32.xlu1 %v918_v30, %s10790_s30  ;;  %900 = vrot.lane.b32.xlu0 %v892_v55, %s10790_s30  ;;  %v351_v55 = vmul.f32 %v6807_v63, %v6473_v0 }
  0xe8   :  { %344 = vst.msk [vmem:[#allocation2 + $0x18] sm:$0xff] %vm223_vm0, %v341_v35  ;;  %v430_v35 = vmul.f32 %v6535_v25, %v6891_v54  ;;  %v6933_v52 = vstv %s5426_s5  ;;  %s5441_s5 = sld [smem:[#allocation10 + $0x4]] }
  0xe9   :  { %v6852_v56 = vpop.permute.xlu1 %392  ;;  %v327_v40 = vpop.permute.xlu0 %326 }
  0xea   :  { %v334_v47 = vadd.f32 %v327_v40, %v314_v8  ;;  %v371_v8 = vadd.f32 %v6801_v59, %v351_v55  ;;  %v376_v40 = vmul.f32 %v6832_v23, %v6513_v16 }
  0xeb   :  { %926 = vrot.lane.b32.xlu1 %v919_v17, %s10790_s30  ;;  %990 = vrot.lane.b32.xlu0 %v983_v36, %s10790_s30  ;;  %v398_v17 = vadd.f32 %v6836_v32, %v378_v21  ;;  %v403_v36 = vmul.f32 %v6522_v19, %v6860_v57 }
  0xec   :  { %v339_v51 = vadd.f32 %v6820_v60, %v334_v47  ;;  %v379_v59 = vadd.f32 %v376_v40, %v371_v8 }
  0xed   :  { %v6874_v41 = vpop.permute.xlu1 %482  ;;  %v417_v62 = vpop.permute.xlu0 %416 }
  0xee   :  { %v342_v2 = vmax.f32 %v339_v51, 0.0  ;;  %v425_v22 = vadd.f32 %v417_v62, %v405_v5  ;;  %v431_v51 = vmul.f32 %v6553_v33, %v6891_v54  ;;  %v399_v62 = vadd.f32 %v6852_v56, %v379_v59 }
  0xef   :  { %1016 = vrot.lane.b32.xlu1 %v1010_v50, %s10790_s30  ;;  %992 = vrot.lane.b32.xlu0 %v984_v15, %s10790_s30  ;;  %v406_v50 = vadd.f32 %v403_v36, %v398_v17  ;;  %v549_v17 = vstv %s5430_s4  ;;  %v496_v59 = vmul.f32 %v6933_v52, %v6513_v16  ;;  %s5460_s4 = sld [smem:[#allocation6 + $0x38]] }
  0xf0   :  { %345 = vst.msk [vmem:[#allocation2 + $0x20] sm:$0xff] %vm223_vm0, %v342_v2  ;;  %v433_v32 = vadd.f32 %v430_v35, %v425_v22  ;;  %v6942_v2 = vld [vmem:[#allocation2] sm:$0xff]  ;;  %v407_v7 = vadd.f32 %v404_v46, %v399_v62  ;;  %v550_v40 = vmul.f32 %v6535_v25, %v549_v17  ;;  %v7011_v46 = vstv %s5435_s28  ;;  %s5444_s28 = sld [smem:[#allocation6 + $0x2a]] }
  0xf1   :  { %v419_v12 = vpop.permute.xlu1 %418  ;;  %v329_v13 = vpop.permute.xlu0 %328 }
  0xf2   :  { %v335_v30 = vadd.f32 %v329_v13, %v315_v9  ;;  %v426_v49 = vadd.f32 %v419_v12, %v406_v50  ;;  %v6954_v9 = vld [vmem:[#allocation2 + $0x18] sm:$0xff]  ;;  %v470_v12 = vmul.f32 %v6918_v38, %v6488_v4 }
  0xf3   :  { %1018 = vrot.lane.b32.xlu1 %v1011_v6, %s10790_s30  ;;  %928 = vrot.lane.b32.xlu0 %v920_v58, %s10790_s30  ;;  %v494_v6 = vmul.f32 %v6933_v52, %v6483_v3  ;;  %v521_v3 = vstv %s5428_s25  ;;  %s5455_s25 = sld [smem:[#allocation6 + $0x34]] }
  0xf4   :  { %v340_v28 = vadd.f32 %v6820_v60, %v335_v30  ;;  %v1040_v60 = vmul.f32 %v6566_v39, %v1037_v10  ;;  %v434_v56 = vadd.f32 %v431_v51, %v426_v49  ;;  %v6956_v10 = vld [vmem:[#allocation2 + $0x10] sm:$0xff]  ;;  %v432_v30 = vmul.f32 %v6566_v39, %v6891_v54 }
  0xf5   :  { %v509_v63 = vpop.permute.xlu1 %508  ;;  %v6907_v24 = vpop.permute.xlu0 %484  ;;  %v497_v31 = vadd.f32 %v494_v6, %v489_v45  ;;  %v522_v4 = vmul.f32 %v6508_v14, %v521_v3  ;;  %v495_v54 = vmul.f32 %v6933_v52, %v6499_v11  ;;  %v523_v50 = vmul.f32 %v6522_v19, %v521_v3 }
  0xf6   :  { %v343_v37 = vmax.f32 %v340_v28, 0.0  ;;  %v490_v28 = vadd.f32 %v6874_v41, %v470_v12 }
  0xf7   :  { %1044 = vrot.lane.b32.xlu1 %v1038_v18, %s10790_s30  ;;  %1020 = vrot.lane.b32.xlu0 %v1012_v20, %s10790_s30  ;;  %v517_v18 = vadd.f32 %v509_v63, %v497_v31  ;;  %v6972_v22 = vld [vmem:[#allocation2 + $0x20] sm:$0xff] }
  0xf8   :  { %346 = vst.msk [vmem:[#allocation2 + $0x28] sm:$0xff] %vm223_vm0, %v343_v37  ;;  %v498_v41 = vadd.f32 %v495_v54, %v490_v28  ;;  %v7023_v31 = vld [vmem:[%s10772_s0 + $0x1] sm:$0xff]  ;;  %v552_v28 = vmul.f32 %v6566_v39, %v549_v17  ;;  %v7057_v39 = vld [vmem:[%s10772_s0 + $0x9] sm:$0xff] }
  0xf9   :  { %v445_v47 = vpop.permute.xlu1 %444  ;;  %v421_v48 = vpop.permute.xlu0 %420  ;;  %v525_v36 = vadd.f32 %v522_v4, %v517_v18 }
  0xfa   :  { %v453_v15 = vadd.f32 %v445_v47, %v433_v32  ;;  %v427_v13 = vadd.f32 %v421_v48, %v407_v7  ;;  %v524_v7 = vmul.f32 %v6540_v27, %v521_v3 }
  0xfb   :  { %1048 = vrot.lane.b32.xlu1 %v1040_v60, %s10790_s30  ;;  %1046 = vrot.lane.b32.xlu0 %v1039_v29, %s10790_s30  ;;  %v471_v29 = vmul.f32 %v6918_v38, %v6473_v0  ;;  %v6996_v38 = vstv %s5433_s26  ;;  %s5457_s26 = sld [smem:[#allocation6 + $0x36]] }
  0xfc   :  { %v458_v23 = vadd.f32 %v6924_v44, %v453_v15  ;;  %v435_v35 = vadd.f32 %v432_v30, %v427_v13 }
  0xfd   :  { %v6935_v53 = vpop.permute.xlu1 %600  ;;  %v511_v61 = vpop.permute.xlu0 %510  ;;  %v491_v0 = vadd.f32 %v6907_v24, %v471_v29  ;;  %v7006_v24 = vld [vmem:[%s10772_s0] sm:$0xff] }
  0xfe   :  { %v461_v1 = vmax.f32 %v458_v23, 0.0  ;;  %v518_v48 = vadd.f32 %v511_v61, %v498_v41  ;;  %v589_v61 = vmul.f32 %v7006_v24, %v6996_v38 }
  0xff   :  { %1117 = vrot.lane.b32.xlu1 %v6940_v42, %s10790_s30  ;;  %1115 = vrot.lane.b32.xlu0 %v6942_v2, %s10790_s30  ;;  %v6970_v21 = vld [vmem:[#allocation2 + $0x28] sm:$0xff]  ;;  %v499_v16 = vadd.f32 %v496_v59, %v491_v0 }
 0x100   :  { %464 = vst.msk [vmem:[#allocation2 + $0x30] sm:$0xff] %vm223_vm0, %v461_v1  ;;  %v526_v19 = vadd.f32 %v523_v50, %v518_v48  ;;  %v551_v1 = vmul.f32 %v6553_v33, %v549_v17  ;;  %v609_v12 = vadd.f32 %v6935_v53, %v589_v61  ;;  %v614_v33 = vmul.f32 %v7023_v31, %v7011_v46  ;;  %v7067_v50 = vld [vmem:[%s10772_s0 + $0x10] sm:$0xff] }
 0x101   :  { %v6952_v58 = vpop.permute.xlu1 %512  ;;  %v447_v57 = vpop.permute.xlu0 %446  ;;  %v615_v17 = vmul.f32 %v7057_v39, %v7011_v46 }
 0x102   :  { %v454_v34 = vadd.f32 %v447_v57, %v434_v56  ;;  %v519_v56 = vadd.f32 %v6952_v58, %v499_v16  ;;  %v617_v18 = vadd.f32 %v614_v33, %v609_v12  ;;  %v7082_v16 = vld [vmem:[%s10772_s0 + $0x28] sm:$0xff] }
 0x103   :  { %1121 = vrot.lane.b32.xlu1 %v6954_v9, %s10790_s30  ;;  %1119 = vrot.lane.b32.xlu0 %v6956_v10, %s10790_s30 }
 0x104   :  { %v459_v5 = vadd.f32 %v6924_v44, %v454_v34  ;;  %v527_v3 = vadd.f32 %v524_v7, %v519_v56  ;;  %v7092_v56 = vld [vmem:[%s10772_s0 + $0x11] sm:$0xff]  ;;  %v697_v7 = vstv %s5441_s5  ;;  %s5453_s5 = sld [smem:[#allocation6 + $0x32]] }
 0x105   :  { %v6967_v26 = vpop.permute.xlu1 %602  ;;  %v537_v55 = vpop.permute.xlu0 %536 }
 0x106   :  { %v462_v20 = vmax.f32 %v459_v5, 0.0  ;;  %v545_v8 = vadd.f32 %v537_v55, %v525_v36  ;;  %v7035_v5 = vld [vmem:[%s10772_s0 + $0x8] sm:$0xff]  ;;  %v7039_v55 = vstv %s5437_s16  ;;  %v7047_v36 = vld [vmem:[%s10772_s0 + $0x20] sm:$0xff]  ;;  %s5468_s16 = sld [smem:[#allocation10 + $0x7]] }
 0x107   :  { %1125 = vrot.lane.b32.xlu1 %v6970_v21, %s10790_s30  ;;  %1123 = vrot.lane.b32.xlu0 %v6972_v22, %s10790_s30  ;;  %v6982_v60 = vld [vmem:[#allocation2 + $0x30] sm:$0xff]  ;;  %v590_v30 = vmul.f32 %v7035_v5, %v6996_v38 }
 0x108   :  { %465 = vst.msk [vmem:[#allocation2 + $0x38] sm:$0xff] %vm223_vm0, %v462_v20  ;;  %v553_v25 = vadd.f32 %v550_v40, %v545_v8 }
 0x109   :  { %v539_v14 = vpop.permute.xlu1 %538  ;;  %v449_v63 = vpop.permute.xlu0 %448  ;;  %v610_v41 = vadd.f32 %v6967_v26, %v590_v30 }
 0x10a   :  { %v455_v37 = vadd.f32 %v449_v63, %v435_v35  ;;  %v546_v52 = vadd.f32 %v539_v14, %v526_v19 }
 0x10b   :  { %1127 = vrot.lane.b32.xlu0 %v6982_v60, %s10790_s30  ;;  %v618_v0 = vadd.f32 %v615_v17, %v610_v41 }
 0x10c   :  { %v460_v11 = vadd.f32 %v6924_v44, %v455_v37  ;;  %v577_v44 = vstv %s5432_s27  ;;  %v554_v58 = vadd.f32 %v551_v1, %v546_v52  ;;  %v642_v37 = vmul.f32 %v7047_v36, %v7039_v55  ;;  %s5462_s27 = sld [smem:[#allocation6 + $0x3a]] }
 0x10d   :  { %v629_v32 = vpop.permute.xlu1 %628  ;;  %v6990_v47 = vpop.permute.xlu0 %604  ;;  %v708_v1 = vstv %s5442_s2  ;;  %s7433_s2 = sld [smem:[#allocation12 + $0xa1]] }
 0x10e   :  { %v463_v15 = vmax.f32 %v460_v11, 0.0  ;;  %v637_v14 = vadd.f32 %v629_v32, %v617_v18  ;;  %v669_v32 = vstv %s5439_s18  ;;  %s7569_s18 = sld [smem:[#allocation12 + $0x85]] }
 0x10f   :  { %v6993_v43 = vld [vmem:[#allocation2 + $0x38] sm:$0xff] }
 0x110   :  { %466 = vst.msk [vmem:[#allocation2 + $0x40] sm:$0xff] %vm223_vm0, %v463_v15  ;;  %1129 = vrot.lane.b32.xlu1 %v6993_v43, %s10790_s30  ;;  %v645_v26 = vadd.f32 %v642_v37, %v637_v14  ;;  %v591_v15 = vmul.f32 %v7067_v50, %v6996_v38  ;;  %v643_v38 = vmul.f32 %v7082_v16, %v7039_v55 }
 0x111   :  { %v565_v49 = vpop.permute.xlu1 %564  ;;  %v541_v23 = vpop.permute.xlu0 %540 }
 0x112   :  { %v573_v51 = vadd.f32 %v565_v49, %v553_v25  ;;  %v547_v20 = vadd.f32 %v541_v23, %v527_v3  ;;  %v7074_v49 = vld [vmem:[%s10772_s0 + $0x21] sm:$0xff] }
 0x113   :  { %v670_v23 = vmul.f32 %v7074_v49, %v669_v32 }
 0x114   :  { %v578_v62 = vadd.f32 %v577_v44, %v573_v51  ;;  %v555_v8 = vadd.f32 %v552_v28, %v547_v20  ;;  %v733_v20 = vstv %s5444_s28  ;;  %s5459_s28 = sld [smem:[#allocation10 + $0x6]] }
 0x115   :  { %v7013_v45 = vpop.permute.xlu1 %720  ;;  %v631_v6 = vpop.permute.xlu0 %630 }
 0x116   :  { %v581_v57 = vmax.f32 %v578_v62, 0.0  ;;  %v638_v61 = vadd.f32 %v631_v6, %v618_v0  ;;  %v611_v62 = vadd.f32 %v6990_v47, %v591_v15  ;;  %v616_v6 = vmul.f32 %v7092_v56, %v7011_v46  ;;  %v7103_v46 = vld [vmem:[%s10772_s0 + $0x29] sm:$0xff] }
 0x117   :  { %v7017_v34 = vld [vmem:[#allocation2 + $0x40] sm:$0xff]  ;;  %v671_v18 = vmul.f32 %v7103_v46, %v669_v32  ;;  %v710_v15 = vmul.f32 %v7035_v5, %v708_v1 }
 0x118   :  { %584 = vst.msk [vmem:[#allocation2 + $0x48] sm:$0xff] %vm223_vm0, %v581_v57  ;;  %1131 = vrot.lane.b32.xlu0 %v7017_v34, %s10790_s30  ;;  %v619_v3 = vadd.f32 %v616_v6, %v611_v62 }
 0x119   :  { %v7030_v13 = vpop.permute.xlu1 %632  ;;  %v567_v27 = vpop.permute.xlu0 %566 }
 0x11a   :  { %v574_v53 = vadd.f32 %v567_v27, %v554_v58  ;;  %v646_v58 = vadd.f32 %v643_v38, %v638_v61  ;;  %v709_v27 = vmul.f32 %v7006_v24, %v708_v1 }
 0x11c   :  { %v579_v4 = vadd.f32 %v577_v44, %v574_v53  ;;  %v729_v17 = vadd.f32 %v7013_v45, %v709_v27  ;;  %v7127_v45 = vld [vmem:[%s10772_s0 + $0x31] sm:$0xff]  ;;  %v789_v27 = vstv %s5448_s22  ;;  %s7420_s22 = sld [smem:[#allocation12 + $0x81]] }
 0x11d   :  { %v7042_v54 = vpop.permute.xlu1 %722  ;;  %v657_v35 = vpop.permute.xlu0 %656 }
 0x11e   :  { %v582_v63 = vmax.f32 %v579_v4, 0.0  ;;  %v665_v59 = vadd.f32 %v657_v35, %v645_v26  ;;  %v639_v35 = vadd.f32 %v7030_v13, %v619_v3 }
 0x11f   :  { %v7051_v29 = vld [vmem:[#allocation2 + $0x48] sm:$0xff] }
 0x120   :  { %585 = vst.msk [vmem:[#allocation2 + $0x50] sm:$0xff] %vm223_vm0, %v582_v63  ;;  %1133 = vrot.lane.b32.xlu1 %v7051_v29, %s10790_s30  ;;  %v673_v57 = vadd.f32 %v670_v23, %v665_v59  ;;  %v7112_v63 = vld [vmem:[%s10772_s0 + $0x30] sm:$0xff]  ;;  %v672_v23 = vmul.f32 %v7127_v45, %v669_v32  ;;  %s5450_s0 = sld [smem:[#allocation10 + $0x5]] }
 0x121   :  { %v659_v11 = vpop.permute.xlu1 %658  ;;  %v569_v40 = vpop.permute.xlu0 %568  ;;  %v644_v37 = vmul.f32 %v7112_v63, %v7039_v55  ;;  %v761_v55 = vstv %s5446_s17  ;;  %s7397_s17 = sld [smem:[#allocation12 + $0x3]] }
 0x122   :  { %v575_v48 = vadd.f32 %v569_v40, %v555_v8  ;;  %v666_v53 = vadd.f32 %v659_v11, %v646_v58  ;;  %v734_v8 = vmul.f32 %v7023_v31, %v733_v20  ;;  %v762_v6 = vmul.f32 %v7047_v36, %v761_v55 }
 0x123   :  { %v647_v26 = vadd.f32 %v644_v37, %v639_v35  ;;  %v790_v35 = vmul.f32 %v7074_v49, %v789_v27 }
 0x124   :  { %v580_v25 = vadd.f32 %v577_v44, %v575_v48  ;;  %v674_v13 = vadd.f32 %v671_v18, %v666_v53  ;;  %v737_v0 = vadd.f32 %v734_v8, %v729_v17  ;;  %v711_v53 = vmul.f32 %v7067_v50, %v708_v1 }
 0x125   :  { %v749_v19 = vpop.permute.xlu1 %748  ;;  %v7077_v51 = vpop.permute.xlu0 %724  ;;  %v763_v8 = vmul.f32 %v7082_v16, %v761_v55  ;;  %v736_v1 = vmul.f32 %v7092_v56, %v733_v20 }
 0x126   :  { %v583_v44 = vmax.f32 %v580_v25, 0.0 }
 0x127   :  { %v7086_v52 = vld [vmem:[#allocation2 + $0x50] sm:$0xff] }
 0x128   :  { %586 = vst.msk [vmem:[#allocation2 + $0x58] sm:$0xff] %vm223_vm0, %v583_v44  ;;  %1135 = vrot.lane.b32.xlu0 %v7086_v52, %s10790_s30  ;;  %v757_v44 = vadd.f32 %v749_v19, %v737_v0 }
 0x129   :  { %v685_v12 = vpop.permute.xlu1 %684  ;;  %v661_v33 = vpop.permute.xlu0 %660 }
 0x12a   :  { %v693_v47 = vadd.f32 %v685_v12, %v673_v57  ;;  %v667_v59 = vadd.f32 %v661_v33, %v647_v26  ;;  %v730_v12 = vadd.f32 %v7042_v54, %v710_v15  ;;  %v735_v33 = vmul.f32 %v7057_v39, %v733_v20 }
 0x12b   :  { %v765_v19 = vadd.f32 %v762_v6, %v757_v44  ;;  %v731_v26 = vadd.f32 %v7077_v51, %v711_v53  ;;  %v7152_v15 = vstv %s5450_s0  ;;  %v791_v20 = vmul.f32 %v7103_v46, %v789_v27  ;;  %s7449_s0 = sld [smem:[#allocation12 + $0x63]] }
 0x12c   :  { %v698_v30 = vadd.f32 %v697_v7, %v693_v47  ;;  %v675_v32 = vadd.f32 %v672_v23, %v667_v59 }
 0x12d   :  { %v7106_v4 = vpop.permute.xlu1 %840  ;;  %v751_v28 = vpop.permute.xlu0 %750 }
 0x12e   :  { %v701_v14 = vmax.f32 %v698_v30, 0.0  ;;  %v738_v30 = vadd.f32 %v735_v33, %v730_v12 }
 0x12f   :  { %v7116_v41 = vld [vmem:[#allocation2 + $0x58] sm:$0xff] }
 0x130   :  { %704 = vst.msk [vmem:[#allocation2 + $0x60] sm:$0xff] %vm223_vm0, %v701_v14  ;;  %1137 = vrot.lane.b32.xlu1 %v7116_v41, %s10790_s30  ;;  %v758_v17 = vadd.f32 %v751_v28, %v738_v30 }
 0x131   :  { %v753_v11 = vpop.permute.xlu1 %752  ;;  %v687_v40 = vpop.permute.xlu0 %686 }
 0x132   :  { %v694_v48 = vadd.f32 %v687_v40, %v674_v13  ;;  %v766_v59 = vadd.f32 %v763_v8, %v758_v17  ;;  %v881_v17 = vstv %s5455_s25  ;;  %s7468_s25 = sld [smem:[#allocation12 + $0x83]] }
 0x134   :  { %v699_v25 = vadd.f32 %v697_v7, %v694_v48  ;;  %v828_v48 = vstv %s5451_s24  ;;  %s7447_s24 = sld [smem:[#allocation12 + $0xc1]] }
 0x135   :  { %v7130_v61 = vpop.permute.xlu1 %842  ;;  %v777_v38 = vpop.permute.xlu0 %776  ;;  %v829_v23 = vmul.f32 %v7006_v24, %v828_v48  ;;  %v830_v53 = vmul.f32 %v7035_v5, %v828_v48 }
 0x136   :  { %v702_v62 = vmax.f32 %v699_v25, 0.0  ;;  %v785_v18 = vadd.f32 %v777_v38, %v765_v19  ;;  %v739_v38 = vadd.f32 %v736_v1, %v731_v26 }
 0x137   :  { %v7133_v57 = vld [vmem:[#allocation2 + $0x60] sm:$0xff]  ;;  %v850_v8 = vadd.f32 %v7130_v61, %v830_v53 }
 0x138   :  { %705 = vst.msk [vmem:[#allocation2 + $0x68] sm:$0xff] %vm223_vm0, %v702_v62  ;;  %1139 = vrot.lane.b32.xlu0 %v7133_v57, %s10790_s30  ;;  %v853_v62 = vstv %s5453_s5  ;;  %v759_v33 = vadd.f32 %v753_v11, %v739_v38  ;;  %v831_v38 = vmul.f32 %v7067_v50, %v828_v48  ;;  %s7457_s5 = sld [smem:[#allocation12 + $0xe1]] }
 0x139   :  { %v779_v58 = vpop.permute.xlu1 %778  ;;  %v689_v47 = vpop.permute.xlu0 %688  ;;  %v854_v30 = vmul.f32 %v7023_v31, %v853_v62 }
 0x13a   :  { %v695_v3 = vadd.f32 %v689_v47, %v675_v32  ;;  %v786_v51 = vadd.f32 %v779_v58, %v766_v59  ;;  %v764_v47 = vmul.f32 %v7112_v63, %v761_v55 }
 0x13c   :  { %v700_v54 = vadd.f32 %v697_v7, %v695_v3  ;;  %v793_v7 = vadd.f32 %v790_v35, %v785_v18  ;;  %v849_v3 = vadd.f32 %v7106_v4, %v829_v23  ;;  %v794_v58 = vadd.f32 %v791_v20, %v786_v51 }
 0x13d   :  { %v869_v14 = vpop.permute.xlu1 %868  ;;  %v7142_v37 = vpop.permute.xlu0 %844  ;;  %v855_v35 = vmul.f32 %v7057_v39, %v853_v62  ;;  %v792_v4 = vmul.f32 %v7127_v45, %v789_v27  ;;  %v882_v23 = vmul.f32 %v7047_v36, %v881_v17 }
 0x13e   :  { %v703_v13 = vmax.f32 %v700_v54, 0.0  ;;  %v767_v54 = vadd.f32 %v764_v47, %v759_v33  ;;  %v909_v33 = vstv %s5457_s26  ;;  %v883_v47 = vmul.f32 %v7082_v16, %v881_v17  ;;  %s7493_s26 = sld [smem:[#allocation12 + $0xc3]] }
 0x13f   :  { %v7145_v40 = vld [vmem:[#allocation2 + $0x68] sm:$0xff]  ;;  %v858_v20 = vadd.f32 %v855_v35, %v850_v8  ;;  %v851_v48 = vadd.f32 %v7142_v37, %v831_v38 }
 0x140   :  { %706 = vst.msk [vmem:[#allocation2 + $0x70] sm:$0xff] %vm223_vm0, %v703_v13  ;;  %1141 = vrot.lane.b32.xlu1 %v7145_v40, %s10790_s30  ;;  %v857_v13 = vadd.f32 %v854_v30, %v849_v3  ;;  %v856_v30 = vmul.f32 %v7092_v56, %v853_v62  ;;  %v911_v62 = vmul.f32 %v7103_v46, %v909_v33 }
 0x141   :  { %v805_v0 = vpop.permute.xlu1 %804  ;;  %v781_v28 = vpop.permute.xlu0 %780 }
 0x142   :  { %v813_v25 = vadd.f32 %v805_v0, %v793_v7  ;;  %v787_v26 = vadd.f32 %v781_v28, %v767_v54  ;;  %v877_v59 = vadd.f32 %v869_v14, %v857_v13  ;;  %v973_v54 = vstv %s5462_s27  ;;  %s7503_s27 = sld [smem:[#allocation12 + $0xe3]] }
 0x143   :  { %v859_v13 = vadd.f32 %v856_v30, %v851_v48 }
 0x144   :  { %v818_v44 = vadd.f32 %v7152_v15, %v813_v25  ;;  %v795_v61 = vadd.f32 %v792_v4, %v787_v26 }
 0x145   :  { %v961_v6 = vpop.permute.xlu1 %960  ;;  %v871_v12 = vpop.permute.xlu0 %870 }
 0x146   :  { %v821_v32 = vmax.f32 %v818_v44, 0.0  ;;  %v948_v44 = vstv %s5460_s4  ;;  %v878_v14 = vadd.f32 %v871_v12, %v858_v20  ;;  %v1001_v20 = vstv %s5464_s29  ;;  %s7388_s29 = sld [smem:[#allocation12 + $0x1]]  ;;  %s7477_s4 = sld [smem:[#allocation12 + $0xa3]] }
 0x147   :  { %v7158_v19 = vld [vmem:[#allocation2 + $0x70] sm:$0xff]  ;;  %v949_v53 = vmul.f32 %v7006_v24, %v948_v44  ;;  %v950_v26 = vmul.f32 %v7035_v5, %v948_v44  ;;  %v884_v5 = vmul.f32 %v7112_v63, %v881_v17  ;;  %v951_v38 = vmul.f32 %v7067_v50, %v948_v44 }
 0x148   :  { %824 = vst.msk [vmem:[#allocation2 + $0x78] sm:$0xff] %vm223_vm0, %v821_v32  ;;  %1143 = vrot.lane.b32.xlu0 %v7158_v19, %s10790_s30  ;;  %v885_v32 = vadd.f32 %v882_v23, %v877_v59  ;;  %v886_v12 = vadd.f32 %v883_v47, %v878_v14 }
 0x149   :  { %v873_v18 = vpop.permute.xlu1 %872  ;;  %v807_v11 = vpop.permute.xlu0 %806  ;;  %v969_v24 = vadd.f32 %v961_v6, %v949_v53  ;;  %v976_v53 = vmul.f32 %v7092_v56, %v973_v54  ;;  %v1003_v56 = vmul.f32 %v7082_v16, %v1001_v20 }
 0x14a   :  { %v814_v55 = vadd.f32 %v807_v11, %v794_v58 }
 0x14c   :  { %v819_v1 = vadd.f32 %v7152_v15, %v814_v55  ;;  %v910_v55 = vmul.f32 %v7074_v49, %v909_v33 }
 0x14d   :  { %v963_v7 = vpop.permute.xlu1 %962  ;;  %v897_v0 = vpop.permute.xlu0 %896 }
 0x14e   :  { %v822_v25 = vmax.f32 %v819_v1, 0.0  ;;  %v905_v58 = vadd.f32 %v897_v0, %v885_v32  ;;  %v974_v1 = vmul.f32 %v7023_v31, %v973_v54  ;;  %v879_v0 = vadd.f32 %v873_v18, %v859_v13 }
 0x14f   :  { %v7172_v51 = vld [vmem:[#allocation2 + $0x78] sm:$0xff]  ;;  %v1002_v18 = vmul.f32 %v7047_v36, %v1001_v20 }
 0x150   :  { %825 = vst.msk [vmem:[#allocation2 + $0x80] sm:$0xff] %vm223_vm0, %v822_v25  ;;  %1145 = vrot.lane.b32.xlu1 %v7172_v51, %s10790_s30  ;;  %v937_v25 = vstv %s5459_s28  ;;  %v887_v47 = vadd.f32 %v884_v5, %v879_v0  ;;  %s7386_s28 = sld [smem:[#allocation12 + $0x21]] }
 0x151   :  { %v899_v27 = vpop.permute.xlu1 %898  ;;  %v809_v28 = vpop.permute.xlu0 %808 }
 0x152   :  { %v815_v3 = vadd.f32 %v809_v28, %v795_v61  ;;  %v906_v59 = vadd.f32 %v899_v27, %v886_v12  ;;  %v975_v61 = vmul.f32 %v7057_v39, %v973_v54  ;;  %v970_v27 = vadd.f32 %v963_v7, %v950_v26 }
 0x153   :  { %v977_v28 = vadd.f32 %v974_v1, %v969_v24  ;;  %v912_v39 = vmul.f32 %v7127_v45, %v909_v33  ;;  %v1029_v12 = vstv %s7191_s1  ;;  %s7529_s1 = sld [smem:[#allocation12 + $0x45]] }
 0x154   :  { %v820_v11 = vadd.f32 %v7152_v15, %v815_v3  ;;  %v913_v15 = vadd.f32 %v910_v55, %v905_v58  ;;  %v914_v32 = vadd.f32 %v911_v62, %v906_v59  ;;  %v978_v55 = vadd.f32 %v975_v61, %v970_v27 }
 0x155   :  { %v989_v35 = vpop.permute.xlu1 %988  ;;  %v965_v4 = vpop.permute.xlu0 %964  ;;  %v1030_v33 = vmul.f32 %v7074_v49, %v1029_v12  ;;  %v1004_v59 = vmul.f32 %v7112_v63, %v1001_v20  ;;  %v1032_v16 = vmul.f32 %v7127_v45, %v1029_v12  ;;  %v1057_v27 = vstv %s5468_s16  ;;  %s7531_s16 = sld [smem:[#allocation12 + $0x7]] }
 0x156   :  { %v823_v8 = vmax.f32 %v820_v11, 0.0  ;;  %v997_v17 = vadd.f32 %v989_v35, %v977_v28  ;;  %v971_v30 = vadd.f32 %v965_v4, %v951_v38 }
 0x157   :  { %v7185_v37 = vld [vmem:[#allocation2 + $0x80] sm:$0xff] }
 0x158   :  { %826 = vst.msk [vmem:[#allocation2 + $0x88] sm:$0xff] %vm223_vm0, %v823_v8  ;;  %1147 = vrot.lane.b32.xlu0 %v7185_v37, %s10790_s30  ;;  %v1005_v4 = vadd.f32 %v1002_v18, %v997_v17  ;;  %v979_v13 = vadd.f32 %v976_v53, %v971_v30 }
 0x159   :  { %v925_v23 = vpop.permute.xlu1 %924  ;;  %v901_v31 = vpop.permute.xlu0 %900 }
 0x15a   :  { %v933_v6 = vadd.f32 %v925_v23, %v913_v15  ;;  %v907_v7 = vadd.f32 %v901_v31, %v887_v47  ;;  %v1031_v31 = vmul.f32 %v7103_v46, %v1029_v12 }
 0x15c   :  { %v938_v14 = vadd.f32 %v937_v25, %v933_v6  ;;  %v915_v24 = vadd.f32 %v912_v39, %v907_v7 }
 0x15d   :  { %v927_v3 = vpop.permute.xlu1 %926  ;;  %v991_v48 = vpop.permute.xlu0 %990 }
 0x15e   :  { %v941_v58 = vmax.f32 %v938_v14, 0.0  ;;  %v934_v50 = vadd.f32 %v927_v3, %v914_v32  ;;  %v998_v35 = vadd.f32 %v991_v48, %v978_v55 }
 0x15f   :  { %v7198_v44 = vld [vmem:[#allocation2 + $0x88] sm:$0xff] }
 0x160   :  { %944 = vst.msk [vmem:[#allocation2 + $0x90] sm:$0xff] %vm223_vm0, %v941_v58  ;;  %v939_v11 = vadd.f32 %v937_v25, %v934_v50  ;;  %1149 = vrot.lane.b32.xlu1 %v7198_v44, %s10790_s30  ;;  %v1006_v0 = vadd.f32 %v1003_v56, %v998_v35 }
 0x161   :  { %v1017_v36 = vpop.permute.xlu1 %1016  ;;  %v993_v8 = vpop.permute.xlu0 %992 }
 0x162   :  { %v942_v54 = vmax.f32 %v939_v11, 0.0  ;;  %v1025_v26 = vadd.f32 %v1017_v36, %v1005_v4  ;;  %v999_v1 = vadd.f32 %v993_v8, %v979_v13 }
 0x164   :  { %945 = vst.msk [vmem:[#allocation2 + $0x98] sm:$0xff] %vm223_vm0, %v942_v54  ;;  %v1033_v49 = vadd.f32 %v1030_v33, %v1025_v26  ;;  %v1007_v61 = vadd.f32 %v1004_v59, %v999_v1 }
 0x165   :  { %v1019_v15 = vpop.permute.xlu1 %1018  ;;  %v929_v62 = vpop.permute.xlu0 %928 }
 0x166   :  { %v935_v23 = vadd.f32 %v929_v62, %v915_v24  ;;  %v1026_v38 = vadd.f32 %v1019_v15, %v1006_v0 }
 0x167   :  { %v7209_v5 = vld [vmem:[#allocation2 + $0x90] sm:$0xff] }
 0x168   :  { %v940_v6 = vadd.f32 %v937_v25, %v935_v23  ;;  %1151 = vrot.lane.b32.xlu0 %v7209_v5, %s10790_s30  ;;  %v1034_v25 = vadd.f32 %v1031_v31, %v1026_v38 }
 0x169   :  { %v1045_v28 = vpop.permute.xlu1 %1044  ;;  %v1021_v63 = vpop.permute.xlu0 %1020 }
 0x16a   :  { %v943_v20 = vmax.f32 %v940_v6, 0.0  ;;  %v1053_v14 = vadd.f32 %v1045_v28, %v1033_v49  ;;  %v1027_v32 = vadd.f32 %v1021_v63, %v1007_v61 }
 0x16b   :  { %v7215_v47 = vld [vmem:[#allocation2 + $0x98] sm:$0xff] }
 0x16c   :  { %946 = vst.msk [vmem:[#allocation2 + $0xa0] sm:$0xff] %vm223_vm0, %v943_v20  ;;  %v1058_v45 = vadd.f32 %v1057_v27, %v1053_v14  ;;  %1153 = vrot.lane.b32.xlu1 %v7215_v47, %s10790_s30  ;;  %v1035_v46 = vadd.f32 %v1032_v16, %v1027_v32 }
 0x16d   :  { %v1049_v3 = vpop.permute.xlu1 %1048  ;;  %v1047_v48 = vpop.permute.xlu0 %1046 }
 0x16e   :  { %v1061_v18 = vmax.f32 %v1058_v45, 0.0  ;;  %v1055_v53 = vadd.f32 %v1049_v3, %v1035_v46  ;;  %v1054_v17 = vadd.f32 %v1047_v48, %v1034_v25 }
 0x170   :  { %1064 = vst.msk [vmem:[#allocation2 + $0xa8] sm:$0xff] %vm223_vm0, %v1061_v18  ;;  %v1060_v30 = vadd.f32 %v1057_v27, %v1055_v53  ;;  %v1059_v58 = vadd.f32 %v1057_v27, %v1054_v17  ;;  %v10807_v27 = vmov 0.0|0.0  }
 0x171   :  { %v1118_v50 = vpop.permute.xlu1 %1117  ;;  %v1116_v39 = vpop.permute.xlu0 %1115  ;;  %6087 = vmatprep.subr.bf16.mxu1 %v10807_v27 }
 0x172   :  { %v1063_v7 = vmax.f32 %v1060_v30, 0.0  ;;  %v1062_v11 = vmax.f32 %v1059_v58, 0.0  ;;  %v1188_v55 = vmax.f32 %v6940_v42, %v1118_v50  ;;  %v1187_v12 = vmax.f32 %v6942_v2, %v1116_v39 }
 0x173   :  { %v7223_v36 = vld [vmem:[#allocation2 + $0xa0] sm:$0xff] }
 0x174   :  { %1066 = vst.msk [vmem:[#allocation2 + $0xb8] sm:$0xff] %vm223_vm0, %v1063_v7  ;;  %1065 = vst.msk [vmem:[#allocation2 + $0xb0] sm:$0xff] %vm223_vm0, %v1062_v11  ;;  %1155 = vrot.lane.b32.xlu0 %v7223_v36, %s10790_s30  ;;  %5914 = vmatprep.mubr.msk.f32.mxu0 %vm1214_vm2, %v1187_v12  ;;  %vm5028_vm0 = vcmask 115792  }
 0x175   :  { %v1122_v8 = vpop.permute.xlu1 %1121  ;;  %5915 = vmatmul.mubr.msk.f32.vlgmr.msra.gmra.mrb[0].mxu0 %vm1214_vm2, %v1188_v55  ;;  %v1120_v56 = vpop.permute.xlu0 %1119 }
 0x176   :  { %v1190_v54 = vmax.f32 %v6954_v9, %v1122_v8  ;;  %v1189_v42 = vmax.f32 %v6956_v10, %v1120_v56  ;;  %v1597_v56 = vld [vmem:[%s10778_s6 + $0x8] sm:$0xff] }
 0x177   :  { %v7233_v2 = vld [vmem:[#allocation2 + $0xa8] sm:$0xff]  ;;  %5495 = vmatprep.mubr.msk.f32.mxu1 %vm1618_vm4, %v1597_v56 }
 0x178   :  { %1157 = vrot.lane.b32.xlu1 %v7233_v2, %s10790_s30  ;;  %5917 = vmatprep.mubr.msk.f32.mxu0 %vm1214_vm2, %v1189_v42 }
 0x179   :  { %v1126_v35 = vpop.permute.xlu1 %1125  ;;  %5918 = vmatmul.mubr.msk.f32.gmra.mrb[2].mxu0 %vm1214_vm2, %v1190_v54  ;;  %v1124_v4 = vpop.permute.xlu0 %1123 }
 0x17a   :  { %v1192_v13 = vmax.f32 %v6970_v21, %v1126_v35  ;;  %v1191_v33 = vmax.f32 %v6972_v22, %v1124_v4 }
 0x17b   :  { %v1090_v26 = vld [vmem:[#allocation2 + $0xb8] sm:$0xff]  ;;  %v1089_v1 = vld [vmem:[#allocation2 + $0xb0] sm:$0xff] }
 0x17c   :  { %1161 = vrot.lane.b32.xlu1 %v1090_v26, %s10790_s30  ;;  %1159 = vrot.lane.b32.xlu0 %v1089_v1, %s10790_s30 }
 0x17d   :  { %5920 = vmatprep.mubr.msk.f32.mxu0 %vm1214_vm2, %v1191_v33  ;;  %v1128_v9 = vpop.permute.xlu0 %1127 }
 0x17e   :  { %5921 = vmatmul.mubr.msk.f32.gmra.mrb[4].mxu0 %vm1214_vm2, %v1192_v13  ;;  %v1193_v10 = vmax.f32 %v6982_v60, %v1128_v9 }
 0x180   :  { %5923 = vmatprep.mubr.msk.f32.mxu0 %vm1214_vm2, %v1193_v10 }
 0x182   :  { %v1130_v24 = vpop.permute.xlu1 %1129 }
 0x183   :  { %v1194_v21 = vmax.f32 %v6993_v43, %v1130_v24 }
 0x185   :  { %5924 = vmatmul.mubr.msk.f32.gmra.mrb[6].mxu0 %vm1214_vm2, %v1194_v21 }
 0x18a   :  { %v1132_v22 = vpop.permute.xlu0 %1131 }
 0x18b   :  { %v1195_v59 = vmax.f32 %v7017_v34, %v1132_v22 }
 0x18d   :  { %5926 = vmatprep.mubr.msk.f32.mxu0 %vm1214_vm2, %v1195_v59 }
 0x192   :  { %v1134_v15 = vpop.permute.xlu1 %1133 }
 0x193   :  { %v1196_v62 = vmax.f32 %v7051_v29, %v1134_v15 }
 0x195   :  { %5927 = vmatmul.mubr.msk.f32.gmra.mrb[8].mxu0 %vm1214_vm2, %v1196_v62 }
 0x19a   :  { %v1136_v0 = vpop.permute.xlu0 %1135 }
 0x19b   :  { %v1197_v60 = vmax.f32 %v7086_v52, %v1136_v0 }
 0x19d   :  { %5929 = vmatprep.mubr.msk.f32.mxu0 %vm1214_vm2, %v1197_v60 }
 0x1a2   :  { %v1138_v23 = vpop.permute.xlu1 %1137 }
 0x1a3   :  { %v1198_v43 = vmax.f32 %v7116_v41, %v1138_v23 }
 0x1a5   :  { %5930 = vmatmul.mubr.msk.f32.gmra.mrb[10].mxu0 %vm1214_vm2, %v1198_v43 }
 0x1aa   :  { %v1140_v16 = vpop.permute.xlu0 %1139 }
 0x1ab   :  { %v1199_v34 = vmax.f32 %v7133_v57, %v1140_v16 }
 0x1ad   :  { %5932 = vmatprep.mubr.msk.f32.mxu0 %vm1214_vm2, %v1199_v34 }
 0x1b2   :  { %v1142_v31 = vpop.permute.xlu1 %1141 }
 0x1b3   :  { %v1200_v29 = vmax.f32 %v7145_v40, %v1142_v31 }
 0x1b5   :  { %5933 = vmatmul.mubr.msk.f32.gmra.mrb[12].mxu0 %vm1214_vm2, %v1200_v29 }
 0x1ba   :  { %v1144_v38 = vpop.permute.xlu0 %1143 }
 0x1bb   :  { %v1201_v52 = vmax.f32 %v7158_v19, %v1144_v38 }
 0x1bd   :  { %5935 = vmatprep.mubr.msk.f32.mxu0 %vm1214_vm2, %v1201_v52 }
 0x1c2   :  { %v1146_v6 = vpop.permute.xlu1 %1145 }
 0x1c3   :  { %v1202_v41 = vmax.f32 %v7172_v51, %v1146_v6 }
 0x1c5   :  { %5936 = vmatmul.mubr.msk.f32.gmra.mrb[14].mxu0 %vm1214_vm2, %v1202_v41 }
 0x1ca   :  { %v1148_v49 = vpop.permute.xlu0 %1147 }
 0x1cb   :  { %v1203_v57 = vmax.f32 %v7185_v37, %v1148_v49 }
 0x1cd   :  { %5938 = vmatprep.mubr.msk.f32.mxu0 %vm1214_vm2, %v1203_v57 }
 0x1d2   :  { %v1150_v61 = vpop.permute.xlu1 %1149 }
 0x1d3   :  { %v1204_v40 = vmax.f32 %v7198_v44, %v1150_v61 }
 0x1d5   :  { %5939 = vmatmul.mubr.msk.f32.gmra.mrb[16].mxu0 %vm1214_vm2, %v1204_v40 }
 0x1da   :  { %v1152_v19 = vpop.permute.xlu0 %1151 }
 0x1db   :  { %v1205_v28 = vmax.f32 %v7209_v5, %v1152_v19 }
 0x1dd   :  { %5941 = vmatprep.mubr.msk.f32.mxu0 %vm1214_vm2, %v1205_v28 }
 0x1de   :  { %v1154_v51 = vpop.permute.xlu1 %1153 }
 0x1df   :  { %v1206_v63 = vmax.f32 %v7215_v47, %v1154_v51 }
 0x1e1   :  { %5942 = vmatmul.mubr.msk.f32.gmra.mrb[18].mxu0 %vm1214_vm2, %v1206_v63 }
 0x1e6   :  { %v1156_v37 = vpop.permute.xlu0 %1155 }
 0x1e7   :  { %v1207_v20 = vmax.f32 %v7223_v36, %v1156_v37 }
 0x1e9   :  { %5944 = vmatprep.mubr.msk.f32.mxu0 %vm1214_vm2, %v1207_v20 }
 0x1ea   :  { %v1158_v44 = vpop.permute.xlu1 %1157 }
 0x1eb   :  { %v1208_v14 = vmax.f32 %v7233_v2, %v1158_v44 }
 0x1ed   :  { %5945 = vmatmul.mubr.msk.f32.gmra.mrb[20].mxu0 %vm1214_vm2, %v1208_v14 }
 0x1ee   :  { %v1162_v32 = vpop.permute.xlu1 %1161  ;;  %v1160_v45 = vpop.permute.xlu0 %1159 }
 0x1ef   :  { %v1210_v5 = vmax.f32 %v1090_v26, %v1162_v32  ;;  %v1209_v46 = vmax.f32 %v1089_v1, %v1160_v45 }
 0x1f1   :  { %5947 = vmatprep.mubr.msk.f32.mxu0 %vm1214_vm2, %v1209_v46 }
 0x1f2   :  { %5948 = vmatmul.mubr.msk.f32.gmra.mrb[22].mxu0 %vm1214_vm2, %v1210_v5  ;;  %vm5040_vm2 = vcmask 197792  }
 0x248   :  { %v5916_v47 = vpop.f32.mrb[0].mxu0 }
 0x249   :  { %v1502_v25 = vrot.slane %v5916_v47, 1  ;;  %v1357_v3 = vpop.f32.mrb[1].mxu0 }
 0x24a   :  { %v1501_v48 = vrot.slane %v1357_v3, 1 }
 0x24c   :  { %v1503_v18 = vsel %vm1500_vm3, %v1501_v48, %v1502_v25  ;;  %v5919_v53 = vpop.f32.mrb[2].mxu0 }
 0x24d   :  { %v1572_v17 = vmax.f32 %v1357_v3, %v1503_v18  ;;  %v1506_v30 = vrot.slane %v5919_v53, 1  ;;  %v1367_v58 = vpop.f32.mrb[3].mxu0 }
 0x24e   :  { %v1504_v50 = vrot.slane %v1367_v58, 1 }
 0x250   :  { %v1507_v39 = vsel %vm1500_vm3, %v1504_v50, %v1506_v30  ;;  %v1505_v7 = vsel %vm1500_vm3, %v1502_v25, %v1504_v50 }
 0x251   :  { %v1574_v11 = vmax.f32 %v1367_v58, %v1507_v39  ;;  %v5922_v55 = vpop.f32.mrb[4].mxu0  ;;  %v1573_v12 = vmax.f32 %v5916_v47, %v1505_v7 }
 0x252   :  { %v1510_v36 = vrot.slane %v5922_v55, 1  ;;  %v1377_v8 = vpop.f32.mrb[5].mxu0 }
 0x253   :  { %v1508_v54 = vrot.slane %v1377_v8, 1  ;;  %v6088_v42 = vpack.c.bf16 %v1573_v12, %v1572_v17 }
 0x255   :  { %v1509_v2 = vsel %vm1500_vm3, %v1506_v30, %v1508_v54  ;;  %v1511_v35 = vsel %vm1500_vm3, %v1508_v54, %v1510_v36  ;;  %6089 = vmatpush1.bf16.msra.mxu1 %v6088_v42 }
 0x256   :  { %v1576_v4 = vmax.f32 %v1377_v8, %v1511_v35  ;;  %6090 = vmatprep.subr.bf16.mxu1 %v10807_v27  ;;  %v1575_v13 = vmax.f32 %v5919_v53, %v1509_v2 }
 0x258   :  { %v5925_v33 = vpop.f32.mrb[6].mxu0  ;;  %v6091_v26 = vpack.c.bf16 %v1575_v13, %v1574_v11 }
 0x259   :  { %v1514_v1 = vrot.slane %v5925_v33, 1  ;;  %v1387_v9 = vpop.f32.mrb[7].mxu0 }
 0x25a   :  { %v1512_v10 = vrot.slane %v1387_v9, 1  ;;  %6092 = vmatpush1.bf16.msra.mxu1 %v6091_v26 }
 0x25b   :  { %6093 = vmatprep.subr.bf16.mxu1 %v10807_v27 }
 0x25c   :  { %v1513_v24 = vsel %vm1500_vm3, %v1510_v36, %v1512_v10  ;;  %v1515_v21 = vsel %vm1500_vm3, %v1512_v10, %v1514_v1 }
 0x25d   :  { %v1578_v22 = vmax.f32 %v1387_v9, %v1515_v21  ;;  %v1577_v59 = vmax.f32 %v5922_v55, %v1513_v24 }
 0x25f   :  { %v6094_v15 = vpack.c.bf16 %v1577_v59, %v1576_v4 }
 0x261   :  { %6095 = vmatpush1.bf16.msra.mxu1 %v6094_v15 }
 0x262   :  { %6096 = vmatprep.subr.bf16.mxu1 %v10807_v27 }
 0x268   :  { %v5928_v62 = vpop.f32.mrb[8].mxu0 }
 0x269   :  { %v1518_v0 = vrot.slane %v5928_v62, 1  ;;  %v1397_v60 = vpop.f32.mrb[9].mxu0 }
 0x26a   :  { %v1516_v23 = vrot.slane %v1397_v60, 1 }
 0x26c   :  { %v1517_v43 = vsel %vm1500_vm3, %v1514_v1, %v1516_v23  ;;  %v1519_v16 = vsel %vm1500_vm3, %v1516_v23, %v1518_v0 }
 0x26d   :  { %v1580_v34 = vmax.f32 %v1397_v60, %v1519_v16  ;;  %v1579_v31 = vmax.f32 %v5925_v33, %v1517_v43 }
 0x26f   :  { %v6097_v29 = vpack.c.bf16 %v1579_v31, %v1578_v22 }
 0x271   :  { %6098 = vmatpush1.bf16.msra.mxu1 %v6097_v29 }
 0x272   :  { %6099 = vmatprep.subr.bf16.mxu1 %v10807_v27 }
 0x278   :  { %v5931_v38 = vpop.f32.mrb[10].mxu0 }
 0x279   :  { %v1522_v52 = vrot.slane %v5931_v38, 1  ;;  %v1407_v6 = vpop.f32.mrb[11].mxu0 }
 0x27a   :  { %v1520_v41 = vrot.slane %v1407_v6, 1 }
 0x27c   :  { %v1521_v49 = vsel %vm1500_vm3, %v1518_v0, %v1520_v41  ;;  %v1523_v57 = vsel %vm1500_vm3, %v1520_v41, %v1522_v52  ;;  %v1596_v41 = vld [vmem:[%s10778_s6] sm:$0xff] }
 0x27d   :  { %v1582_v61 = vmax.f32 %v1407_v6, %v1523_v57  ;;  %v1581_v40 = vmax.f32 %v5928_v62, %v1521_v49  ;;  %v1599_v49 = vld [vmem:[%s10778_s6 + $0x18] sm:$0xff]  ;;  %v1598_v57 = vld [vmem:[%s10778_s6 + $0x10] sm:$0xff] }
 0x27f   :  { %v6100_v19 = vpack.c.bf16 %v1581_v40, %v1580_v34  ;;  %v1600_v40 = vld [vmem:[%s10778_s6 + $0x20] sm:$0xff] }
 0x281   :  { %6101 = vmatpush1.bf16.msra.mxu1 %v6100_v19  ;;  %v1603_v19 = vld [vmem:[%s10778_s6 + $0x38] sm:$0xff] }
 0x282   :  { %6102 = vmatprep.subr.bf16.mxu1 %v10807_v27 }
 0x288   :  { %v5934_v28 = vpop.f32.mrb[12].mxu0 }
 0x289   :  { %v1526_v51 = vrot.slane %v5934_v28, 1  ;;  %v1417_v63 = vpop.f32.mrb[13].mxu0 }
 0x28a   :  { %v1524_v37 = vrot.slane %v1417_v63, 1 }
 0x28c   :  { %v1525_v20 = vsel %vm1500_vm3, %v1522_v52, %v1524_v37  ;;  %v1527_v44 = vsel %vm1500_vm3, %v1524_v37, %v1526_v51  ;;  %v1607_v37 = vld [vmem:[%s10778_s6 + $0x58] sm:$0xff] }
 0x28d   :  { %v1584_v14 = vmax.f32 %v1417_v63, %v1527_v44  ;;  %v1583_v32 = vmax.f32 %v5931_v38, %v1525_v20  ;;  %v1604_v63 = vld [vmem:[%s10778_s6 + $0x40] sm:$0xff]  ;;  %v1606_v20 = vld [vmem:[%s10778_s6 + $0x50] sm:$0xff]  ;;  %v1609_v44 = vld [vmem:[%s10778_s6 + $0x68] sm:$0xff] }
 0x28f   :  { %v6103_v45 = vpack.c.bf16 %v1583_v32, %v1582_v61  ;;  %v1601_v61 = vld [vmem:[%s10778_s6 + $0x28] sm:$0xff]  ;;  %v1611_v32 = vld [vmem:[%s10778_s6 + $0x78] sm:$0xff] }
 0x291   :  { %6104 = vmatpush1.bf16.msra.mxu1 %v6103_v45  ;;  %v1610_v45 = vld [vmem:[%s10778_s6 + $0x70] sm:$0xff] }
 0x292   :  { %6105 = vmatprep.subr.bf16.mxu1 %v10807_v27 }
 0x298   :  { %v5937_v5 = vpop.f32.mrb[14].mxu0 }
 0x299   :  { %v1530_v46 = vrot.slane %v5937_v5, 1  ;;  %v1427_v47 = vpop.f32.mrb[15].mxu0 }
 0x29a   :  { %v1528_v25 = vrot.slane %v1427_v47, 1 }
 0x29c   :  { %v1529_v3 = vsel %vm1500_vm3, %v1526_v51, %v1528_v25  ;;  %v1531_v48 = vsel %vm1500_vm3, %v1528_v25, %v1530_v46  ;;  %v1605_v51 = vld [vmem:[%s10778_s6 + $0x48] sm:$0xff] }
 0x29d   :  { %v1586_v18 = vmax.f32 %v1427_v47, %v1531_v48  ;;  %v1585_v53 = vmax.f32 %v5934_v28, %v1529_v3  ;;  %v1602_v28 = vld [vmem:[%s10778_s6 + $0x30] sm:$0xff]  ;;  %v1615_v47 = vld [vmem:[%s10778_s6 + $0x98] sm:$0xff] }
 0x29e   :  { %v1614_v48 = vld [vmem:[%s10778_s6 + $0x90] sm:$0xff] }
 0x29f   :  { %v6106_v17 = vpack.c.bf16 %v1585_v53, %v1584_v14  ;;  %v1608_v14 = vld [vmem:[%s10778_s6 + $0x60] sm:$0xff] }
 0x2a1   :  { %6107 = vmatpush1.bf16.msra.mxu1 %v6106_v17  ;;  %v1834_v17 = vstv %s7386_s28  ;;  %s7517_s28 = sld [smem:[#allocation12 + $0x25]] }
 0x2a2   :  { %6108 = vmatprep.subr.bf16.mxu1 %v10807_v27 }
 0x2a8   :  { %v5940_v30 = vpop.f32.mrb[16].mxu0 }
 0x2a9   :  { %v1534_v58 = vrot.slane %v5940_v30, 1  ;;  %v1437_v50 = vpop.f32.mrb[17].mxu0 }
 0x2aa   :  { %v1532_v39 = vrot.slane %v1437_v50, 1 }
 0x2ac   :  { %v1533_v7 = vsel %vm1500_vm3, %v1530_v46, %v1532_v39  ;;  %v1535_v11 = vsel %vm1500_vm3, %v1532_v39, %v1534_v58  ;;  %v1612_v46 = vld [vmem:[%s10778_s6 + $0x80] sm:$0xff] }
 0x2ad   :  { %v1588_v55 = vmax.f32 %v1437_v50, %v1535_v11  ;;  %v1587_v12 = vmax.f32 %v5937_v5, %v1533_v7  ;;  %v1613_v5 = vld [vmem:[%s10778_s6 + $0x88] sm:$0xff] }
 0x2af   :  { %v6109_v36 = vpack.c.bf16 %v1587_v12, %v1586_v18  ;;  %v1816_v12 = vstv %s7397_s17  ;;  %s7559_s17 = sld [smem:[#allocation12 + $0x27]] }
 0x2b1   :  { %6110 = vmatpush1.bf16.msra.mxu1 %v6109_v36 }
 0x2b2   :  { %6111 = vmatprep.subr.bf16.mxu1 %v10807_v27 }
 0x2b4   :  { %v5943_v8 = vpop.f32.mrb[18].mxu0 }
 0x2b5   :  { %v1538_v56 = vrot.slane %v5943_v8, 1  ;;  %v1447_v54 = vpop.f32.mrb[19].mxu0 }
 0x2b6   :  { %v1536_v42 = vrot.slane %v1447_v54, 1 }
 0x2b8   :  { %v1537_v2 = vsel %vm1500_vm3, %v1534_v58, %v1536_v42  ;;  %v1539_v35 = vsel %vm1500_vm3, %v1536_v42, %v1538_v56 }
 0x2b9   :  { %v1590_v4 = vmax.f32 %v1447_v54, %v1539_v35  ;;  %v1589_v13 = vmax.f32 %v5940_v30, %v1537_v2  ;;  %v1796_v30 = vstv %s7388_s29  ;;  %v1910_v2 = vstv %s7405_s20  ;;  %s7519_s29 = sld [smem:[#allocation12 + $0x5]]  ;;  %s7716_s20 = sld [smem:[#allocation12]] }
 0x2ba   :  { %v1854_v35 = vstv %s7407_s21  ;;  %s7720_s21 = sld [smem:[#allocation12 + $0xb]] }
 0x2bb   :  { %v6112_v33 = vpack.c.bf16 %v1589_v13, %v1588_v55  ;;  %v1872_v55 = vstv %s7395_s3  ;;  %s7557_s3 = sld [smem:[#allocation12 + $0x65]] }
 0x2bd   :  { %6113 = vmatpush1.bf16.msra.mxu1 %v6112_v33 }
 0x2be   :  { %6114 = vmatprep.subr.bf16.mxu1 %v10807_v27 }
 0x2c0   :  { %v5946_v26 = vpop.f32.mrb[20].mxu0  ;;  %10837 = sst [smem:[#allocation21_spill]] %s7720_s21 }
 0x2c1   :  { %v1542_v1 = vrot.slane %v5946_v26, 1  ;;  %v1457_v9 = vpop.f32.mrb[21].mxu0 }
 0x2c2   :  { %v1540_v10 = vrot.slane %v1457_v9, 1 }
 0x2c4   :  { %v1541_v24 = vsel %vm1500_vm3, %v1538_v56, %v1540_v10  ;;  %v1543_v21 = vsel %vm1500_vm3, %v1540_v10, %v1542_v1 }
 0x2c5   :  { %v1592_v22 = vmax.f32 %v1457_v9, %v1543_v21  ;;  %v5949_v59 = vpop.f32.mrb[22].mxu0  ;;  %v1591_v15 = vmax.f32 %v5943_v8, %v1541_v24  ;;  %v1948_v9 = vstv %s7420_s22  ;;  %v1986_v21 = vstv %s7433_s2  ;;  %s7722_s22 = sld [smem:[#allocation12 + $0x69]]  ;;  %s7736_s2 = sld [smem:[#allocation12 + $0x40]] }
 0x2c6   :  { %v1546_v62 = vrot.slane %v5949_v59, 1  ;;  %v1467_v0 = vpop.f32.mrb[23].mxu0 }
 0x2c7   :  { %v1544_v60 = vrot.slane %v1467_v0, 1  ;;  %v6115_v23 = vpack.c.bf16 %v1591_v15, %v1590_v4 }
 0x2c8   :  { %v1595_v34 = vmax.f32 %v5949_v59, %v1546_v62 }
 0x2c9   :  { %v1545_v43 = vsel %vm1500_vm3, %v1542_v1, %v1544_v60  ;;  %v1547_v16 = vsel %vm1500_vm3, %v1544_v60, %v1546_v62  ;;  %6116 = vmatpush1.bf16.msra.mxu1 %v6115_v23  ;;  %v2024_v60 = vstv %s7447_s24  ;;  %v1930_v23 = vstv %s7449_s0  ;;  %s7600_s24 = sld [smem:[#allocation12 + $0x67]] }
 0x2ca   :  { %v1594_v31 = vmax.f32 %v1467_v0, %v1547_v16  ;;  %6117 = vmatprep.subr.bf16.mxu1 %v10807_v27  ;;  %v1593_v29 = vmax.f32 %v5946_v26, %v1545_v43  ;;  %s7612_s0 = sld [smem:[#allocation12 + $0x87]] }
 0x2cb   :  { %10838 = sst [smem:[#allocation22_spill]] %s7722_s22 }
 0x2cc   :  { %v6121_v38 = vpack.c.bf16 %v1595_v34, %v1594_v31  ;;  %v6118_v52 = vpack.c.bf16 %v1593_v29, %v1592_v22  ;;  %v1892_v22 = vstv %s7435_s23  ;;  %v2062_v34 = vstv %s7457_s5  ;;  %s7598_s23 = sld [smem:[#allocation12 + $0xa5]] }
 0x2cd   :  { %s7624_s5 = sld [smem:[#allocation12 + $0xe5]] }
 0x2ce   :  { %6119 = vmatpush1.bf16.msra.mxu1 %v6118_v52 }
 0x2cf   :  { %6120 = vmatprep.subr.bf16.mxu1 %v10807_v27 }
 0x2d2   :  { %6123 = vmatpush1.bf16.msk.msra.mxu1 %vm7320_vm6, %v6121_v38  ;;  %v1968_v38 = vstv %s7468_s25  ;;  %s7637_s25 = sld [smem:[#allocation12 + $0xc5]] }
 0x2d3   :  { %6164 = vmatprep.subr.bf16.mxu1 %v10807_v27 }
 0x2d5   :  { %1720 = vmatmul.mubr.f32.vlgmr.msra.gmra.mrb[0].mxu1 %v1596_v41 }
 0x2d6   :  { %5496 = vmatprep.mubr.msk.f32.mxu1 %vm1618_vm4, %v1599_v49  ;;  %v2006_v49 = vstv %s7477_s4  ;;  %s7659_s4 = sld [smem:[#allocation12 + $0xc7]] }
 0x2d9   :  { %1725 = vmatmul.mubr.f32.gmra.mrb[2].mxu1 %v1598_v57 }
 0x2da   :  { %5497 = vmatprep.mubr.msk.f32.mxu1 %vm1618_vm4, %v1601_v61 }
 0x2dd   :  { %1730 = vmatmul.mubr.f32.gmra.mrb[4].mxu1 %v1600_v40 }
 0x2de   :  { %5498 = vmatprep.mubr.msk.f32.mxu1 %vm1618_vm4, %v1603_v19 }
 0x2e1   :  { %1735 = vmatmul.mubr.f32.gmra.mrb[6].mxu1 %v1602_v28  ;;  %v2044_v28 = vstv %s7493_s26  ;;  %s7671_s26 = sld [smem:[#allocation12 + $0x29]] }
 0x2e2   :  { %5499 = vmatprep.mubr.msk.f32.mxu1 %vm1618_vm4, %v1605_v51 }
 0x2e5   :  { %1740 = vmatmul.mubr.f32.gmra.mrb[8].mxu1 %v1604_v63 }
 0x2e6   :  { %5500 = vmatprep.mubr.msk.f32.mxu1 %vm1618_vm4, %v1607_v37  ;;  %v2082_v37 = vstv %s7503_s27  ;;  %s7694_s27 = sld [smem:[#allocation12 + $0x9]] }
 0x2e9   :  { %1745 = vmatmul.mubr.f32.gmra.mrb[10].mxu1 %v1606_v20 }
 0x2ea   :  { %5501 = vmatprep.mubr.msk.f32.mxu1 %vm1618_vm4, %v1609_v44 }
 0x2ed   :  { %1750 = vmatmul.mubr.f32.gmra.mrb[12].mxu1 %v1608_v14 }
 0x2ee   :  { %5502 = vmatprep.mubr.msk.f32.mxu1 %vm1618_vm4, %v1611_v32 }
 0x2f1   :  { %1755 = vmatmul.mubr.f32.gmra.mrb[14].mxu1 %v1610_v45 }
 0x2f2   :  { %5503 = vmatprep.mubr.msk.f32.mxu1 %vm1618_vm4, %v1613_v5 }
 0x2f5   :  { %1760 = vmatmul.mubr.f32.gmra.mrb[16].mxu1 %v1612_v46  ;;  %v2146_v46 = vstv %s7517_s28  ;;  %s7696_s28 = sld [smem:[#allocation12 + $0x49]] }
 0x2f6   :  { %5504 = vmatprep.mubr.msk.f32.mxu1 %vm1618_vm4, %v1615_v47  ;;  %v2106_v47 = vstv %s7519_s29  ;;  %s7714_s29 = sld [smem:[#allocation12 + $0x20]] }
 0x2f9   :  { %1765 = vmatmul.mubr.f32.gmra.mrb[18].mxu1 %v1614_v48 }
 0x2fb   :  { %10836 = sst [smem:[#allocation20_spill]] %s7696_s28 }
 0x3a8   :  { %v1721_v25 = vpop.f32.mrb[0].mxu1 }
 0x3a9   :  { %1776 = vst.msk [vmem:[#allocation3] sm:$0xff] %vm1775_vm7, %v1721_v25  ;;  %v1723_v3 = vpop.f32.mrb[1].mxu1 }
 0x3ac   :  { %v1726_v18 = vpop.f32.mrb[2].mxu1 }
 0x3ad   :  { %1777 = vst.msk [vmem:[#allocation3 + $0x8] sm:$0xff] %vm1775_vm7, %v1726_v18  ;;  %v1728_v53 = vpop.f32.mrb[3].mxu1  ;;  %v2186_v18 = vstv %s7529_s1  ;;  %s10841_s1 = smov 127  }
 0x3ae   :  { %v2126_v53 = vstv %s7531_s16  ;;  %s7726_s16 = sld [smem:[#allocation12 + $0x2]] }
 0x3b0   :  { %v7409_v58 = vld [vmem:[#allocation3] sm:$0xff]  ;;  %v1731_v50 = vpop.f32.mrb[4].mxu1 }
 0x3b1   :  { %1778 = vst.msk [vmem:[#allocation3 + $0x10] sm:$0xff] %vm1775_vm7, %v1731_v50  ;;  %v1835_v39 = vmul.f32 %v1834_v17, %v7409_v58  ;;  %v1797_v7 = vmul.f32 %v1796_v30, %v7409_v58  ;;  %v1733_v11 = vpop.f32.mrb[5].mxu1  ;;  %v1873_v56 = vmul.f32 %v1872_v55, %v7409_v58  ;;  %v1911_v13 = vmul.f32 %v1910_v2, %v7409_v58  ;;  %v1617_v50 = vld [vmem:[%s10778_s6 + $0xa8] sm:$0xff] }
 0x3b2   :  { %v1949_v10 = vmul.f32 %v1948_v9, %v7409_v58  ;;  %v1987_v62 = vmul.f32 %v1986_v21, %v7409_v58  ;;  %v2025_v43 = vmul.f32 %v2024_v60, %v7409_v58  ;;  %v2063_v31 = vmul.f32 %v2062_v34, %v7409_v58  ;;  %5505 = vmatprep.mubr.msk.f32.mxu1 %vm1618_vm4, %v1617_v50 }
 0x3b3   :  { %1839 = vrot.lane.b32.xlu1 %v1835_v39, %s10790_s30  ;;  %1801 = vrot.lane.b32.xlu0 %v1797_v7, %s10790_s30  ;;  %v2226_v11 = vstv %s7557_s3  ;;  %s7728_s3 = sld [smem:[#allocation12 + $0x22]]  ;;  %vm5052_vm4 = vcmask 279792  }
 0x3b4   :  { %v7424_v36 = vld [vmem:[#allocation3 + $0x1] sm:$0xff]  ;;  %v1736_v8 = vpop.f32.mrb[6].mxu1 }
 0x3b5   :  { %v1817_v54 = vmul.f32 %v1816_v12, %v7424_v36  ;;  %1779 = vst.msk [vmem:[#allocation3 + $0x18] sm:$0xff] %vm1775_vm7, %v1736_v8  ;;  %v1738_v42 = vpop.f32.mrb[7].mxu1  ;;  %v1855_v33 = vmul.f32 %v1854_v35, %v7424_v36  ;;  %v7444_v1 = vld [vmem:[#allocation3 + $0x8] sm:$0xff]  ;;  %v1893_v0 = vmul.f32 %v1892_v22, %v7424_v36  ;;  %v1931_v16 = vmul.f32 %v1930_v23, %v7424_v36 }
 0x3b6   :  { %v1874_v24 = vmul.f32 %v1872_v55, %v7444_v1  ;;  %v1950_v29 = vmul.f32 %v1948_v9, %v7444_v1  ;;  %v1969_v52 = vmul.f32 %v1968_v38, %v7424_v36  ;;  %v1798_v41 = vmul.f32 %v1796_v30, %v7444_v1 }
 0x3b7   :  { %1877 = vrot.lane.b32.xlu1 %v1873_v56, %s10790_s30  ;;  %1821 = vrot.lane.b32.xlu0 %v1817_v54, %s10790_s30  ;;  %v2007_v57 = vmul.f32 %v2006_v49, %v7424_v36  ;;  %v1836_v61 = vmul.f32 %v1834_v17, %v7444_v1  ;;  %v2026_v40 = vmul.f32 %v2024_v60, %v7444_v1  ;;  %v2166_v55 = vstv %s7559_s17  ;;  %s7669_s17 = sld [smem:[#allocation12 + $0xe7]] }
 0x3b8   :  { %v1741_v4 = vpop.f32.mrb[8].mxu1  ;;  %v1912_v19 = vmul.f32 %v1910_v2, %v7444_v1  ;;  %v2045_v51 = vmul.f32 %v2044_v28, %v7424_v36  ;;  %v1988_v63 = vmul.f32 %v1986_v21, %v7444_v1  ;;  %v2083_v20 = vmul.f32 %v2082_v37, %v7424_v36  ;;  %v7527_v14 = vld [vmem:[#allocation3 + $0x9] sm:$0xff] }
 0x3b9   :  { %1780 = vst.msk [vmem:[#allocation3 + $0x20] sm:$0xff] %vm1775_vm7, %v1741_v4  ;;  %v1743_v26 = vpop.f32.mrb[9].mxu1  ;;  %v2064_v44 = vmul.f32 %v2062_v34, %v7444_v1  ;;  %v1856_v32 = vmul.f32 %v1854_v35, %v7527_v14  ;;  %v1818_v45 = vmul.f32 %v1816_v12, %v7527_v14  ;;  %v7541_v5 = vld [vmem:[#allocation3 + $0xa] sm:$0xff]  ;;  %v1932_v39 = vmul.f32 %v1930_v23, %v7527_v14  ;;  %v1616_v12 = vld [vmem:[%s10778_s6 + $0xa0] sm:$0xff]  ;;  %s7610_s6 = sld [smem:[#allocation12 + $0xa7]] }
 0x3ba   :  { %v2147_v25 = vmul.f32 %v2146_v46, %v7541_v5  ;;  %v2107_v3 = vmul.f32 %v2106_v47, %v7541_v5  ;;  %v7553_v48 = vld [vmem:[#allocation3 + $0xb] sm:$0xff]  ;;  %v2187_v17 = vmul.f32 %v2186_v18, %v7541_v5  ;;  %v1894_v7 = vmul.f32 %v1892_v22, %v7527_v14  ;;  %1770 = vmatmul.mubr.f32.gmra.mrb[20].mxu1 %v1616_v12 }
 0x3bb   :  { %1915 = vrot.lane.b32.xlu1 %v1911_v13, %s10790_s30  ;;  %1859 = vrot.lane.b32.xlu0 %v1855_v33, %s10790_s30  ;;  %v2127_v30 = vmul.f32 %v2126_v53, %v7553_v48  ;;  %v2227_v8 = vmul.f32 %v2226_v11, %v7541_v5  ;;  %v2167_v56 = vmul.f32 %v2166_v55, %v7553_v48  ;;  %v2266_v54 = vstv %s7569_s18  ;;  %s7885_s18 = sld [smem:[#allocation12 + $0xe2]] }
 0x3bc   :  { %v1746_v59 = vpop.f32.mrb[10].mxu1  ;;  %v2206_v42 = vstv %s7571_s19  ;;  %v2267_v2 = vmul.f32 %v2266_v54, %v7541_v5  ;;  %v2008_v4 = vmul.f32 %v2006_v49, %v7527_v14  ;;  %v1970_v13 = vmul.f32 %v1968_v38, %v7527_v14  ;;  %s7822_s19 = sld [smem:[#allocation12 + $0xa2]] }
 0x3bd   :  { %1781 = vst.msk [vmem:[#allocation3 + $0x28] sm:$0xff] %vm1775_vm7, %v1746_v59  ;;  %v1748_v15 = vpop.f32.mrb[11].mxu1  ;;  %v2207_v35 = vmul.f32 %v2206_v42, %v7553_v48  ;;  %v2306_v33 = vstv %s7598_s23  ;;  %v2246_v26 = vstv %s7600_s24  ;;  %v2286_v59 = vstv %s7612_s0  ;;  %s7766_s24 = sld [smem:[#allocation12 + $0x62]]  ;;  %s7825_s23 = sld [smem:[#allocation12 + $0x44]] }
 0x3be   :  { %v2247_v21 = vmul.f32 %v2246_v26, %v7553_v48  ;;  %v2046_v23 = vmul.f32 %v2044_v28, %v7527_v14  ;;  %v1848_v50 = vstv %s7728_s3  ;;  %s7939_s0 = sld [smem:[#allocation12 + $0xa4]]  ;;  %s8329_s3 = sld [smem:[#allocation12 + $0x8d]] }
 0x3bf   :  { %1953 = vrot.lane.b32.xlu1 %v1949_v10, %s10790_s30  ;;  %1879 = vrot.lane.b32.xlu0 %v1874_v24, %s10790_s30  ;;  %v2307_v24 = vmul.f32 %v2306_v33, %v7541_v5  ;;  %v2326_v22 = vstv %s7610_s6  ;;  %s7912_s6 = sld [smem:[#allocation12 + $0x84]] }
 0x3c0   :  { %v1751_v9 = vpop.f32.mrb[12].mxu1  ;;  %v2327_v15 = vmul.f32 %v2326_v22, %v7553_v48 }
 0x3c1   :  { %1782 = vst.msk [vmem:[#allocation3 + $0x30] sm:$0xff] %vm1775_vm7, %v1751_v9  ;;  %v1753_v10 = vpop.f32.mrb[13].mxu1  ;;  %v2100_v9 = vstv %s7742_s14  ;;  %s7872_s14 = sld [smem:[#allocation12 + $0x89]] }
 0x3c3   :  { %1991 = vrot.lane.b32.xlu1 %v1987_v62, %s10790_s30  ;;  %1897 = vrot.lane.b32.xlu0 %v1893_v0, %s10790_s30  ;;  %v2287_v62 = vmul.f32 %v2286_v59, %v7553_v48  ;;  %v2386_v0 = vstv %s7624_s5  ;;  %s7994_s5 = sld [smem:[#allocation12 + $0xc4]] }
 0x3c4   :  { %v2387_v60 = vmul.f32 %v2386_v0, %v7541_v5 }
 0x3c7   :  { %2029 = vrot.lane.b32.xlu1 %v2025_v43, %s10790_s30  ;;  %1935 = vrot.lane.b32.xlu0 %v1931_v16, %s10790_s30  ;;  %v7656_v43 = vld [vmem:[#allocation3 + $0x12] sm:$0xff]  ;;  %v2346_v16 = vstv %s7637_s25  ;;  %s8009_s25 = sld [smem:[#allocation12 + $0x2d]] }
 0x3c8   :  { %v2347_v34 = vmul.f32 %v2346_v16, %v7541_v5  ;;  %v2148_v38 = vmul.f32 %v2146_v46, %v7656_v43  ;;  %v2188_v46 = vmul.f32 %v2186_v18, %v7656_v43  ;;  %v1810_v18 = vstv %s7726_s16  ;;  %s8127_s16 = sld [smem:[#allocation12 + $0x6d]] }
 0x3cb   :  { %2067 = vrot.lane.b32.xlu1 %v2063_v31, %s10790_s30  ;;  %1955 = vrot.lane.b32.xlu0 %v1950_v29, %s10790_s30  ;;  %v2108_v31 = vmul.f32 %v2106_v47, %v7656_v43  ;;  %v2084_v29 = vmul.f32 %v2082_v37, %v7527_v14  ;;  %v2228_v37 = vmul.f32 %v2226_v11, %v7656_v43 }
 0x3cf   :  { %1973 = vrot.lane.b32.xlu0 %v1969_v52, %s10790_s30  ;;  %1803 = vrot.lane.b32.xlu1 %v1798_v41, %s10790_s30  ;;  %v7681_v52 = vld [vmem:[#allocation3 + $0x13] sm:$0xff]  ;;  %v2366_v41 = vstv %s7659_s4  ;;  %s8179_s4 = sld [smem:[#allocation12 + $0x6f]] }
 0x3d0   :  { %v2367_v49 = vmul.f32 %v2366_v41, %v7553_v48  ;;  %v2248_v47 = vmul.f32 %v2246_v26, %v7681_v52  ;;  %v1886_v26 = vstv %s7740_s15  ;;  %s7900_s15 = sld [smem:[#allocation12 + $0xe9]] }
 0x3d3   :  { %2011 = vrot.lane.b32.xlu0 %v2007_v57, %s10790_s30  ;;  %1841 = vrot.lane.b32.xlu1 %v1836_v61, %s10790_s30  ;;  %v2168_v57 = vmul.f32 %v2166_v55, %v7681_v52  ;;  %v7690_v61 = vld [vmem:[#allocation3 + $0x14] sm:$0xff] }
 0x3d5   :  { %10850 = sst [smem:[#allocation23_spill]] %s8179_s4 }
 0x3d7   :  { %2031 = vrot.lane.b32.xlu0 %v2026_v40, %s10790_s30  ;;  %1917 = vrot.lane.b32.xlu1 %v1912_v19, %s10790_s30  ;;  %v2406_v40 = vstv %s7669_s17  ;;  %v2470_v19 = vstv %s7671_s26  ;;  %s8109_s17 = sld [smem:[#allocation12 + $0x46]]  ;;  %s8192_s26 = sld [smem:[#allocation12 + $0x48]] }
 0x3d8   :  { %v2407_v28 = vmul.f32 %v2406_v40, %v7553_v48 }
 0x3db   :  { %2049 = vrot.lane.b32.xlu0 %v2045_v51, %s10790_s30  ;;  %1993 = vrot.lane.b32.xlu1 %v1988_v63, %s10790_s30  ;;  %v2471_v51 = vmul.f32 %v2470_v19, %v7690_v61  ;;  %v2128_v63 = vmul.f32 %v2126_v53, %v7681_v52  ;;  %v7758_v53 = vld [vmem:[#allocation3 + $0x15] sm:$0xff] }
 0x3dd   :  { %10852 = sst [smem:[#allocation21_spill]] %s8192_s26 }
 0x3df   :  { %2087 = vrot.lane.b32.xlu0 %v2083_v20, %s10790_s30  ;;  %2069 = vrot.lane.b32.xlu1 %v2064_v44, %s10790_s30  ;;  %v2430_v20 = vstv %s7694_s27  ;;  %v2510_v44 = vstv %s7696_s28  ;;  %s7839_s28 = sld [smem:[#allocation12 + $0xc0]]  ;;  %s8019_s27 = sld [smem:[#allocation12 + $0xe4]] }
 0x3e3   :  { %1861 = vrot.lane.b32.xlu1 %v1856_v32, %s10790_s30  ;;  %1823 = vrot.lane.b32.xlu0 %v1818_v45, %s10790_s30  ;;  %v2431_v32 = vmul.f32 %v2430_v20, %v7690_v61  ;;  %v2511_v45 = vmul.f32 %v2510_v44, %v7690_v61 }
 0x3e7   :  { %2151 = vrot.lane.b32.xlu1 %v2147_v25, %s10790_s30  ;;  %2111 = vrot.lane.b32.xlu0 %v2107_v3, %s10790_s30  ;;  %v1830_v25 = vstv %s7714_s29  ;;  %v1792_v3 = vstv %s7716_s20  ;;  %s8111_s29 = sld [smem:[#allocation12 + $0x8]]  ;;  %s8125_s20 = sld [smem:[#allocation12 + $0xd]] }
 0x3eb   :  { %2191 = vrot.lane.b32.xlu1 %v2187_v17, %s10790_s30  ;;  %2131 = vrot.lane.b32.xlu0 %v2127_v30, %s10790_s30  ;;  %v2450_v17 = vstv %s7720_s21  ;;  %v2550_v30 = vstv %s7722_s22  ;;  %s7853_s21 = sld [smem:[#allocation12 + $0x64]]  ;;  %s7874_s22 = sld [smem:[#allocation12 + $0xab]] }
 0x3ec   :  { %v2451_v12 = vmul.f32 %v2450_v17, %v7758_v53 }
 0x3ef   :  { %1937 = vrot.lane.b32.xlu1 %v1932_v39, %s10790_s30  ;;  %1899 = vrot.lane.b32.xlu0 %v1894_v7, %s10790_s30  ;;  %v1831_v39 = vmul.f32 %v1830_v25, %v7409_v58  ;;  %v1793_v7 = vmul.f32 %v1792_v3, %v7409_v58 }
 0x3f3   :  { %2231 = vrot.lane.b32.xlu1 %v2227_v8, %s10790_s30  ;;  %2171 = vrot.lane.b32.xlu0 %v2167_v56, %s10790_s30  ;;  %v2551_v8 = vmul.f32 %v2550_v30, %v7690_v61  ;;  %v1868_v56 = vstv %s7736_s2  ;;  %s7796_s2 = sld [smem:[#allocation12 + $0x82]] }
 0x3f4   :  { %v1869_v10 = vmul.f32 %v1868_v56, %v7409_v58 }
 0x3f7   :  { %2271 = vrot.lane.b32.xlu1 %v2267_v2, %s10790_s30  ;;  %2211 = vrot.lane.b32.xlu0 %v2207_v35, %s10790_s30 }
 0x3fb   :  { %2013 = vrot.lane.b32.xlu1 %v2008_v4, %s10790_s30  ;;  %1975 = vrot.lane.b32.xlu0 %v1970_v13, %s10790_s30  ;;  %v1811_v4 = vmul.f32 %v1810_v18, %v7424_v36  ;;  %v1849_v13 = vmul.f32 %v1848_v50, %v7424_v36 }
 0x3ff   :  { %2311 = vrot.lane.b32.xlu1 %v2307_v24, %s10790_s30  ;;  %2251 = vrot.lane.b32.xlu0 %v2247_v21, %s10790_s30  ;;  %v1906_v21 = vstv %s7744_s12  ;;  %s8065_s12 = sld [smem:[#allocation12 + $0xeb]] }
 0x403   :  { %2331 = vrot.lane.b32.xlu1 %v2327_v15, %s10790_s30  ;;  %2291 = vrot.lane.b32.xlu0 %v2287_v62, %s10790_s30 }
 0x407   :  { %2391 = vrot.lane.b32.xlu1 %v2387_v60, %s10790_s30  ;;  %2051 = vrot.lane.b32.xlu0 %v2046_v23, %s10790_s30  ;;  %v2208_v23 = vmul.f32 %v2206_v42, %v7681_v52  ;;  %v2101_v42 = vmul.f32 %v2100_v9, %v7541_v5 }
 0x40b   :  { %2351 = vrot.lane.b32.xlu0 %v2347_v34, %s10790_s30  ;;  %2113 = vrot.lane.b32.xlu1 %v2108_v31, %s10790_s30  ;;  %v2308_v34 = vmul.f32 %v2306_v33, %v7656_v43  ;;  %v2490_v31 = vstv %s7754_s13  ;;  %v1924_v33 = vstv %s7766_s24  ;;  %s8082_s13 = sld [smem:[#allocation12 + $0x26]]  ;;  %s8243_s24 = sld [smem:[#allocation12 + $0x68]] }
 0x40f   :  { %2089 = vrot.lane.b32.xlu0 %v2084_v29, %s10790_s30  ;;  %2153 = vrot.lane.b32.xlu1 %v2148_v38, %s10790_s30 }
 0x413   :  { %2371 = vrot.lane.b32.xlu0 %v2367_v49, %s10790_s30  ;;  %2173 = vrot.lane.b32.xlu1 %v2168_v57, %s10790_s30  ;;  %v1887_v57 = vmul.f32 %v1886_v26, %v7424_v36 }
 0x417   :  { %2411 = vrot.lane.b32.xlu0 %v2407_v28, %s10790_s30  ;;  %2475 = vrot.lane.b32.xlu1 %v2471_v51, %s10790_s30  ;;  %v2140_v28 = vstv %s7768_s10  ;;  %v1907_v51 = vmul.f32 %v1906_v21, %v7409_v58  ;;  %s7860_s10 = sld [smem:[#allocation12 + $0xe0]] }
 0x41b   :  { %2133 = vrot.lane.b32.xlu0 %v2128_v63, %s10790_s30  ;;  %2233 = vrot.lane.b32.xlu1 %v2228_v37, %s10790_s30 }
 0x41f   :  { %2435 = vrot.lane.b32.xlu0 %v2431_v32, %s10790_s30  ;;  %2515 = vrot.lane.b32.xlu1 %v2511_v45, %s10790_s30  ;;  %s7756_s30 = sld [smem:[#allocation12 + $0x6b]] }
 0x423   :  { %2193 = vrot.lane.b32.xlu0 %v2188_v46, %s10841_s1  ;;  %2253 = vrot.lane.b32.xlu1 %v2248_v47, %s10841_s1  ;;  %v2491_v46 = vmul.f32 %v2490_v31, %v7758_v53 }
 0x425   :  { %10840 = sst [smem:[#allocation24_spill]] %s7756_s30  ;;  %v1840_v11 = vpop.permute.xlu1 %1839  ;;  %v1802_v55 = vpop.permute.xlu0 %1801  ;;  %v2570_v29 = vstv %s7756_s30  ;;  %s7851_s30 = sld [smem:[#allocation12 + $0xc2]] }
 0x426   :  { %v1845_v2 = vadd.f32 %v1840_v11, %v1831_v39  ;;  %v1807_v35 = vadd.f32 %v1802_v55, %v1793_v7  ;;  %v2571_v47 = vmul.f32 %v2570_v29, %v7758_v53  ;;  %v1944_v39 = vstv %s7783_s11  ;;  %s7981_s11 = sld [smem:[#allocation12 + $0xc9]] }
 0x427   :  { %2455 = vrot.lane.b32.xlu0 %v2451_v12, %s10841_s1  ;;  %2555 = vrot.lane.b32.xlu1 %v2551_v8, %s10841_s1  ;;  %v1925_v55 = vmul.f32 %v1924_v33, %v7424_v36  ;;  %v2141_v12 = vmul.f32 %v2140_v28, %v7541_v5  ;;  %v1756_v8 = vpop.f32.mrb[14].mxu1 }
 0x428   :  { %v1813_v24 = vadd.f32 %v1811_v4, %v1807_v35  ;;  %v1851_v15 = vadd.f32 %v1849_v13, %v1845_v2  ;;  %v1982_v2 = vstv %s7793_s9  ;;  %v1962_v35 = vstv %s7796_s2  ;;  %1783 = vst.msk [vmem:[#allocation3 + $0x38] sm:$0xff] %vm1775_vm7, %v1756_v8  ;;  %v1758_v4 = vpop.f32.mrb[15].mxu1  ;;  %s8080_s9 = sld [smem:[#allocation12 + $0x6]] }
 0x429   :  { %v1878_v62 = vpop.permute.xlu1 %1877  ;;  %v1822_v60 = vpop.permute.xlu0 %1821  ;;  %v1945_v13 = vmul.f32 %v1944_v39, %v7409_v58  ;;  %s8164_s2 = sld [smem:[#allocation12 + $0x66]] }
 0x42a   :  { %v1883_v38 = vadd.f32 %v1878_v62, %v1869_v10  ;;  %v1827_v49 = vadd.f32 %v1822_v60, %v1813_v24  ;;  %v1870_v10 = vmul.f32 %v1868_v56, %v7444_v1 }
 0x42b   :  { %2213 = vrot.lane.b32.xlu0 %v2208_v23, %s10841_s1  ;;  %2313 = vrot.lane.b32.xlu1 %v2308_v34, %s10841_s1  ;;  %v2268_v23 = vmul.f32 %v2266_v54, %v7656_v43  ;;  %v2328_v34 = vmul.f32 %v2326_v22, %v7681_v52  ;;  %v1888_v54 = vmul.f32 %v1886_v26, %v7527_v14  ;;  %v2000_v22 = vstv %s7822_s19  ;;  %s8166_s19 = sld [smem:[#allocation12 + $0x28]] }
 0x42c   :  { %v1889_v63 = vadd.f32 %v1887_v57, %v1883_v38  ;;  %v7830_v37 = vadd.f32 %v2101_v42, %v1827_v49  ;;  %v2530_v38 = vstv %s7809_s8  ;;  %v2630_v49 = vstv %s7811_s7  ;;  %s7928_s8 = sld [smem:[#allocation12 + $0x8b]]  ;;  %s8239_s7 = sld [smem:[#allocation12 + $0xa6]] }
 0x42d   :  { %v1916_v32 = vpop.permute.xlu1 %1915  ;;  %v1860_v45 = vpop.permute.xlu0 %1859  ;;  %v1963_v42 = vmul.f32 %v1962_v35, %v7424_v36  ;;  %v2001_v4 = vmul.f32 %v2000_v22, %v7424_v36 }
 0x42e   :  { %v1921_v7 = vadd.f32 %v1916_v32, %v1907_v51  ;;  %v1865_v11 = vadd.f32 %v1860_v45, %v1851_v15  ;;  %v2180_v51 = vstv %s7825_s23  ;;  %v1983_v32 = vmul.f32 %v1982_v2, %v7409_v58  ;;  %s8228_s23 = sld [smem:[#allocation12 + $0xad]] }
 0x42f   :  { %2495 = vrot.lane.b32.xlu0 %v2491_v46, %s10841_s1  ;;  %2575 = vrot.lane.b32.xlu1 %v2571_v47, %s10841_s1 }
 0x430   :  { %v1927_v24 = vadd.f32 %v1925_v55, %v1921_v7  ;;  %v7862_v15 = vadd.f32 %v2141_v12, %v1865_v11  ;;  %v2531_v7 = vmul.f32 %v2530_v38, %v7758_v53  ;;  %v2631_v11 = vmul.f32 %v2630_v49, %v7690_v61 }
 0x431   :  { %v1954_v62 = vpop.permute.xlu1 %1953  ;;  %v1880_v60 = vpop.permute.xlu0 %1879  ;;  %v2020_v55 = vstv %s7839_s28  ;;  %s8038_s28 = sld [smem:[#allocation12 + $0xcb]] }
 0x432   :  { %v1959_v56 = vadd.f32 %v1954_v62, %v1945_v13  ;;  %v1884_v57 = vadd.f32 %v1880_v60, %v1870_v10  ;;  %v2181_v13 = vmul.f32 %v2180_v51, %v7541_v5  ;;  %v2038_v10 = vstv %s7851_s30  ;;  %s8067_s30 = sld [smem:[#allocation12 + $0x2f]] }
 0x433   :  { %2273 = vrot.lane.b32.xlu0 %v2268_v23, %s10841_s1  ;;  %2333 = vrot.lane.b32.xlu1 %v2328_v34, %s10841_s1  ;;  %v2220_v62 = vstv %s7853_s21  ;;  %v2058_v60 = vstv %s7860_s10  ;;  %s8190_s10 = sld [smem:[#allocation12 + $0x86]]  ;;  %s8226_s21 = sld [smem:[#allocation12 + $0x4d]] }
 0x434   :  { %v1965_v45 = vadd.f32 %v1963_v42, %v1959_v56  ;;  %v7891_v46 = vadd.f32 %v1888_v54, %v1884_v57  ;;  %v2288_v42 = vmul.f32 %v2286_v59, %v7681_v52  ;;  %v2388_v54 = vmul.f32 %v2386_v0, %v7656_v43 }
 0x435   :  { %v1992_v26 = vpop.permute.xlu1 %1991  ;;  %v1898_v47 = vpop.permute.xlu0 %1897  ;;  %v2076_v59 = vstv %s7885_s18  ;;  %v2059_v0 = vmul.f32 %v2058_v60, %v7409_v58  ;;  %s8177_s18 = sld [smem:[#allocation12 + $0xf]] }
 0x436   :  { %v1997_v12 = vadd.f32 %v1992_v26, %v1983_v32  ;;  %v1903_v8 = vadd.f32 %v1898_v47, %v1889_v63  ;;  %v2021_v63 = vmul.f32 %v2020_v55, %v7409_v58  ;;  %v2590_v32 = vstv %s7872_s14  ;;  %s8361_s14 = sld [smem:[#allocation12 + $0xc8]] }
 0x437   :  { %2535 = vrot.lane.b32.xlu0 %v2531_v7, %s10841_s1  ;;  %2635 = vrot.lane.b32.xlu1 %v2631_v11, %s10841_s1  ;;  %v2650_v26 = vstv %s7874_s22  ;;  %v2039_v11 = vmul.f32 %v2038_v10, %v7424_v36  ;;  %v2710_v58 = vstv %s7900_s15  ;;  %s8291_s22 = sld [smem:[#allocation12 + $0xe6]]  ;;  %s8372_s15 = sld [smem:[#allocation12 + $0x8f]] }
 0x438   :  { %v2003_v23 = vadd.f32 %v2001_v4, %v1997_v12  ;;  %v7918_v34 = vadd.f32 %v2181_v13, %v1903_v8  ;;  %v2221_v12 = vmul.f32 %v2220_v62, %v7541_v5 }
 0x439   :  { %v2030_v56 = vpop.permute.xlu1 %2029  ;;  %v1936_v57 = vpop.permute.xlu0 %1935  ;;  %10851 = sst [smem:[#allocation25_spill]] %s8190_s10 }
 0x43a   :  { %v2035_v47 = vadd.f32 %v2030_v56, %v2021_v63  ;;  %v1941_v7 = vadd.f32 %v1936_v57, %v1927_v24  ;;  %v1946_v24 = vmul.f32 %v1944_v39, %v7444_v1  ;;  %v2591_v56 = vmul.f32 %v2590_v32, %v7690_v61 }
 0x43b   :  { %2293 = vrot.lane.b32.xlu0 %v2288_v42, %s10841_s1  ;;  %2393 = vrot.lane.b32.xlu1 %v2388_v54, %s10841_s1  ;;  %v2651_v57 = vmul.f32 %v2650_v26, %v7758_v53  ;;  %v2077_v39 = vmul.f32 %v2076_v59, %v7424_v36  ;;  %10849 = sst [smem:[#allocation22_spill]] %s8177_s18 }
 0x43c   :  { %v7947_v8 = vadd.f32 %v2039_v11, %v2035_v47  ;;  %v7949_v4 = vadd.f32 %v2221_v12, %v1941_v7  ;;  %v1964_v47 = vmul.f32 %v1962_v35, %v7527_v14  ;;  %v2260_v7 = vstv %s7912_s6  ;;  %s8304_s6 = sld [smem:[#allocation12 + $0xed]] }
 0x43d   :  { %v2068_v13 = vpop.permute.xlu1 %2067  ;;  %v1956_v63 = vpop.permute.xlu0 %1955  ;;  %v1794_v11 = vmul.f32 %v1792_v3, %v7444_v1  ;;  %v2348_v35 = vmul.f32 %v2346_v16, %v7656_v43  ;;  %v7983_v3 = vld [vmem:[#allocation3 + $0x1c] sm:$0xff]  ;;  %v2300_v16 = vstv %s7939_s0  ;;  %s8315_s0 = sld [smem:[#allocation12 + $0xc6]] }
 0x43e   :  { %v2073_v42 = vadd.f32 %v2068_v13, %v2059_v0  ;;  %v1960_v54 = vadd.f32 %v1956_v63, %v1946_v24  ;;  %v2711_v13 = vmul.f32 %v2710_v58, %v7690_v61  ;;  %v2610_v63 = vstv %s7928_s8  ;;  %s8387_s8 = sld [smem:[#allocation12 + $0x2a]] }
 0x43f   :  { %2595 = vrot.lane.b32.xlu0 %v2591_v56, %s10841_s1  ;;  %2655 = vrot.lane.b32.xlu1 %v2651_v57, %s10841_s1 }
 0x440   :  { %v7970_v12 = vadd.f32 %v2077_v39, %v2073_v42  ;;  %v7972_v0 = vadd.f32 %v1964_v47, %v1960_v54  ;;  %v1812_v42 = vmul.f32 %v1810_v18, %v7527_v14  ;;  %v2261_v54 = vmul.f32 %v2260_v7, %v7541_v5 }
 0x441   :  { %v1974_v36 = vpop.permute.xlu0 %1973  ;;  %v1804_v24 = vpop.permute.xlu1 %1803 }
 0x442   :  { %v1979_v56 = vadd.f32 %v1974_v36, %v1965_v45  ;;  %v1808_v57 = vadd.f32 %v1804_v24, %v1794_v11  ;;  %v1832_v45 = vmul.f32 %v1830_v25, %v7444_v1  ;;  %v2611_v36 = vmul.f32 %v2610_v63, %v7758_v53 }
 0x443   :  { %2353 = vrot.lane.b32.xlu0 %v2348_v35, %s10841_s1  ;;  %2715 = vrot.lane.b32.xlu1 %v2711_v13, %s10841_s1  ;;  %v2432_v24 = vmul.f32 %v2430_v20, %v7983_v3  ;;  %v1850_v13 = vmul.f32 %v1848_v50, %v7527_v14  ;;  %v2022_v20 = vmul.f32 %v2020_v55, %v7444_v1 }
 0x444   :  { %v7999_v39 = vadd.f32 %v1812_v42, %v1808_v57  ;;  %v8001_v18 = vadd.f32 %v2261_v54, %v1979_v56  ;;  %v2301_v56 = vmul.f32 %v2300_v16, %v7541_v5 }
 0x445   :  { %v2012_v47 = vpop.permute.xlu0 %2011  ;;  %v1842_v11 = vpop.permute.xlu1 %1841 }
 0x446   :  { %v2017_v35 = vadd.f32 %v2012_v47, %v2003_v23  ;;  %v1846_v25 = vadd.f32 %v1842_v11, %v1832_v45  ;;  %v1908_v23 = vmul.f32 %v1906_v21, %v7444_v1  ;;  %v2368_v45 = vmul.f32 %v2366_v41, %v7681_v52  ;;  %v8040_v21 = vld [vmem:[#allocation3 + $0x1d] sm:$0xff] }
 0x447   :  { %2615 = vrot.lane.b32.xlu0 %v2611_v36, %s10841_s1  ;;  %2437 = vrot.lane.b32.xlu1 %v2432_v24, %s10841_s1  ;;  %v2472_v47 = vmul.f32 %v2470_v19, %v7983_v3  ;;  %v2670_v11 = vstv %s7981_s11  ;;  %v1926_v24 = vmul.f32 %v1924_v33, %v7527_v14  ;;  %v2340_v41 = vstv %s7994_s5  ;;  %s8380_s5 = sld [smem:[#allocation12 + $0x11]]  ;;  %s8433_s11 = sld [smem:[#allocation12 + $0xa]] }
 0x448   :  { %v8027_v57 = vadd.f32 %v1850_v13, %v1846_v25  ;;  %v8029_v50 = vadd.f32 %v2301_v56, %v2017_v35  ;;  %v2040_v35 = vmul.f32 %v2038_v10, %v7527_v14  ;;  %v1984_v19 = vmul.f32 %v1982_v2, %v7444_v1  ;;  %v8069_v2 = vld [vmem:[#allocation3 + $0x1e] sm:$0xff] }
 0x449   :  { %v2032_v42 = vpop.permute.xlu0 %2031  ;;  %v1918_v54 = vpop.permute.xlu1 %1917  ;;  %v2671_v33 = vmul.f32 %v2670_v11, %v7690_v61  ;;  %v2492_v10 = vmul.f32 %v2490_v31, %v8040_v21 }
 0x44a   :  { %v2036_v55 = vadd.f32 %v2032_v42, %v2022_v20  ;;  %v1922_v36 = vadd.f32 %v1918_v54, %v1908_v23  ;;  %v2794_v23 = vstv %s8009_s25  ;;  %v1761_v31 = vpop.f32.mrb[16].mxu1  ;;  %s8436_s25 = sld [smem:[#allocation12 + $0x4a]] }
 0x44b   :  { %2373 = vrot.lane.b32.xlu0 %v2368_v45, %s10841_s1  ;;  %2477 = vrot.lane.b32.xlu1 %v2472_v47, %s10841_s1  ;;  %v2002_v45 = vmul.f32 %v2000_v22, %v7527_v14  ;;  %v2341_v47 = vmul.f32 %v2340_v41, %v7541_v5  ;;  %1784 = vst.msk [vmem:[#allocation3 + $0x40] sm:$0xff] %vm1775_vm7, %v1761_v31  ;;  %v1763_v22 = vpop.f32.mrb[17].mxu1  ;;  %v8129_v31 = vld [vmem:[#allocation3 + $0x1f] sm:$0xff] }
 0x44c   :  { %v8054_v25 = vadd.f32 %v1926_v24, %v1922_v36  ;;  %v8056_v13 = vadd.f32 %v2040_v35, %v2036_v55  ;;  %v2060_v55 = vmul.f32 %v2058_v60, %v7444_v1 }
 0x44d   :  { %v2050_v56 = vpop.permute.xlu0 %2049  ;;  %v1994_v20 = vpop.permute.xlu1 %1993 }
 0x44e   :  { %v2055_v42 = vadd.f32 %v2050_v56, %v7947_v8  ;;  %v1998_v54 = vadd.f32 %v1994_v20, %v1984_v19  ;;  %v2380_v8 = vstv %s8019_s27  ;;  %v2408_v56 = vmul.f32 %v2406_v40, %v7681_v52  ;;  %s8418_s27 = sld [smem:[#allocation12 + $0xcd]] }
 0x44f   :  { %2675 = vrot.lane.b32.xlu0 %v2671_v33, %s10841_s1  ;;  %2497 = vrot.lane.b32.xlu1 %v2492_v10, %s10841_s1  ;;  %v2795_v20 = vmul.f32 %v2794_v23, %v8069_v2  ;;  %v2690_v33 = vstv %s8038_s28  ;;  %v2381_v60 = vmul.f32 %v2380_v8, %v7541_v5  ;;  %s8489_s28 = sld [smem:[#allocation12 + $0xc]] }
 0x450   :  { %v8089_v36 = vadd.f32 %v2002_v45, %v1998_v54  ;;  %v8091_v24 = vadd.f32 %v2341_v47, %v2055_v42  ;;  %v2078_v42 = vmul.f32 %v2076_v59, %v7527_v14  ;;  %v2691_v14 = vmul.f32 %v2690_v33, %v7758_v53  ;;  %10856 = sst [smem:[#allocation20_spill]] %s8436_s25 }
 0x451   :  { %v2088_v35 = vpop.permute.xlu0 %2087  ;;  %v2070_v19 = vpop.permute.xlu1 %2069  ;;  %v2552_v59 = vmul.f32 %v2550_v30, %v7983_v3  ;;  %v2730_v45 = vstv %s8065_s12  ;;  %v2814_v47 = vstv %s8067_s30  ;;  %v2142_v30 = vmul.f32 %v2140_v28, %v7656_v43  ;;  %s8499_s30 = sld [smem:[#allocation12 + $0xef]]  ;;  %s8532_s12 = sld [smem:[#allocation12 + $0x2c]] }
 0x452   :  { %v2093_v10 = vadd.f32 %v2088_v35, %v7970_v12  ;;  %v2074_v1 = vadd.f32 %v2070_v19, %v2060_v55  ;;  %v2102_v35 = vmul.f32 %v2100_v9, %v7656_v43  ;;  %v2120_v19 = vstv %s8080_s9  ;;  %s8426_s9 = sld [smem:[#allocation12 + $0x31]] }
 0x453   :  { %2413 = vrot.lane.b32.xlu0 %v2408_v56, %s10841_s1  ;;  %2799 = vrot.lane.b32.xlu1 %v2795_v20, %s10841_s1  ;;  %v2160_v56 = vstv %s8082_s13  ;;  %v2731_v9 = vmul.f32 %v2730_v45, %v7758_v53  ;;  %v2815_v28 = vmul.f32 %v2814_v47, %v8129_v31  ;;  %s8476_s13 = sld [smem:[#allocation12 + $0xcf]] }
 0x454   :  { %v8113_v40 = vadd.f32 %v2381_v60, %v2093_v10  ;;  %v8115_v12 = vadd.f32 %v2078_v42, %v2074_v1  ;;  %v2121_v42 = vmul.f32 %v2120_v19, %v7553_v48 }
 0x455   :  { %v1862_v54 = vpop.permute.xlu1 %1861  ;;  %v1824_v5 = vpop.permute.xlu0 %1823 }
 0x456   :  { %v1866_v22 = vadd.f32 %v1862_v54, %v8027_v57  ;;  %v1828_v55 = vadd.f32 %v1824_v5, %v7999_v39  ;;  %v2161_v54 = vmul.f32 %v2160_v56, %v7553_v48  ;;  %v2200_v5 = vstv %s8109_s17  ;;  %s8592_s17 = sld [smem:[#allocation12 + $0x51]] }
 0x457   :  { %2695 = vrot.lane.b32.xlu0 %v2691_v14, %s10841_s1  ;;  %2557 = vrot.lane.b32.xlu1 %v2552_v59, %s10841_s1 }
 0x458   :  { %v8143_v20 = vadd.f32 %v2102_v35, %v1828_v55  ;;  %v8145_v57 = vadd.f32 %v2142_v30, %v1866_v22  ;;  %v2452_v55 = vmul.f32 %v2450_v17, %v8040_v21  ;;  %v2572_v35 = vmul.f32 %v2570_v29, %v8040_v21 }
 0x459   :  { %v2152_v39 = vpop.permute.xlu1 %2151  ;;  %v2112_v10 = vpop.permute.xlu0 %2111  ;;  %v2754_v30 = vstv %s8125_s20  ;;  %s8478_s20 = sld [smem:[#allocation12 + $0x6a]] }
 0x45a   :  { %v2157_v1 = vadd.f32 %v2152_v39, %v7862_v15  ;;  %v2117_v60 = vadd.f32 %v2112_v10, %v7830_v37  ;;  %v2424_v15 = vstv %s8111_s29  ;;  %v2874_v39 = vstv %s8127_s16  ;;  %s8506_s29 = sld [smem:[#allocation12 + $0x71]]  ;;  %s8535_s16 = sld [smem:[#allocation12 + $0x6c]] }
 0x45b   :  { %2735 = vrot.lane.b32.xlu0 %v2731_v9, %s10841_s1  ;;  %2819 = vrot.lane.b32.xlu1 %v2815_v28, %s10841_s1  ;;  %v2201_v28 = vmul.f32 %v2200_v5, %v7553_v48  ;;  %v2425_v17 = vmul.f32 %v2424_v15, %v7690_v61 }
 0x45c   :  { %v2123_v37 = vadd.f32 %v2121_v42, %v2117_v60  ;;  %v2163_v14 = vadd.f32 %v2161_v54, %v2157_v1  ;;  %v2755_v42 = vmul.f32 %v2754_v30, %v8069_v2  ;;  %v2875_v54 = vmul.f32 %v2874_v39, %v8069_v2 }
 0x45d   :  { %v2192_v59 = vpop.permute.xlu1 %2191  ;;  %v2132_v22 = vpop.permute.xlu0 %2131 }
 0x45e   :  { %v2197_v10 = vadd.f32 %v2192_v59, %v7918_v34  ;;  %v2137_v9 = vadd.f32 %v2132_v22, %v2123_v37  ;;  %v2222_v22 = vmul.f32 %v2220_v62, %v7656_v43  ;;  %v2512_v62 = vmul.f32 %v2510_v44, %v7983_v3 }
 0x45f   :  { %2457 = vrot.lane.b32.xlu0 %v2452_v55, %s10841_s1  ;;  %2577 = vrot.lane.b32.xlu1 %v2572_v35, %s10841_s1  ;;  %v2182_v55 = vmul.f32 %v2180_v51, %v7656_v43  ;;  %v2240_v35 = vstv %s8164_s2  ;;  %v2632_v51 = vmul.f32 %v2630_v49, %v7983_v3  ;;  %v10809_v49 = vstv %s8190_s10  ;;  %s8276_s10 = sld [smem:[#allocation12 + $0x4f]]  ;;  %s8572_s2 = sld [smem:[#allocation12 + $0xb1]] }
 0x460   :  { %v2203_v29 = vadd.f32 %v2201_v28, %v2197_v10  ;;  %v8194_v34 = vadd.f32 %v2425_v17, %v2137_v9  ;;  %v2464_v10 = vstv %s8166_s19  ;;  %v2774_v17 = vstv %s8177_s18  ;;  %s8262_s18 = sld [smem:[#allocation12 + $0xa8]]  ;;  %s8664_s19 = sld [smem:[#allocation12 + $0x91]] }
 0x461   :  { %v1938_v1 = vpop.permute.xlu1 %1937  ;;  %v1900_v60 = vpop.permute.xlu0 %1899  ;;  %v2465_v44 = vmul.f32 %v2464_v10, %v7690_v61 }
 0x462   :  { %v1942_v37 = vadd.f32 %v1938_v1, %v8054_v25  ;;  %v1904_v59 = vadd.f32 %v1900_v60, %v7891_v46  ;;  %v2894_v1 = vstv %s8179_s4  ;;  %s8264_s4 = sld [smem:[#allocation12 + $0x88]] }
 0x463   :  { %2759 = vrot.lane.b32.xlu0 %v2755_v42, %s10841_s1  ;;  %2879 = vrot.lane.b32.xlu1 %v2875_v54, %s10841_s1  ;;  %v2241_v54 = vmul.f32 %v2240_v35, %v7553_v48 }
 0x464   :  { %v8214_v9 = vadd.f32 %v2222_v22, %v1942_v37  ;;  %v8216_v28 = vadd.f32 %v2182_v55, %v1904_v59  ;;  %v2504_v37 = vstv %s8192_s26  ;;  %v2775_v55 = vmul.f32 %v2774_v17, %v8129_v31  ;;  %s8278_s26 = sld [smem:[#allocation12 + $0xaf]] }
 0x465   :  { %v2232_v46 = vpop.permute.xlu1 %2231  ;;  %v2172_v25 = vpop.permute.xlu0 %2171 }
 0x466   :  { %v2237_v60 = vadd.f32 %v2232_v46, %v7949_v4  ;;  %v2177_v42 = vadd.f32 %v2172_v25, %v2163_v14  ;;  %v2895_v46 = vmul.f32 %v2894_v1, %v8129_v31 }
 0x467   :  { %2517 = vrot.lane.b32.xlu0 %v2512_v62, %s10841_s1  ;;  %2637 = vrot.lane.b32.xlu1 %v2632_v51, %s10841_s1  ;;  %v2281_v51 = vmul.f32 %v10809_v49, %v7553_v48 }
 0x468   :  { %v2243_v4 = vadd.f32 %v2241_v54, %v2237_v60  ;;  %v8245_v14 = vadd.f32 %v2465_v44, %v2177_v42  ;;  %v2505_v60 = vmul.f32 %v2504_v37, %v7690_v61  ;;  %10855 = sst [smem:[#allocation24_spill]] %s8264_s4  ;;  %v2532_v44 = vmul.f32 %v2530_v38, %v8040_v21 }
 0x469   :  { %v2272_v59 = vpop.permute.xlu1 %2271  ;;  %v2212_v22 = vpop.permute.xlu0 %2211  ;;  %v2262_v38 = vmul.f32 %v2260_v7, %v7656_v43 }
 0x46a   :  { %v2277_v25 = vadd.f32 %v2272_v59, %v8001_v18  ;;  %v2217_v62 = vadd.f32 %v2212_v22, %v2203_v29  ;;  %v2652_v59 = vmul.f32 %v2650_v26, %v8040_v21  ;;  %v2834_v22 = vstv %s8226_s21  ;;  %s8628_s21 = sld [smem:[#allocation12 + $0xac]] }
 0x46b   :  { %2779 = vrot.lane.b32.xlu0 %v2775_v55, %s10841_s1  ;;  %2899 = vrot.lane.b32.xlu1 %v2895_v46, %s10841_s1  ;;  %v2954_v55 = vstv %s8228_s23  ;;  %v2320_v26 = vstv %s8239_s7  ;;  %v2835_v7 = vmul.f32 %v2834_v22, %v8069_v2  ;;  %s10860_s7 = sld [smem:[#allocation25_spill]]  ;;  %s8618_s23 = sld [smem:[#allocation12 + $0xf1]] }
 0x46c   :  { %v2283_v42 = vadd.f32 %v2281_v51, %v2277_v25  ;;  %v8266_v18 = vadd.f32 %v2505_v60, %v2217_v62  ;;  %v2302_v62 = vmul.f32 %v2300_v16, %v7656_v43  ;;  %v2544_v51 = vstv %s8243_s24  ;;  %s8566_s24 = sld [smem:[#allocation12 + $0xaa]] }
 0x46d   :  { %v2014_v29 = vpop.permute.xlu1 %2013  ;;  %v1976_v54 = vpop.permute.xlu0 %1975 }
 0x46e   :  { %v2018_v46 = vadd.f32 %v2014_v29, %v8089_v36  ;;  %v1980_v25 = vadd.f32 %v1976_v54, %v7972_v0  ;;  %v2955_v29 = vmul.f32 %v2954_v55, %v8069_v2 }
 0x46f   :  { %2537 = vrot.lane.b32.xlu0 %v2532_v44, %s10841_s1  ;;  %2657 = vrot.lane.b32.xlu1 %v2652_v59, %s10841_s1  ;;  %v2321_v59 = vmul.f32 %v2320_v26, %v7553_v48  ;;  %v2592_v48 = vmul.f32 %v2590_v32, %v7983_v3 }
 0x470   :  { %v8294_v36 = vadd.f32 %v2302_v62, %v2018_v46  ;;  %v8296_v0 = vadd.f32 %v2262_v38, %v1980_v25  ;;  %v2545_v46 = vmul.f32 %v2544_v51, %v7690_v61  ;;  %v2624_v25 = vstv %s8262_s18  ;;  %s10863_s18 = sld [smem:[#allocation24_spill]] }
 0x471   :  { %v2312_v16 = vpop.permute.xlu1 %2311  ;;  %v2252_v60 = vpop.permute.xlu0 %2251  ;;  %v10810_v62 = vstv %s8264_s4  ;;  %s8389_s4 = sld [smem:[#allocation12 + $0xe8]] }
 0x472   :  { %v2317_v54 = vadd.f32 %v2312_v16, %v8029_v50  ;;  %v2257_v44 = vadd.f32 %v2252_v60, %v2243_v4  ;;  %v2712_v60 = vmul.f32 %v2710_v58, %v7983_v3  ;;  %v2585_v32 = vmul.f32 %v10810_v62, %v7690_v61 }
 0x473   :  { %2839 = vrot.lane.b32.xlu0 %v2835_v7, %s10841_s1  ;;  %2959 = vrot.lane.b32.xlu1 %v2955_v29, %s10841_s1  ;;  %v10811_v7 = vstv %s8276_s10  ;;  %v2974_v29 = vstv %s8278_s26  ;;  %s8625_s26 = sld [smem:[#allocation12 + $0x8a]] }
 0x474   :  { %v2323_v50 = vadd.f32 %v2321_v59, %v2317_v54  ;;  %v8319_v38 = vadd.f32 %v2545_v46, %v2257_v44  ;;  %v2625_v54 = vmul.f32 %v2624_v25, %v7690_v61  ;;  %v2400_v58 = vstv %s8291_s22  ;;  %s8673_s22 = sld [smem:[#allocation12 + $0x8c]] }
 0x475   :  { %v2332_v4 = vpop.permute.xlu1 %2331  ;;  %v2292_v16 = vpop.permute.xlu0 %2291 }
 0x476   :  { %v2337_v27 = vadd.f32 %v2332_v4, %v2323_v50  ;;  %v2297_v49 = vadd.f32 %v2292_v16, %v2283_v42  ;;  %v2855_v50 = vmul.f32 %v10811_v7, %v8129_v31  ;;  %v2975_v4 = vmul.f32 %v2974_v29, %v8129_v31 }
 0x477   :  { %2597 = vrot.lane.b32.xlu0 %v2592_v48, %s10841_s1  ;;  %2717 = vrot.lane.b32.xlu1 %v2712_v60, %s10841_s1  ;;  %v3034_v16 = vstv %s8304_s6  ;;  %s8691_s6 = sld [smem:[#allocation12 + $0x33]] }
 0x478   :  { %v8340_v44 = vadd.f32 %v2625_v54, %v2337_v27  ;;  %v8342_v59 = vadd.f32 %v2585_v32, %v2297_v49  ;;  %v6231_v27 = vld [vmem:[#allocation3 + $0xb] sm:$0xff]  ;;  %v2342_v54 = vmul.f32 %v2340_v41, %v7656_v43  ;;  %v2360_v32 = vstv %s8315_s0  ;;  %s8736_s0 = sld [smem:[#allocation12 + $0xd1]] }
 0x479   :  { %v2392_v46 = vpop.permute.xlu1 %2391  ;;  %v2052_v42 = vpop.permute.xlu0 %2051  ;;  %v2401_v49 = vmul.f32 %v6231_v27, %v2400_v58  ;;  %v3035_v41 = vmul.f32 %v3034_v16, %v8069_v2 }
 0x47a   :  { %v2397_v48 = vadd.f32 %v2392_v46, %v8113_v40  ;;  %v2056_v60 = vadd.f32 %v2052_v42, %v8056_v13  ;;  %v2612_v46 = vmul.f32 %v2610_v63, %v8040_v21  ;;  %v2914_v42 = vstv %s8329_s3  ;;  %s8710_s3 = sld [smem:[#allocation12 + $0xca]] }
 0x47b   :  { %2859 = vrot.lane.b32.xlu0 %v2855_v50, %s10841_s1  ;;  %2979 = vrot.lane.b32.xlu1 %v2975_v4, %s10841_s1  ;;  %v8374_v50 = vld [vmem:[#allocation3 + $0x26] sm:$0xff]  ;;  %v2122_v63 = vmul.f32 %v2120_v19, %v7681_v52 }
 0x47c   :  { %v2403_v62 = vadd.f32 %v2401_v49, %v2397_v48  ;;  %v8363_v7 = vadd.f32 %v2342_v54, %v2056_v60  ;;  %v2361_v60 = vmul.f32 %v6231_v27, %v2360_v32  ;;  %v1766_v49 = vpop.f32.mrb[18].mxu1 }
 0x47d   :  { %v2352_v40 = vpop.permute.xlu0 %2351  ;;  %v2114_v13 = vpop.permute.xlu1 %2113  ;;  %1785 = vst.msk [vmem:[#allocation3 + $0x48] sm:$0xff] %vm1775_vm7, %v1766_v49 }
 0x47e   :  { %v2357_v4 = vadd.f32 %v2352_v40, %v8091_v24  ;;  %v2118_v48 = vadd.f32 %v2114_v13, %v8143_v20  ;;  %v1768_v24 = vpop.f32.mrb[19].mxu1  ;;  %v2915_v40 = vmul.f32 %v2914_v42, %v8069_v2  ;;  %v2756_v13 = vmul.f32 %v2754_v30, %v8374_v50 }
 0x47f   :  { %2617 = vrot.lane.b32.xlu0 %v2612_v46, %s10841_s1  ;;  %3039 = vrot.lane.b32.xlu1 %v3035_v41, %s10841_s1 }
 0x480   :  { %v2363_v20 = vadd.f32 %v2361_v60, %v2357_v4  ;;  %v2124_v27 = vadd.f32 %v2122_v63, %v2118_v48  ;;  %v2162_v4 = vmul.f32 %v2160_v56, %v7681_v52  ;;  %v2382_v48 = vmul.f32 %v2380_v8, %v7656_v43  ;;  %v8423_v56 = vld [vmem:[#allocation3 + $0x28] sm:$0xff] }
 0x481   :  { %v2090_v54 = vpop.permute.xlu0 %2089  ;;  %v2154_v19 = vpop.permute.xlu1 %2153  ;;  %v2664_v60 = vstv %s8361_s14  ;;  %v2796_v43 = vmul.f32 %v2794_v23, %v8374_v50  ;;  %v2934_v52 = vstv %s8372_s15  ;;  %v2466_v8 = vmul.f32 %v2464_v10, %v7983_v3  ;;  %s8738_s15 = sld [smem:[#allocation12 + $0x73]] }
 0x482   :  { %v2094_v46 = vadd.f32 %v2090_v54, %v8115_v12  ;;  %v2158_v41 = vadd.f32 %v2154_v19, %v8145_v57  ;;  %v2672_v57 = vmul.f32 %v2670_v11, %v7983_v3  ;;  %v3078_v19 = vstv %s8380_s5  ;;  %s8745_s5 = sld [smem:[#allocation12 + $0x2e]]  ;;  %s8785_s14 = sld [smem:[#allocation12 + $0x13]] }
 0x483   :  { %2919 = vrot.lane.b32.xlu0 %v2915_v40, %s10841_s1  ;;  %2761 = vrot.lane.b32.xlu1 %v2756_v13, %s10841_s1  ;;  %v2665_v11 = vmul.f32 %v2664_v60, %v7690_v61  ;;  %v2484_v23 = vstv %s8387_s8  ;;  %v2704_v10 = vstv %s8389_s4  ;;  %s8787_s8 = sld [smem:[#allocation12 + $0xb3]] }
 0x484   :  { %v2164_v63 = vadd.f32 %v2162_v4, %v2158_v41  ;;  %v8409_v30 = vadd.f32 %v2382_v48, %v2094_v46  ;;  %v2935_v41 = vmul.f32 %v2934_v52, %v8129_v31  ;;  %v3079_v4 = vmul.f32 %v3078_v19, %v8423_v56  ;;  %v8449_v48 = vld [vmem:[#allocation3 + $0x27] sm:$0xff]  ;;  %s8834_s4 = sld [smem:[#allocation12 + $0x53]] }
 0x485   :  { %v2372_v49 = vpop.permute.xlu0 %2371  ;;  %v2174_v12 = vpop.permute.xlu1 %2173 }
 0x486   :  { %v2377_v24 = vadd.f32 %v2372_v49, %v2363_v20  ;;  %v2178_v54 = vadd.f32 %v2174_v12, %v2164_v63  ;;  %v2485_v12 = vmul.f32 %v2484_v23, %v7758_v53 }
 0x487   :  { %2677 = vrot.lane.b32.xlu0 %v2672_v57, %s10841_s1  ;;  %2801 = vrot.lane.b32.xlu1 %v2796_v43, %s10841_s1  ;;  %v2705_v57 = vmul.f32 %v2704_v10, %v7690_v61  ;;  %v2816_v61 = vmul.f32 %v2814_v47, %v8449_v48  ;;  %v2444_v47 = vstv %s8433_s11  ;;  %s8794_s11 = sld [smem:[#allocation12 + $0x30]] }
 0x488   :  { %v8439_v20 = vadd.f32 %v2466_v8, %v2178_v54  ;;  %v8441_v40 = vadd.f32 %v2665_v11, %v2377_v24  ;;  %v2692_v24 = vmul.f32 %v2690_v33, %v8040_v21  ;;  %v2994_v54 = vstv %s8418_s27  ;;  %v8471_v11 = vld [vmem:[#allocation3 + $0x13] sm:$0xff]  ;;  %s8792_s27 = sld [smem:[#allocation12 + $0xec]] }
 0x489   :  { %v2412_v13 = vpop.permute.xlu0 %2411  ;;  %v2476_v46 = vpop.permute.xlu1 %2475  ;;  %v2426_v33 = vmul.f32 %v2424_v15, %v7983_v3 }
 0x48a   :  { %v2417_v63 = vadd.f32 %v2412_v13, %v2403_v62  ;;  %v2481_v49 = vadd.f32 %v2476_v46, %v8245_v14  ;;  %v2242_v13 = vmul.f32 %v8471_v11, %v2240_v35  ;;  %v2524_v35 = vstv %s8436_s25  ;;  %s8581_s25 = sld [smem:[#allocation12 + $0x4c]] }
 0x48b   :  { %2939 = vrot.lane.b32.xlu0 %v2935_v41, %s10841_s1  ;;  %3083 = vrot.lane.b32.xlu1 %v3079_v4, %s10841_s1  ;;  %v3118_v4 = vstv %s8426_s9  ;;  %s8758_s9 = sld [smem:[#allocation12 + $0xcc]] }
 0x48c   :  { %v8460_v43 = vadd.f32 %v2485_v12, %v2481_v49  ;;  %v8462_v8 = vadd.f32 %v2705_v57, %v2417_v63  ;;  %v2995_v12 = vmul.f32 %v2994_v54, %v8069_v2  ;;  %v3119_v15 = vmul.f32 %v3118_v4, %v8423_v56 }
 0x48d   :  { %v2134_v62 = vpop.permute.xlu0 %2133  ;;  %v2234_v14 = vpop.permute.xlu1 %2233 }
 0x48e   :  { %v2138_v46 = vadd.f32 %v2134_v62, %v2124_v27  ;;  %v2238_v41 = vadd.f32 %v2234_v14, %v8214_v9  ;;  %v2445_v14 = vmul.f32 %v2444_v47, %v7758_v53 }
 0x48f   :  { %2697 = vrot.lane.b32.xlu0 %v2692_v24, %s10841_s1  ;;  %2821 = vrot.lane.b32.xlu1 %v2816_v61, %s10841_s1  ;;  %v2525_v24 = vmul.f32 %v2524_v35, %v7758_v53  ;;  %v2564_v53 = vstv %s8478_s20  ;;  %s8840_s20 = sld [smem:[#allocation12 + $0xe]] }
 0x490   :  { %v2244_v63 = vadd.f32 %v2242_v13, %v2238_v41  ;;  %v8491_v49 = vadd.f32 %v2426_v33, %v2138_v46  ;;  %v2732_v46 = vmul.f32 %v2730_v45, %v8040_v21  ;;  %v2876_v41 = vmul.f32 %v2874_v39, %v8374_v50 }
 0x491   :  { %v2436_v27 = vpop.permute.xlu0 %2435  ;;  %v2516_v9 = vpop.permute.xlu1 %2515  ;;  %v3014_v33 = vstv %s8476_s13  ;;  %v2748_v45 = vstv %s8489_s28  ;;  %s8836_s13 = sld [smem:[#allocation12 + $0x15]]  ;;  %s8893_s28 = sld [smem:[#allocation12 + $0x70]] }
 0x492   :  { %v2441_v57 = vadd.f32 %v2436_v27, %v8194_v34  ;;  %v2521_v62 = vadd.f32 %v2516_v9, %v8266_v18 }
 0x493   :  { %2999 = vrot.lane.b32.xlu0 %v2995_v12, %s10841_s1  ;;  %3123 = vrot.lane.b32.xlu1 %v3119_v15, %s10841_s1  ;;  %v2202_v12 = vmul.f32 %v8471_v11, %v2200_v5  ;;  %v2546_v15 = vmul.f32 %v2544_v51, %v7983_v3  ;;  %v3015_v5 = vmul.f32 %v3014_v33, %v8129_v31 }
 0x494   :  { %v2447_v61 = vadd.f32 %v2445_v14, %v2441_v57  ;;  %v8513_v13 = vadd.f32 %v2525_v24, %v2521_v62  ;;  %v2896_v51 = vmul.f32 %v2894_v1, %v8449_v48  ;;  %v3054_v62 = vstv %s8499_s30  ;;  %v8546_v14 = vld [vmem:[#allocation3 + $0x15] sm:$0xff]  ;;  %s8842_s30 = sld [smem:[#allocation12 + $0x6e]] }
 0x495   :  { %v2194_v34 = vpop.permute.xlu0 %2193  ;;  %v2254_v18 = vpop.permute.xlu1 %2253  ;;  %v2565_v24 = vmul.f32 %v8546_v14, %v2564_v53 }
 0x496   :  { %v2198_v27 = vadd.f32 %v2194_v34, %v8216_v28  ;;  %v2258_v9 = vadd.f32 %v2254_v18, %v2244_v63 }
 0x497   :  { %2737 = vrot.lane.b32.xlu0 %v2732_v46, %s10841_s1  ;;  %2881 = vrot.lane.b32.xlu1 %v2876_v41, %s10841_s1  ;;  %v3198_v46 = vstv %s8506_s29  ;;  %v2749_v41 = vmul.f32 %v2748_v45, %v8069_v2  ;;  %s8872_s29 = sld [smem:[#allocation12 + $0x93]] }
 0x498   :  { %v2204_v39 = vadd.f32 %v2202_v12, %v2198_v27  ;;  %v8537_v28 = vadd.f32 %v2546_v15, %v2258_v9 }
 0x499   :  { %v2456_v63 = vpop.permute.xlu0 %2455  ;;  %v2556_v57 = vpop.permute.xlu1 %2555 }
 0x49a   :  { %v2461_v34 = vadd.f32 %v2456_v63, %v2447_v61  ;;  %v2561_v18 = vadd.f32 %v2556_v57, %v8319_v38  ;;  %v3055_v61 = vmul.f32 %v3054_v62, %v8129_v31  ;;  %v3199_v38 = vmul.f32 %v3198_v46, %v8423_v56 }
 0x49b   :  { %3019 = vrot.lane.b32.xlu0 %v3015_v5, %s10841_s1  ;;  %2901 = vrot.lane.b32.xlu1 %v2896_v51, %s10841_s1  ;;  %v2322_v57 = vmul.f32 %v8471_v11, %v2320_v26  ;;  %v2506_v5 = vmul.f32 %v2504_v37, %v7983_v3  ;;  %v2788_v51 = vstv %s8532_s12  ;;  %v2776_v37 = vmul.f32 %v2774_v17, %v8449_v48  ;;  %s8885_s12 = sld [smem:[#allocation12 + $0x35]] }
 0x49c   :  { %v2567_v1 = vadd.f32 %v2565_v24, %v2561_v18  ;;  %v8558_v27 = vadd.f32 %v2749_v41, %v2461_v34  ;;  %v2868_v24 = vstv %s8535_s16  ;;  %v2956_v18 = vmul.f32 %v2954_v55, %v8374_v50  ;;  %s9030_s16 = sld [smem:[#allocation12 + $0x8e]] }
 0x49d   :  { %v2214_v9 = vpop.permute.xlu0 %2213  ;;  %v2314_v12 = vpop.permute.xlu1 %2313 }
 0x49e   :  { %v2218_v15 = vadd.f32 %v2214_v9, %v2204_v39  ;;  %v2318_v63 = vadd.f32 %v2314_v12, %v8294_v36  ;;  %v2789_v12 = vmul.f32 %v2788_v51, %v8069_v2 }
 0x49f   :  { %3059 = vrot.lane.b32.xlu0 %v3055_v61, %s10841_s1  ;;  %3203 = vrot.lane.b32.xlu1 %v3199_v38, %s10841_s1  ;;  %v2869_v61 = vmul.f32 %v2868_v24, %v8069_v2  ;;  %v2836_v38 = vmul.f32 %v2834_v22, %v8374_v50  ;;  %v2626_v22 = vmul.f32 %v2624_v25, %v7983_v3 }
 0x4a0   :  { %v2324_v39 = vadd.f32 %v2322_v57, %v2318_v63  ;;  %v8583_v36 = vadd.f32 %v2506_v5, %v2218_v15  ;;  %v2976_v15 = vmul.f32 %v2974_v29, %v8449_v48  ;;  %v10861_v63 = vstv %s10860_s7  ;;  %s8917_s7 = sld [smem:[#allocation12 + $0x37]] }
 0x4a1   :  { %v2496_v26 = vpop.permute.xlu0 %2495  ;;  %v2576_v34 = vpop.permute.xlu1 %2575  ;;  %v2282_v57 = vmul.f32 %v8471_v11, %v10861_v63  ;;  %v2644_v5 = vstv %s8566_s24  ;;  %v2828_v29 = vstv %s8581_s25  ;;  %s8959_s24 = sld [smem:[#allocation12 + $0xf3]]  ;;  %s9011_s25 = sld [smem:[#allocation12 + $0xee]] }
 0x4a2   :  { %v2501_v41 = vadd.f32 %v2496_v26, %v8460_v43  ;;  %v2581_v9 = vadd.f32 %v2576_v34, %v2567_v1 }
 0x4a3   :  { %2781 = vrot.lane.b32.xlu0 %v2776_v37, %s10841_s1  ;;  %2961 = vrot.lane.b32.xlu1 %v2956_v18, %s10841_s1  ;;  %v3278_v37 = vstv %s8572_s2  ;;  %s8887_s2 = sld [smem:[#allocation12 + $0x10]] }
 0x4a4   :  { %v8602_v17 = vadd.f32 %v2789_v12, %v2501_v41  ;;  %v8604_v55 = vadd.f32 %v2869_v61, %v2581_v9  ;;  %v10862_v9 = vstv %s8276_s10  ;;  %v3279_v12 = vmul.f32 %v3278_v37, %v8423_v56  ;;  %s8649_s10 = sld [smem:[#allocation12 + $0xea]] }
 0x4a5   :  { %v2274_v43 = vpop.permute.xlu0 %2273  ;;  %v2334_v1 = vpop.permute.xlu1 %2333  ;;  %v2856_v25 = vmul.f32 %v10862_v9, %v8449_v48  ;;  %v2645_v61 = vmul.f32 %v8546_v14, %v2644_v5  ;;  %v3358_v9 = vstv %s8618_s23  ;;  %s8936_s23 = sld [smem:[#allocation12 + $0xae]] }
 0x4a6   :  { %v2278_v26 = vadd.f32 %v2274_v43, %v8296_v0  ;;  %v2338_v34 = vadd.f32 %v2334_v1, %v2324_v39 }
 0x4a7   :  { %2841 = vrot.lane.b32.xlu0 %v2836_v38, %s10841_s1  ;;  %2981 = vrot.lane.b32.xlu1 %v2976_v15, %s10841_s1  ;;  %v3158_v38 = vstv %s8592_s17  ;;  %v2829_v15 = vmul.f32 %v2828_v29, %v8069_v2  ;;  %s8924_s17 = sld [smem:[#allocation12 + $0x4e]]  ;;  %10867 = sst [smem:[#allocation23_spill]] %s9011_s25 }
 0x4a8   :  { %v2284_v0 = vadd.f32 %v2282_v57, %v2278_v26  ;;  %v8630_v18 = vadd.f32 %v2626_v22, %v2338_v34  ;;  %v3036_v34 = vmul.f32 %v3034_v16, %v8374_v50  ;;  %v2402_v22 = vmul.f32 %v8471_v11, %v2400_v58  ;;  %v8675_v58 = vld [vmem:[#allocation3 + $0x30] sm:$0xff] }
 0x4a9   :  { %v2536_v39 = vpop.permute.xlu0 %2535  ;;  %v2636_v41 = vpop.permute.xlu1 %2635  ;;  %v2604_v16 = vstv %s8625_s26  ;;  %s9057_s26 = sld [smem:[#allocation12 + $0xb7]] }
 0x4aa   :  { %v2541_v43 = vadd.f32 %v2536_v39, %v8513_v13  ;;  %v2641_v1 = vadd.f32 %v2636_v41, %v8340_v44  ;;  %v3159_v44 = vmul.f32 %v3158_v38, %v8423_v56 }
 0x4ab   :  { %2861 = vrot.lane.b32.xlu0 %v2856_v25, %s10841_s1  ;;  %3283 = vrot.lane.b32.xlu1 %v3279_v12, %s10841_s1  ;;  %v10864_v25 = vstv %s10863_s18  ;;  %s8941_s18 = sld [smem:[#allocation12 + $0xd3]] }
 0x4ac   :  { %v2647_v63 = vadd.f32 %v2645_v61, %v2641_v1  ;;  %v8651_v57 = vadd.f32 %v2829_v15, %v2541_v43  ;;  %v2586_v12 = vmul.f32 %v10864_v25, %v7983_v3  ;;  %v2948_v61 = vstv %s8628_s21  ;;  %s8993_s21 = sld [smem:[#allocation12 + $0x50]] }
 0x4ad   :  { %v2294_v13 = vpop.permute.xlu0 %2293  ;;  %v2394_v26 = vpop.permute.xlu1 %2393  ;;  %v2916_v3 = vmul.f32 %v2914_v42, %v8374_v50  ;;  %v3359_v15 = vmul.f32 %v3358_v9, %v8423_v56  ;;  %v3080_v42 = vmul.f32 %v3078_v19, %v8675_v58  ;;  %v2936_v25 = vmul.f32 %v2934_v52, %v8449_v48  ;;  %10866 = sst [smem:[#allocation26_spill]] %s8924_s17 }
 0x4ae   :  { %v2298_v39 = vadd.f32 %v2294_v13, %v2284_v0  ;;  %v2398_v41 = vadd.f32 %v2394_v26, %v8409_v30  ;;  %v2908_v52 = vstv %s8673_s22  ;;  %s9113_s22 = sld [smem:[#allocation12 + $0xf5]] }
 0x4af   :  { %3163 = vrot.lane.b32.xlu0 %v3159_v44, %s10841_s1  ;;  %3041 = vrot.lane.b32.xlu1 %v3036_v34, %s10841_s1  ;;  %v2605_v44 = vmul.f32 %v8546_v14, %v2604_v16  ;;  %v2949_v34 = vmul.f32 %v2948_v61, %v8069_v2  ;;  %10868 = sst [smem:[#allocation21_spill]] %s9057_s26 }
 0x4b0   :  { %v8677_v30 = vadd.f32 %v2402_v22, %v2398_v41  ;;  %v8679_v0 = vadd.f32 %v2586_v12, %v2298_v39  ;;  %v2362_v12 = vmul.f32 %v8471_v11, %v2360_v32 }
 0x4b1   :  { %v2596_v43 = vpop.permute.xlu0 %2595  ;;  %v2656_v1 = vpop.permute.xlu1 %2655 }
 0x4b2   :  { %v2601_v13 = vadd.f32 %v2596_v43, %v8342_v59  ;;  %v2661_v26 = vadd.f32 %v2656_v1, %v2647_v63  ;;  %v2724_v59 = vstv %s8649_s10  ;;  %v3238_v1 = vstv %s8664_s19  ;;  %s8961_s19 = sld [smem:[#allocation12 + $0x75]] }
 0x4b3   :  { %2921 = vrot.lane.b32.xlu0 %v2916_v3, %s10841_s1  ;;  %3363 = vrot.lane.b32.xlu1 %v3359_v15, %s10841_s1  ;;  %v2725_v3 = vmul.f32 %v8546_v14, %v2724_v59  ;;  %s9059_s10 = sld [smem:[#allocation12 + $0x55]] }
 0x4b4   :  { %v2607_v63 = vadd.f32 %v2605_v44, %v2601_v13  ;;  %v8702_v22 = vadd.f32 %v2949_v34, %v2661_v26  ;;  %v2446_v26 = vmul.f32 %v2444_v47, %v8040_v21  ;;  %v8732_v44 = vld [vmem:[#allocation3 + $0x29] sm:$0xff] }
 0x4b5   :  { %v2354_v39 = vpop.permute.xlu0 %2353  ;;  %v2716_v41 = vpop.permute.xlu1 %2715 }
 0x4b6   :  { %v2358_v43 = vadd.f32 %v2354_v39, %v8363_v7  ;;  %v2721_v19 = vadd.f32 %v2716_v41, %v8462_v8  ;;  %v3239_v7 = vmul.f32 %v3238_v1, %v8423_v56  ;;  %v3120_v8 = vmul.f32 %v3118_v4, %v8675_v58 }
 0x4b7   :  { %2941 = vrot.lane.b32.xlu0 %v2936_v25, %s10841_s1  ;;  %3085 = vrot.lane.b32.xlu1 %v3080_v42, %s10841_s1  ;;  %v3138_v39 = vstv %s8691_s6  ;;  %v2909_v4 = vmul.f32 %v2908_v52, %v8069_v2  ;;  %v2996_v25 = vmul.f32 %v2994_v54, %v8374_v50  ;;  %s8984_s6 = sld [smem:[#allocation12 + $0x77]] }
 0x4b8   :  { %v2364_v15 = vadd.f32 %v2362_v12, %v2358_v43  ;;  %v8721_v13 = vadd.f32 %v2725_v3, %v2721_v19  ;;  %v3139_v12 = vmul.f32 %v3138_v39, %v8732_v44  ;;  %v2684_v43 = vstv %s8710_s3  ;;  %s9141_s3 = sld [smem:[#allocation12 + $0x32]] }
 0x4b9   :  { %v2616_v32 = vpop.permute.xlu0 %2615  ;;  %v2438_v11 = vpop.permute.xlu1 %2437 }
 0x4ba   :  { %v2621_v34 = vadd.f32 %v2616_v32, %v2607_v63  ;;  %v2442_v42 = vadd.f32 %v2438_v11, %v8491_v49  ;;  %v2486_v32 = vmul.f32 %v2484_v23, %v8040_v21  ;;  %v6234_v11 = vld [vmem:[#allocation3 + $0x1c] sm:$0xff]  ;;  %v3200_v21 = vmul.f32 %v3198_v46, %v8675_v58 }
 0x4bb   :  { %3243 = vrot.lane.b32.xlu0 %v3239_v7, %s10841_s1  ;;  %3125 = vrot.lane.b32.xlu1 %v3120_v8, %s10841_s1  ;;  %v2666_v54 = vmul.f32 %v6234_v11, %v2664_v60  ;;  %v2685_v23 = vmul.f32 %v8546_v14, %v2684_v43  ;;  %v2790_v60 = vmul.f32 %v2788_v51, %v8374_v50 }
 0x4bc   :  { %v8747_v47 = vadd.f32 %v2446_v26, %v2442_v42  ;;  %v8749_v63 = vadd.f32 %v2909_v4, %v2621_v34  ;;  %v3318_v4 = vstv %s8736_s0  ;;  %s8989_s0 = sld [smem:[#allocation12 + $0xb0]] }
 0x4bd   :  { %v2374_v49 = vpop.permute.xlu0 %2373  ;;  %v2478_v41 = vpop.permute.xlu1 %2477 }
 0x4be   :  { %v2378_v19 = vadd.f32 %v2374_v49, %v2364_v15  ;;  %v2482_v3 = vadd.f32 %v2478_v41, %v8439_v20  ;;  %v3016_v20 = vmul.f32 %v3014_v33, %v8449_v48  ;;  %v3218_v49 = vstv %s8738_s15  ;;  %s9017_s15 = sld [smem:[#allocation12 + $0x17]] }
 0x4bf   :  { %3001 = vrot.lane.b32.xlu0 %v2996_v25, %s10841_s1  ;;  %3143 = vrot.lane.b32.xlu1 %v3139_v12, %s10841_s1  ;;  %v2808_v33 = vstv %s8745_s5  ;;  %v3319_v12 = vmul.f32 %v3318_v4, %v8423_v56  ;;  %s9155_s5 = sld [smem:[#allocation12 + $0x97]] }
 0x4c0   :  { %v2488_v7 = vadd.f32 %v2486_v32, %v2482_v3  ;;  %v8768_v8 = vadd.f32 %v2666_v54, %v2378_v19  ;;  %v3219_v19 = vmul.f32 %v3218_v49, %v8732_v44  ;;  %v2988_v3 = vstv %s8758_s9  ;;  %s9188_s9 = sld [smem:[#allocation12 + $0xf0]] }
 0x4c1   :  { %v2676_v26 = vpop.permute.xlu0 %2675  ;;  %v2498_v15 = vpop.permute.xlu1 %2497 }
 0x4c2   :  { %v2681_v34 = vadd.f32 %v2676_v26, %v8441_v40  ;;  %v2502_v42 = vadd.f32 %v2498_v15, %v2488_v7  ;;  %v1771_v40 = vpop.f32.mrb[20].mxu1  ;;  %v2809_v7 = vmul.f32 %v2808_v33, %v8129_v31  ;;  %v2706_v26 = vmul.f32 %v6234_v11, %v2704_v10 }
 0x4c3   :  { %3021 = vrot.lane.b32.xlu0 %v3016_v20, %s10841_s1  ;;  %3205 = vrot.lane.b32.xlu1 %v3200_v21, %s10841_s1  ;;  %1786 = vst.msk [vmem:[#allocation3 + $0x50] sm:$0xff] %vm1775_vm7, %v1771_v40  ;;  %v1773_v51 = vpop.f32.mrb[21].mxu1  ;;  %v3280_v31 = vmul.f32 %v3278_v37, %v8675_v58  ;;  %v2989_v11 = vmul.f32 %v2988_v3, %v8069_v2  ;;  %v3298_v40 = vstv %s8787_s8  ;;  %v3028_v2 = vstv %s8792_s27  ;;  %s9087_s8 = sld [smem:[#allocation12 + $0x90]]  ;;  %s9257_s27 = sld [smem:[#allocation12 + $0xf7]] }
 0x4c4   :  { %v2687_v14 = vadd.f32 %v2685_v23, %v2681_v34  ;;  %v8796_v46 = vadd.f32 %v2790_v60, %v2502_v42  ;;  %v3098_v42 = vstv %s8785_s14  ;;  %s9082_s14 = sld [smem:[#allocation12 + $0x57]]  ;;  %vm5070_vm7 = vcmask 402792  }
 0x4c5   :  { %v2414_v41 = vpop.permute.xlu0 %2413  ;;  %v2800_v25 = vpop.permute.xlu1 %2799  ;;  %v3099_v51 = vmul.f32 %v3098_v42, %v8732_v44 }
 0x4c6   :  { %v2418_v32 = vadd.f32 %v2414_v41, %v8677_v30  ;;  %v2805_v54 = vadd.f32 %v2800_v25, %v8602_v17  ;;  %v3056_v17 = vmul.f32 %v3054_v62, %v8449_v48  ;;  %v8823_v30 = vld [vmem:[#allocation3 + $0x1d] sm:$0xff]  ;;  %v3299_v41 = vmul.f32 %v3298_v40, %v8732_v44 }
 0x4c7   :  { %3323 = vrot.lane.b32.xlu0 %v3319_v12, %s10841_s1  ;;  %3223 = vrot.lane.b32.xlu1 %v3219_v19, %s10841_s1  ;;  %v2566_v10 = vmul.f32 %v8823_v30, %v2564_v53  ;;  %v3112_v53 = vstv %s8794_s11  ;;  %v6236_v19 = vld [vmem:[#allocation3 + $0x1e] sm:$0xff]  ;;  %s9203_s11 = sld [smem:[#allocation12 + $0x72]] }
 0x4c8   :  { %v2811_v15 = vadd.f32 %v2809_v7, %v2805_v54  ;;  %v8815_v20 = vadd.f32 %v2706_v26, %v2418_v32  ;;  %v3029_v32 = vmul.f32 %v6236_v19, %v3028_v2  ;;  %v3113_v54 = vmul.f32 %v3112_v53, %v8423_v56  ;;  %v8909_v19 = vld [vmem:[#allocation3 + $0x1f] sm:$0xff] }
 0x4c9   :  { %v2696_v21 = vpop.permute.xlu0 %2695  ;;  %v2558_v23 = vpop.permute.xlu1 %2557 }
 0x4ca   :  { %v2701_v60 = vadd.f32 %v2696_v21, %v2687_v14  ;;  %v2562_v34 = vadd.f32 %v2558_v23, %v8537_v28  ;;  %v3360_v23 = vmul.f32 %v3358_v9, %v8675_v58 }
 0x4cb   :  { %3061 = vrot.lane.b32.xlu0 %v3056_v17, %s10841_s1  ;;  %3285 = vrot.lane.b32.xlu1 %v3280_v31, %s10841_s1  ;;  %v2750_v17 = vmul.f32 %v2748_v45, %v8374_v50  ;;  %v2870_v31 = vmul.f32 %v2868_v24, %v8374_v50  ;;  %v2768_v45 = vstv %s8840_s20  ;;  %v2888_v24 = vstv %s8842_s30  ;;  %s9136_s20 = sld [smem:[#allocation12 + $0x95]]  ;;  %s9279_s30 = sld [smem:[#allocation12 + $0xb2]] }
 0x4cc   :  { %v2568_v28 = vadd.f32 %v2566_v10, %v2562_v34  ;;  %v8846_v62 = vadd.f32 %v2989_v11, %v2701_v60  ;;  %v8880_v10 = vld [vmem:[#allocation3 + $0x32] sm:$0xff]  ;;  %v3178_v34 = vstv %s8834_s4  ;;  %s9131_s4 = sld [smem:[#allocation12 + $0xce]] }
 0x4cd   :  { %v2736_v37 = vpop.permute.xlu0 %2735  ;;  %v2820_v14 = vpop.permute.xlu1 %2819 }
 0x4ce   :  { %v2741_v25 = vadd.f32 %v2736_v37, %v8721_v13  ;;  %v2825_v12 = vadd.f32 %v2820_v14, %v2811_v15  ;;  %v3160_v15 = vmul.f32 %v3158_v38, %v8675_v58  ;;  %v3402_v38 = vstv %s8836_s13  ;;  %s9235_s13 = sld [smem:[#allocation12 + $0xd7]] }
 0x4cf   :  { %3103 = vrot.lane.b32.xlu0 %v3099_v51, %s10841_s1  ;;  %3303 = vrot.lane.b32.xlu1 %v3299_v41, %s10841_s1  ;;  %v3179_v14 = vmul.f32 %v3178_v34, %v8732_v44  ;;  %v3403_v51 = vmul.f32 %v3402_v38, %v8880_v10  ;;  %v8905_v41 = vld [vmem:[#allocation3 + $0x31] sm:$0xff] }
 0x4d0   :  { %v8862_v7 = vadd.f32 %v3029_v32, %v2741_v25  ;;  %v8864_v26 = vadd.f32 %v3113_v54, %v2825_v12  ;;  %v2769_v32 = vmul.f32 %v8909_v19, %v2768_v45  ;;  %v2889_v54 = vmul.f32 %v8909_v19, %v2888_v24 }
 0x4d1   :  { %v2458_v21 = vpop.permute.xlu0 %2457  ;;  %v2578_v13 = vpop.permute.xlu1 %2577 }
 0x4d2   :  { %v2462_v11 = vadd.f32 %v2458_v21, %v8747_v47  ;;  %v2582_v60 = vadd.f32 %v2578_v13, %v2568_v28 }
 0x4d3   :  { %3165 = vrot.lane.b32.xlu0 %v3160_v15, %s10841_s1  ;;  %3365 = vrot.lane.b32.xlu1 %v3360_v23, %s10841_s1  ;;  %v3240_v23 = vmul.f32 %v3238_v1, %v8675_v58  ;;  %v3072_v1 = vstv %s8887_s2  ;;  %s9328_s2 = sld [smem:[#allocation12 + $0x1b]] }
 0x4d4   :  { %v8895_v9 = vadd.f32 %v2750_v17, %v2462_v11  ;;  %v8897_v47 = vadd.f32 %v2870_v31, %v2582_v60  ;;  %v3140_v17 = vmul.f32 %v3138_v39, %v8905_v41  ;;  %v3258_v31 = vstv %s8872_s29  ;;  %s9183_s29 = sld [smem:[#allocation12 + $0xd0]] }
 0x4d5   :  { %v2760_v28 = vpop.permute.xlu0 %2759  ;;  %v2880_v37 = vpop.permute.xlu1 %2879  ;;  %v2646_v11 = vmul.f32 %v8823_v30, %v2644_v5  ;;  %v3192_v39 = vstv %s8893_s28  ;;  %s9285_s28 = sld [smem:[#allocation12 + $0x3b]] }
 0x4d6   :  { %v2765_v25 = vadd.f32 %v2760_v28, %v8558_v27  ;;  %v2885_v12 = vadd.f32 %v2880_v37, %v8604_v55  ;;  %v2526_v55 = vmul.f32 %v8823_v30, %v2524_v35  ;;  %v3442_v28 = vstv %s8885_s12  ;;  %s9237_s12 = sld [smem:[#allocation12 + $0x39]] }
 0x4d7   :  { %3183 = vrot.lane.b32.xlu0 %v3179_v14, %s10841_s1  ;;  %3407 = vrot.lane.b32.xlu1 %v3403_v51, %s10841_s1 }
 0x4d8   :  { %v2771_v27 = vadd.f32 %v2769_v32, %v2765_v25  ;;  %v2891_v21 = vadd.f32 %v2889_v54, %v2885_v12  ;;  %v3073_v25 = vmul.f32 %v3072_v1, %v8423_v56  ;;  %v8956_v12 = vld [vmem:[#allocation3 + $0x33] sm:$0xff] }
 0x4d9   :  { %v2518_v13 = vpop.permute.xlu0 %2517  ;;  %v2638_v15 = vpop.permute.xlu1 %2637 }
 0x4da   :  { %v2522_v35 = vadd.f32 %v2518_v13, %v8583_v36  ;;  %v2642_v60 = vadd.f32 %v2638_v15, %v8630_v18  ;;  %v3259_v36 = vmul.f32 %v3258_v31, %v8732_v44  ;;  %v3443_v18 = vmul.f32 %v3442_v28, %v8880_v10 }
 0x4db   :  { %3245 = vrot.lane.b32.xlu0 %v3240_v23, %s10841_s1  ;;  %3145 = vrot.lane.b32.xlu1 %v3140_v17, %s10841_s1  ;;  %v3193_v13 = vmul.f32 %v3192_v39, %v8423_v56  ;;  %v2848_v15 = vstv %s8924_s17  ;;  %s9038_s17 = sld [smem:[#allocation12 + $0xb5]] }
 0x4dc   :  { %v2528_v37 = vadd.f32 %v2526_v55, %v2522_v35  ;;  %v2648_v5 = vadd.f32 %v2646_v11, %v2642_v60  ;;  %v3462_v55 = vstv %s8917_s7  ;;  %v3320_v11 = vmul.f32 %v3318_v4, %v8675_v58  ;;  %s9593_s7 = sld [smem:[#allocation12 + $0x1d]] }
 0x4dd   :  { %v2780_v14 = vpop.permute.xlu0 %2779  ;;  %v2900_v51 = vpop.permute.xlu1 %2899  ;;  %v3463_v35 = vmul.f32 %v3462_v55, %v8956_v12  ;;  %v2968_v60 = vstv %s8936_s23  ;;  %s9330_s23 = sld [smem:[#allocation12 + $0x79]] }
 0x4de   :  { %v2785_v32 = vadd.f32 %v2780_v14, %v2771_v27  ;;  %v2905_v54 = vadd.f32 %v2900_v51, %v2891_v21  ;;  %v2950_v14 = vmul.f32 %v2948_v61, %v8374_v50 }
 0x4df   :  { %3263 = vrot.lane.b32.xlu0 %v3259_v36, %s10841_s1  ;;  %3447 = vrot.lane.b32.xlu1 %v3443_v18, %s10841_s1  ;;  %v3338_v18 = vstv %s8941_s18  ;;  %s9308_s18 = sld [smem:[#allocation12 + $0x52]] }
 0x4e0   :  { %v8969_v23 = vadd.f32 %v3073_v25, %v2785_v32  ;;  %v8971_v27 = vadd.f32 %v3193_v13, %v2905_v54  ;;  %v2830_v25 = vmul.f32 %v2828_v29, %v8374_v50  ;;  %v3339_v32 = vmul.f32 %v3338_v18, %v8732_v44 }
 0x4e1   :  { %v2538_v21 = vpop.permute.xlu0 %2537  ;;  %v2658_v17 = vpop.permute.xlu1 %2657  ;;  %v3220_v29 = vmul.f32 %v3218_v49, %v8905_v41  ;;  %v2849_v54 = vmul.f32 %v8909_v19, %v2848_v15  ;;  %v2969_v13 = vmul.f32 %v8909_v19, %v2968_v60 }
 0x4e2   :  { %v2542_v51 = vadd.f32 %v2538_v21, %v2528_v37  ;;  %v2662_v36 = vadd.f32 %v2658_v17, %v2648_v5 }
 0x4e3   :  { %3325 = vrot.lane.b32.xlu0 %v3320_v11, %s10841_s1  ;;  %3467 = vrot.lane.b32.xlu1 %v3463_v35, %s10841_s1  ;;  %v3378_v11 = vstv %s8959_s24  ;;  %v3522_v35 = vstv %s8961_s19  ;;  %s9178_s24 = sld [smem:[#allocation12 + $0x19]]  ;;  %s9337_s19 = sld [smem:[#allocation12 + $0xf2]] }
 0x4e4   :  { %v8995_v61 = vadd.f32 %v2950_v14, %v2662_v36  ;;  %v8997_v4 = vadd.f32 %v2830_v25, %v2542_v51  ;;  %v2606_v25 = vmul.f32 %v8823_v30, %v2604_v16  ;;  %v3152_v16 = vstv %s8993_s21  ;;  %s9379_s21 = sld [smem:[#allocation12 + $0x59]] }
 0x4e5   :  { %v2840_v37 = vpop.permute.xlu0 %2839  ;;  %v2960_v5 = vpop.permute.xlu1 %2959 }
 0x4e6   :  { %v2845_v21 = vadd.f32 %v2840_v37, %v8651_v57  ;;  %v2965_v17 = vadd.f32 %v2960_v5, %v8702_v22  ;;  %v3379_v57 = vmul.f32 %v3378_v11, %v8732_v44  ;;  %v3523_v22 = vmul.f32 %v3522_v35, %v8880_v10 }
 0x4e7   :  { %3343 = vrot.lane.b32.xlu0 %v3339_v32, %s10841_s1  ;;  %3225 = vrot.lane.b32.xlu1 %v3220_v29, %s10841_s1  ;;  %v2726_v37 = vmul.f32 %v8823_v30, %v2724_v59  ;;  %v3542_v29 = vstv %s8984_s6  ;;  %s9381_s6 = sld [smem:[#allocation12 + $0x7b]] }
 0x4e8   :  { %v2851_v49 = vadd.f32 %v2849_v54, %v2845_v21  ;;  %v2971_v14 = vadd.f32 %v2969_v13, %v2965_v17  ;;  %v3272_v54 = vstv %s8989_s0  ;;  %s9604_s0 = sld [smem:[#allocation12 + $0x94]] }
 0x4e9   :  { %v2598_v51 = vpop.permute.xlu0 %2597  ;;  %v2718_v36 = vpop.permute.xlu1 %2717 }
 0x4ea   :  { %v2602_v5 = vadd.f32 %v2598_v51, %v8679_v0  ;;  %v2722_v32 = vadd.f32 %v2718_v36, %v8815_v20  ;;  %v3543_v0 = vmul.f32 %v3542_v29, %v8956_v12  ;;  %v3100_v20 = vmul.f32 %v3098_v42, %v8905_v41 }
 0x4eb   :  { %3383 = vrot.lane.b32.xlu0 %v3379_v57, %s10841_s1  ;;  %3527 = vrot.lane.b32.xlu1 %v3523_v22, %s10841_s1  ;;  %v3048_v51 = vstv %s9011_s25  ;;  %v3273_v36 = vmul.f32 %v3272_v54, %v8423_v56  ;;  %s9091_s25 = sld [smem:[#allocation12 + $0x12]] }
 0x4ec   :  { %v2608_v13 = vadd.f32 %v2606_v25, %v2602_v5  ;;  %v9044_v21 = vadd.f32 %v2726_v37, %v2722_v32  ;;  %v3422_v25 = vstv %s9017_s15  ;;  %v3153_v37 = vmul.f32 %v3152_v16, %v8423_v56  ;;  %s9361_s15 = sld [smem:[#allocation12 + $0x92]] }
 0x4ed   :  { %v2860_v59 = vpop.permute.xlu0 %2859  ;;  %v2980_v17 = vpop.permute.xlu1 %2979  ;;  %v3300_v32 = vmul.f32 %v3298_v40, %v8905_v41  ;;  %v2910_v40 = vmul.f32 %v2908_v52, %v8374_v50  ;;  %v3180_v50 = vmul.f32 %v3178_v34, %v8905_v41 }
 0x4ee   :  { %v2865_v57 = vadd.f32 %v2860_v59, %v2851_v49  ;;  %v2985_v22 = vadd.f32 %v2980_v17, %v2971_v14  ;;  %v3423_v59 = vmul.f32 %v3422_v25, %v8956_v12  ;;  %v2928_v17 = vstv %s9030_s16  ;;  %s9426_s16 = sld [smem:[#allocation12 + $0x5b]] }
 0x4ef   :  { %3547 = vrot.lane.b32.xlu1 %v3543_v0, %s10841_s1  ;;  %3105 = vrot.lane.b32.xlu0 %v3100_v20, %s10841_s1  ;;  %v3049_v0 = vmul.f32 %v8909_v19, %v3048_v51  ;;  %v2929_v52 = vmul.f32 %v8909_v19, %v2928_v17 }
 0x4f0   :  { %v9066_v42 = vadd.f32 %v3273_v36, %v2985_v22  ;;  %v9068_v5 = vadd.f32 %v3153_v37, %v2865_v57  ;;  %v3602_v57 = vstv %s9038_s17  ;;  %s9428_s17 = sld [smem:[#allocation12 + $0xb9]] }
 0x4f1   :  { %v2618_v49 = vpop.permute.xlu0 %2617  ;;  %v3040_v14 = vpop.permute.xlu1 %3039 }
 0x4f2   :  { %v2622_v20 = vadd.f32 %v2618_v49, %v2608_v13  ;;  %v3045_v36 = vadd.f32 %v3040_v14, %v8862_v7  ;;  %v3603_v49 = vmul.f32 %v3602_v57, %v8880_v10  ;;  %v2770_v14 = vmul.f32 %v2768_v45, %v8449_v48 }
 0x4f3   :  { %3305 = vrot.lane.b32.xlu1 %v3300_v32, %s10841_s1  ;;  %3427 = vrot.lane.b32.xlu0 %v3423_v59, %s10841_s1 }
 0x4f4   :  { %v9093_v13 = vadd.f32 %v3049_v0, %v3045_v36  ;;  %v9095_v22 = vadd.f32 %v2910_v40, %v2622_v20  ;;  %v10818_v0 = vstv %s9057_s26  ;;  %v3482_v20 = vstv %s9059_s10  ;;  %s9208_s26 = sld [smem:[#allocation12 + $0xd5]]  ;;  %s9401_s10 = sld [smem:[#allocation12 + $0x34]] }
 0x4f5   :  { %v2920_v7 = vpop.permute.xlu0 %2919  ;;  %v2762_v37 = vpop.permute.xlu1 %2761 }
 0x4f6   :  { %v2925_v32 = vadd.f32 %v2920_v7, %v8749_v63  ;;  %v2766_v59 = vadd.f32 %v2762_v37, %v8895_v9  ;;  %v3623_v63 = vmul.f32 %v10818_v0, %v8956_v12  ;;  %v3483_v9 = vmul.f32 %v3482_v20, %v8880_v10 }
 0x4f7   :  { %3607 = vrot.lane.b32.xlu1 %v3603_v49, %s10841_s1  ;;  %3185 = vrot.lane.b32.xlu0 %v3180_v50, %s10841_s1  ;;  %v2686_v7 = vmul.f32 %v8823_v30, %v2684_v43  ;;  %v2810_v37 = vmul.f32 %v2808_v33, %v8449_v48  ;;  %v3092_v48 = vstv %s9091_s25  ;;  %s9445_s25 = sld [smem:[#allocation12 + $0xd2]] }
 0x4f8   :  { %v2931_v34 = vadd.f32 %v2929_v52, %v2925_v32  ;;  %v9117_v36 = vadd.f32 %v2770_v14, %v2766_v59  ;;  %v3502_v52 = vstv %s9082_s14  ;;  %v3232_v14 = vstv %s9087_s8  ;;  %s9453_s14 = sld [smem:[#allocation12 + $0x74]]  ;;  %s9477_s8 = sld [smem:[#allocation12 + $0x99]] }
 0x4f9   :  { %v2678_v40 = vpop.permute.xlu0 %2677  ;;  %v2802_v45 = vpop.permute.xlu1 %2801  ;;  %v3503_v32 = vmul.f32 %v3502_v52, %v8956_v12  ;;  %v3233_v59 = vmul.f32 %v3232_v14, %v8423_v56 }
 0x4fa   :  { %v2682_v49 = vadd.f32 %v2678_v40, %v8768_v8  ;;  %v2806_v50 = vadd.f32 %v2802_v45, %v8796_v46  ;;  %v3380_v46 = vmul.f32 %v3378_v11, %v8905_v41 }
 0x4fb   :  { %3627 = vrot.lane.b32.xlu1 %v3623_v63, %s10841_s1  ;;  %3487 = vrot.lane.b32.xlu0 %v3483_v9, %s10841_s1  ;;  %v10819_v63 = vstv %s9113_s22  ;;  %v3093_v9 = vmul.f32 %v3092_v48, %v8732_v44 }
 0x4fc   :  { %v2688_v43 = vadd.f32 %v2686_v7, %v2682_v49  ;;  %v2812_v33 = vadd.f32 %v2810_v37, %v2806_v50  ;;  %v3260_v37 = vmul.f32 %v3258_v31, %v8905_v41  ;;  %v3008_v49 = vstv %s9131_s4  ;;  %v6238_v50 = vld [vmem:[#allocation3 + $0x26] sm:$0xff]  ;;  %s9491_s4 = sld [smem:[#allocation12 + $0x14]] }
 0x4fd   :  { %v2940_v30 = vpop.permute.xlu0 %2939  ;;  %v3084_v8 = vpop.permute.xlu1 %3083 }
 0x4fe   :  { %v2945_v40 = vadd.f32 %v2940_v30, %v2931_v34  ;;  %v3089_v45 = vadd.f32 %v3084_v8, %v8969_v23  ;;  %v3683_v23 = vmul.f32 %v10819_v63, %v8880_v10  ;;  %v2990_v30 = vmul.f32 %v6238_v50, %v2988_v3  ;;  %v9175_v8 = vld [vmem:[#allocation3 + $0x3a] sm:$0xff] }
 0x4ff   :  { %3385 = vrot.lane.b32.xlu1 %v3380_v46, %s10841_s1  ;;  %3507 = vrot.lane.b32.xlu0 %v3503_v32, %s10841_s1  ;;  %v3132_v3 = vstv %s9141_s3  ;;  %s9524_s3 = sld [smem:[#allocation12 + $0x9b]] }
 0x500   :  { %v9162_v11 = vadd.f32 %v3233_v59, %v2945_v40  ;;  %v9164_v7 = vadd.f32 %v3093_v9, %v3089_v45  ;;  %v3562_v59 = vstv %s9136_s20  ;;  %v3114_v40 = vmul.f32 %v3112_v53, %v8675_v58  ;;  %s9501_s20 = sld [smem:[#allocation12 + $0xb4]] }
 0x501   :  { %v2698_v56 = vpop.permute.xlu0 %2697  ;;  %v2822_v34 = vpop.permute.xlu1 %2821  ;;  %v3563_v53 = vmul.f32 %v3562_v59, %v8880_v10  ;;  %v3404_v9 = vmul.f32 %v3402_v38, %v9175_v8 }
 0x502   :  { %v2702_v46 = vadd.f32 %v2698_v56, %v2688_v43  ;;  %v2826_v32 = vadd.f32 %v2822_v34, %v2812_v33  ;;  %v3009_v56 = vmul.f32 %v8909_v19, %v3008_v49 }
 0x503   :  { %3687 = vrot.lane.b32.xlu1 %v3683_v23, %s10841_s1  ;;  %3265 = vrot.lane.b32.xlu0 %v3260_v37, %s10841_s1  ;;  %v3582_v37 = vstv %s9155_s5  ;;  %s10872_s5 = sld [smem:[#allocation21_spill]] }
 0x504   :  { %v9190_v31 = vadd.f32 %v3114_v40, %v2826_v32  ;;  %v9192_v43 = vadd.f32 %v2990_v30, %v2702_v46  ;;  %v3133_v30 = vmul.f32 %v3132_v3, %v8732_v44  ;;  %v9223_v40 = vld [vmem:[#allocation3 + $0x27] sm:$0xff] }
 0x505   :  { %v3000_v33 = vpop.permute.xlu0 %2999  ;;  %v3124_v45 = vpop.permute.xlu1 %3123 }
 0x506   :  { %v3005_v34 = vadd.f32 %v3000_v33, %v8846_v62  ;;  %v3129_v23 = vadd.f32 %v3124_v45, %v8864_v26  ;;  %v3583_v62 = vmul.f32 %v3582_v37, %v8956_v12  ;;  %v3444_v26 = vmul.f32 %v3442_v28, %v9175_v8 }
 0x507   :  { %3567 = vrot.lane.b32.xlu0 %v3563_v53, %s10841_s1  ;;  %3409 = vrot.lane.b32.xlu1 %v3404_v9, %s10841_s1  ;;  %v2890_v33 = vmul.f32 %v9223_v40, %v2888_v24  ;;  %v3030_v45 = vmul.f32 %v6238_v50, %v3028_v2  ;;  %v9230_v53 = vld [vmem:[#allocation3 + $0x3c] sm:$0xff]  ;;  %v3312_v28 = vstv %s9183_s29  ;;  %s9543_s29 = sld [smem:[#allocation12 + $0x16]] }
 0x508   :  { %v3011_v38 = vadd.f32 %v3009_v56, %v3005_v34  ;;  %v9215_v19 = vadd.f32 %v3133_v30, %v3129_v23  ;;  %v10817_v34 = vstv %s9178_s24 }
 0x509   :  { %v2738_v46 = vpop.permute.xlu0 %2737  ;;  %v2882_v32 = vpop.permute.xlu1 %2881  ;;  %v3727_v30 = vmul.f32 %v10817_v34, %v9230_v53 }
 0x50a   :  { %v2742_v9 = vadd.f32 %v2738_v46, %v9044_v21  ;;  %v2886_v56 = vadd.f32 %v2882_v32, %v8897_v47  ;;  %v3352_v21 = vstv %s9188_s9  ;;  %v3340_v47 = vmul.f32 %v3338_v18, %v8905_v41  ;;  %v6240_v46 = vld [vmem:[#allocation3 + $0x28] sm:$0xff]  ;;  %s9553_s9 = sld [smem:[#allocation12 + $0x54]] }
 0x50b   :  { %3587 = vrot.lane.b32.xlu0 %v3583_v62, %s10841_s1  ;;  %3449 = vrot.lane.b32.xlu1 %v3444_v26, %s10841_s1  ;;  %v3313_v32 = vmul.f32 %v6240_v46, %v3312_v28  ;;  %v3212_v62 = vstv %s9203_s11  ;;  %v9254_v26 = vld [vmem:[#allocation3 + $0x3b] sm:$0xff]  ;;  %v3194_v18 = vmul.f32 %v3192_v39, %v8675_v58  ;;  %v3353_v39 = vmul.f32 %v6240_v46, %v3352_v21  ;;  %s9573_s11 = sld [smem:[#allocation12 + $0xd9]] }
 0x50c   :  { %v2892_v2 = vadd.f32 %v2890_v33, %v2886_v56  ;;  %v9242_v24 = vadd.f32 %v3030_v45, %v2742_v9  ;;  %v3642_v9 = vstv %s9208_s26  ;;  %s9479_s26 = sld [smem:[#allocation12 + $0xbb]] }
 0x50d   :  { %v3020_v50 = vpop.permute.xlu0 %3019  ;;  %v2902_v23 = vpop.permute.xlu1 %2901 }
 0x50e   :  { %v3025_v33 = vadd.f32 %v3020_v50, %v3011_v38  ;;  %v2906_v45 = vadd.f32 %v2902_v23, %v2892_v2  ;;  %v3643_v38 = vmul.f32 %v3642_v9, %v8880_v10  ;;  %v3464_v2 = vmul.f32 %v3462_v55, %v9254_v26 }
 0x50f   :  { %3345 = vrot.lane.b32.xlu0 %v3340_v47, %s10841_s1  ;;  %3731 = vrot.lane.b32.xlu1 %v3727_v30, %s10841_s1  ;;  %v3213_v50 = vmul.f32 %v3212_v62, %v8732_v44  ;;  %v3662_v30 = vstv %s9235_s13  ;;  %s9650_s13 = sld [smem:[#allocation12 + $0x3d]] }
 0x510   :  { %v9264_v56 = vadd.f32 %v3194_v18, %v2906_v45  ;;  %v9266_v34 = vadd.f32 %v3313_v32, %v3025_v33  ;;  %v3766_v32 = vstv %s9237_s12  ;;  %s9658_s12 = sld [smem:[#allocation12 + $0xd4]] }
 0x511   :  { %v3060_v0 = vpop.permute.xlu0 %3059  ;;  %v3204_v63 = vpop.permute.xlu1 %3203 }
 0x512   :  { %v3065_v23 = vadd.f32 %v3060_v0, %v9093_v13  ;;  %v3209_v47 = vadd.f32 %v3204_v63, %v8971_v27  ;;  %v3663_v27 = vmul.f32 %v3662_v30, %v8956_v12  ;;  %v3767_v13 = vmul.f32 %v3766_v32, %v9230_v53 }
 0x513   :  { %3647 = vrot.lane.b32.xlu0 %v3643_v38, %s10841_s1  ;;  %3469 = vrot.lane.b32.xlu1 %v3464_v2, %s10841_s1  ;;  %v2970_v0 = vmul.f32 %v9223_v40, %v2968_v60  ;;  %v3702_v38 = vstv %s9257_s27  ;;  %v3074_v2 = vmul.f32 %v3072_v1, %v8675_v58  ;;  %v2850_v1 = vmul.f32 %v9223_v40, %v2848_v15  ;;  %s9577_s27 = sld [smem:[#allocation12 + $0x36]] }
 0x514   :  { %v9289_v55 = vadd.f32 %v3353_v39, %v3065_v23  ;;  %v9291_v46 = vadd.f32 %v3213_v50, %v3209_v47  ;;  %v3292_v47 = vstv %s9279_s30  ;;  %s9587_s30 = sld [smem:[#allocation12 + $0xdb]] }
 0x515   :  { %v2782_v33 = vpop.permute.xlu0 %2781  ;;  %v2962_v45 = vpop.permute.xlu1 %2961 }
 0x516   :  { %v2786_v63 = vadd.f32 %v2782_v33, %v9117_v36  ;;  %v2966_v18 = vadd.f32 %v2962_v45, %v8995_v61  ;;  %v3703_v61 = vmul.f32 %v3702_v38, %v8956_v12  ;;  %v3524_v36 = vmul.f32 %v3522_v35, %v9175_v8  ;;  %v9324_v33 = vld [vmem:[#allocation3 + $0x3d] sm:$0xff] }
 0x517   :  { %3667 = vrot.lane.b32.xlu0 %v3663_v27, %s10841_s1  ;;  %3771 = vrot.lane.b32.xlu1 %v3767_v13, %s10841_s1  ;;  %v3786_v13 = vstv %s9285_s28  ;;  %v3274_v35 = vmul.f32 %v3272_v54, %v8675_v58  ;;  %s9709_s28 = sld [smem:[#allocation12 + $0x78]] }
 0x518   :  { %v2972_v39 = vadd.f32 %v2970_v0, %v2966_v18  ;;  %v9312_v50 = vadd.f32 %v3074_v2, %v2786_v63  ;;  %v3424_v18 = vmul.f32 %v3422_v25, %v9254_v26  ;;  %v3787_v54 = vmul.f32 %v3786_v13, %v9324_v33 }
 0x519   :  { %v2842_v60 = vpop.permute.xlu0 %2841  ;;  %v2982_v23 = vpop.permute.xlu1 %2981  ;;  %v3293_v2 = vmul.f32 %v3292_v47, %v8732_v44 }
 0x51a   :  { %v2846_v45 = vadd.f32 %v2842_v60, %v8997_v4  ;;  %v2986_v27 = vadd.f32 %v2982_v23, %v2972_v39  ;;  %v3154_v23 = vmul.f32 %v3152_v16, %v8675_v58  ;;  %v3544_v16 = vmul.f32 %v3542_v29, %v9254_v26 }
 0x51b   :  { %3707 = vrot.lane.b32.xlu0 %v3703_v61, %s10841_s1  ;;  %3529 = vrot.lane.b32.xlu1 %v3524_v36, %s10841_s1  ;;  %v3172_v61 = vstv %s9308_s18  ;;  %v3372_v29 = vstv %s9337_s19  ;;  %s9621_s18 = sld [smem:[#allocation12 + $0xfb]]  ;;  %s9673_s19 = sld [smem:[#allocation12 + $0x76]] }
 0x51c   :  { %v2852_v15 = vadd.f32 %v2850_v1, %v2846_v45  ;;  %v9339_v0 = vadd.f32 %v3274_v35, %v2986_v27  ;;  %v3050_v27 = vmul.f32 %v9223_v40, %v3048_v51  ;;  %v3173_v35 = vmul.f32 %v3172_v61, %v8732_v44 }
 0x51d   :  { %v2862_v4 = vpop.permute.xlu0 %2861  ;;  %v3284_v63 = vpop.permute.xlu1 %3283 }
 0x51e   :  { %v2866_v39 = vadd.f32 %v2862_v4, %v2852_v15  ;;  %v3289_v60 = vadd.f32 %v3284_v63, %v9066_v42  ;;  %v3484_v42 = vmul.f32 %v3482_v20, %v9175_v8  ;;  %v3746_v63 = vstv %s9328_s2  ;;  %s9734_s2 = sld [smem:[#allocation12 + $0xb6]] }
 0x51f   :  { %3429 = vrot.lane.b32.xlu0 %v3424_v18, %s10841_s1  ;;  %3791 = vrot.lane.b32.xlu1 %v3787_v54, %s10841_s1  ;;  %v3846_v18 = vstv %s9330_s23  ;;  %v3747_v54 = vmul.f32 %v3746_v63, %v9324_v33  ;;  %s9759_s23 = sld [smem:[#allocation12 + $0x5d]] }
 0x520   :  { %v9357_v25 = vadd.f32 %v3293_v2, %v3289_v60  ;;  %v9359_v36 = vadd.f32 %v3154_v23, %v2866_v39  ;;  %v3847_v2 = vmul.f32 %v3846_v18, %v9230_v53  ;;  %v2930_v23 = vmul.f32 %v9223_v40, %v2928_v17 }
 0x521   :  { %v3164_v1 = vpop.permute.xlu0 %3163  ;;  %v3042_v45 = vpop.permute.xlu1 %3041  ;;  %v3504_v17 = vmul.f32 %v3502_v52, %v9254_v26 }
 0x522   :  { %v3169_v15 = vadd.f32 %v3164_v1, %v9068_v5  ;;  %v3046_v4 = vadd.f32 %v3042_v45, %v9242_v24  ;;  %v3373_v1 = vmul.f32 %v3372_v29, %v8732_v44 }
 0x523   :  { %3489 = vrot.lane.b32.xlu0 %v3484_v42, %s10841_s1  ;;  %3549 = vrot.lane.b32.xlu1 %v3544_v16, %s10841_s1  ;;  %v3252_v42 = vstv %s9361_s15  ;;  %s9675_s15 = sld [smem:[#allocation12 + $0xf4]] }
 0x524   :  { %v9386_v51 = vadd.f32 %v3050_v27, %v3046_v4  ;;  %v9388_v20 = vadd.f32 %v3173_v35, %v3169_v15  ;;  %v3604_v27 = vmul.f32 %v3602_v57, %v9175_v8  ;;  %v3234_v35 = vmul.f32 %v3232_v14, %v8675_v58  ;;  %10876 = sst [smem:[#allocation25_spill]] %s9734_s2 }
 0x525   :  { %v2922_v5 = vpop.permute.xlu0 %2921  ;;  %v3364_v24 = vpop.permute.xlu1 %3363  ;;  %v3094_v15 = vmul.f32 %v3092_v48, %v8905_v41 }
 0x526   :  { %v2926_v39 = vadd.f32 %v2922_v5, %v9095_v22  ;;  %v3369_v60 = vadd.f32 %v3364_v24, %v9289_v55  ;;  %v3806_v24 = vstv %s9379_s21  ;;  %s9761_s21 = sld [smem:[#allocation12 + $0x7d]] }
 0x527   :  { %3751 = vrot.lane.b32.xlu0 %v3747_v54, %s10841_s1  ;;  %3851 = vrot.lane.b32.xlu1 %v3847_v2, %s10841_s1  ;;  %v3866_v54 = vstv %s9381_s6  ;;  %v3807_v48 = vmul.f32 %v3806_v24, %v9230_v53  ;;  %v3253_v2 = vmul.f32 %v3252_v42, %v8732_v44  ;;  %s9860_s6 = sld [smem:[#allocation12 + $0x9d]] }
 0x528   :  { %v2932_v45 = vadd.f32 %v2930_v23, %v2926_v39  ;;  %v9409_v16 = vadd.f32 %v3373_v1, %v3369_v60  ;;  %v3134_v23 = vmul.f32 %v3132_v3, %v8905_v41  ;;  %v3436_v1 = vstv %s9401_s10  ;;  %s9699_s10 = sld [smem:[#allocation12 + $0x1f]] }
 0x529   :  { %v2942_v22 = vpop.permute.xlu0 %2941  ;;  %v3086_v55 = vpop.permute.xlu1 %3085  ;;  %v3644_v3 = vmul.f32 %v3642_v9, %v9175_v8 }
 0x52a   :  { %v2946_v4 = vadd.f32 %v2942_v22, %v2932_v45  ;;  %v3090_v5 = vadd.f32 %v3086_v55, %v9312_v50  ;;  %v3867_v50 = vmul.f32 %v3866_v54, %v9324_v33  ;;  %v3010_v55 = vmul.f32 %v9223_v40, %v3008_v49 }
 0x52b   :  { %3509 = vrot.lane.b32.xlu0 %v3504_v17, %s10841_s1  ;;  %3609 = vrot.lane.b32.xlu1 %v3604_v27, %s10841_s1  ;;  %v3437_v17 = vmul.f32 %v3436_v1, %v8880_v10 }
 0x52c   :  { %v9432_v58 = vadd.f32 %v3234_v35, %v2946_v4  ;;  %v9434_v57 = vadd.f32 %v3094_v15, %v3090_v5  ;;  %v3826_v15 = vstv %s9426_s16  ;;  %v3926_v4 = vstv %s9428_s17  ;;  %v6241_v5 = vld [vmem:[#allocation3 + $0x30] sm:$0xff]  ;;  %s9809_s16 = sld [smem:[#allocation12 + $0x5f]]  ;;  %s9862_s17 = sld [smem:[#allocation12 + $0xbd]] }
 0x52d   :  { %v3244_v52 = vpop.permute.xlu0 %3243  ;;  %v3126_v14 = vpop.permute.xlu1 %3125  ;;  %v3927_v9 = vmul.f32 %v3926_v4, %v9230_v53 }
 0x52e   :  { %v3249_v39 = vadd.f32 %v3244_v52, %v9162_v11  ;;  %v3130_v60 = vadd.f32 %v3126_v14, %v9190_v31  ;;  %v3564_v31 = vmul.f32 %v3562_v59, %v9175_v8  ;;  %v3314_v52 = vmul.f32 %v6241_v5, %v3312_v28 }
 0x52f   :  { %3811 = vrot.lane.b32.xlu0 %v3807_v48, %s10841_s1  ;;  %3871 = vrot.lane.b32.xlu1 %v3867_v50, %s10841_s1  ;;  %v3332_v14 = vstv %s9445_s25  ;;  %s9725_s25 = sld [smem:[#allocation12 + $0x18]] }
 0x530   :  { %v9457_v44 = vadd.f32 %v3134_v23, %v3130_v60  ;;  %v9459_v45 = vadd.f32 %v3253_v2, %v3249_v39  ;;  %v3214_v2 = vmul.f32 %v3212_v62, %v8905_v41  ;;  %v3516_v39 = vstv %s9453_s14  ;;  %s9774_s14 = sld [smem:[#allocation12 + $0x56]] }
 0x531   :  { %v3002_v22 = vpop.permute.xlu0 %3001  ;;  %v3144_v11 = vpop.permute.xlu1 %3143  ;;  %v10871_v62 = vstv %s9113_s22  ;;  %s9526_s22 = sld [smem:[#allocation12 + $0xf9]] }
 0x532   :  { %v3006_v27 = vadd.f32 %v3002_v22, %v9192_v43  ;;  %v3149_v35 = vadd.f32 %v3144_v11, %v9215_v19  ;;  %v3827_v19 = vmul.f32 %v3826_v15, %v9324_v33  ;;  %v3684_v11 = vmul.f32 %v10871_v62, %v9175_v8 }
 0x533   :  { %3569 = vrot.lane.b32.xlu0 %v3564_v31, %s10841_s1  ;;  %3649 = vrot.lane.b32.xlu1 %v3644_v3, %s10841_s1  ;;  %v6242_v31 = vld [vmem:[#allocation3 + $0x29] sm:$0xff] }
 0x534   :  { %v3012_v49 = vadd.f32 %v3010_v55, %v3006_v27  ;;  %v9483_v59 = vadd.f32 %v3437_v17, %v3149_v35  ;;  %v3333_v3 = vmul.f32 %v6242_v31, %v3332_v14  ;;  %v3517_v55 = vmul.f32 %v3516_v39, %v8880_v10 }
 0x535   :  { %v3022_v43 = vpop.permute.xlu0 %3021  ;;  %v3206_v40 = vpop.permute.xlu1 %3205  ;;  %v3886_v35 = vstv %s9477_s8  ;;  %s9811_s8 = sld [smem:[#allocation12 + $0x7f]] }
 0x536   :  { %v3026_v48 = vadd.f32 %v3022_v43, %v3012_v49  ;;  %v3210_v50 = vadd.f32 %v3206_v40, %v9264_v56  ;;  %v3584_v56 = vmul.f32 %v3582_v37, %v9254_v26  ;;  %v3946_v49 = vstv %s9479_s26  ;;  %s9960_s26 = sld [smem:[#allocation12 + $0xfd]] }
 0x537   :  { %3831 = vrot.lane.b32.xlu0 %v3827_v19, %s10841_s1  ;;  %3931 = vrot.lane.b32.xlu1 %v3927_v9, %s10841_s1  ;;  %v3947_v19 = vmul.f32 %v3946_v49, %v9324_v33  ;;  %v3354_v9 = vmul.f32 %v6241_v5, %v3352_v21 }
 0x538   :  { %v9505_v60 = vadd.f32 %v3314_v52, %v3026_v48  ;;  %v9507_v28 = vadd.f32 %v3214_v2, %v3210_v50  ;;  %v3396_v52 = vstv %s9491_s4  ;;  %v3294_v2 = vmul.f32 %v3292_v47, %v8905_v41  ;;  %s9815_s4 = sld [smem:[#allocation12 + $0x58]] }
 0x539   :  { %v3324_v23 = vpop.permute.xlu0 %3323  ;;  %v3224_v22 = vpop.permute.xlu1 %3223  ;;  %v3704_v47 = vmul.f32 %v3702_v38, %v9254_v26  ;;  %v3397_v62 = vmul.f32 %v3396_v52, %v8880_v10 }
 0x53a   :  { %v3329_v17 = vadd.f32 %v3324_v23, %v9266_v34  ;;  %v3229_v27 = vadd.f32 %v3224_v22, %v9291_v46  ;;  %v3887_v46 = vmul.f32 %v3886_v35, %v9230_v53  ;;  %v3596_v23 = vstv %s9501_s20  ;;  %s9831_s20 = sld [smem:[#allocation12 + $0xf6]] }
 0x53b   :  { %3589 = vrot.lane.b32.xlu0 %v3584_v56, %s10841_s1  ;;  %3689 = vrot.lane.b32.xlu1 %v3684_v11, %s10841_s1  ;;  %v3597_v11 = vmul.f32 %v3596_v23, %v8880_v10 }
 0x53c   :  { %v9530_v37 = vadd.f32 %v3333_v3, %v3329_v17  ;;  %v9532_v43 = vadd.f32 %v3517_v55, %v3229_v27  ;;  %v3906_v55 = vstv %s9524_s3  ;;  %v4006_v17 = vstv %s9526_s22  ;;  %s9908_s3 = sld [smem:[#allocation12 + $0x9f]]  ;;  %s9965_s22 = sld [smem:[#allocation12 + $0xd8]] }
 0x53d   :  { %v3062_v40 = vpop.permute.xlu0 %3061  ;;  %v3286_v34 = vpop.permute.xlu1 %3285 }
 0x53e   :  { %v3066_v48 = vadd.f32 %v3062_v40, %v9386_v51  ;;  %v3290_v50 = vadd.f32 %v3286_v34, %v9339_v0  ;;  %v10873_v51 = vstv %s10872_s5  ;;  %v4007_v34 = vmul.f32 %v4006_v17, %v9230_v53  ;;  %s9701_s5 = sld [smem:[#allocation12 + $0x3f]] }
 0x53f   :  { %3891 = vrot.lane.b32.xlu0 %v3887_v46, %s10841_s1  ;;  %3951 = vrot.lane.b32.xlu1 %v3947_v19, %s10841_s1  ;;  %v3624_v0 = vmul.f32 %v10873_v51, %v9254_v26  ;;  %v3416_v46 = vstv %s9543_s29  ;;  %v9590_v19 = vld [vmem:[#allocation3 + $0x44] sm:$0xff]  ;;  %s9950_s29 = sld [smem:[#allocation12 + $0xdd]] }
 0x540   :  { %v3356_v21 = vadd.f32 %v3354_v9, %v3066_v48  ;;  %v9555_v5 = vadd.f32 %v3294_v2, %v3290_v50  ;;  %v3174_v50 = vmul.f32 %v3172_v61, %v8905_v41  ;;  %v3374_v2 = vmul.f32 %v3372_v29, %v8905_v41 }
 0x541   :  { %v3104_v22 = vpop.permute.xlu0 %3103  ;;  %v3304_v56 = vpop.permute.xlu1 %3303  ;;  %v3664_v61 = vmul.f32 %v3662_v30, %v9254_v26  ;;  %v10874_v29 = vstv %s9178_s24  ;;  %s9628_s24 = sld [smem:[#allocation12 + $0x38]]  ;;  %v3456_v30 = vstv %s9577_s27  ;;  %s9978_s27 = sld [smem:[#allocation12 + $0xdf]] }
 0x542   :  { %v3109_v31 = vadd.f32 %v3104_v22, %v9164_v7  ;;  %v3309_v3 = vadd.f32 %v3304_v56, %v9357_v25  ;;  %v3907_v25 = vmul.f32 %v3906_v55, %v9324_v33  ;;  %v3476_v22 = vstv %s9553_s9  ;;  %s9883_s9 = sld [smem:[#allocation12 + $0x98]] }
 0x543   :  { %3629 = vrot.lane.b32.xlu0 %v3624_v0, %s10841_s1  ;;  %3709 = vrot.lane.b32.xlu1 %v3704_v47, %s10841_s1  ;;  %v3728_v0 = vmul.f32 %v10874_v29, %v9590_v19  ;;  %v3417_v47 = vmul.f32 %v3416_v46, %v8956_v12  ;;  %v3457_v29 = vmul.f32 %v3456_v30, %v8956_v12 }
 0x544   :  { %v3399_v38 = vadd.f32 %v3397_v62, %v3109_v31  ;;  %v9579_v27 = vadd.f32 %v3597_v11, %v3309_v3  ;;  %v3966_v31 = vstv %s9573_s11  ;;  %v3477_v3 = vmul.f32 %v3476_v22, %v8880_v10  ;;  %10875 = sst [smem:[#allocation22_spill]] %s9701_s5  ;;  %s9910_s11 = sld [smem:[#allocation12 + $0xbf]] }
 0x545   :  { %v3166_v40 = vpop.permute.xlu0 %3165  ;;  %v3366_v7 = vpop.permute.xlu1 %3365  ;;  %v3768_v10 = vmul.f32 %v3766_v32, %v9590_v19 }
 0x546   :  { %v3170_v9 = vadd.f32 %v3166_v40, %v9359_v36  ;;  %v3370_v48 = vadd.f32 %v3366_v7, %v3356_v21 }
 0x547   :  { %3911 = vrot.lane.b32.xlu0 %v3907_v25, %s10841_s1  ;;  %4011 = vrot.lane.b32.xlu1 %v4007_v34, %s10841_s1  ;;  %v3967_v25 = vmul.f32 %v3966_v31, %v9230_v53  ;;  %v3986_v34 = vstv %s9587_s30  ;;  %v3760_v12 = vstv %s9628_s24  ;;  %s10012_s30 = sld [smem:[#allocation12 + $0x3c]]  ;;  %s10391_s24 = sld [smem:[#allocation12 + $0xbe]] }
 0x548   :  { %v9606_v36 = vadd.f32 %v3174_v50, %v3170_v9  ;;  %v9608_v21 = vadd.f32 %v3374_v2, %v3370_v48  ;;  %v3254_v9 = vmul.f32 %v3252_v42, %v8905_v41  ;;  %v9645_v48 = vld [vmem:[#allocation3 + $0x46] sm:$0xff]  ;;  %v3556_v41 = vstv %s9604_s0  ;;  %10878 = sst [smem:[#allocation20_spill]] %s9883_s9  ;;  %s9914_s0 = sld [smem:[#allocation12 + $0x1a]] }
 0x549   :  { %v3184_v56 = vpop.permute.xlu0 %3183  ;;  %v3408_v51 = vpop.permute.xlu1 %3407 }
 0x54a   :  { %v3189_v62 = vadd.f32 %v3184_v56, %v9388_v20  ;;  %v3413_v11 = vadd.f32 %v3408_v51, %v3399_v38  ;;  %v4050_v56 = vstv %s9593_s7  ;;  %v3438_v51 = vmul.f32 %v3436_v1, %v9175_v8  ;;  %s10055_s7 = sld [smem:[#allocation12 + $0x7a]] }
 0x54b   :  { %3669 = vrot.lane.b32.xlu0 %v3664_v61, %s10841_s1  ;;  %3733 = vrot.lane.b32.xlu1 %v3728_v0, %s10841_s1  ;;  %v3987_v61 = vmul.f32 %v3986_v34, %v9324_v33  ;;  %v4051_v1 = vmul.f32 %v4050_v56, %v9645_v48  ;;  %v9677_v0 = vld [vmem:[#allocation3 + $0x45] sm:$0xff] }
 0x54c   :  { %v9631_v40 = vadd.f32 %v3417_v47, %v3413_v11  ;;  %v9633_v20 = vadd.f32 %v3477_v3, %v3189_v62  ;;  %v4026_v11 = vstv %s9621_s18  ;;  %v6243_v3 = vld [vmem:[#allocation3 + $0x32] sm:$0xff]  ;;  %s10057_s18 = sld [smem:[#allocation12 + $0x1c]] }
 0x54d   :  { %v3246_v38 = vpop.permute.xlu0 %3245  ;;  %v3146_v7 = vpop.permute.xlu1 %3145 }
 0x54e   :  { %v3250_v50 = vadd.f32 %v3246_v38, %v9432_v58  ;;  %v3150_v2 = vadd.f32 %v3146_v7, %v9457_v44  ;;  %v3557_v38 = vmul.f32 %v6243_v3, %v3556_v41 }
 0x54f   :  { %3971 = vrot.lane.b32.xlu0 %v3967_v25, %s10841_s1  ;;  %3773 = vrot.lane.b32.xlu1 %v3768_v10, %s10841_s1 }
 0x550   :  { %v9660_v32 = vadd.f32 %v3254_v9, %v3250_v50  ;;  %v9662_v42 = vadd.f32 %v3438_v51, %v3150_v2  ;;  %v6244_v50 = vld [vmem:[#allocation3 + $0x31] sm:$0xff] }
 0x551   :  { %v3264_v58 = vpop.permute.xlu0 %3263  ;;  %v3448_v44 = vpop.permute.xlu1 %3447  ;;  %v3334_v2 = vmul.f32 %v6244_v50, %v3332_v14 }
 0x552   :  { %v3269_v47 = vadd.f32 %v3264_v58, %v9459_v45  ;;  %v3453_v62 = vadd.f32 %v3448_v44, %v9483_v59  ;;  %v4027_v45 = vmul.f32 %v4026_v11, %v9324_v33  ;;  %v3788_v59 = vmul.f32 %v3786_v13, %v9677_v0 }
 0x553   :  { %3991 = vrot.lane.b32.xlu0 %v3987_v61, %s10841_s1  ;;  %4055 = vrot.lane.b32.xlu1 %v4051_v1, %s10841_s1  ;;  %v4090_v44 = vstv %s9650_s13  ;;  %v3761_v61 = vmul.f32 %v3760_v12, %v9230_v53  ;;  %v3636_v13 = vstv %s9658_s12  ;;  %s10097_s13 = sld [smem:[#allocation12 + $0x5a]]  ;;  %s10100_s12 = sld [smem:[#allocation12 + $0x7c]] }
 0x554   :  { %v3459_v7 = vadd.f32 %v3457_v29, %v3453_v62  ;;  %v9687_v25 = vadd.f32 %v3557_v38, %v3269_v47  ;;  %v3748_v47 = vmul.f32 %v3746_v63, %v9677_v0  ;;  %v4091_v62 = vmul.f32 %v4090_v44, %v9645_v48 }
 0x555   :  { %v3326_v10 = vpop.permute.xlu0 %3325  ;;  %v3468_v9 = vpop.permute.xlu1 %3467  ;;  %v3536_v38 = vstv %s9673_s19  ;;  %v3518_v63 = vmul.f32 %v3516_v39, %v9175_v8  ;;  %v3848_v39 = vmul.f32 %v3846_v18, %v9590_v19  ;;  %v3840_v18 = vstv %s9709_s28  ;;  %s10142_s28 = sld [smem:[#allocation12 + $0x5c]]  ;;  %s10439_s19 = sld [smem:[#allocation12 + $0xde]] }
 0x556   :  { %v3330_v51 = vadd.f32 %v3326_v10, %v9505_v60  ;;  %v3473_v58 = vadd.f32 %v3468_v9, %v3459_v7  ;;  %v3676_v7 = vstv %s9675_s15  ;;  %s9929_s15 = sld [smem:[#allocation12 + $0xd6]] }
 0x557   :  { %4031 = vrot.lane.b32.xlu0 %v4027_v45, %s10841_s1  ;;  %3793 = vrot.lane.b32.xlu1 %v3788_v59, %s10841_s1  ;;  %v3637_v45 = vmul.f32 %v6243_v3, %v3636_v13 }
 0x558   :  { %v9711_v14 = vadd.f32 %v3334_v2, %v3330_v51  ;;  %v9713_v60 = vadd.f32 %v3761_v61, %v3473_v58  ;;  %v3808_v2 = vmul.f32 %v3806_v24, %v9590_v19  ;;  %v9746_v51 = vld [vmem:[#allocation3 + $0x33] sm:$0xff]  ;;  %v3677_v61 = vmul.f32 %v6243_v3, %v3676_v7 }
 0x559   :  { %v3344_v1 = vpop.permute.xlu0 %3343  ;;  %v3226_v29 = vpop.permute.xlu1 %3225  ;;  %v3537_v58 = vmul.f32 %v9746_v51, %v3536_v38  ;;  %v4070_v24 = vstv %s9699_s10  ;;  %s10131_s10 = sld [smem:[#allocation12 + $0xba]] }
 0x55a   :  { %v3349_v10 = vadd.f32 %v3344_v1, %v9530_v37  ;;  %v3230_v9 = vadd.f32 %v3226_v29, %v9507_v28  ;;  %v9753_v1 = vld [vmem:[#allocation3 + $0x47] sm:$0xff] }
 0x55b   :  { %3753 = vrot.lane.b32.xlu0 %v3748_v47, %s10841_s1  ;;  %4095 = vrot.lane.b32.xlu1 %v4091_v62, %s10841_s1  ;;  %v4110_v62 = vstv %s9701_s5  ;;  %s9784_s5 = sld [smem:[#allocation12 + $0xb8]] }
 0x55c   :  { %v9736_v59 = vadd.f32 %v3637_v45, %v3349_v10  ;;  %v9738_v37 = vadd.f32 %v3518_v63, %v3230_v9  ;;  %v4111_v45 = vmul.f32 %v4110_v62, %v9753_v1  ;;  %v3398_v63 = vmul.f32 %v3396_v52, %v9175_v8 }
 0x55d   :  { %v3384_v28 = vpop.permute.xlu0 %3383  ;;  %v3528_v50 = vpop.permute.xlu1 %3527 }
 0x55e   :  { %v3389_v29 = vadd.f32 %v3384_v28, %v9409_v16  ;;  %v3533_v47 = vadd.f32 %v3528_v50, %v9532_v43  ;;  %v4071_v43 = vmul.f32 %v4070_v24, %v9753_v1 }
 0x55f   :  { %3813 = vrot.lane.b32.xlu0 %v3808_v2, %s10841_s1  ;;  %3853 = vrot.lane.b32.xlu1 %v3848_v39, %s10841_s1  ;;  %v3720_v2 = vstv %s9725_s25  ;;  %v3841_v39 = vmul.f32 %v3840_v18, %v9230_v53  ;;  %s10159_s25 = sld [smem:[#allocation12 + $0xff]] }
 0x560   :  { %v3539_v3 = vadd.f32 %v3537_v58, %v3533_v47  ;;  %v9766_v10 = vadd.f32 %v3677_v61, %v3389_v29  ;;  %v3616_v58 = vstv %s9734_s2  ;;  %s9841_s2 = sld [smem:[#allocation12 + $0x96]] }
 0x561   :  { %v3548_v16 = vpop.permute.xlu1 %3547  ;;  %v3106_v9 = vpop.permute.xlu0 %3105  ;;  %10877 = sst [smem:[#allocation24_spill]] %s9784_s5 }
 0x562   :  { %v3553_v28 = vadd.f32 %v3548_v16, %v3539_v3  ;;  %v3110_v50 = vadd.f32 %v3106_v9, %v9434_v57  ;;  %v3828_v57 = vmul.f32 %v3826_v15, %v9677_v0  ;;  %v3888_v3 = vmul.f32 %v3886_v35, %v9590_v19 }
 0x563   :  { %4075 = vrot.lane.b32.xlu0 %v4071_v43, %s10841_s1  ;;  %4115 = vrot.lane.b32.xlu1 %v4111_v45, %s10841_s1  ;;  %v3721_v16 = vmul.f32 %v3720_v2, %v9230_v53  ;;  %v3598_v9 = vmul.f32 %v3596_v23, %v9175_v8 }
 0x564   :  { %v9789_v61 = vadd.f32 %v3398_v63, %v3110_v50  ;;  %v9791_v52 = vadd.f32 %v3841_v39, %v3553_v28  ;;  %v4130_v63 = vstv %s9759_s23  ;;  %v4170_v28 = vstv %s9761_s21  ;;  %s10185_s23 = sld [smem:[#allocation12 + $0x9a]]  ;;  %s6345_s21 = smov 50  }
 0x565   :  { %v3306_v29 = vpop.permute.xlu1 %3305  ;;  %v3428_v47 = vpop.permute.xlu0 %3427  ;;  %v4171_v50 = vmul.f32 %v4170_v28, %v9645_v48  ;;  %v3617_v39 = vmul.f32 %v9746_v51, %v3616_v58 }
 0x566   :  { %v3310_v43 = vadd.f32 %v3306_v29, %v9555_v5  ;;  %v3433_v45 = vadd.f32 %v3428_v47, %v9631_v40  ;;  %v4131_v40 = vmul.f32 %v4130_v63, %v9645_v48  ;;  %v3496_v29 = vstv %s9774_s14  ;;  %s10220_s14 = sld [smem:[#allocation12 + $0xfa]] }
 0x567   :  { %3833 = vrot.lane.b32.xlu0 %v3828_v57, %s10841_s1  ;;  %3893 = vrot.lane.b32.xlu1 %v3888_v3, %s10841_s1  ;;  %v3478_v3 = vmul.f32 %v3476_v22, %v9175_v8  ;;  %v3928_v22 = vmul.f32 %v3926_v4, %v9590_v19 }
 0x568   :  { %v9817_v15 = vadd.f32 %v3721_v16, %v3433_v45  ;;  %v9819_v35 = vadd.f32 %v3598_v9, %v3310_v43  ;;  %v10822_v16 = vstv %s9784_s5  ;;  %s9952_s5 = sld [smem:[#allocation12 + $0x3a]] }
 0x569   :  { %v3608_v23 = vpop.permute.xlu1 %3607  ;;  %v3186_v5 = vpop.permute.xlu0 %3185 }
 0x56a   :  { %v3613_v47 = vadd.f32 %v3608_v23, %v9579_v27  ;;  %v3190_v57 = vadd.f32 %v3186_v5, %v9606_v36  ;;  %v3868_v36 = vmul.f32 %v3866_v54, %v9677_v0  ;;  %v3497_v23 = vmul.f32 %v9746_v51, %v3496_v29 }
 0x56b   :  { %4135 = vrot.lane.b32.xlu0 %v4131_v40, %s10841_s1  ;;  %4175 = vrot.lane.b32.xlu1 %v4171_v50, %s10841_s1  ;;  %v3921_v5 = vmul.f32 %v10822_v16, %v9230_v53  ;;  %v3800_v54 = vstv %s9815_s4  ;;  %s10243_s4 = sld [smem:[#allocation12 + $0xda]] }
 0x56c   :  { %v3619_v9 = vadd.f32 %v3617_v39, %v3613_v47  ;;  %v9843_v43 = vadd.f32 %v3478_v3, %v3190_v57  ;;  %v4150_v39 = vstv %s9809_s16  ;;  %v4190_v47 = vstv %s9811_s8  ;;  %s10222_s16 = sld [smem:[#allocation12 + $0x9c]] }
 0x56d   :  { %v3628_v45 = vpop.permute.xlu1 %3627  ;;  %v3488_v27 = vpop.permute.xlu0 %3487  ;;  %s10882_s8 = sld [smem:[#allocation24_spill]] }
 0x56e   :  { %v3633_v40 = vadd.f32 %v3628_v45, %v3619_v9  ;;  %v3493_v50 = vadd.f32 %v3488_v27, %v9633_v20  ;;  %v4151_v20 = vmul.f32 %v4150_v39, %v9753_v1  ;;  %v4191_v45 = vmul.f32 %v4190_v47, %v9753_v1 }
 0x56f   :  { %3873 = vrot.lane.b32.xlu0 %v3868_v36, %s10841_s1  ;;  %3933 = vrot.lane.b32.xlu1 %v3928_v22, %s10841_s1  ;;  %v3696_v27 = vstv %s9831_s20  ;;  %s10258_s20 = sld [smem:[#allocation12 + $0x1e]] }
 0x570   :  { %v3499_v4 = vadd.f32 %v3497_v23, %v3493_v50  ;;  %v9867_v57 = vadd.f32 %v3921_v5, %v3633_v40  ;;  %v3801_v23 = vmul.f32 %v3800_v54, %v9230_v53  ;;  %v3678_v5 = vmul.f32 %v3676_v7, %v9175_v8 }
 0x571   :  { %v3386_v3 = vpop.permute.xlu1 %3385  ;;  %v3508_v9 = vpop.permute.xlu0 %3507  ;;  %v3576_v40 = vstv %s9841_s2  ;;  %v3968_v7 = vmul.f32 %v3966_v31, %v9590_v19  ;;  %s10188_s2 = sld [smem:[#allocation12 + $0xbc]] }
 0x572   :  { %v3390_v36 = vadd.f32 %v3386_v3, %v9608_v21  ;;  %v3513_v22 = vadd.f32 %v3508_v9, %v3499_v4  ;;  %v3908_v3 = vmul.f32 %v3906_v55, %v9677_v0  ;;  %v3697_v9 = vmul.f32 %v9746_v51, %v3696_v27 }
 0x573   :  { %4155 = vrot.lane.b32.xlu0 %v4151_v20, %s10841_s1  ;;  %4195 = vrot.lane.b32.xlu1 %v4191_v45, %s10841_s1  ;;  %v3558_v20 = vmul.f32 %v3556_v41, %v9175_v8 }
 0x574   :  { %v9888_v50 = vadd.f32 %v3801_v23, %v3513_v22  ;;  %v9890_v16 = vadd.f32 %v3678_v5, %v3390_v36  ;;  %v4210_v22 = vstv %s9860_s6  ;;  %v4250_v23 = vstv %s9862_s17  ;;  %s10260_s6 = sld [smem:[#allocation12 + $0xdc]] }
 0x575   :  { %v3688_v21 = vpop.permute.xlu1 %3687  ;;  %v3266_v4 = vpop.permute.xlu0 %3265  ;;  %v3577_v5 = vmul.f32 %v9746_v51, %v3576_v40  ;;  %s10272_s17 = sld [smem:[#allocation12 + $0xfc]] }
 0x576   :  { %v3693_v45 = vadd.f32 %v3688_v21, %v9766_v10  ;;  %v3270_v36 = vadd.f32 %v3266_v4, %v9660_v32  ;;  %v4211_v32 = vmul.f32 %v4210_v22, %v9645_v48  ;;  %v4251_v10 = vmul.f32 %v4250_v23, %v9645_v48 }
 0x577   :  { %3913 = vrot.lane.b32.xlu0 %v3908_v3, %s10841_s1  ;;  %3973 = vrot.lane.b32.xlu1 %v3968_v7, %s10841_s1  ;;  %v3418_v3 = vmul.f32 %v3416_v46, %v9254_v26  ;;  %v3880_v7 = vstv %s9883_s9  ;;  %v3458_v46 = vmul.f32 %v3456_v30, %v9254_v26  ;;  %v3740_v26 = vstv %s9914_s0  ;;  %s9987_s9 = sld [smem:[#allocation12 + $0xf8]]  ;;  %s10332_s0 = sld [smem:[#allocation12 + $0x7e]] }
 0x578   :  { %v9916_v8 = vadd.f32 %v3697_v9, %v3693_v45  ;;  %v9918_v55 = vadd.f32 %v3558_v20, %v3270_v36 }
 0x579   :  { %v3568_v31 = vpop.permute.xlu0 %3567  ;;  %v3410_v41 = vpop.permute.xlu1 %3409 }
 0x57a   :  { %v3573_v21 = vadd.f32 %v3568_v31, %v9687_v25  ;;  %v3414_v4 = vadd.f32 %v3410_v41, %v9789_v61  ;;  %v3948_v25 = vmul.f32 %v3946_v49, %v9677_v0  ;;  %v4008_v61 = vmul.f32 %v4006_v17, %v9590_v19 }
 0x57b   :  { %4215 = vrot.lane.b32.xlu0 %v4211_v32, %s10841_s1  ;;  %4255 = vrot.lane.b32.xlu1 %v4251_v10, %s10841_s1  ;;  %v3881_v31 = vmul.f32 %v3880_v7, %v9230_v53  ;;  %v4230_v49 = vstv %s9908_s3  ;;  %v4270_v10 = vstv %s9910_s11  ;;  %s10311_s3 = sld [smem:[#allocation13 + $0x1]]  ;;  %s10330_s11 = sld [smem:[#allocation12 + $0x5e]] }
 0x57c   :  { %v3579_v9 = vadd.f32 %v3577_v5, %v3573_v21  ;;  %v9939_v20 = vadd.f32 %v3418_v3, %v3414_v4  ;;  %v4271_v21 = vmul.f32 %v4270_v10, %v9753_v1  ;;  %v3656_v4 = vstv %s9929_s15  ;;  %s6334_s15 = smov 15  }
 0x57d   :  { %v3588_v45 = vpop.permute.xlu0 %3587  ;;  %v3450_v36 = vpop.permute.xlu1 %3449 }
 0x57e   :  { %v3593_v41 = vadd.f32 %v3588_v45, %v3579_v9  ;;  %v3454_v32 = vadd.f32 %v3450_v36, %v9662_v42  ;;  %v4231_v42 = vmul.f32 %v4230_v49, %v9753_v1  ;;  %v3741_v45 = vmul.f32 %v3740_v26, %v9324_v33  ;;  %v6246_v36 = vld [vmem:[#allocation3 + $0x3a] sm:$0xff] }
 0x57f   :  { %3953 = vrot.lane.b32.xlu0 %v3948_v25, %s10841_s1  ;;  %4013 = vrot.lane.b32.xlu1 %v4008_v61, %s10841_s1  ;;  %v3638_v25 = vmul.f32 %v6246_v36, %v3636_v13  ;;  %v3988_v13 = vmul.f32 %v3986_v34, %v9677_v0  ;;  %v3960_v34 = vstv %s9965_s22  ;;  %v10025_v36 = vld [vmem:[#allocation3 + $0x4e] sm:$0xff] }
 0x580   :  { %v3460_v17 = vadd.f32 %v3458_v46, %v3454_v32  ;;  %v9967_v53 = vadd.f32 %v3881_v31, %v3593_v41  ;;  %v4028_v41 = vmul.f32 %v4026_v11, %v9677_v0  ;;  %v4290_v32 = vstv %s9950_s29  ;;  %s6335_s29 = smov 10  }
 0x581   :  { %v3346_v30 = vpop.permute.xlu0 %3345  ;;  %v3732_v5 = vpop.permute.xlu1 %3731 }
 0x582   :  { %v3350_v3 = vadd.f32 %v3346_v30, %v9711_v14  ;;  %v3737_v9 = vadd.f32 %v3732_v5, %v9817_v15  ;;  %v3657_v14 = vmul.f32 %v9746_v51, %v3656_v4  ;;  %v3780_v30 = vstv %s9952_s5  ;;  %s10309_s5 = sld [smem:[#allocation13]] }
 0x583   :  { %4235 = vrot.lane.b32.xlu0 %v4231_v42, %s10841_s1  ;;  %4275 = vrot.lane.b32.xlu1 %v4271_v21, %s10841_s1  ;;  %v4330_v42 = vstv %s9960_s26  ;;  %v3762_v21 = vmul.f32 %v3760_v12, %v9590_v19  ;;  %s10884_s26 = sld [smem:[#allocation27_spill]] }
 0x584   :  { %v9992_v15 = vadd.f32 %v3741_v45, %v3737_v9  ;;  %v9994_v61 = vadd.f32 %v3638_v25, %v3350_v3  ;;  %v4331_v12 = vmul.f32 %v4330_v42, %v9645_v48  ;;  %v3781_v45 = vmul.f32 %v3780_v30, %v9324_v33 }
 0x585   :  { %v3648_v46 = vpop.permute.xlu0 %3647  ;;  %v3470_v31 = vpop.permute.xlu1 %3469 }
 0x586   :  { %v3653_v5 = vadd.f32 %v3648_v46, %v9736_v59  ;;  %v3474_v51 = vadd.f32 %v3470_v31, %v3460_v17  ;;  %v4291_v17 = vmul.f32 %v4290_v32, %v9645_v48  ;;  %v4310_v46 = vstv %s9978_s27  ;;  %v6247_v31 = vld [vmem:[#allocation3 + $0x3c] sm:$0xff] }
 0x587   :  { %3993 = vrot.lane.b32.xlu0 %v3988_v13, %s10841_s1  ;;  %4033 = vrot.lane.b32.xlu1 %v4028_v41, %s10841_s1  ;;  %v3961_v13 = vmul.f32 %v6247_v31, %v3960_v34  ;;  %v4000_v41 = vstv %s9987_s9  ;;  %s10285_s9 = sld [smem:[#allocation12 + $0x3e]] }
 0x588   :  { %v3659_v11 = vadd.f32 %v3657_v14, %v3653_v5  ;;  %v10014_v3 = vadd.f32 %v3762_v21, %v3474_v51 }
 0x589   :  { %v3668_v9 = vpop.permute.xlu0 %3667  ;;  %v3772_v59 = vpop.permute.xlu1 %3771 }
 0x58a   :  { %v3673_v25 = vadd.f32 %v3668_v9, %v3659_v11  ;;  %v3777_v14 = vadd.f32 %v3772_v59, %v9713_v60  ;;  %v4311_v60 = vmul.f32 %v4310_v46, %v9753_v1  ;;  %v4052_v11 = vmul.f32 %v4050_v56, %v10025_v36  ;;  %v10042_v9 = vld [vmem:[#allocation3 + $0x4f] sm:$0xff] }
 0x58b   :  { %4295 = vrot.lane.b32.xlu0 %v4291_v17, %s10841_s1  ;;  %4335 = vrot.lane.b32.xlu1 %v4331_v12, %s10841_s1  ;;  %v10046_v12 = vld [vmem:[#allocation3 + $0x3b] sm:$0xff]  ;;  %v4084_v56 = vstv %s10012_s30  ;;  %s10364_s30 = sld [smem:[#allocation13 + $0x2]] }
 0x58c   :  { %v3783_v5 = vadd.f32 %v3781_v45, %v3777_v14  ;;  %v10034_v51 = vadd.f32 %v3961_v13, %v3673_v25  ;;  %v3538_v45 = vmul.f32 %v10046_v12, %v3536_v38  ;;  %v4001_v25 = vmul.f32 %v6247_v31, %v4000_v41 }
 0x58d   :  { %v3708_v33 = vpop.permute.xlu0 %3707  ;;  %v3530_v21 = vpop.permute.xlu1 %3529  ;;  %v4072_v38 = vmul.f32 %v4070_v24, %v10042_v9  ;;  %v4092_v31 = vmul.f32 %v4090_v44, %v10025_v36 }
 0x58e   :  { %v3713_v59 = vadd.f32 %v3708_v33, %v9916_v8  ;;  %v3534_v17 = vadd.f32 %v3530_v21, %v9738_v37 }
 0x58f   :  { %4315 = vrot.lane.b32.xlu0 %v4311_v60, %s10841_s1  ;;  %4057 = vrot.lane.b32.xlu1 %v4052_v11, %s10841_s1  ;;  %v3722_v60 = vmul.f32 %v3720_v2, %v9590_v19  ;;  %v4085_v11 = vmul.f32 %v4084_v56, %v9645_v48  ;;  %v4132_v2 = vmul.f32 %v4130_v63, %v10025_v36  ;;  %v4044_v63 = vstv %s10057_s18  ;;  %s10389_s18 = sld [smem:[#allocation12 + $0x9e]] }
 0x590   :  { %v3540_v8 = vadd.f32 %v3538_v45, %v3534_v17  ;;  %v10060_v37 = vadd.f32 %v4001_v25, %v3713_v59  ;;  %v3498_v25 = vmul.f32 %v10046_v12, %v3496_v29 }
 0x591   :  { %v3430_v14 = vpop.permute.xlu0 %3429  ;;  %v3792_v13 = vpop.permute.xlu1 %3791 }
 0x592   :  { %v3434_v33 = vadd.f32 %v3430_v14, %v9939_v20  ;;  %v3797_v21 = vadd.f32 %v3792_v13, %v3783_v5  ;;  %v4112_v20 = vmul.f32 %v4110_v62, %v10042_v9  ;;  %v3842_v14 = vmul.f32 %v3840_v18, %v9590_v19 }
 0x593   :  { %4077 = vrot.lane.b32.xlu0 %v4072_v38, %s10841_s1  ;;  %4097 = vrot.lane.b32.xlu1 %v4092_v31, %s10841_s1  ;;  %v3860_v62 = vstv %s10055_s7  ;;  %v4152_v18 = vmul.f32 %v4150_v39, %v10042_v9  ;;  %v4172_v38 = vmul.f32 %v4170_v28, %v10025_v36  ;;  %s10366_s7 = sld [smem:[#allocation13 + $0x3]] }
 0x594   :  { %v10077_v24 = vadd.f32 %v3722_v60, %v3434_v33  ;;  %v10079_v59 = vadd.f32 %v4085_v11, %v3797_v21  ;;  %v10112_v21 = vld [vmem:[#allocation3 + $0x3d] sm:$0xff]  ;;  %v4045_v11 = vmul.f32 %v4044_v63, %v9645_v48 }
 0x595   :  { %v3490_v44 = vpop.permute.xlu0 %3489  ;;  %v3550_v17 = vpop.permute.xlu1 %3549  ;;  %v3861_v60 = vmul.f32 %v10112_v21, %v3860_v62 }
 0x596   :  { %v3494_v5 = vadd.f32 %v3490_v44, %v9843_v43  ;;  %v3554_v45 = vadd.f32 %v3550_v17, %v3540_v8  ;;  %v4192_v44 = vmul.f32 %v4190_v47, %v10042_v9  ;;  %v4212_v17 = vmul.f32 %v4210_v22, %v10025_v36 }
 0x597   :  { %4117 = vrot.lane.b32.xlu0 %v4112_v20, %s10841_s1  ;;  %4137 = vrot.lane.b32.xlu1 %v4132_v2, %s10841_s1  ;;  %v3820_v47 = vstv %s10097_s13  ;;  %v4164_v22 = vstv %s10100_s12  ;;  %s10419_s13 = sld [smem:[#allocation13 + $0x4]]  ;;  %s10421_s12 = sld [smem:[#allocation13 + $0x5]] }
 0x598   :  { %v3500_v43 = vadd.f32 %v3498_v25, %v3494_v5  ;;  %v10102_v8 = vadd.f32 %v3842_v14, %v3554_v45  ;;  %v3618_v5 = vmul.f32 %v10046_v12, %v3616_v58  ;;  %v3802_v45 = vmul.f32 %v3800_v54, %v9590_v19 }
 0x599   :  { %v3752_v29 = vpop.permute.xlu0 %3751  ;;  %v3852_v13 = vpop.permute.xlu1 %3851  ;;  %v4232_v54 = vmul.f32 %v4230_v49, %v10042_v9 }
 0x59a   :  { %v3757_v31 = vadd.f32 %v3752_v29, %v9992_v15  ;;  %v3857_v33 = vadd.f32 %v3852_v13, %v9791_v52 }
 0x59b   :  { %4157 = vrot.lane.b32.xlu0 %v4152_v18, %s10841_s1  ;;  %4177 = vrot.lane.b32.xlu1 %v4172_v38, %s10841_s1  ;;  %v3821_v18 = vmul.f32 %v10112_v21, %v3820_v47  ;;  %v4165_v38 = vmul.f32 %v4164_v22, %v9645_v48 }
 0x59c   :  { %v3863_v28 = vadd.f32 %v3861_v60, %v3857_v33  ;;  %v10122_v39 = vadd.f32 %v4045_v11, %v3757_v31  ;;  %v4272_v33 = vmul.f32 %v4270_v10, %v10042_v9  ;;  %v4292_v60 = vmul.f32 %v4290_v32, %v10025_v36 }
 0x59d   :  { %v3510_v15 = vpop.permute.xlu0 %3509  ;;  %v3610_v52 = vpop.permute.xlu1 %3609  ;;  %v3578_v11 = vmul.f32 %v10046_v12, %v3576_v40  ;;  %v4124_v10 = vstv %s10142_s28  ;;  %s10457_s28 = sld [smem:[#allocation13 + $0x6]] }
 0x59e   :  { %v3514_v20 = vadd.f32 %v3510_v15, %v3500_v43  ;;  %v3614_v2 = vadd.f32 %v3610_v52, %v9819_v35  ;;  %v4252_v43 = vmul.f32 %v4250_v23, %v10025_v36  ;;  %v3940_v52 = vstv %s10131_s10  ;;  %s10441_s10 = sld [smem:[#allocation12 + $0xfe]] }
 0x59f   :  { %4197 = vrot.lane.b32.xlu0 %v4192_v44, %s10841_s1  ;;  %4217 = vrot.lane.b32.xlu1 %v4212_v17, %s10841_s1  ;;  %v3658_v44 = vmul.f32 %v10046_v12, %v3656_v4  ;;  %v4332_v4 = vmul.f32 %v4330_v42, %v10025_v36 }
 0x5a0   :  { %v10145_v25 = vadd.f32 %v3618_v5, %v3614_v2  ;;  %v10147_v35 = vadd.f32 %v3802_v45, %v3514_v20  ;;  %v3941_v20 = vmul.f32 %v10112_v21, %v3940_v52  ;;  %v4350_v45 = vstv %s10159_s25  ;;  %s5767_s25 = sld [smem:[#allocation13 + $0x7]] }
 0x5a1   :  { %v3812_v14 = vpop.permute.xlu0 %3811  ;;  %v3872_v58 = vpop.permute.xlu1 %3871 }
 0x5a2   :  { %v3817_v29 = vadd.f32 %v3812_v14, %v9888_v50  ;;  %v3877_v13 = vadd.f32 %v3872_v58, %v3863_v28  ;;  %v4125_v14 = vmul.f32 %v4124_v10, %v9645_v48 }
 0x5a3   :  { %4237 = vrot.lane.b32.xlu0 %v4232_v54, %s10841_s1  ;;  %4257 = vrot.lane.b32.xlu1 %v4252_v43, %s10841_s1  ;;  %v4351_v43 = vmul.f32 %v4350_v45, %v9753_v1 }
 0x5a4   :  { %v3823_v49 = vadd.f32 %v3821_v18, %v3817_v29  ;;  %v10166_v23 = vadd.f32 %v4165_v38, %v3877_v13  ;;  %v4352_v29 = vmul.f32 %v4350_v45, %v10042_v9  ;;  %v3698_v18 = vmul.f32 %v10046_v12, %v3696_v27 }
 0x5a5   :  { %v3570_v50 = vpop.permute.xlu0 %3569  ;;  %v3650_v31 = vpop.permute.xlu1 %3649  ;;  %v3882_v38 = vmul.f32 %v3880_v7, %v9590_v19 }
 0x5a6   :  { %v3574_v28 = vadd.f32 %v3570_v50, %v9918_v55  ;;  %v3654_v15 = vadd.f32 %v3650_v31, %v9994_v61  ;;  %v4312_v61 = vmul.f32 %v4310_v46, %v10042_v9  ;;  %v4244_v50 = vstv %s10188_s2  ;;  %s10887_s2 = sld [smem:[#allocation28_spill]] }
 0x5a7   :  { %4277 = vrot.lane.b32.xlu0 %v4272_v33, %s10841_s1  ;;  %4297 = vrot.lane.b32.xlu1 %v4292_v60, %s10841_s1 }
 0x5a8   :  { %v3580_v40 = vadd.f32 %v3578_v11, %v3574_v28  ;;  %v3660_v32 = vadd.f32 %v3658_v44, %v3654_v15  ;;  %v4245_v11 = vmul.f32 %v4244_v50, %v9645_v48 }
 0x5a9   :  { %v3832_v55 = vpop.permute.xlu0 %3831  ;;  %v3932_v17 = vpop.permute.xlu1 %3931 }
 0x5aa   :  { %v3837_v2 = vadd.f32 %v3832_v55, %v3823_v49  ;;  %v3937_v5 = vadd.f32 %v3932_v17, %v9867_v57  ;;  %v3900_v49 = vstv %s10185_s23  ;;  %s6344_s23 = smov 55  }
 0x5ab   :  { %4317 = vrot.lane.b32.xlu0 %v4312_v61, %s10841_s1  ;;  %4337 = vrot.lane.b32.xlu1 %v4332_v4, %s10841_s1  ;;  %v3901_v60 = vmul.f32 %v10112_v21, %v3900_v49  ;;  %v10883_v61 = vstv %s10882_s8  ;;  %v4002_v4 = vmul.f32 %v4000_v41, %v9590_v19  ;;  %s6348_s8 = smov 75  }
 0x5ac   :  { %v3943_v46 = vadd.f32 %v3941_v20, %v3937_v5  ;;  %v10206_v42 = vadd.f32 %v4125_v14, %v3837_v2  ;;  %v4020_v20 = vstv %s10220_s14  ;;  %v4204_v2 = vstv %s10222_s16  ;;  %v4807_v6 = vld [vmem:[%s10887_s2 + $0x20] sm:$0xff]  ;;  %s10888_s16 = sld [smem:[#allocation29_spill]]  ;;  %s6346_s14 = smov 65  }
 0x5ad   :  { %v3590_v58 = vpop.permute.xlu0 %3589  ;;  %v3690_v54 = vpop.permute.xlu1 %3689  ;;  %v4205_v41 = vmul.f32 %v4204_v2, %v9645_v48 }
 0x5ae   :  { %v3594_v57 = vadd.f32 %v3590_v58, %v3580_v40  ;;  %v3694_v13 = vadd.f32 %v3690_v54, %v9890_v16  ;;  %v4021_v54 = vmul.f32 %v10112_v21, %v4020_v20 }
 0x5af   :  { %4355 = vrot.lane.b32.xlu0 %v4351_v43, %s10841_s1  ;;  %4357 = vrot.lane.b32.xlu1 %v4352_v29, %s10841_s1 }
 0x5b0   :  { %v3700_v16 = vadd.f32 %v3698_v18, %v3694_v13  ;;  %v10225_v31 = vadd.f32 %v3882_v38, %v3594_v57  ;;  %v3742_v38 = vmul.f32 %v3740_v26, %v9677_v0 }
 0x5b1   :  { %v3892_v27 = vpop.permute.xlu0 %3891  ;;  %v3952_v12 = vpop.permute.xlu1 %3951 }
 0x5b2   :  { %v3897_v7 = vadd.f32 %v3892_v27, %v9967_v53  ;;  %v3957_v33 = vadd.f32 %v3952_v12, %v3943_v46  ;;  %v3922_v53 = vmul.f32 %v10883_v61, %v9590_v19  ;;  %v3980_v27 = vstv %s10243_s4  ;;  %s6349_s4 = smov 70  }
 0x5b3   :  { %v3981_v26 = vmul.f32 %v10112_v21, %v3980_v27 }
 0x5b4   :  { %v3903_v28 = vadd.f32 %v3901_v60, %v3897_v7  ;;  %v10234_v15 = vadd.f32 %v4245_v11, %v3957_v33  ;;  %v4284_v11 = vstv %s10260_s6 }
 0x5b5   :  { %v3630_v44 = vpop.permute.xlu0 %3629  ;;  %v3710_v40 = vpop.permute.xlu1 %3709 }
 0x5b6   :  { %v3634_v55 = vadd.f32 %v3630_v44, %v10145_v25  ;;  %v3714_v17 = vadd.f32 %v3710_v40, %v3700_v16  ;;  %v3962_v16 = vmul.f32 %v3960_v34, %v9590_v19  ;;  %v3782_v19 = vmul.f32 %v3780_v30, %v9677_v0 }
 0x5b7   :  { %v4064_v34 = vstv %s10258_s20  ;;  %v4285_v30 = vmul.f32 %v4284_v11, %v9645_v48  ;;  %s6350_s20 = smov [#allocation14]  }
 0x5b8   :  { %v10247_v5 = vadd.f32 %v3922_v53, %v3634_v55  ;;  %v10249_v45 = vadd.f32 %v4002_v4, %v3714_v17  ;;  %v4065_v21 = vmul.f32 %v4064_v34, %v9753_v1  ;;  %v4324_v17 = vstv %s10272_s17  ;;  %s10890_s17 = sld [smem:[#allocation31_spill]]  ;;  %s5382_s6 = sshll.u32 %s6350_s20, 4  ;;  %s5383_s6 = int_to_ptr.vmem [resolvable:$true] %s5382_s6 }
 0x5b9   :  { %v3912_v14 = vpop.permute.xlu0 %3911  ;;  %v4012_v25 = vpop.permute.xlu1 %4011  ;;  %p6299_p1 = scmp.lt.s32.totalorder %s5383_s6, %s5383_s6 }
 0x5ba   :  { %v3917_v46 = vadd.f32 %v3912_v14, %v3903_v28  ;;  %v4017_v58 = vadd.f32 %v4012_v25, %v10060_v37 }
 0x5bc   :  { %v4023_v43 = vadd.f32 %v4021_v54, %v4017_v58  ;;  %v10262_v29 = vadd.f32 %v4205_v41, %v3917_v46  ;;  %v4325_v58 = vmul.f32 %v4324_v17, %v9645_v48  ;;  %v4104_v54 = vstv %s10285_s9  ;;  %s6333_s9 = smov 5  }
 0x5bd   :  { %v3670_v57 = vpop.permute.xlu0 %3669  ;;  %v3734_v13 = vpop.permute.xlu1 %3733 }
 0x5be   :  { %v3674_v18 = vadd.f32 %v3670_v57, %v3660_v32  ;;  %v3738_v37 = vadd.f32 %v3734_v13, %v10077_v24 }
 0x5c0   :  { %v3744_v12 = vadd.f32 %v3742_v38, %v3738_v37  ;;  %v10274_v7 = vadd.f32 %v3962_v16, %v3674_v18  ;;  %v4046_v37 = vmul.f32 %v4044_v63, %v10025_v36 }
 0x5c1   :  { %v3972_v33 = vpop.permute.xlu0 %3971  ;;  %v3774_v60 = vpop.permute.xlu1 %3773 }
 0x5c2   :  { %v3977_v32 = vadd.f32 %v3972_v33, %v10034_v51  ;;  %v3778_v24 = vadd.f32 %v3774_v60, %v10014_v3 }
 0x5c4   :  { %v3983_v28 = vadd.f32 %v3981_v26, %v3977_v32  ;;  %v3784_v44 = vadd.f32 %v3782_v19, %v3778_v24  ;;  %v3862_v24 = vmul.f32 %v3860_v62, %v9677_v0  ;;  %v4364_v19 = vstv %s10309_s5 }
 0x5c5   :  { %v3992_v40 = vpop.permute.xlu0 %3991  ;;  %v4056_v55 = vpop.permute.xlu1 %4055 }
 0x5c6   :  { %v3997_v51 = vadd.f32 %v3992_v40, %v3983_v28  ;;  %v4061_v3 = vadd.f32 %v4056_v55, %v10122_v39  ;;  %v4086_v39 = vmul.f32 %v4084_v56, %v10025_v36  ;;  %v4105_v56 = vmul.f32 %v4104_v54, %v9753_v1 }
 0x5c8   :  { %v4067_v61 = vadd.f32 %v4065_v21, %v4061_v3  ;;  %v10296_v53 = vadd.f32 %v4285_v30, %v3997_v51  ;;  %v3902_v3 = vmul.f32 %v3900_v49, %v9677_v0  ;;  %v4126_v21 = vmul.f32 %v4124_v10, %v10025_v36  ;;  %v4524_v30 = vld [vmem:[%s10884_s26] sm:$0xff] }
 0x5c9   :  { %v4032_v4 = vpop.permute.xlu0 %4031  ;;  %v3794_v14 = vpop.permute.xlu1 %3793  ;;  %v4144_v10 = vstv %s10330_s11  ;;  %v4264_v49 = vstv %s10391_s24  ;;  %s6338_s24 = smov 35  }
 0x5ca   :  { %v4037_v25 = vadd.f32 %v4032_v4, %v4023_v43  ;;  %v3798_v46 = vadd.f32 %v3794_v14, %v3784_v44  ;;  %v4373_v44 = vstv %s10311_s3 }
 0x5cc   :  { %v10305_v41 = vadd.f32 %v4325_v58, %v4037_v25  ;;  %v10307_v57 = vadd.f32 %v4086_v39, %v3798_v46  ;;  %v4184_v58 = vstv %s10332_s0 }
 0x5cd   :  { %v3754_v13 = vpop.permute.xlu0 %3753  ;;  %v4096_v18 = vpop.permute.xlu1 %4095 }
 0x5ce   :  { %v3758_v43 = vadd.f32 %v3754_v13, %v3744_v12  ;;  %v4101_v48 = vadd.f32 %v4096_v18, %v10079_v59  ;;  %v3822_v59 = vmul.f32 %v3820_v47, %v9677_v0 }
 0x5d0   :  { %v4107_v38 = vadd.f32 %v4105_v56, %v4101_v48  ;;  %v10320_v16 = vadd.f32 %v4046_v37, %v3758_v43  ;;  %v4145_v37 = vmul.f32 %v4144_v10, %v9753_v1 }
 0x5d1   :  { %v3814_v33 = vpop.permute.xlu0 %3813  ;;  %v3854_v60 = vpop.permute.xlu1 %3853 }
 0x5d2   :  { %v3818_v32 = vadd.f32 %v3814_v33, %v10147_v35  ;;  %v3858_v12 = vadd.f32 %v3854_v60, %v10102_v8 }
 0x5d4   :  { %v3824_v63 = vadd.f32 %v3822_v59, %v3818_v32  ;;  %v3864_v26 = vadd.f32 %v3862_v24, %v3858_v12  ;;  %v4166_v24 = vmul.f32 %v4164_v22, %v10025_v36 }
 0x5d5   :  { %v4076_v28 = vpop.permute.xlu0 %4075  ;;  %v4116_v35 = vpop.permute.xlu1 %4115 }
 0x5d6   :  { %v4081_v40 = vadd.f32 %v4076_v28, %v4067_v61  ;;  %v4121_v8 = vadd.f32 %v4116_v35, %v4107_v38  ;;  %v4525_v61 = vld [vmem:[%s10884_s26 + $0x8] sm:$0x1]  ;;  %v4185_v38 = vmul.f32 %v4184_v58, %v9753_v1  ;;  %v4381_v28 = vstv %s10364_s30  ;;  %s6336_s26 = smov 25  }
 0x5d7   :  { %v6124_v39 = vpack.c.bf16 %v4525_v61, %v4524_v30  ;;  %v4206_v30 = vmul.f32 %v4204_v2, %v10025_v36 }
 0x5d8   :  { %v4365_v47 = vadd.f32 %v4364_v19, %v4081_v40  ;;  %v4374_v62 = vadd.f32 %v4373_v44, %v4121_v8 }
 0x5d9   :  { %v3834_v55 = vpop.permute.xlu0 %3833  ;;  %v3894_v51 = vpop.permute.xlu1 %3893  ;;  %6126 = vmatprep.subr.msk.bf16.mxu0 %vm10354_vm10, %v6124_v39 }
 0x5da   :  { %v4367_v4 = vmax.f32 %v4365_v47, 0.0  ;;  %v4376_v14 = vmax.f32 %v4374_v62, 0.0  ;;  %v3838_v25 = vadd.f32 %v3834_v55, %v3824_v63  ;;  %v3898_v46 = vadd.f32 %v3894_v51, %v10225_v31  ;;  %6129 = vmatpush3.bf16.msk.msra.mxu0 %vm10354_vm10, %v6124_v39 }
 0x5db   :  { %vm5088_vm10 = vcmask 525792  }
 0x5dc   :  { %4370 = vst.msk [vmem:[#allocation4] sm:$0xff] %vm4369_vm8, %v4367_v4  ;;  %4378 = vst.msk [vmem:[#allocation4 + $0x10] sm:$0xff] %vm4369_vm8, %v4376_v14  ;;  %v3904_v13 = vadd.f32 %v3902_v3, %v3898_v46  ;;  %v10362_v18 = vadd.f32 %v4126_v21, %v3838_v25  ;;  %v6250_v3 = vld [vmem:[#allocation3 + $0x45] sm:$0xff]  ;;  %v4224_v46 = vstv %s10389_s18  ;;  %s6337_s18 = smov 20  }
 0x5dd   :  { %v4136_v43 = vpop.permute.xlu0 %4135  ;;  %v4176_v31 = vpop.permute.xlu1 %4175  ;;  %v3982_v21 = vmul.f32 %v6250_v3, %v3980_v27 }
 0x5de   :  { %v4141_v48 = vadd.f32 %v4136_v43, %v10206_v42  ;;  %v4181_v56 = vadd.f32 %v4176_v31, %v10166_v23  ;;  %v3942_v23 = vmul.f32 %v3940_v52, %v9677_v0  ;;  %v4389_v52 = vstv %s10366_s7 }
 0x5df   :  { %v4225_v31 = vmul.f32 %v4224_v46, %v9753_v1 }
 0x5e0   :  { %v4147_v33 = vadd.f32 %v4145_v37, %v4141_v48  ;;  %v4187_v60 = vadd.f32 %v4185_v38, %v4181_v56  ;;  %v4265_v48 = vmul.f32 %v4264_v49, %v9753_v1 }
 0x5e1   :  { %v3874_v32 = vpop.permute.xlu0 %3873  ;;  %v3934_v12 = vpop.permute.xlu1 %3933 }
 0x5e2   :  { %v3878_v59 = vadd.f32 %v3874_v32, %v3864_v26  ;;  %v3938_v42 = vadd.f32 %v3934_v12, %v10247_v5 }
 0x5e3   :  { %v10387_v63 = vld [vmem:[#allocation4] sm:$0xff]  ;;  %v10399_v8 = vld [vmem:[#allocation4 + $0x10] sm:$0xff] }
 0x5e4   :  { %4460 = vrot.lane.b32.xlu0 %v10387_v63, %s10841_s1  ;;  %v3944_v26 = vadd.f32 %v3942_v23, %v3938_v42  ;;  %v10395_v5 = vadd.f32 %v4166_v24, %v3878_v59  ;;  %v4397_v59 = vstv %s10419_s13  ;;  %v4405_v42 = vstv %s10421_s12  ;;  %s6339_s13 = smov 30   ;;  %s6340_s12 = smov 45  }
 0x5e5   :  { %v4156_v0 = vpop.permute.xlu0 %4155  ;;  %v4196_v35 = vpop.permute.xlu1 %4195 }
 0x5e6   :  { %v4161_v22 = vadd.f32 %v4156_v0, %v4147_v33  ;;  %v4201_v40 = vadd.f32 %v4196_v35, %v4187_v60 }
 0x5e8   :  { %v4382_v47 = vadd.f32 %v4381_v28, %v4161_v22  ;;  %v4390_v62 = vadd.f32 %v4389_v52, %v4201_v40  ;;  %4464 = vrot.lane.b32.xlu0 %v10399_v8, %s10841_s1 }
 0x5e9   :  { %v3914_v55 = vpop.permute.xlu0 %3913  ;;  %v3974_v51 = vpop.permute.xlu1 %3973 }
 0x5ea   :  { %v4384_v61 = vmax.f32 %v4382_v47, 0.0  ;;  %v4392_v4 = vmax.f32 %v4390_v62, 0.0  ;;  %v3918_v14 = vadd.f32 %v3914_v55, %v3904_v13  ;;  %v3978_v25 = vadd.f32 %v3974_v51, %v10274_v7 }
 0x5eb   :  { %v4286_v47 = vmul.f32 %v4284_v11, %v10025_v36  ;;  %v4326_v62 = vmul.f32 %v4324_v17, %v10025_v36 }
 0x5ec   :  { %4386 = vst.msk [vmem:[#allocation4 + $0x20] sm:$0xff] %vm4369_vm8, %v4384_v61  ;;  %4394 = vst.msk [vmem:[#allocation4 + $0x30] sm:$0xff] %vm4369_vm8, %v4392_v4  ;;  %v3984_v39 = vadd.f32 %v3982_v21, %v3978_v25  ;;  %v10417_v43 = vadd.f32 %v4206_v30, %v3918_v14  ;;  %v4304_v30 = vstv %s10439_s19  ;;  %v4344_v61 = vstv %s10441_s10  ;;  %s6341_s19 = smov 40  }
 0x5ed   :  { %v4216_v27 = vpop.permute.xlu0 %4215  ;;  %v4256_v2 = vpop.permute.xlu1 %4255 }
 0x5ee   :  { %v4221_v13 = vadd.f32 %v4216_v27, %v10262_v29  ;;  %v4261_v7 = vadd.f32 %v4256_v2, %v10234_v15  ;;  %v4022_v29 = vmul.f32 %v6250_v3, %v4020_v20  ;;  %v4246_v15 = vmul.f32 %v4244_v50, %v10025_v36 }
 0x5f0   :  { %v4227_v56 = vadd.f32 %v4225_v31, %v4221_v13  ;;  %v4267_v37 = vadd.f32 %v4265_v48, %v4261_v7  ;;  %v4413_v31 = vstv %s10457_s28  ;;  %s10892_s28 = sld [smem:[#allocation33_spill]] }
 0x5f1   :  { %v3954_v38 = vpop.permute.xlu0 %3953  ;;  %v4014_v33 = vpop.permute.xlu1 %4013 }
 0x5f2   :  { %v3958_v60 = vadd.f32 %v3954_v38, %v3944_v26  ;;  %v4018_v32 = vadd.f32 %v4014_v33, %v10249_v45 }
 0x5f3   :  { %v10437_v12 = vld [vmem:[#allocation4 + $0x20] sm:$0xff]  ;;  %v10449_v26 = vld [vmem:[#allocation4 + $0x30] sm:$0xff] }
 0x5f4   :  { %4468 = vrot.lane.b32.xlu0 %v10437_v12, %s10841_s1  ;;  %v4024_v1 = vadd.f32 %v4022_v29, %v4018_v32  ;;  %v10445_v45 = vadd.f32 %v4246_v15, %v3958_v60 }
 0x5f5   :  { %v4236_v20 = vpop.permute.xlu0 %4235  ;;  %v4276_v23 = vpop.permute.xlu1 %4275 }
 0x5f6   :  { %v4241_v50 = vadd.f32 %v4236_v20, %v4227_v56  ;;  %v4281_v24 = vadd.f32 %v4276_v23, %v4267_v37 }
 0x5f8   :  { %v4398_v0 = vadd.f32 %v4397_v59, %v4241_v50  ;;  %v4406_v35 = vadd.f32 %v4405_v42, %v4281_v24  ;;  %4472 = vrot.lane.b32.xlu0 %v10449_v26, %s10841_s1 }
 0x5f9   :  { %v3994_v22 = vpop.permute.xlu0 %3993  ;;  %v4034_v40 = vpop.permute.xlu1 %4033 }
 0x5fa   :  { %v4400_v55 = vmax.f32 %v4398_v0, 0.0  ;;  %v4408_v51 = vmax.f32 %v4406_v35, 0.0  ;;  %v3998_v3 = vadd.f32 %v3994_v22, %v3984_v39  ;;  %v4038_v21 = vadd.f32 %v4034_v40, %v4024_v1  ;;  %v6251_v39 = vld [vmem:[#allocation3 + $0x47] sm:$0xff] }
 0x5fb   :  { %v4305_v27 = vmul.f32 %v6251_v39, %v4304_v30  ;;  %v4345_v2 = vmul.f32 %v6251_v39, %v4344_v61 }
 0x5fc   :  { %4402 = vst.msk [vmem:[#allocation4 + $0x40] sm:$0xff] %vm4369_vm8, %v4400_v55  ;;  %4410 = vst.msk [vmem:[#allocation4 + $0x50] sm:$0xff] %vm4369_vm8, %v4408_v51  ;;  %v10469_v4 = vadd.f32 %v4286_v47, %v3998_v3  ;;  %v10471_v11 = vadd.f32 %v4326_v62, %v4038_v21  ;;  %v4186_v21 = vmul.f32 %v4184_v58, %v10042_v9 }
 0x5fd   :  { %v4296_v14 = vpop.permute.xlu0 %4295  ;;  %v4336_v36 = vpop.permute.xlu1 %4335  ;;  %v4226_v58 = vmul.f32 %v4224_v46, %v10042_v9  ;;  %v4266_v46 = vmul.f32 %v4264_v49, %v10042_v9  ;;  %v4306_v49 = vmul.f32 %v4304_v30, %v10042_v9 }
 0x5fe   :  { %v4301_v17 = vadd.f32 %v4296_v14, %v10296_v53  ;;  %v4341_v25 = vadd.f32 %v4336_v36, %v10305_v41  ;;  %v4066_v53 = vmul.f32 %v4064_v34, %v10042_v9 }
 0x600   :  { %v4307_v13 = vadd.f32 %v4305_v27, %v4301_v17  ;;  %v10479_v7 = vadd.f32 %v4345_v2, %v4341_v25 }
 0x601   :  { %v4316_v48 = vpop.permute.xlu0 %4315  ;;  %v4058_v56 = vpop.permute.xlu1 %4057 }
 0x602   :  { %v4321_v37 = vadd.f32 %v4316_v48, %v4307_v13  ;;  %v4062_v38 = vadd.f32 %v4058_v56, %v10320_v16  ;;  %v4106_v16 = vmul.f32 %v4104_v54, %v10042_v9  ;;  %v4146_v54 = vmul.f32 %v4144_v10, %v10042_v9 }
 0x603   :  { %v10486_v41 = vld [vmem:[#allocation4 + $0x40] sm:$0xff]  ;;  %v10496_v34 = vld [vmem:[#allocation4 + $0x50] sm:$0xff] }
 0x604   :  { %v4414_v33 = vadd.f32 %v4413_v31, %v4321_v37  ;;  %4476 = vrot.lane.b32.xlu0 %v10486_v41, %s10841_s1  ;;  %v4068_v60 = vadd.f32 %v4066_v53, %v4062_v38 }
 0x605   :  { %v4078_v32 = vpop.permute.xlu0 %4077  ;;  %v4098_v29 = vpop.permute.xlu1 %4097 }
 0x606   :  { %v4416_v15 = vmax.f32 %v4414_v33, 0.0  ;;  %v4082_v1 = vadd.f32 %v4078_v32, %v4068_v60  ;;  %v4102_v20 = vadd.f32 %v4098_v29, %v10307_v57 }
 0x608   :  { %4418 = vst.msk [vmem:[#allocation4 + $0x60] sm:$0xff] %vm4369_vm8, %v4416_v15  ;;  %v4366_v23 = vadd.f32 %v4364_v19, %v4082_v1  ;;  %4480 = vrot.lane.b32.xlu0 %v10496_v34, %s10841_s1  ;;  %v4108_v50 = vadd.f32 %v4106_v16, %v4102_v20 }
 0x609   :  { %v4118_v24 = vpop.permute.xlu0 %4117  ;;  %v4138_v0 = vpop.permute.xlu1 %4137 }
 0x60a   :  { %v4368_v35 = vmax.f32 %v4366_v23, 0.0  ;;  %v4122_v22 = vadd.f32 %v4118_v24, %v4108_v50  ;;  %v4142_v57 = vadd.f32 %v4138_v0, %v10362_v18  ;;  %v4421_v0 = vstv %s5767_s25 }
 0x60c   :  { %4371 = vst.msk [vmem:[#allocation4 + $0x8] sm:$0xff] %vm4369_vm8, %v4368_v35  ;;  %v4375_v40 = vadd.f32 %v4373_v44, %v4122_v22  ;;  %v4148_v19 = vadd.f32 %v4146_v54, %v4142_v57 }
 0x60d   :  { %v4158_v47 = vpop.permute.xlu0 %4157  ;;  %v4178_v62 = vpop.permute.xlu1 %4177 }
 0x60e   :  { %v4377_v55 = vmax.f32 %v4375_v40, 0.0  ;;  %v4162_v51 = vadd.f32 %v4158_v47, %v4148_v19  ;;  %v4182_v3 = vadd.f32 %v4178_v62, %v10395_v5 }
 0x60f   :  { %v10514_v18 = vld [vmem:[#allocation4 + $0x60] sm:$0xff] }
 0x610   :  { %4379 = vst.msk [vmem:[#allocation4 + $0x18] sm:$0xff] %vm4369_vm8, %v4377_v55  ;;  %v4383_v10 = vadd.f32 %v4381_v28, %v4162_v51  ;;  %4484 = vrot.lane.b32.xlu0 %v10514_v18, %s10841_s1  ;;  %v4188_v44 = vadd.f32 %v4186_v21, %v4182_v3 }
 0x611   :  { %v4198_v14 = vpop.permute.xlu0 %4197  ;;  %v4218_v36 = vpop.permute.xlu1 %4217 }
 0x612   :  { %v4385_v17 = vmax.f32 %v4383_v10, 0.0  ;;  %v4202_v25 = vadd.f32 %v4198_v14, %v4188_v44  ;;  %v4222_v5 = vadd.f32 %v4218_v36, %v10417_v43 }
 0x613   :  { %v10525_v39 = vld [vmem:[#allocation4 + $0x8] sm:$0xff] }
 0x614   :  { %4387 = vst.msk [vmem:[#allocation4 + $0x28] sm:$0xff] %vm4369_vm8, %v4385_v17  ;;  %v4391_v28 = vadd.f32 %v4389_v52, %v4202_v25  ;;  %4462 = vrot.lane.b32.xlu1 %v10525_v39, %s10841_s1  ;;  %v4228_v27 = vadd.f32 %v4226_v58, %v4222_v5 }
 0x615   :  { %v4238_v2 = vpop.permute.xlu0 %4237  ;;  %v4258_v13 = vpop.permute.xlu1 %4257 }
 0x616   :  { %v4393_v48 = vmax.f32 %v4391_v28, 0.0  ;;  %v4242_v56 = vadd.f32 %v4238_v2, %v4228_v27  ;;  %v4262_v43 = vadd.f32 %v4258_v13, %v10445_v45 }
 0x617   :  { %v10536_v37 = vld [vmem:[#allocation4 + $0x18] sm:$0xff] }
 0x618   :  { %4395 = vst.msk [vmem:[#allocation4 + $0x38] sm:$0xff] %vm4369_vm8, %v4393_v48  ;;  %v4399_v52 = vadd.f32 %v4397_v59, %v4242_v56  ;;  %4466 = vrot.lane.b32.xlu1 %v10536_v37, %s10841_s1  ;;  %v4268_v38 = vadd.f32 %v4266_v46, %v4262_v43 }
 0x619   :  { %v4278_v53 = vpop.permute.xlu0 %4277  ;;  %v4298_v33 = vpop.permute.xlu1 %4297 }
 0x61a   :  { %v4401_v60 = vmax.f32 %v4399_v52, 0.0  ;;  %v4282_v45 = vadd.f32 %v4278_v53, %v4268_v38  ;;  %v4302_v32 = vadd.f32 %v4298_v33, %v10469_v4  ;;  %v4346_v4 = vmul.f32 %v4344_v61, %v10042_v9 }
 0x61b   :  { %v4433_v29 = vld [vmem:[#allocation4 + $0x28] sm:$0xff] }
 0x61c   :  { %4403 = vst.msk [vmem:[#allocation4 + $0x48] sm:$0xff] %vm4369_vm8, %v4401_v60  ;;  %v4407_v59 = vadd.f32 %v4405_v42, %v4282_v45  ;;  %4470 = vrot.lane.b32.xlu1 %v4433_v29, %s10841_s1  ;;  %v4308_v15 = vadd.f32 %v4306_v49, %v4302_v32 }
 0x61d   :  { %v4318_v1 = vpop.permute.xlu0 %4317  ;;  %v4338_v20 = vpop.permute.xlu1 %4337 }
 0x61e   :  { %v4409_v16 = vmax.f32 %v4407_v59, 0.0  ;;  %v4322_v23 = vadd.f32 %v4318_v1, %v4308_v15  ;;  %v4342_v50 = vadd.f32 %v4338_v20, %v10471_v11 }
 0x61f   :  { %v4435_v24 = vld [vmem:[#allocation4 + $0x38] sm:$0xff] }
 0x620   :  { %4411 = vst.msk [vmem:[#allocation4 + $0x58] sm:$0xff] %vm4369_vm8, %v4409_v16  ;;  %v4415_v30 = vadd.f32 %v4413_v31, %v4322_v23  ;;  %4474 = vrot.lane.b32.xlu1 %v4435_v24, %s10841_s1  ;;  %v4348_v42 = vadd.f32 %v4346_v4, %v4342_v50 }
 0x621   :  { %v4356_v35 = vpop.permute.xlu0 %4355  ;;  %v4358_v22 = vpop.permute.xlu1 %4357 }
 0x622   :  { %v4417_v57 = vmax.f32 %v4415_v30, 0.0  ;;  %v4361_v54 = vadd.f32 %v4356_v35, %v10479_v7  ;;  %v4362_v40 = vadd.f32 %v4358_v22, %v4348_v42 }
 0x623   :  { %v4437_v19 = vld [vmem:[#allocation4 + $0x48] sm:$0xff] }
 0x624   :  { %4419 = vst.msk [vmem:[#allocation4 + $0x68] sm:$0xff] %vm4369_vm8, %v4417_v57  ;;  %v4422_v11 = vadd.f32 %v4421_v0, %v4361_v54  ;;  %v4423_v9 = vadd.f32 %v4421_v0, %v4362_v40  ;;  %4478 = vrot.lane.b32.xlu1 %v4437_v19, %s10841_s1 }
 0x626   :  { %v4424_v61 = vmax.f32 %v4422_v11, 0.0  ;;  %v4425_v47 = vmax.f32 %v4423_v9, 0.0 }
 0x627   :  { %v4439_v31 = vld [vmem:[#allocation4 + $0x58] sm:$0xff] }
 0x628   :  { %4426 = vst.msk [vmem:[#allocation4 + $0x70] sm:$0xff] %vm4369_vm8, %v4424_v61  ;;  %4427 = vst.msk [vmem:[#allocation4 + $0x78] sm:$0xff] %vm4369_vm8, %v4425_v47  ;;  %4482 = vrot.lane.b32.xlu1 %v4439_v31, %s10841_s1  ;;  %vm5076_vm8 = vcmask 443792  }
 0x62b   :  { %v4441_v62 = vld [vmem:[#allocation4 + $0x68] sm:$0xff] }
 0x62c   :  { %4486 = vrot.lane.b32.xlu1 %v4441_v62, %s10841_s1 }
 0x62f   :  { %v4442_v7 = vld [vmem:[#allocation4 + $0x70] sm:$0xff]  ;;  %v4443_v55 = vld [vmem:[#allocation4 + $0x78] sm:$0xff] }
 0x630   :  { %4488 = vrot.lane.b32.xlu0 %v4442_v7, %s10841_s1  ;;  %4490 = vrot.lane.b32.xlu1 %v4443_v55, %s10841_s1 }
 0x656   :  { %v4461_v51 = vpop.permute.xlu0 %4460 }
 0x657   :  { %v4508_v3 = vmax.f32 %v10387_v63, %v4461_v51 }
 0x659   :  { %5954 = vmatprep.mubr.msk.f32.mxu0 %vm4526_vm11, %v4508_v3 }
 0x65a   :  { %v4465_v21 = vpop.permute.xlu0 %4464 }
 0x65b   :  { %v4510_v36 = vmax.f32 %v10399_v8, %v4465_v21 }
 0x666   :  { %v4469_v10 = vpop.permute.xlu0 %4468 }
 0x667   :  { %v4512_v58 = vmax.f32 %v10437_v12, %v4469_v10 }
 0x66a   :  { %v4473_v25 = vpop.permute.xlu0 %4472 }
 0x676   :  { %v4477_v28 = vpop.permute.xlu0 %4476 }
 0x677   :  { %v4516_v13 = vmax.f32 %v10486_v41, %v4477_v28 }
 0x67a   :  { %v4481_v48 = vpop.permute.xlu0 %4480 }
 0x67b   :  { %v4518_v43 = vmax.f32 %v10496_v34, %v4481_v48 }
 0x682   :  { %v4485_v46 = vpop.permute.xlu0 %4484 }
 0x683   :  { %v4520_v52 = vmax.f32 %v10514_v18, %v4485_v46  ;;  %v4803_v18 = vld [vmem:[%s10887_s2] sm:$0xff] }
 0x686   :  { %v4463_v44 = vpop.permute.xlu1 %4462 }
 0x687   :  { %v4509_v14 = vmax.f32 %v10525_v39, %v4463_v44  ;;  %v4514_v39 = vmax.f32 %v10449_v26, %v4473_v25 }
 0x689   :  { %5955 = vmatmul.mubr.msk.f32.vlgmr.msra.gmra.mrb[24].mxu0 %vm4526_vm11, %v4509_v14 }
 0x68a   :  { %5957 = vmatprep.mubr.msk.f32.mxu0 %vm4526_vm11, %v4510_v36  ;;  %v4467_v17 = vpop.permute.xlu1 %4466 }
 0x68b   :  { %v4511_v5 = vmax.f32 %v10536_v37, %v4467_v17 }
 0x68d   :  { %5958 = vmatmul.mubr.msk.f32.gmra.mrb[26].mxu0 %vm4526_vm11, %v4511_v5 }
 0x68e   :  { %5960 = vmatprep.mubr.msk.f32.mxu0 %vm4526_vm11, %v4512_v58  ;;  %v4471_v63 = vpop.permute.xlu1 %4470 }
 0x68f   :  { %v4513_v27 = vmax.f32 %v4433_v29, %v4471_v63 }
 0x691   :  { %5961 = vmatmul.mubr.msk.f32.gmra.mrb[28].mxu0 %vm4526_vm11, %v4513_v27 }
 0x692   :  { %5963 = vmatprep.mubr.msk.f32.mxu0 %vm4526_vm11, %v4514_v39  ;;  %v4475_v8 = vpop.permute.xlu1 %4474 }
 0x693   :  { %v4515_v2 = vmax.f32 %v4435_v24, %v4475_v8 }
 0x695   :  { %5964 = vmatmul.mubr.msk.f32.gmra.mrb[30].mxu0 %vm4526_vm11, %v4515_v2 }
 0x696   :  { %5966 = vmatprep.mubr.msk.f32.mxu0 %vm4526_vm11, %v4516_v13  ;;  %v4479_v12 = vpop.permute.xlu1 %4478 }
 0x697   :  { %v4517_v56 = vmax.f32 %v4437_v19, %v4479_v12 }
 0x699   :  { %5967 = vmatmul.mubr.msk.f32.gmra.mrb[32].mxu0 %vm4526_vm11, %v4517_v56 }
 0x69a   :  { %5969 = vmatprep.mubr.msk.f32.mxu0 %vm4526_vm11, %v4518_v43  ;;  %v4483_v26 = vpop.permute.xlu1 %4482 }
 0x69b   :  { %v4519_v37 = vmax.f32 %v4439_v31, %v4483_v26 }
 0x69d   :  { %5970 = vmatmul.mubr.msk.f32.gmra.mrb[34].mxu0 %vm4526_vm11, %v4519_v37 }
 0x69e   :  { %5972 = vmatprep.mubr.msk.f32.mxu0 %vm4526_vm11, %v4520_v52  ;;  %v4487_v41 = vpop.permute.xlu1 %4486 }
 0x69f   :  { %v4521_v38 = vmax.f32 %v4441_v62, %v4487_v41 }
 0x6a1   :  { %5973 = vmatmul.mubr.msk.f32.gmra.mrb[36].mxu0 %vm4526_vm11, %v4521_v38 }
 0x6a2   :  { %v4489_v53 = vpop.permute.xlu0 %4488  ;;  %v4491_v33 = vpop.permute.xlu1 %4490 }
 0x6a3   :  { %v4522_v34 = vmax.f32 %v4442_v7, %v4489_v53  ;;  %v4523_v60 = vmax.f32 %v4443_v55, %v4491_v33 }
 0x6a5   :  { %5975 = vmatprep.mubr.msk.f32.mxu0 %vm4526_vm11, %v4522_v34 }
 0x6a6   :  { %5976 = vmatmul.mubr.msk.f32.gmra.mrb[38].mxu0 %vm4526_vm11, %v4523_v60  ;;  %vm5094_vm11 = vcmask 566792  }
 0x6a7   :  { %6010 = vmatprep.mubr.msk.f32.mxu0 %vm4819_vm12, %v4803_v18 }
 0x75c   :  { %v5956_v45 = vpop.f32.mrb[24].mxu0 }
 0x75d   :  { %v4741_v32 = vrot.slane %v5956_v45, 1  ;;  %v4645_v49 = vpop.f32.mrb[25].mxu0 }
 0x75e   :  { %v4740_v29 = vrot.slane %v4645_v49, 1 }
 0x760   :  { %v4742_v59 = vsel %vm1500_vm3, %v4740_v29, %v4741_v32  ;;  %v5959_v15 = vpop.f32.mrb[26].mxu0 }
 0x761   :  { %v4787_v1 = vmax.f32 %v4645_v49, %v4742_v59  ;;  %v4745_v20 = vrot.slane %v5959_v15, 1  ;;  %v4655_v16 = vpop.f32.mrb[27].mxu0 }
 0x762   :  { %v4743_v23 = vrot.slane %v4655_v16, 1 }
 0x764   :  { %v4744_v50 = vsel %vm1500_vm3, %v4741_v32, %v4743_v23  ;;  %v4746_v4 = vsel %vm1500_vm3, %v4743_v23, %v4745_v20  ;;  %v5962_v24 = vpop.f32.mrb[28].mxu0  ;;  %v4805_v23 = vld [vmem:[%s10887_s2 + $0x10] sm:$0xff] }
 0x765   :  { %v4789_v30 = vmax.f32 %v4655_v16, %v4746_v4  ;;  %v4749_v42 = vrot.slane %v5962_v24, 1  ;;  %v4665_v0 = vpop.f32.mrb[29].mxu0  ;;  %v4788_v35 = vmax.f32 %v5956_v45, %v4744_v50  ;;  %v4804_v16 = vld [vmem:[%s10887_s2 + $0x8] sm:$0xff]  ;;  %v4806_v50 = vld [vmem:[%s10887_s2 + $0x18] sm:$0xff] }
 0x766   :  { %v4747_v22 = vrot.slane %v4665_v0, 1  ;;  %v4808_v4 = vld [vmem:[%s10887_s2 + $0x28] sm:$0xff] }
 0x767   :  { %v6130_v57 = vpack.c.bf16 %v4788_v35, %v4787_v1  ;;  %v4813_v35 = vld [vmem:[%s10887_s2 + $0x50] sm:$0xff] }
 0x768   :  { %v4748_v54 = vsel %vm1500_vm3, %v4745_v20, %v4747_v22  ;;  %v4750_v40 = vsel %vm1500_vm3, %v4747_v22, %v4749_v42  ;;  %v5965_v19 = vpop.f32.mrb[30].mxu0  ;;  %v4814_v22 = vld [vmem:[%s10887_s2 + $0x58] sm:$0xff] }
 0x769   :  { %v4791_v11 = vmax.f32 %v4665_v0, %v4750_v40  ;;  %v4753_v9 = vrot.slane %v5965_v19, 1  ;;  %v4675_v61 = vpop.f32.mrb[31].mxu0  ;;  %6131 = vmatprep.subr.bf16.mxu0 %v6130_v57  ;;  %v4790_v47 = vmax.f32 %v5959_v15, %v4748_v54  ;;  %v4812_v0 = vld [vmem:[%s10887_s2 + $0x48] sm:$0xff]  ;;  %v4817_v40 = vld [vmem:[%s10887_s2 + $0x70] sm:$0xff] }
 0x76a   :  { %v4751_v31 = vrot.slane %v4675_v61, 1  ;;  %6133 = vmatpush3.bf16.msra.mxu0 %v6130_v57  ;;  %v4815_v57 = vld [vmem:[%s10887_s2 + $0x60] sm:$0xff]  ;;  %v4816_v54 = vld [vmem:[%s10887_s2 + $0x68] sm:$0xff] }
 0x76b   :  { %v6134_v62 = vpack.c.bf16 %v4790_v47, %v4789_v30  ;;  %v4810_v30 = vld [vmem:[%s10887_s2 + $0x38] sm:$0xff]  ;;  %v10889_v47 = vmov 0.0|0.0  }
 0x76c   :  { %v4752_v7 = vsel %vm1500_vm3, %v4749_v42, %v4751_v31  ;;  %v4754_v55 = vsel %vm1500_vm3, %v4751_v31, %v4753_v9  ;;  %v5968_v51 = vpop.f32.mrb[32].mxu0  ;;  %v4811_v42 = vld [vmem:[%s10887_s2 + $0x40] sm:$0xff]  ;;  %v5111_v31 = vld [vmem:[%s10888_s16 + $0x10] sm:$0xff] }
 0x76d   :  { %v4793_v3 = vmax.f32 %v4675_v61, %v4754_v55  ;;  %v4757_v21 = vrot.slane %v5968_v51, 1  ;;  %v4685_v10 = vpop.f32.mrb[33].mxu0  ;;  %6135 = vmatprep.subr.bf16.mxu0 %v6134_v62  ;;  %v4792_v44 = vmax.f32 %v5962_v24, %v4752_v7  ;;  %v4809_v24 = vld [vmem:[%s10887_s2 + $0x30] sm:$0xff] }
 0x76e   :  { %v4755_v14 = vrot.slane %v4685_v10, 1  ;;  %6137 = vmatpush3.bf16.msra.mxu0 %v6134_v62  ;;  %v5112_v62 = vld [vmem:[%s10888_s16 + $0x18] sm:$0xff] }
 0x76f   :  { %v6138_v36 = vpack.c.bf16 %v4792_v44, %v4791_v11  ;;  %v5109_v11 = vld [vmem:[%s10888_s16] sm:$0xff]  ;;  %v6168_v7 = vpack.c.bf16 %v5112_v62, %v5111_v31 }
 0x770   :  { %v4756_v17 = vsel %vm1500_vm3, %v4753_v9, %v4755_v14  ;;  %v4758_v25 = vsel %vm1500_vm3, %v4755_v14, %v4757_v21  ;;  %v5971_v5 = vpop.f32.mrb[34].mxu0  ;;  %v5110_v9 = vld [vmem:[%s10888_s16 + $0x8] sm:$0xff] }
 0x771   :  { %v4795_v58 = vmax.f32 %v4685_v10, %v4758_v25  ;;  %v4761_v63 = vrot.slane %v5971_v5, 1  ;;  %v4695_v28 = vpop.f32.mrb[35].mxu0  ;;  %6139 = vmatprep.subr.bf16.mxu0 %v6138_v36  ;;  %v4794_v27 = vmax.f32 %v5965_v19, %v4756_v17  ;;  %v4818_v19 = vld [vmem:[%s10887_s2 + $0x78] sm:$0xff]  ;;  %v6165_v61 = vpack.c.bf16 %v5110_v9, %v5109_v11  ;;  %v5115_v25 = vld [vmem:[%s10888_s16 + $0x30] sm:$0xff] }
 0x772   :  { %v4759_v39 = vrot.slane %v4695_v28, 1  ;;  %6141 = vmatpush3.bf16.msra.mxu0 %v6138_v36 }
 0x773   :  { %v6142_v8 = vpack.c.bf16 %v4794_v27, %v4793_v3  ;;  %6166 = vmatpush3.bf16.msra.mxu1 %v6165_v61  ;;  %v5113_v3 = vld [vmem:[%s10888_s16 + $0x20] sm:$0xff] }
 0x774   :  { %v4760_v2 = vsel %vm1500_vm3, %v4757_v21, %v4759_v39  ;;  %v4762_v13 = vsel %vm1500_vm3, %v4759_v39, %v4761_v63  ;;  %v5974_v48 = vpop.f32.mrb[36].mxu0  ;;  %6167 = vmatprep.subr.bf16.mxu1 %v10889_v47  ;;  %v5114_v21 = vld [vmem:[%s10888_s16 + $0x28] sm:$0xff]  ;;  %v5291_v61 = vld [vmem:[%s10892_s28] sm:$0xff] }
 0x775   :  { %v4797_v12 = vmax.f32 %v4695_v28, %v4762_v13  ;;  %v4765_v56 = vrot.slane %v5974_v48, 1  ;;  %v4705_v43 = vpop.f32.mrb[37].mxu0  ;;  %6143 = vmatprep.subr.bf16.mxu0 %v6142_v8  ;;  %v4796_v46 = vmax.f32 %v5968_v51, %v4760_v2  ;;  %v6171_v10 = vpack.c.bf16 %v5114_v21, %v5113_v3  ;;  %v5118_v2 = vld [vmem:[%s10888_s16 + $0x48] sm:$0xff] }
 0x776   :  { %v4763_v26 = vrot.slane %v4705_v43, 1  ;;  %6145 = vmatpush3.bf16.msra.mxu0 %v6142_v8  ;;  %v5117_v8 = vld [vmem:[%s10888_s16 + $0x40] sm:$0xff] }
 0x777   :  { %v6146_v37 = vpack.c.bf16 %v4796_v46, %v4795_v58  ;;  %6169 = vmatpush3.bf16.msra.mxu1 %v6168_v7  ;;  %v6177_v13 = vpack.c.bf16 %v5118_v2, %v5117_v8 }
 0x778   :  { %v4764_v52 = vsel %vm1500_vm3, %v4761_v63, %v4763_v26  ;;  %v4766_v41 = vsel %vm1500_vm3, %v4763_v26, %v4765_v56  ;;  %6170 = vmatprep.subr.bf16.mxu1 %v10889_v47 }
 0x779   :  { %v4799_v38 = vmax.f32 %v4705_v43, %v4766_v41  ;;  %v5977_v53 = vpop.f32.mrb[38].mxu0  ;;  %6147 = vmatprep.subr.bf16.mxu0 %v6146_v37  ;;  %v4798_v33 = vmax.f32 %v5971_v5, %v4764_v52  ;;  %v5116_v5 = vld [vmem:[%s10888_s16 + $0x38] sm:$0xff]  ;;  %s6347_s16 = smov 60  }
 0x77a   :  { %v4769_v34 = vrot.slane %v5977_v53, 1  ;;  %v4715_v60 = vpop.f32.mrb[39].mxu0  ;;  %6149 = vmatpush3.bf16.msra.mxu0 %v6146_v37  ;;  %v6174_v58 = vpack.c.bf16 %v5116_v5, %v5115_v25 }
 0x77b   :  { %v4767_v18 = vrot.slane %v4715_v60, 1  ;;  %v6150_v45 = vpack.c.bf16 %v4798_v33, %v4797_v12  ;;  %6172 = vmatpush3.bf16.msra.mxu1 %v6171_v10 }
 0x77c   :  { %v4802_v29 = vmax.f32 %v5977_v53, %v4769_v34  ;;  %6173 = vmatprep.subr.bf16.mxu1 %v10889_v47 }
 0x77d   :  { %v4768_v32 = vsel %vm1500_vm3, %v4765_v56, %v4767_v18  ;;  %v4770_v49 = vsel %vm1500_vm3, %v4767_v18, %v4769_v34  ;;  %6151 = vmatprep.subr.bf16.mxu0 %v6150_v45  ;;  %vm5046_vm3 = vcmask 238792  }
 0x77e   :  { %v4801_v59 = vmax.f32 %v4715_v60, %v4770_v49  ;;  %6153 = vmatpush3.bf16.msra.mxu0 %v6150_v45  ;;  %v4800_v15 = vmax.f32 %v5974_v48, %v4768_v32  ;;  %v6343_v48 = vmov 0.0  }
 0x77f   :  { %6175 = vmatpush3.bf16.msra.mxu1 %v6174_v58  ;;  %6054 = vmatprep.mubr.msk.f32.mxu1 %vm6342_vm14, %v6343_v48 }
 0x780   :  { %v6158_v1 = vpack.c.bf16 %v4802_v29, %v4801_v59  ;;  %v6154_v20 = vpack.c.bf16 %v4800_v15, %v4799_v38  ;;  %6176 = vmatprep.subr.bf16.mxu1 %v10889_v47 }
 0x782   :  { %6155 = vmatprep.subr.bf16.mxu0 %v6154_v20 }
 0x783   :  { %6157 = vmatpush3.bf16.msra.mxu0 %v6154_v20  ;;  %6178 = vmatpush3.bf16.msra.mxu1 %v6177_v13  ;;  %v5201_v20 = vld [vmem:[%s10890_s17] sm:$0xff] }
 0x784   :  { %6160 = vmatprep.subr.msk.bf16.mxu0 %vm7320_vm6, %v6158_v1  ;;  %6179 = vmatprep.subr.bf16.mxu1 %v10889_v47 }
 0x787   :  { %6163 = vmatpush3.bf16.msk.msra.mxu0 %vm7320_vm6, %v6158_v1  ;;  %vm5064_vm6 = vcmask 361792  }
 0x78a   :  { %6011 = vmatmul.mubr.msk.f32.vlgmr.msra.gmra.mrb[40].mxu0 %vm4819_vm12, %v4804_v16  ;;  %v5202_v16 = vld [vmem:[%s10890_s17 + $0x8] sm:$0xff] }
 0x78b   :  { %6013 = vmatprep.mubr.msk.f32.mxu0 %vm4819_vm12, %v4805_v23  ;;  %v6180_v23 = vpack.c.bf16 %v5202_v16, %v5201_v20 }
 0x78e   :  { %6014 = vmatmul.mubr.msk.f32.gmra.mrb[42].mxu0 %vm4819_vm12, %v4806_v50  ;;  %v5203_v50 = vld [vmem:[%s10890_s17 + $0x10] sm:$0xff] }
 0x78f   :  { %6016 = vmatprep.mubr.msk.f32.mxu0 %vm4819_vm12, %v4807_v6  ;;  %v5204_v6 = vld [vmem:[%s10890_s17 + $0x18] sm:$0xff] }
 0x792   :  { %6017 = vmatmul.mubr.msk.f32.gmra.mrb[44].mxu0 %vm4819_vm12, %v4808_v4 }
 0x793   :  { %6019 = vmatprep.mubr.msk.f32.mxu0 %vm4819_vm12, %v4809_v24  ;;  %v6183_v24 = vpack.c.bf16 %v5204_v6, %v5203_v50 }
 0x796   :  { %6020 = vmatmul.mubr.msk.f32.gmra.mrb[46].mxu0 %vm4819_vm12, %v4810_v30  ;;  %v5205_v30 = vld [vmem:[%s10890_s17 + $0x20] sm:$0xff] }
 0x797   :  { %6022 = vmatprep.mubr.msk.f32.mxu0 %vm4819_vm12, %v4811_v42  ;;  %v5206_v42 = vld [vmem:[%s10890_s17 + $0x28] sm:$0xff] }
 0x79a   :  { %6023 = vmatmul.mubr.msk.f32.gmra.mrb[48].mxu0 %vm4819_vm12, %v4812_v0  ;;  %v6186_v0 = vpack.c.bf16 %v5206_v42, %v5205_v30 }
 0x79b   :  { %6025 = vmatprep.mubr.msk.f32.mxu0 %vm4819_vm12, %v4813_v35  ;;  %v5207_v35 = vld [vmem:[%s10890_s17 + $0x30] sm:$0xff] }
 0x79e   :  { %6026 = vmatmul.mubr.msk.f32.gmra.mrb[50].mxu0 %vm4819_vm12, %v4814_v22  ;;  %v5208_v22 = vld [vmem:[%s10890_s17 + $0x38] sm:$0xff]  ;;  %s6294_s17 = scalar_lea.vmem %s5383_s6, 32 }
 0x79f   :  { %6028 = vmatprep.mubr.msk.f32.mxu0 %vm4819_vm12, %v4815_v57  ;;  %v6189_v57 = vpack.c.bf16 %v5208_v22, %v5207_v35  ;;  %p6295_p0 = scmp.ne.s32.totalorder %s5383_s6, %s6294_s17  ;;  %p6300_p2 = scmp.lt.s32.totalorder %s6294_s17, %s6294_s17 }
 0x7a1   :  { %p6301_p3 = por %p6300_p2, %p6299_p1 }
 0x7a2   :  { %6029 = vmatmul.mubr.msk.f32.gmra.mrb[52].mxu0 %vm4819_vm12, %v4816_v54 }
 0x7a3   :  { %6031 = vmatprep.mubr.msk.f32.mxu0 %vm4819_vm12, %v4817_v40  ;;  %p6302_p4 = pnand %p6301_p3, %p6295_p0 }
 0x7a6   :  { %6032 = vmatmul.mubr.msk.f32.gmra.mrb[54].mxu0 %vm4819_vm12, %v4818_v19  ;;  %vm5100_vm12 = vcmask 607792  }
 0x85d   :  { %v6012_v55 = vpop.f32.mrb[40].mxu0 }
 0x85e   :  { %v4937_v51 = vpop.f32.mrb[41].mxu0  ;;  %5019 = vrot.lane.b32.xlu0 %v6012_v55, %s6333_s9 }
 0x85f   :  { %5017 = vst.msk [vmem:[#allocation5] sm:$0x3] %vm5016_vm13, %v4937_v51  ;;  %vm5106_vm13 = vcmask 648792  }
 0x861   :  { %v6015_v44 = vpop.f32.mrb[42].mxu0 }
 0x862   :  { %v4947_v14 = vpop.f32.mrb[43].mxu0  ;;  %5031 = vrot.lane.b32.xlu0 %v6015_v44, %s6334_s15 }
 0x863   :  { %5025 = vrot.lane.b32.xlu1 %v4947_v14, %s6335_s29 }
 0x865   :  { %v6018_v36 = vpop.f32.mrb[44].mxu0 }
 0x866   :  { %v4957_v17 = vpop.f32.mrb[45].mxu0  ;;  %5043 = vrot.lane.b32.xlu0 %v6018_v36, %s6336_s26 }
 0x867   :  { %5037 = vrot.lane.b32.xlu1 %v4957_v17, %s6337_s18 }
 0x869   :  { %v6021_v63 = vpop.f32.mrb[46].mxu0 }
 0x86a   :  { %v4967_v28 = vpop.f32.mrb[47].mxu0  ;;  %5055 = vrot.lane.b32.xlu0 %v6021_v63, %s6338_s24 }
 0x86b   :  { %5049 = vrot.lane.b32.xlu1 %v4967_v28, %s6339_s13 }
 0x86d   :  { %v6024_v27 = vpop.f32.mrb[48].mxu0 }
 0x86e   :  { %v4977_v39 = vpop.f32.mrb[49].mxu0  ;;  %5067 = vrot.lane.b32.xlu0 %v6024_v27, %s6340_s12  ;;  %s10891_s12 = sld [smem:[#allocation30_spill]] }
 0x86f   :  { %5061 = vrot.lane.b32.xlu1 %v4977_v39, %s6341_s19 }
 0x871   :  { %v6027_v12 = vpop.f32.mrb[50].mxu0 }
 0x872   :  { %v4987_v56 = vpop.f32.mrb[51].mxu0  ;;  %5079 = vrot.lane.b32.xlu0 %v6027_v12, %s6344_s23 }
 0x873   :  { %5073 = vrot.lane.b32.xlu1 %v4987_v56, %s6345_s21 }
 0x874   :  { %v5802_v54 = vld [vmem:[%s10891_s12] ss:$0 sm:$0xff] }
 0x875   :  { %v6030_v43 = vpop.f32.mrb[52].mxu0 }
 0x876   :  { %v4997_v46 = vpop.f32.mrb[53].mxu0  ;;  %5091 = vrot.lane.b32.xlu0 %v6030_v43, %s6346_s14  ;;  %s10893_s14 = sld [smem:[#allocation32_spill]] }
 0x877   :  { %5085 = vrot.lane.b32.xlu1 %v4997_v46, %s6347_s16 }
 0x879   :  { %v6033_v26 = vpop.f32.mrb[54].mxu0 }
 0x87a   :  { %v5007_v37 = vpop.f32.mrb[55].mxu0  ;;  %5103 = vrot.lane.b32.xlu0 %v6033_v26, %s6348_s8 }
 0x87b   :  { %5097 = vrot.lane.b32.xlu1 %v5007_v37, %s6349_s4  ;;  %s10894_s4 = sld [smem:[#allocation34_spill]] }
 0x87c   :  { %v5804_v62 = vld [vmem:[%s10893_s14] ss:$0 sm:$0xff] }
 0x881   :  { %v5806_v21 = vld [vmem:[%s10894_s4] ss:$0 sm:$0xff] }
 0x8d0   :  { %v5020_v52 = vpop.permute.xlu0 %5019 }
 0x8d1   :  { %5023 = vst.msk [vmem:[#allocation5] sm:$0x3] %vm5022_vm15, %v5020_v52  ;;  %vm5126_vm15 = vcmask 654336  }
 0x8d4   :  { %v5032_v41 = vpop.permute.xlu0 %5031 }
 0x8d5   :  { %v5026_v38 = vpop.permute.xlu1 %5025 }
 0x8d6   :  { %5029 = vst.msk [vmem:[#allocation5] sm:$0x3] %vm5028_vm0, %v5026_v38  ;;  %vm5216_vm0 = vcmask 523264  }
 0x8d7   :  { %5035 = vst.msk [vmem:[#allocation5] sm:$0x3] %vm5034_vm1, %v5032_v41  ;;  %vm5300_vm1 = vcmask 130048  }
 0x8d8   :  { %v5044_v53 = vpop.permute.xlu0 %5043 }
 0x8d9   :  { %v5038_v33 = vpop.permute.xlu1 %5037 }
 0x8da   :  { %5041 = vst.msk [vmem:[#allocation5] sm:$0x3] %vm5040_vm2, %v5038_v33 }
 0x8db   :  { %5047 = vst.msk [vmem:[#allocation5] sm:$0x3] %vm5046_vm3, %v5044_v53 }
 0x8dc   :  { %v5056_v34 = vpop.permute.xlu0 %5055 }
 0x8dd   :  { %v5050_v60 = vpop.permute.xlu1 %5049 }
 0x8de   :  { %5053 = vst.msk [vmem:[#allocation5] sm:$0x3] %vm5052_vm4, %v5050_v60 }
 0x8df   :  { %5059 = vst.msk [vmem:[#allocation5] sm:$0x3] %vm5058_vm5, %v5056_v34 }
 0x8e0   :  { %v5068_v18 = vpop.permute.xlu0 %5067 }
 0x8e1   :  { %v5062_v45 = vpop.permute.xlu1 %5061 }
 0x8e2   :  { %5065 = vst.msk [vmem:[#allocation5] sm:$0x3] %vm5064_vm6, %v5062_v45 }
 0x8e3   :  { %5071 = vst.msk [vmem:[#allocation5] sm:$0x3] %vm5070_vm7, %v5068_v18 }
 0x8e4   :  { %v5080_v32 = vpop.permute.xlu0 %5079 }
 0x8e5   :  { %v5074_v49 = vpop.permute.xlu1 %5073 }
 0x8e6   :  { %5077 = vst.msk [vmem:[#allocation5] sm:$0x3] %vm5076_vm8, %v5074_v49 }
 0x8e7   :  { %5083 = vst.msk [vmem:[#allocation5] sm:$0x3] %vm5082_vm9, %v5080_v32 }
 0x8e8   :  { %v5092_v29 = vpop.permute.xlu0 %5091 }
 0x8e9   :  { %v5086_v59 = vpop.permute.xlu1 %5085 }
 0x8ea   :  { %5089 = vst.msk [vmem:[#allocation5] sm:$0x3] %vm5088_vm10, %v5086_v59 }
 0x8eb   :  { %5095 = vst.msk [vmem:[#allocation5] sm:$0x3] %vm5094_vm11, %v5092_v29 }
 0x8ec   :  { %v5104_v1 = vpop.permute.xlu0 %5103 }
 0x8ed   :  { %v5098_v15 = vpop.permute.xlu1 %5097 }
 0x8ee   :  { %5101 = vst.msk [vmem:[#allocation5] sm:$0x3] %vm5100_vm12, %v5098_v15 }
 0x8ef   :  { %5107 = vst.msk [vmem:[#allocation5] sm:$0x3] %vm5106_vm13, %v5104_v1 }
 0x8f6   :  { %v5108_v4 = vld [vmem:[#allocation5] sm:$0x3] }
 0x8f7   :  { %6055 = vmatmul.mubr.msk.f32.vlgmr.msra.gmra.mrb[22].mxu1 %vm5126_vm15, %v5108_v4 }
 0x8f8   :  { %6181 = vmatpush3.bf16.msra.mxu1 %v6180_v23  ;;  %6073 = vmatprep.mubr.msk.f32.mxu1 %vm6342_vm14, %v6343_v48 }
 0x8f9   :  { %6182 = vmatprep.subr.bf16.mxu1 %v10889_v47 }
 0x8fc   :  { %6184 = vmatpush3.bf16.msra.mxu1 %v6183_v24 }
 0x8fd   :  { %6185 = vmatprep.subr.bf16.mxu1 %v10889_v47 }
 0x900   :  { %6187 = vmatpush3.bf16.msra.mxu1 %v6186_v0 }
 0x901   :  { %6188 = vmatprep.subr.bf16.mxu1 %v10889_v47 }
 0x904   :  { %6190 = vmatpush3.bf16.msra.mxu1 %v6189_v57 }
 0x905   :  { %6191 = vmatprep.subr.bf16.mxu1 %v10889_v47  ;;  %v5292_v47 = vld [vmem:[%s10892_s28 + $0x8] sm:$0xff] }
 0x906   :  { %v6192_v31 = vpack.c.bf16 %v5292_v47, %v5291_v61 }
 0x9ca   :  { %v5196_v40 = vpop.f32.mrb[22].mxu1 }
 0x9cb   :  { %v5197_v19 = vadd.f32 %v5802_v54, %v5196_v40  ;;  %v6056_v11 = vpop.f32.mrb[23].mxu1 }
 0x9cd   :  { %v5200_v9 = vmax.f32 %v5197_v19, 0.0 }
 0x9cf   :  { %6074 = vmatmul.mubr.msk.f32.vlgmr.msra.gmra.mrb[24].mxu1 %vm5216_vm0, %v5200_v9 }
 0x9d0   :  { %6080 = vmatprep.mubr.msk.f32.mxu1 %vm6342_vm14, %v6343_v48  ;;  %6193 = vmatpush3.bf16.msra.mxu1 %v6192_v31  ;;  %vm5374_vm14 = vcmask 25600  }
 0xaa2   :  { %v5286_v7 = vpop.f32.mrb[24].mxu1 }
 0xaa3   :  { %v5287_v55 = vadd.f32 %v5804_v62, %v5286_v7  ;;  %v6075_v51 = vpop.f32.mrb[25].mxu1 }
 0xaa5   :  { %v5290_v3 = vmax.f32 %v5287_v55, 0.0 }
 0xaa7   :  { %6081 = vmatmul.mubr.msk.f32.vlgmr.msra.gmra.mrb[26].mxu1 %vm5300_vm1, %v5290_v3 }
 0xb7a   :  { %v5370_v10 = vpop.f32.mrb[26].mxu1 }
 0xb7b   :  { %v5371_v44 = vadd.f32 %v5806_v21, %v5370_v10  ;;  %v6082_v14 = vpop.f32.mrb[27].mxu1 }
 0xb7d   :  { %5375 = vst.msk [vmem:[#allocation14] sm:$0x3] %vm5374_vm14, %v5371_v44 }
 0xb7e   :  { %6305 = shalt.err (!%p6302_p4)
}
 0xb7f   :  { %s10895_s5 = sld [smem:[#allocation35_spill]] }
 0xb85   :  { %s6306_s3 = scalar_lea.hbm %s10895_s5, 32 }
 0xb86   :  { %p6307_p5 = scmp.ne.s32.totalorder %s10895_s5, %s6306_s3  ;;  %p6310_p6 = scmp.lt.u32.totalorder %s6306_s3, %s10895_s5 }
 0xb88   :  { %p6312_p7 = pnand %p6310_p6, %p6307_p5 }
 0xb8a   :  { %6315 = shalt.err (!%p6312_p7)
}
 0xb8b   :  { %5385 = dma.vmem_to_hbm [thread:$0]  %s5383_s6, 32, %s10895_s5, [#allocation7]  }
 0xb8c   :  { %6324 = dma.done.wait [#allocation7], 32  }
 0xb8d   :  { %6325 = vsyncadd [#allocation7], 4294967264 }
 0xb8e   :  { %5389 = vsyncpa [#allocation7], 1 }
 0xb8f   :  { %5390 = vsyncpa [#allocation8], 1 }
 0xb90   :  { %5391 = vsyncpa [#allocation11], 1 }
 0xb91   :  { %5392 = vsyncpa [#allocation9], 1 }

</bundles_post_ra>
